<compile_context>
chip_gen: v6e
topology: v6e:2x2x1
jax: 0.10.0
libtpu: 0.0.40
codegen_flags: <defaults>
</compile_context>

<pallas_src>
import functools

import jax
import jax.numpy as jnp
from jax.experimental import pallas as pl
from jax.experimental.pallas import tpu as pltpu

NC = 3
NDF = 8
N_CLASS = 5
LRELU_SLOPE = 0.2
BN_EPS = 1e-5
COMPUTE_DTYPE = jnp.bfloat16  # matmul operand dtype; accumulation is f32


def _lrelu(x):
    return jnp.where(x > 0, x, LRELU_SLOPE * x)


# --------------------------------------------------------------------------
# Pallas kernels
# --------------------------------------------------------------------------
def _conv_bn_lrelu_kernel(p_ref, w_ref, g_ref, b_ref, o_ref, *, use_bn):
    """Fused: (im2col patches @ W) -> [BatchNorm(batch stats)] -> LeakyReLU.

    p_ref: [M, K] bf16 patches (M = N*Ho*Wo), w_ref: [K, C] bf16.
    Accumulation and the whole epilogue are f32 (v5e has no bf16 VPU/EUP).
    """
    x = jnp.dot(p_ref[...], w_ref[...], preferred_element_type=jnp.float32)
    if use_bn:
        mean = jnp.mean(x, axis=0, keepdims=True)
        var = jnp.mean((x - mean) ** 2, axis=0, keepdims=True)
        x = (x - mean) * jax.lax.rsqrt(var + BN_EPS) * g_ref[...] + b_ref[...]
    x = _lrelu(x)
    o_ref[...] = x.astype(o_ref.dtype)


def _heads_kernel(f_ref, dw_ref, db_ref, w1_ref, b1_ref, w2_ref, b2_ref,
                  w3_ref, b3_ref, dis_ref, cla_ref):
    """Fused disc + clas heads.  Intermediates stay in VMEM/vregs.

    disc: Linear(1024->1) -> Sigmoid
    clas: Linear(1024->1024) -> LReLU -> Linear(1024->512) -> LReLU -> Linear(512->n_class)
    """
    f = f_ref[...]  # [N, 1024] bf16

    # disc head
    d = jnp.dot(f, dw_ref[...], preferred_element_type=jnp.float32) + db_ref[...]
    dis_ref[...] = 1.0 / (1.0 + jnp.exp(-d))

    # clas head
    h = jnp.dot(f, w1_ref[...], preferred_element_type=jnp.float32) + b1_ref[...]
    h = _lrelu(h).astype(f.dtype)
    h = jnp.dot(h, w2_ref[...], preferred_element_type=jnp.float32) + b2_ref[...]
    h = _lrelu(h).astype(f.dtype)
    cla_ref[...] = jnp.dot(h, w3_ref[...], preferred_element_type=jnp.float32) + b3_ref[...]


# --------------------------------------------------------------------------
# Pallas wrappers
# --------------------------------------------------------------------------
def _full_spec(shape):
    return pl.BlockSpec(shape, lambda i, _n=len(shape): (0,) * _n)


def conv_bn_lrelu_matmul(patches, w, gamma, beta, use_bn):
    M, K = patches.shape
    K2, C = w.shape
    assert K == K2
    kernel = functools.partial(_conv_bn_lrelu_kernel, use_bn=use_bn)
    return pl.pallas_call(
        kernel,
        out_shape=jax.ShapeDtypeStruct((M, C), COMPUTE_DTYPE),
        grid=(1,),
        in_specs=[
            _full_spec((M, K)),
            _full_spec((K, C)),
            _full_spec((1, C)),
            _full_spec((1, C)),
        ],
        out_specs=_full_spec((M, C)),
        compiler_params=pltpu.CompilerParams(dimension_semantics=("arbitrary",)),
    )(patches, w, gamma.reshape(1, C), beta.reshape(1, C))


def fused_heads(feat, params):
    N, F = feat.shape
    dis, cla = pl.pallas_call(
        _heads_kernel,
        out_shape=(
            jax.ShapeDtypeStruct((N, 1), jnp.float32),
            jax.ShapeDtypeStruct((N, N_CLASS), jnp.float32),
        ),
        grid=(1,),
        in_specs=[
            _full_spec((N, F)),
            _full_spec((F, 1)), _full_spec((1, 1)),
            _full_spec((F, 1024)), _full_spec((1, 1024)),
            _full_spec((1024, 512)), _full_spec((1, 512)),
            _full_spec((512, N_CLASS)), _full_spec((1, N_CLASS)),
        ],
        out_specs=(_full_spec((N, 1)), _full_spec((N, N_CLASS))),
        compiler_params=pltpu.CompilerParams(dimension_semantics=("arbitrary",)),
    )(
        feat,
        params["disc_w"], params["disc_b"].reshape(1, 1),
        params["cls1_w"], params["cls1_b"].reshape(1, 1024),
        params["cls2_w"], params["cls2_b"].reshape(1, 512),
        params["cls3_w"], params["cls3_b"].reshape(1, N_CLASS),
    )
    return dis, cla


# --------------------------------------------------------------------------
# Conv = im2col (lightweight XLA glue) + fused Pallas matmul/BN/LReLU
# --------------------------------------------------------------------------
# TODO(synk): move the 4x4/s2 patch extraction (strided window gather) into the
# kernel itself (16 shifted accumulated matmuls on a VMEM-resident NHWC tile) so
# the patch tensor never hits HBM; kept as XLA glue here for lowering robustness.
def _im2col_4x4_s2_p1(x_nhwc):
    N, H, W, C = x_nhwc.shape
    kh = kw = 4
    stride, pad = 2, 1
    xp = jnp.pad(x_nhwc, ((0, 0), (pad, pad), (pad, pad), (0, 0)))
    Ho = (H + 2 * pad - kh) // stride + 1
    Wo = (W + 2 * pad - kw) // stride + 1
    cols = []
    for di in range(kh):
        for dj in range(kw):
            cols.append(
                xp[:, di:di + Ho * stride:stride, dj:dj + Wo * stride:stride, :]
            )
    patches = jnp.stack(cols, axis=3)  # [N, Ho, Wo, kh*kw, C]
    return patches.reshape(N * Ho * Wo, kh * kw * C), Ho, Wo


def conv_block(x_nhwc, w_oihw, gamma, beta, use_bn):
    """Conv2d(k=4, s=2, p=1, bias=False) [+ BatchNorm] + LeakyReLU(0.2)."""
    N = x_nhwc.shape[0]
    C_out, C_in = w_oihw.shape[0], w_oihw.shape[1]
    patches, Ho, Wo = _im2col_4x4_s2_p1(x_nhwc)
    # reorder to (kh, kw, C_in, C_out) to match patch feature ordering
    w = jnp.transpose(w_oihw, (2, 3, 1, 0)).reshape(16 * C_in, C_out)
    w = w.astype(COMPUTE_DTYPE)
    if gamma is None:
        gamma = jnp.ones((C_out,), jnp.float32)
        beta = jnp.zeros((C_out,), jnp.float32)
    y = conv_bn_lrelu_matmul(patches.astype(COMPUTE_DTYPE), w, gamma, beta, use_bn)
    return y.reshape(N, Ho, Wo, C_out)


# --------------------------------------------------------------------------
# Parameter init (deterministic, synthetic)
# --------------------------------------------------------------------------
def init_params(key, nc=NC, ndf=NDF, n_class=N_CLASS):
    ks = jax.random.split(key, 16)
    s = 0.05
    p = {}
    p["conv1_w"] = s * jax.random.normal(ks[0], (ndf, nc, 4, 4), jnp.float32)
    p["conv2_w"] = s * jax.random.normal(ks[1], (ndf * 2, ndf, 4, 4), jnp.float32)
    p["conv3_w"] = s * jax.random.normal(ks[2], (ndf * 4, ndf * 2, 4, 4), jnp.float32)
    p["conv4_w"] = s * jax.random.normal(ks[3], (ndf * 8, ndf * 4, 4, 4), jnp.float32)
    p["bn2_g"] = jnp.ones((ndf * 2,), jnp.float32)
    p["bn2_b"] = jnp.zeros((ndf * 2,), jnp.float32)
    p["bn3_g"] = jnp.ones((ndf * 4,), jnp.float32)
    p["bn3_b"] = jnp.zeros((ndf * 4,), jnp.float32)
    p["bn4_g"] = jnp.ones((ndf * 8,), jnp.float32)
    p["bn4_b"] = jnp.zeros((ndf * 8,), jnp.float32)
    feat = ndf * 8 * 4 * 4  # 1024
    # Linear weights stored [in, out]; big head weights kept in bf16 (bandwidth)
    p["disc_w"] = (s * jax.random.normal(ks[4], (feat, 1), jnp.float32)).astype(COMPUTE_DTYPE)
    p["disc_b"] = jnp.zeros((1,), jnp.float32)
    p["cls1_w"] = (s * jax.random.normal(ks[5], (feat, 1024), jnp.float32)).astype(COMPUTE_DTYPE)
    p["cls1_b"] = jnp.zeros((1024,), jnp.float32)
    p["cls2_w"] = (s * jax.random.normal(ks[6], (1024, 512), jnp.float32)).astype(COMPUTE_DTYPE)
    p["cls2_b"] = jnp.zeros((512,), jnp.float32)
    p["cls3_w"] = (s * jax.random.normal(ks[7], (512, n_class), jnp.float32)).astype(COMPUTE_DTYPE)
    p["cls3_b"] = jnp.zeros((n_class,), jnp.float32)
    return p


# --------------------------------------------------------------------------
# Forward pass (matches Discriminator.forward)
# --------------------------------------------------------------------------
def discriminator_forward(params, x_nchw):
    # NCHW -> NHWC, bf16 operands for the conv matmuls (f32 accumulation inside)
    x = jnp.transpose(x_nchw, (0, 2, 3, 1)).astype(COMPUTE_DTYPE)

    # main: conv -> lrelu, then 3x (conv -> BN -> lrelu), each a single kernel
    h = conv_block(x, params["conv1_w"], None, None, use_bn=False)                 # 64 -> 32
    h = conv_block(h, params["conv2_w"], params["bn2_g"], params["bn2_b"], True)   # 32 -> 16
    h = conv_block(h, params["conv3_w"], params["bn3_g"], params["bn3_b"], True)   # 16 -> 8
    h = conv_block(h, params["conv4_w"], params["bn4_g"], params["bn4_b"], True)   # 8  -> 4

    # flatten exactly like PyTorch's NCHW .view(-1, ndf*8*4*4): order (C, H, W)
    N = h.shape[0]
    feat = jnp.transpose(h, (0, 3, 1, 2)).reshape(N, -1).astype(COMPUTE_DTYPE)

    # fused heads: disc (Linear -> Sigmoid) and clas (Linear/LReLU x2 + Linear)
    dis, cla = fused_heads(feat, params)
    dis = dis.reshape(-1)  # view(-1, 1).squeeze(1)
    return dis, cla


# --------------------------------------------------------------------------
if __name__ == "__main__":
    key = jax.random.PRNGKey(0)
    k_param, k_input = jax.random.split(key)

    params = init_params(k_param)
    # Input spatial size is forced to 64x64 by the module's ndf*8*4*4 flatten.
    x = jax.random.normal(k_input, (2, NC, 64, 64), jnp.float32)

    fwd = jax.jit(discriminator_forward)
    dis, cla = fwd(params, x)
    jax.block_until_ready((dis, cla))

    assert dis.shape == (2,), dis.shape
    assert cla.shape == (2, N_CLASS), cla.shape
    assert bool(jnp.all(jnp.isfinite(dis))) and bool(jnp.all(jnp.isfinite(cla)))
    assert bool(jnp.all((dis >= 0.0) & (dis <= 1.0)))  # sigmoid range

    print("KERNEL_OK")
</pallas_src>

<mosaic_0001>
module attributes {stable_mosaic.version = 11 : i64} {
  func.func @_conv_bn_lrelu_kernel(%arg0: i32, %arg1: memref<2048x48xbf16, #tpu.memory_space<vmem>>, %arg2: memref<48x8xbf16, #tpu.memory_space<vmem>>, %arg3: memref<1x8xf32, #tpu.memory_space<vmem>>, %arg4: memref<1x8xf32, #tpu.memory_space<vmem>>, %arg5: memref<2048x8xbf16, #tpu.memory_space<vmem>>) attributes {dimension_semantics = [#tpu.dimension_semantics<arbitrary>], iteration_bounds = array<i64: 1>, scalar_prefetch = 0 : i64, scratch_operands = 0 : i64, tpu.core_type = #tpu.core_type<tc>, window_params = [{pipeline_mode = #tpu.pipeline_mode<synchronous>, transform_indices = @transform_0, window_bounds = array<i64: 2048, 48>}, {pipeline_mode = #tpu.pipeline_mode<synchronous>, transform_indices = @transform_1, window_bounds = array<i64: 48, 8>}, {pipeline_mode = #tpu.pipeline_mode<synchronous>, transform_indices = @transform_2, window_bounds = array<i64: 1, 8>}, {pipeline_mode = #tpu.pipeline_mode<synchronous>, transform_indices = @transform_3, window_bounds = array<i64: 1, 8>}, {pipeline_mode = #tpu.pipeline_mode<synchronous>, transform_indices = @transform_4, window_bounds = array<i64: 2048, 8>}]} {
    %c0 = arith.constant 0 : index
    %c0_0 = arith.constant 0 : index
    %0 = vector.load %arg1[%c0, %c0_0] : memref<2048x48xbf16, #tpu.memory_space<vmem>>, vector<2048x48xbf16>
    %c0_1 = arith.constant 0 : index
    %c0_2 = arith.constant 0 : index
    %1 = vector.load %arg2[%c0_1, %c0_2] : memref<48x8xbf16, #tpu.memory_space<vmem>>, vector<48x8xbf16>
    %cst = arith.constant dense<0.000000e+00> : vector<2048x8xf32>
    %2 = tpu.matmul %0, %1, %cst {dimension_numbers = #tpu.dot_dimension_numbers<[1], [0], [0], [1], [0, 0, 1, 1], [], []>} : vector<2048x48xbf16>, vector<48x8xbf16>, vector<2048x8xf32> -> vector<2048x8xf32>
    %cst_3 = arith.constant 0.000000e+00 : f32
    %3 = vector.broadcast %cst_3 : f32 to vector<2048x8xf32>
    %4 = arith.cmpf ogt, %2, %3 : vector<2048x8xf32>
    %cst_4 = arith.constant 2.000000e-01 : f32
    %5 = vector.broadcast %cst_4 : f32 to vector<2048x8xf32>
    %6 = arith.mulf %5, %2 : vector<2048x8xf32>
    %7 = arith.select %4, %2, %6 : vector<2048x8xi1>, vector<2048x8xf32>
    %8 = arith.truncf %7 : vector<2048x8xf32> to vector<2048x8xbf16>
    %c0_5 = arith.constant 0 : index
    %c0_6 = arith.constant 0 : index
    %9 = vector.load %arg5[%c0_5, %c0_6] : memref<2048x8xbf16, #tpu.memory_space<vmem>>, vector<2048x8xbf16>
    tpu.vector_store %arg5[%c0_5, %c0_6], %8 {strides = array<i32>} : memref<2048x8xbf16, #tpu.memory_space<vmem>>, vector<2048x8xbf16>,
    return
  }
  func.func @transform_0(%arg0: i32) -> (i32, i32) {
    %c0_i32 = arith.constant 0 : i32
    %c0_i32_0 = arith.constant 0 : i32
    %c0_i32_1 = arith.constant 0 : i32
    return %c0_i32, %c0_i32_0 : i32, i32
  }
  func.func @transform_1(%arg0: i32) -> (i32, i32) {
    %c0_i32 = arith.constant 0 : i32
    %c0_i32_0 = arith.constant 0 : i32
    %c0_i32_1 = arith.constant 0 : i32
    return %c0_i32, %c0_i32_0 : i32, i32
  }
  func.func @transform_2(%arg0: i32) -> (i32, i32) {
    %c0_i32 = arith.constant 0 : i32
    %c0_i32_0 = arith.constant 0 : i32
    %c0_i32_1 = arith.constant 0 : i32
    return %c0_i32, %c0_i32_0 : i32, i32
  }
  func.func @transform_3(%arg0: i32) -> (i32, i32) {
    %c0_i32 = arith.constant 0 : i32
    %c0_i32_0 = arith.constant 0 : i32
    %c0_i32_1 = arith.constant 0 : i32
    return %c0_i32, %c0_i32_0 : i32, i32
  }
  func.func @transform_4(%arg0: i32) -> (i32, i32) {
    %c0_i32 = arith.constant 0 : i32
    %c0_i32_0 = arith.constant 0 : i32
    %c0_i32_1 = arith.constant 0 : i32
    return %c0_i32, %c0_i32_0 : i32, i32
  }
}

module attributes {stable_mosaic.version = 11 : i64} {
  func.func @_conv_bn_lrelu_kernel(%arg0: i32, %arg1: memref<512x128xbf16, #tpu.memory_space<vmem>>, %arg2: memref<128x16xbf16, #tpu.memory_space<vmem>>, %arg3: memref<1x16xf32, #tpu.memory_space<vmem>>, %arg4: memref<1x16xf32, #tpu.memory_space<vmem>>, %arg5: memref<512x16xbf16, #tpu.memory_space<vmem>>) attributes {dimension_semantics = [#tpu.dimension_semantics<arbitrary>], iteration_bounds = array<i64: 1>, scalar_prefetch = 0 : i64, scratch_operands = 0 : i64, tpu.core_type = #tpu.core_type<tc>, window_params = [{pipeline_mode = #tpu.pipeline_mode<synchronous>, transform_indices = @transform_0, window_bounds = array<i64: 512, 128>}, {pipeline_mode = #tpu.pipeline_mode<synchronous>, transform_indices = @transform_1, window_bounds = array<i64: 128, 16>}, {pipeline_mode = #tpu.pipeline_mode<synchronous>, transform_indices = @transform_2, window_bounds = array<i64: 1, 16>}, {pipeline_mode = #tpu.pipeline_mode<synchronous>, transform_indices = @transform_3, window_bounds = array<i64: 1, 16>}, {pipeline_mode = #tpu.pipeline_mode<synchronous>, transform_indices = @transform_4, window_bounds = array<i64: 512, 16>}]} {
    %c0 = arith.constant 0 : index
    %c0_0 = arith.constant 0 : index
    %0 = vector.load %arg1[%c0, %c0_0] : memref<512x128xbf16, #tpu.memory_space<vmem>>, vector<512x128xbf16>
    %c0_1 = arith.constant 0 : index
    %c0_2 = arith.constant 0 : index
    %1 = vector.load %arg2[%c0_1, %c0_2] : memref<128x16xbf16, #tpu.memory_space<vmem>>, vector<128x16xbf16>
    %cst = arith.constant dense<0.000000e+00> : vector<512x16xf32>
    %2 = tpu.matmul %0, %1, %cst {dimension_numbers = #tpu.dot_dimension_numbers<[1], [0], [0], [1], [0, 0, 1, 1], [], []>} : vector<512x128xbf16>, vector<128x16xbf16>, vector<512x16xf32> -> vector<512x16xf32>
    %cst_3 = arith.constant dense<0.000000e+00> : vector<16xf32>
    %3 = vector.multi_reduction <add>, %2, %cst_3 [0] : vector<512x16xf32> to vector<16xf32>
    %4 = vector.shape_cast %3 : vector<16xf32> to vector<1x16xf32>
    %cst_4 = arith.constant 5.120000e+02 : f32
    %5 = vector.broadcast %cst_4 : f32 to vector<1x16xf32>
    %6 = arith.divf %4, %5 : vector<1x16xf32>
    %7 = vector.broadcast %6 : vector<1x16xf32> to vector<512x16xf32>
    %8 = arith.subf %2, %7 : vector<512x16xf32>
    %9 = arith.mulf %8, %8 : vector<512x16xf32>
    %cst_5 = arith.constant dense<0.000000e+00> : vector<16xf32>
    %10 = vector.multi_reduction <add>, %9, %cst_5 [0] : vector<512x16xf32> to vector<16xf32>
    %11 = vector.shape_cast %10 : vector<16xf32> to vector<1x16xf32>
    %cst_6 = arith.constant 5.120000e+02 : f32
    %12 = vector.broadcast %cst_6 : f32 to vector<1x16xf32>
    %13 = arith.divf %11, %12 : vector<1x16xf32>
    %14 = vector.broadcast %6 : vector<1x16xf32> to vector<512x16xf32>
    %15 = arith.subf %2, %14 : vector<512x16xf32>
    %cst_7 = arith.constant 9.99999974E-6 : f32
    %16 = vector.broadcast %cst_7 : f32 to vector<1x16xf32>
    %17 = arith.addf %13, %16 : vector<1x16xf32>
    %18 = math.rsqrt %17 : vector<1x16xf32>
    %19 = vector.broadcast %18 : vector<1x16xf32> to vector<512x16xf32>
    %20 = arith.mulf %15, %19 : vector<512x16xf32>
    %c0_8 = arith.constant 0 : index
    %c0_9 = arith.constant 0 : index
    %21 = vector.load %arg3[%c0_8, %c0_9] : memref<1x16xf32, #tpu.memory_space<vmem>>, vector<1x16xf32>
    %22 = vector.broadcast %21 : vector<1x16xf32> to vector<512x16xf32>
    %23 = arith.mulf %20, %22 : vector<512x16xf32>
    %c0_10 = arith.constant 0 : index
    %c0_11 = arith.constant 0 : index
    %24 = vector.load %arg4[%c0_10, %c0_11] : memref<1x16xf32, #tpu.memory_space<vmem>>, vector<1x16xf32>
    %25 = vector.broadcast %24 : vector<1x16xf32> to vector<512x16xf32>
    %26 = arith.addf %23, %25 : vector<512x16xf32>
    %cst_12 = arith.constant 0.000000e+00 : f32
    %27 = vector.broadcast %cst_12 : f32 to vector<512x16xf32>
    %28 = arith.cmpf ogt, %26, %27 : vector<512x16xf32>
    %cst_13 = arith.constant 2.000000e-01 : f32
    %29 = vector.broadcast %cst_13 : f32 to vector<512x16xf32>
    %30 = arith.mulf %29, %26 : vector<512x16xf32>
    %31 = arith.select %28, %26, %30 : vector<512x16xi1>, vector<512x16xf32>
    %32 = arith.truncf %31 : vector<512x16xf32> to vector<512x16xbf16>
    %c0_14 = arith.constant 0 : index
    %c0_15 = arith.constant 0 : index
    %33 = vector.load %arg5[%c0_14, %c0_15] : memref<512x16xbf16, #tpu.memory_space<vmem>>, vector<512x16xbf16>
    tpu.vector_store %arg5[%c0_14, %c0_15], %32 {strides = array<i32>} : memref<512x16xbf16, #tpu.memory_space<vmem>>, vector<512x16xbf16>,
    return
  }
  func.func @transform_0(%arg0: i32) -> (i32, i32) {
    %c0_i32 = arith.constant 0 : i32
    %c0_i32_0 = arith.constant 0 : i32
    %c0_i32_1 = arith.constant 0 : i32
    return %c0_i32, %c0_i32_0 : i32, i32
  }
  func.func @transform_1(%arg0: i32) -> (i32, i32) {
    %c0_i32 = arith.constant 0 : i32
    %c0_i32_0 = arith.constant 0 : i32
    %c0_i32_1 = arith.constant 0 : i32
    return %c0_i32, %c0_i32_0 : i32, i32
  }
  func.func @transform_2(%arg0: i32) -> (i32, i32) {
    %c0_i32 = arith.constant 0 : i32
    %c0_i32_0 = arith.constant 0 : i32
    %c0_i32_1 = arith.constant 0 : i32
    return %c0_i32, %c0_i32_0 : i32, i32
  }
  func.func @transform_3(%arg0: i32) -> (i32, i32) {
    %c0_i32 = arith.constant 0 : i32
    %c0_i32_0 = arith.constant 0 : i32
    %c0_i32_1 = arith.constant 0 : i32
    return %c0_i32, %c0_i32_0 : i32, i32
  }
  func.func @transform_4(%arg0: i32) -> (i32, i32) {
    %c0_i32 = arith.constant 0 : i32
    %c0_i32_0 = arith.constant 0 : i32
    %c0_i32_1 = arith.constant 0 : i32
    return %c0_i32, %c0_i32_0 : i32, i32
  }
}

module attributes {stable_mosaic.version = 11 : i64} {
  func.func @_conv_bn_lrelu_kernel(%arg0: i32, %arg1: memref<128x256xbf16, #tpu.memory_space<vmem>>, %arg2: memref<256x32xbf16, #tpu.memory_space<vmem>>, %arg3: memref<1x32xf32, #tpu.memory_space<vmem>>, %arg4: memref<1x32xf32, #tpu.memory_space<vmem>>, %arg5: memref<128x32xbf16, #tpu.memory_space<vmem>>) attributes {dimension_semantics = [#tpu.dimension_semantics<arbitrary>], iteration_bounds = array<i64: 1>, scalar_prefetch = 0 : i64, scratch_operands = 0 : i64, tpu.core_type = #tpu.core_type<tc>, window_params = [{pipeline_mode = #tpu.pipeline_mode<synchronous>, transform_indices = @transform_0, window_bounds = array<i64: 128, 256>}, {pipeline_mode = #tpu.pipeline_mode<synchronous>, transform_indices = @transform_1, window_bounds = array<i64: 256, 32>}, {pipeline_mode = #tpu.pipeline_mode<synchronous>, transform_indices = @transform_2, window_bounds = array<i64: 1, 32>}, {pipeline_mode = #tpu.pipeline_mode<synchronous>, transform_indices = @transform_3, window_bounds = array<i64: 1, 32>}, {pipeline_mode = #tpu.pipeline_mode<synchronous>, transform_indices = @transform_4, window_bounds = array<i64: 128, 32>}]} {
    %c0 = arith.constant 0 : index
    %c0_0 = arith.constant 0 : index
    %0 = vector.load %arg1[%c0, %c0_0] : memref<128x256xbf16, #tpu.memory_space<vmem>>, vector<128x256xbf16>
    %c0_1 = arith.constant 0 : index
    %c0_2 = arith.constant 0 : index
    %1 = vector.load %arg2[%c0_1, %c0_2] : memref<256x32xbf16, #tpu.memory_space<vmem>>, vector<256x32xbf16>
    %cst = arith.constant dense<0.000000e+00> : vector<128x32xf32>
    %2 = tpu.matmul %0, %1, %cst {dimension_numbers = #tpu.dot_dimension_numbers<[1], [0], [0], [1], [0, 0, 1, 1], [], []>} : vector<128x256xbf16>, vector<256x32xbf16>, vector<128x32xf32> -> vector<128x32xf32>
    %cst_3 = arith.constant dense<0.000000e+00> : vector<32xf32>
    %3 = vector.multi_reduction <add>, %2, %cst_3 [0] : vector<128x32xf32> to vector<32xf32>
    %4 = vector.shape_cast %3 : vector<32xf32> to vector<1x32xf32>
    %cst_4 = arith.constant 1.280000e+02 : f32
    %5 = vector.broadcast %cst_4 : f32 to vector<1x32xf32>
    %6 = arith.divf %4, %5 : vector<1x32xf32>
    %7 = vector.broadcast %6 : vector<1x32xf32> to vector<128x32xf32>
    %8 = arith.subf %2, %7 : vector<128x32xf32>
    %9 = arith.mulf %8, %8 : vector<128x32xf32>
    %cst_5 = arith.constant dense<0.000000e+00> : vector<32xf32>
    %10 = vector.multi_reduction <add>, %9, %cst_5 [0] : vector<128x32xf32> to vector<32xf32>
    %11 = vector.shape_cast %10 : vector<32xf32> to vector<1x32xf32>
    %cst_6 = arith.constant 1.280000e+02 : f32
    %12 = vector.broadcast %cst_6 : f32 to vector<1x32xf32>
    %13 = arith.divf %11, %12 : vector<1x32xf32>
    %14 = vector.broadcast %6 : vector<1x32xf32> to vector<128x32xf32>
    %15 = arith.subf %2, %14 : vector<128x32xf32>
    %cst_7 = arith.constant 9.99999974E-6 : f32
    %16 = vector.broadcast %cst_7 : f32 to vector<1x32xf32>
    %17 = arith.addf %13, %16 : vector<1x32xf32>
    %18 = math.rsqrt %17 : vector<1x32xf32>
    %19 = vector.broadcast %18 : vector<1x32xf32> to vector<128x32xf32>
    %20 = arith.mulf %15, %19 : vector<128x32xf32>
    %c0_8 = arith.constant 0 : index
    %c0_9 = arith.constant 0 : index
    %21 = vector.load %arg3[%c0_8, %c0_9] : memref<1x32xf32, #tpu.memory_space<vmem>>, vector<1x32xf32>
    %22 = vector.broadcast %21 : vector<1x32xf32> to vector<128x32xf32>
    %23 = arith.mulf %20, %22 : vector<128x32xf32>
    %c0_10 = arith.constant 0 : index
    %c0_11 = arith.constant 0 : index
    %24 = vector.load %arg4[%c0_10, %c0_11] : memref<1x32xf32, #tpu.memory_space<vmem>>, vector<1x32xf32>
    %25 = vector.broadcast %24 : vector<1x32xf32> to vector<128x32xf32>
    %26 = arith.addf %23, %25 : vector<128x32xf32>
    %cst_12 = arith.constant 0.000000e+00 : f32
    %27 = vector.broadcast %cst_12 : f32 to vector<128x32xf32>
    %28 = arith.cmpf ogt, %26, %27 : vector<128x32xf32>
    %cst_13 = arith.constant 2.000000e-01 : f32
    %29 = vector.broadcast %cst_13 : f32 to vector<128x32xf32>
    %30 = arith.mulf %29, %26 : vector<128x32xf32>
    %31 = arith.select %28, %26, %30 : vector<128x32xi1>, vector<128x32xf32>
    %32 = arith.truncf %31 : vector<128x32xf32> to vector<128x32xbf16>
    %c0_14 = arith.constant 0 : index
    %c0_15 = arith.constant 0 : index
    %33 = vector.load %arg5[%c0_14, %c0_15] : memref<128x32xbf16, #tpu.memory_space<vmem>>, vector<128x32xbf16>
    tpu.vector_store %arg5[%c0_14, %c0_15], %32 {strides = array<i32>} : memref<128x32xbf16, #tpu.memory_space<vmem>>, vector<128x32xbf16>,
    return
  }
  func.func @transform_0(%arg0: i32) -> (i32, i32) {
    %c0_i32 = arith.constant 0 : i32
    %c0_i32_0 = arith.constant 0 : i32
    %c0_i32_1 = arith.constant 0 : i32
    return %c0_i32, %c0_i32_0 : i32, i32
  }
  func.func @transform_1(%arg0: i32) -> (i32, i32) {
    %c0_i32 = arith.constant 0 : i32
    %c0_i32_0 = arith.constant 0 : i32
    %c0_i32_1 = arith.constant 0 : i32
    return %c0_i32, %c0_i32_0 : i32, i32
  }
  func.func @transform_2(%arg0: i32) -> (i32, i32) {
    %c0_i32 = arith.constant 0 : i32
    %c0_i32_0 = arith.constant 0 : i32
    %c0_i32_1 = arith.constant 0 : i32
    return %c0_i32, %c0_i32_0 : i32, i32
  }
  func.func @transform_3(%arg0: i32) -> (i32, i32) {
    %c0_i32 = arith.constant 0 : i32
    %c0_i32_0 = arith.constant 0 : i32
    %c0_i32_1 = arith.constant 0 : i32
    return %c0_i32, %c0_i32_0 : i32, i32
  }
  func.func @transform_4(%arg0: i32) -> (i32, i32) {
    %c0_i32 = arith.constant 0 : i32
    %c0_i32_0 = arith.constant 0 : i32
    %c0_i32_1 = arith.constant 0 : i32
    return %c0_i32, %c0_i32_0 : i32, i32
  }
}

module attributes {stable_mosaic.version = 11 : i64} {
  func.func @_conv_bn_lrelu_kernel(%arg0: i32, %arg1: memref<32x512xbf16, #tpu.memory_space<vmem>>, %arg2: memref<512x64xbf16, #tpu.memory_space<vmem>>, %arg3: memref<1x64xf32, #tpu.memory_space<vmem>>, %arg4: memref<1x64xf32, #tpu.memory_space<vmem>>, %arg5: memref<32x64xbf16, #tpu.memory_space<vmem>>) attributes {dimension_semantics = [#tpu.dimension_semantics<arbitrary>], iteration_bounds = array<i64: 1>, scalar_prefetch = 0 : i64, scratch_operands = 0 : i64, tpu.core_type = #tpu.core_type<tc>, window_params = [{pipeline_mode = #tpu.pipeline_mode<synchronous>, transform_indices = @transform_0, window_bounds = array<i64: 32, 512>}, {pipeline_mode = #tpu.pipeline_mode<synchronous>, transform_indices = @transform_1, window_bounds = array<i64: 512, 64>}, {pipeline_mode = #tpu.pipeline_mode<synchronous>, transform_indices = @transform_2, window_bounds = array<i64: 1, 64>}, {pipeline_mode = #tpu.pipeline_mode<synchronous>, transform_indices = @transform_3, window_bounds = array<i64: 1, 64>}, {pipeline_mode = #tpu.pipeline_mode<synchronous>, transform_indices = @transform_4, window_bounds = array<i64: 32, 64>}]} {
    %c0 = arith.constant 0 : index
    %c0_0 = arith.constant 0 : index
    %0 = vector.load %arg1[%c0, %c0_0] : memref<32x512xbf16, #tpu.memory_space<vmem>>, vector<32x512xbf16>
    %c0_1 = arith.constant 0 : index
    %c0_2 = arith.constant 0 : index
    %1 = vector.load %arg2[%c0_1, %c0_2] : memref<512x64xbf16, #tpu.memory_space<vmem>>, vector<512x64xbf16>
    %cst = arith.constant dense<0.000000e+00> : vector<32x64xf32>
    %2 = tpu.matmul %0, %1, %cst {dimension_numbers = #tpu.dot_dimension_numbers<[1], [0], [0], [1], [0, 0, 1, 1], [], []>} : vector<32x512xbf16>, vector<512x64xbf16>, vector<32x64xf32> -> vector<32x64xf32>
    %cst_3 = arith.constant dense<0.000000e+00> : vector<64xf32>
    %3 = vector.multi_reduction <add>, %2, %cst_3 [0] : vector<32x64xf32> to vector<64xf32>
    %4 = vector.shape_cast %3 : vector<64xf32> to vector<1x64xf32>
    %cst_4 = arith.constant 3.200000e+01 : f32
    %5 = vector.broadcast %cst_4 : f32 to vector<1x64xf32>
    %6 = arith.divf %4, %5 : vector<1x64xf32>
    %7 = vector.broadcast %6 : vector<1x64xf32> to vector<32x64xf32>
    %8 = arith.subf %2, %7 : vector<32x64xf32>
    %9 = arith.mulf %8, %8 : vector<32x64xf32>
    %cst_5 = arith.constant dense<0.000000e+00> : vector<64xf32>
    %10 = vector.multi_reduction <add>, %9, %cst_5 [0] : vector<32x64xf32> to vector<64xf32>
    %11 = vector.shape_cast %10 : vector<64xf32> to vector<1x64xf32>
    %cst_6 = arith.constant 3.200000e+01 : f32
    %12 = vector.broadcast %cst_6 : f32 to vector<1x64xf32>
    %13 = arith.divf %11, %12 : vector<1x64xf32>
    %14 = vector.broadcast %6 : vector<1x64xf32> to vector<32x64xf32>
    %15 = arith.subf %2, %14 : vector<32x64xf32>
    %cst_7 = arith.constant 9.99999974E-6 : f32
    %16 = vector.broadcast %cst_7 : f32 to vector<1x64xf32>
    %17 = arith.addf %13, %16 : vector<1x64xf32>
    %18 = math.rsqrt %17 : vector<1x64xf32>
    %19 = vector.broadcast %18 : vector<1x64xf32> to vector<32x64xf32>
    %20 = arith.mulf %15, %19 : vector<32x64xf32>
    %c0_8 = arith.constant 0 : index
    %c0_9 = arith.constant 0 : index
    %21 = vector.load %arg3[%c0_8, %c0_9] : memref<1x64xf32, #tpu.memory_space<vmem>>, vector<1x64xf32>
    %22 = vector.broadcast %21 : vector<1x64xf32> to vector<32x64xf32>
    %23 = arith.mulf %20, %22 : vector<32x64xf32>
    %c0_10 = arith.constant 0 : index
    %c0_11 = arith.constant 0 : index
    %24 = vector.load %arg4[%c0_10, %c0_11] : memref<1x64xf32, #tpu.memory_space<vmem>>, vector<1x64xf32>
    %25 = vector.broadcast %24 : vector<1x64xf32> to vector<32x64xf32>
    %26 = arith.addf %23, %25 : vector<32x64xf32>
    %cst_12 = arith.constant 0.000000e+00 : f32
    %27 = vector.broadcast %cst_12 : f32 to vector<32x64xf32>
    %28 = arith.cmpf ogt, %26, %27 : vector<32x64xf32>
    %cst_13 = arith.constant 2.000000e-01 : f32
    %29 = vector.broadcast %cst_13 : f32 to vector<32x64xf32>
    %30 = arith.mulf %29, %26 : vector<32x64xf32>
    %31 = arith.select %28, %26, %30 : vector<32x64xi1>, vector<32x64xf32>
    %32 = arith.truncf %31 : vector<32x64xf32> to vector<32x64xbf16>
    %c0_14 = arith.constant 0 : index
    %c0_15 = arith.constant 0 : index
    %33 = vector.load %arg5[%c0_14, %c0_15] : memref<32x64xbf16, #tpu.memory_space<vmem>>, vector<32x64xbf16>
    tpu.vector_store %arg5[%c0_14, %c0_15], %32 {strides = array<i32>} : memref<32x64xbf16, #tpu.memory_space<vmem>>, vector<32x64xbf16>,
    return
  }
  func.func @transform_0(%arg0: i32) -> (i32, i32) {
    %c0_i32 = arith.constant 0 : i32
    %c0_i32_0 = arith.constant 0 : i32
    %c0_i32_1 = arith.constant 0 : i32
    return %c0_i32, %c0_i32_0 : i32, i32
  }
  func.func @transform_1(%arg0: i32) -> (i32, i32) {
    %c0_i32 = arith.constant 0 : i32
    %c0_i32_0 = arith.constant 0 : i32
    %c0_i32_1 = arith.constant 0 : i32
    return %c0_i32, %c0_i32_0 : i32, i32
  }
  func.func @transform_2(%arg0: i32) -> (i32, i32) {
    %c0_i32 = arith.constant 0 : i32
    %c0_i32_0 = arith.constant 0 : i32
    %c0_i32_1 = arith.constant 0 : i32
    return %c0_i32, %c0_i32_0 : i32, i32
  }
  func.func @transform_3(%arg0: i32) -> (i32, i32) {
    %c0_i32 = arith.constant 0 : i32
    %c0_i32_0 = arith.constant 0 : i32
    %c0_i32_1 = arith.constant 0 : i32
    return %c0_i32, %c0_i32_0 : i32, i32
  }
  func.func @transform_4(%arg0: i32) -> (i32, i32) {
    %c0_i32 = arith.constant 0 : i32
    %c0_i32_0 = arith.constant 0 : i32
    %c0_i32_1 = arith.constant 0 : i32
    return %c0_i32, %c0_i32_0 : i32, i32
  }
}

module attributes {stable_mosaic.version = 11 : i64} {
  func.func @_heads_kernel(%arg0: i32, %arg1: memref<2x1024xbf16, #tpu.memory_space<vmem>>, %arg2: memref<1024x1xbf16, #tpu.memory_space<vmem>>, %arg3: memref<1x1xf32, #tpu.memory_space<vmem>>, %arg4: memref<1024x1024xbf16, #tpu.memory_space<vmem>>, %arg5: memref<1x1024xf32, #tpu.memory_space<vmem>>, %arg6: memref<1024x512xbf16, #tpu.memory_space<vmem>>, %arg7: memref<1x512xf32, #tpu.memory_space<vmem>>, %arg8: memref<512x5xbf16, #tpu.memory_space<vmem>>, %arg9: memref<1x5xf32, #tpu.memory_space<vmem>>, %arg10: memref<2x1xf32, #tpu.memory_space<vmem>>, %arg11: memref<2x5xf32, #tpu.memory_space<vmem>>) attributes {dimension_semantics = [#tpu.dimension_semantics<arbitrary>], iteration_bounds = array<i64: 1>, scalar_prefetch = 0 : i64, scratch_operands = 0 : i64, tpu.core_type = #tpu.core_type<tc>, window_params = [{pipeline_mode = #tpu.pipeline_mode<synchronous>, transform_indices = @transform_0, window_bounds = array<i64: 2, 1024>}, {pipeline_mode = #tpu.pipeline_mode<synchronous>, transform_indices = @transform_1, window_bounds = array<i64: 1024, 1>}, {pipeline_mode = #tpu.pipeline_mode<synchronous>, transform_indices = @transform_2, window_bounds = array<i64: 1, 1>}, {pipeline_mode = #tpu.pipeline_mode<synchronous>, transform_indices = @transform_3, window_bounds = array<i64: 1024, 1024>}, {pipeline_mode = #tpu.pipeline_mode<synchronous>, transform_indices = @transform_4, window_bounds = array<i64: 1, 1024>}, {pipeline_mode = #tpu.pipeline_mode<synchronous>, transform_indices = @transform_5, window_bounds = array<i64: 1024, 512>}, {pipeline_mode = #tpu.pipeline_mode<synchronous>, transform_indices = @transform_6, window_bounds = array<i64: 1, 512>}, {pipeline_mode = #tpu.pipeline_mode<synchronous>, transform_indices = @transform_7, window_bounds = array<i64: 512, 5>}, {pipeline_mode = #tpu.pipeline_mode<synchronous>, transform_indices = @transform_8, window_bounds = array<i64: 1, 5>}, {pipeline_mode = #tpu.pipeline_mode<synchronous>, transform_indices = @transform_9, window_bounds = array<i64: 2, 1>}, {pipeline_mode = #tpu.pipeline_mode<synchronous>, transform_indices = @transform_10, window_bounds = array<i64: 2, 5>}]} {
    %c0 = arith.constant 0 : index
    %c0_0 = arith.constant 0 : index
    %0 = vector.load %arg1[%c0, %c0_0] : memref<2x1024xbf16, #tpu.memory_space<vmem>>, vector<2x1024xbf16>
    %c0_1 = arith.constant 0 : index
    %c0_2 = arith.constant 0 : index
    %1 = vector.load %arg2[%c0_1, %c0_2] : memref<1024x1xbf16, #tpu.memory_space<vmem>>, vector<1024x1xbf16>
    %cst = arith.constant dense<0.000000e+00> : vector<2x1xf32>
    %2 = tpu.matmul %0, %1, %cst {dimension_numbers = #tpu.dot_dimension_numbers<[1], [0], [0], [1], [0, 0, 1, 1], [], []>} : vector<2x1024xbf16>, vector<1024x1xbf16>, vector<2x1xf32> -> vector<2x1xf32>
    %c0_3 = arith.constant 0 : index
    %c0_4 = arith.constant 0 : index
    %3 = vector.load %arg3[%c0_3, %c0_4] : memref<1x1xf32, #tpu.memory_space<vmem>>, vector<1x1xf32>
    %4 = vector.broadcast %3 : vector<1x1xf32> to vector<2x1xf32>
    %5 = arith.addf %2, %4 : vector<2x1xf32>
    %cst_5 = arith.constant 0.000000e+00 : f32
    %6 = vector.broadcast %cst_5 : f32 to vector<2x1xf32>
    %7 = arith.subf %6, %5 : vector<2x1xf32>
    %8 = math.exp %7 : vector<2x1xf32>
    %cst_6 = arith.constant 1.000000e+00 : f32
    %9 = vector.broadcast %cst_6 : f32 to vector<2x1xf32>
    %10 = arith.addf %9, %8 : vector<2x1xf32>
    %cst_7 = arith.constant 1.000000e+00 : f32
    %11 = vector.broadcast %cst_7 : f32 to vector<2x1xf32>
    %12 = arith.divf %11, %10 : vector<2x1xf32>
    %c0_8 = arith.constant 0 : index
    %c0_9 = arith.constant 0 : index
    %13 = vector.load %arg10[%c0_8, %c0_9] : memref<2x1xf32, #tpu.memory_space<vmem>>, vector<2x1xf32>
    tpu.vector_store %arg10[%c0_8, %c0_9], %12 {strides = array<i32>} : memref<2x1xf32, #tpu.memory_space<vmem>>, vector<2x1xf32>,
    %c0_10 = arith.constant 0 : index
    %c0_11 = arith.constant 0 : index
    %14 = vector.load %arg4[%c0_10, %c0_11] : memref<1024x1024xbf16, #tpu.memory_space<vmem>>, vector<1024x1024xbf16>
    %cst_12 = arith.constant dense<0.000000e+00> : vector<2x1024xf32>
    %15 = tpu.matmul %0, %14, %cst_12 {dimension_numbers = #tpu.dot_dimension_numbers<[1], [0], [0], [1], [0, 0, 1, 1], [], []>} : vector<2x1024xbf16>, vector<1024x1024xbf16>, vector<2x1024xf32> -> vector<2x1024xf32>
    %c0_13 = arith.constant 0 : index
    %c0_14 = arith.constant 0 : index
    %16 = vector.load %arg5[%c0_13, %c0_14] : memref<1x1024xf32, #tpu.memory_space<vmem>>, vector<1x1024xf32>
    %17 = vector.broadcast %16 : vector<1x1024xf32> to vector<2x1024xf32>
    %18 = arith.addf %15, %17 : vector<2x1024xf32>
    %cst_15 = arith.constant 0.000000e+00 : f32
    %19 = vector.broadcast %cst_15 : f32 to vector<2x1024xf32>
    %20 = arith.cmpf ogt, %18, %19 : vector<2x1024xf32>
    %cst_16 = arith.constant 2.000000e-01 : f32
    %21 = vector.broadcast %cst_16 : f32 to vector<2x1024xf32>
    %22 = arith.mulf %21, %18 : vector<2x1024xf32>
    %23 = arith.select %20, %18, %22 : vector<2x1024xi1>, vector<2x1024xf32>
    %24 = arith.truncf %23 : vector<2x1024xf32> to vector<2x1024xbf16>
    %c0_17 = arith.constant 0 : index
    %c0_18 = arith.constant 0 : index
    %25 = vector.load %arg6[%c0_17, %c0_18] : memref<1024x512xbf16, #tpu.memory_space<vmem>>, vector<1024x512xbf16>
    %cst_19 = arith.constant dense<0.000000e+00> : vector<2x512xf32>
    %26 = tpu.matmul %24, %25, %cst_19 {dimension_numbers = #tpu.dot_dimension_numbers<[1], [0], [0], [1], [0, 0, 1, 1], [], []>} : vector<2x1024xbf16>, vector<1024x512xbf16>, vector<2x512xf32> -> vector<2x512xf32>
    %c0_20 = arith.constant 0 : index
    %c0_21 = arith.constant 0 : index
    %27 = vector.load %arg7[%c0_20, %c0_21] : memref<1x512xf32, #tpu.memory_space<vmem>>, vector<1x512xf32>
    %28 = vector.broadcast %27 : vector<1x512xf32> to vector<2x512xf32>
    %29 = arith.addf %26, %28 : vector<2x512xf32>
    %cst_22 = arith.constant 0.000000e+00 : f32
    %30 = vector.broadcast %cst_22 : f32 to vector<2x512xf32>
    %31 = arith.cmpf ogt, %29, %30 : vector<2x512xf32>
    %cst_23 = arith.constant 2.000000e-01 : f32
    %32 = vector.broadcast %cst_23 : f32 to vector<2x512xf32>
    %33 = arith.mulf %32, %29 : vector<2x512xf32>
    %34 = arith.select %31, %29, %33 : vector<2x512xi1>, vector<2x512xf32>
    %35 = arith.truncf %34 : vector<2x512xf32> to vector<2x512xbf16>
    %c0_24 = arith.constant 0 : index
    %c0_25 = arith.constant 0 : index
    %36 = vector.load %arg8[%c0_24, %c0_25] : memref<512x5xbf16, #tpu.memory_space<vmem>>, vector<512x5xbf16>
    %cst_26 = arith.constant dense<0.000000e+00> : vector<2x5xf32>
    %37 = tpu.matmul %35, %36, %cst_26 {dimension_numbers = #tpu.dot_dimension_numbers<[1], [0], [0], [1], [0, 0, 1, 1], [], []>} : vector<2x512xbf16>, vector<512x5xbf16>, vector<2x5xf32> -> vector<2x5xf32>
    %c0_27 = arith.constant 0 : index
    %c0_28 = arith.constant 0 : index
    %38 = vector.load %arg9[%c0_27, %c0_28] : memref<1x5xf32, #tpu.memory_space<vmem>>, vector<1x5xf32>
    %39 = vector.broadcast %38 : vector<1x5xf32> to vector<2x5xf32>
    %40 = arith.addf %37, %39 : vector<2x5xf32>
    %c0_29 = arith.constant 0 : index
    %c0_30 = arith.constant 0 : index
    %41 = vector.load %arg11[%c0_29, %c0_30] : memref<2x5xf32, #tpu.memory_space<vmem>>, vector<2x5xf32>
    tpu.vector_store %arg11[%c0_29, %c0_30], %40 {strides = array<i32>} : memref<2x5xf32, #tpu.memory_space<vmem>>, vector<2x5xf32>,
    return
  }
  func.func @transform_0(%arg0: i32) -> (i32, i32) {
    %c0_i32 = arith.constant 0 : i32
    %c0_i32_0 = arith.constant 0 : i32
    %c0_i32_1 = arith.constant 0 : i32
    return %c0_i32, %c0_i32_0 : i32, i32
  }
  func.func @transform_1(%arg0: i32) -> (i32, i32) {
    %c0_i32 = arith.constant 0 : i32
    %c0_i32_0 = arith.constant 0 : i32
    %c0_i32_1 = arith.constant 0 : i32
    return %c0_i32, %c0_i32_0 : i32, i32
  }
  func.func @transform_2(%arg0: i32) -> (i32, i32) {
    %c0_i32 = arith.constant 0 : i32
    %c0_i32_0 = arith.constant 0 : i32
    %c0_i32_1 = arith.constant 0 : i32
    return %c0_i32, %c0_i32_0 : i32, i32
  }
  func.func @transform_3(%arg0: i32) -> (i32, i32) {
    %c0_i32 = arith.constant 0 : i32
    %c0_i32_0 = arith.constant 0 : i32
    %c0_i32_1 = arith.constant 0 : i32
    return %c0_i32, %c0_i32_0 : i32, i32
  }
  func.func @transform_4(%arg0: i32) -> (i32, i32) {
    %c0_i32 = arith.constant 0 : i32
    %c0_i32_0 = arith.constant 0 : i32
    %c0_i32_1 = arith.constant 0 : i32
    return %c0_i32, %c0_i32_0 : i32, i32
  }
  func.func @transform_5(%arg0: i32) -> (i32, i32) {
    %c0_i32 = arith.constant 0 : i32
    %c0_i32_0 = arith.constant 0 : i32
    %c0_i32_1 = arith.constant 0 : i32
    return %c0_i32, %c0_i32_0 : i32, i32
  }
  func.func @transform_6(%arg0: i32) -> (i32, i32) {
    %c0_i32 = arith.constant 0 : i32
    %c0_i32_0 = arith.constant 0 : i32
    %c0_i32_1 = arith.constant 0 : i32
    return %c0_i32, %c0_i32_0 : i32, i32
  }
  func.func @transform_7(%arg0: i32) -> (i32, i32) {
    %c0_i32 = arith.constant 0 : i32
    %c0_i32_0 = arith.constant 0 : i32
    %c0_i32_1 = arith.constant 0 : i32
    return %c0_i32, %c0_i32_0 : i32, i32
  }
  func.func @transform_8(%arg0: i32) -> (i32, i32) {
    %c0_i32 = arith.constant 0 : i32
    %c0_i32_0 = arith.constant 0 : i32
    %c0_i32_1 = arith.constant 0 : i32
    return %c0_i32, %c0_i32_0 : i32, i32
  }
  func.func @transform_9(%arg0: i32) -> (i32, i32) {
    %c0_i32 = arith.constant 0 : i32
    %c0_i32_0 = arith.constant 0 : i32
    %c0_i32_1 = arith.constant 0 : i32
    return %c0_i32, %c0_i32_0 : i32, i32
  }
  func.func @transform_10(%arg0: i32) -> (i32, i32) {
    %c0_i32 = arith.constant 0 : i32
    %c0_i32_0 = arith.constant 0 : i32
    %c0_i32_1 = arith.constant 0 : i32
    return %c0_i32, %c0_i32_0 : i32, i32
  }
}

</mosaic_0001>

<bundles_post_ra>
// kernel: discriminator_forward.5
= control target key start
LH: loop header
LB: loop body
LE: loop exit
PB: predicated region body
PF: predicated region fallthrough
CT: control target
= control target key end

     0   :  { %vm938_vm0 = vcmask 392192   ;;  %vm4172_vm3 = vcmask 60416   ;;  %s7305_s1 = inlined_call_operand.vmem [shape: bf16[48,8], index: 1, kind: input, shape index: {}]   ;;  %s7306_s2 = inlined_call_operand.vmem [shape: f32[1,8], index: 2, kind: input, shape index: {}]   ;;  %s7307_s3 = inlined_call_operand.vmem [shape: f32[1,8], index: 3, kind: input, shape index: {}]   ;;  %s7308_s0 = inlined_call_operand.vmem [shape: bf16[2048,48], index: 0, kind: input, shape index: {}]   ;;  %s7309_s4 = inlined_call_operand.vmem [shape: bf16[2048,8], index: 4, kind: output, shape index: {}]  }
   0x1   :  { %v5603_v0 = vld [vmem:[%s7305_s1 + $0x10] sm:$0xff]   ;;  %v5604_v1 = vld [vmem:[%s7305_s1 + $0x8] sm:$0xff]   ;;  %v5605_v2 = vld [vmem:[%s7305_s1] sm:$0xff]  }
   0x2   :  { %5335 = vmatprep.subr.bf16.mxu0 %v5603_v0  ;;  %5597 = vmatprep.subr.bf16.mxu1 %v5603_v0  ;;  %v5606_v3 = vld [vmem:[%s7308_s0] sm:$0xff]   ;;  %v5608_v5 = vld [vmem:[%s7308_s0 + $0x8] sm:$0xff]   ;;  %v5610_v7 = vld [vmem:[%s7308_s0 + $0x10] sm:$0xff]  }
   0x3   :  { %5336 = vmatpush3.bf16.msra.mxu0 %v5603_v0  ;;  %5600 = vmatpush3.bf16.msra.mxu1 %v5603_v0  ;;  %v5607_v4 = vld [vmem:[%s7308_s0 + $0x200] sm:$0xff]   ;;  %v5609_v6 = vld [vmem:[%s7308_s0 + $0x208] sm:$0xff]   ;;  %v5611_v8 = vld [vmem:[%s7308_s0 + $0x210] sm:$0xff]  }
   0x4   :  { %5337 = vmatprep.subr.bf16.mxu0 %v5604_v1  ;;  %5598 = vmatprep.subr.bf16.mxu1 %v5604_v1  ;;  %v5612_v9 = vld [vmem:[%s7308_s0 + $0x18] sm:$0xff]   ;;  %v5614_v11 = vld [vmem:[%s7308_s0 + $0x20] sm:$0xff]   ;;  %v5616_v13 = vld [vmem:[%s7308_s0 + $0x28] sm:$0xff]  }
   0x5   :  { %5341 = vmatprep.mubr.msk.bf16.mxu0 %vm938_vm0, %v5606_v3  ;;  %5469 = vmatprep.mubr.msk.bf16.mxu1 %vm938_vm0, %v5607_v4  ;;  %v5613_v10 = vld [vmem:[%s7308_s0 + $0x218] sm:$0xff]   ;;  %v5615_v12 = vld [vmem:[%s7308_s0 + $0x220] sm:$0xff]   ;;  %v5617_v14 = vld [vmem:[%s7308_s0 + $0x228] sm:$0xff]  }
   0x6   :  { %v5618_v15 = vld [vmem:[%s7308_s0 + $0x30] sm:$0xff]   ;;  %v5620_v17 = vld [vmem:[%s7308_s0 + $0x38] sm:$0xff]   ;;  %v5622_v19 = vld [vmem:[%s7308_s0 + $0x40] sm:$0xff]  }
   0x7   :  { %5338 = vmatpush3.bf16.msra.mxu0 %v5604_v1  ;;  %5601 = vmatpush3.bf16.msra.mxu1 %v5604_v1  ;;  %v5619_v16 = vld [vmem:[%s7308_s0 + $0x230] sm:$0xff]   ;;  %v5621_v18 = vld [vmem:[%s7308_s0 + $0x238] sm:$0xff]   ;;  %v5623_v20 = vld [vmem:[%s7308_s0 + $0x240] sm:$0xff]  }
   0x8   :  { %5339 = vmatprep.subr.bf16.mxu0 %v5605_v2  ;;  %5599 = vmatprep.subr.bf16.mxu1 %v5605_v2  ;;  %v5624_v21 = vld [vmem:[%s7308_s0 + $0x48] sm:$0xff]   ;;  %v5626_v23 = vld [vmem:[%s7308_s0 + $0x50] sm:$0xff]   ;;  %v5628_v25 = vld [vmem:[%s7308_s0 + $0x58] sm:$0xff]  }
   0x9   :  { %v5625_v22 = vld [vmem:[%s7308_s0 + $0x248] sm:$0xff]   ;;  %v5627_v24 = vld [vmem:[%s7308_s0 + $0x250] sm:$0xff]   ;;  %v5629_v26 = vld [vmem:[%s7308_s0 + $0x258] sm:$0xff]  }
   0xa   :  { %v5630_v27 = vld [vmem:[%s7308_s0 + $0x60] sm:$0xff]   ;;  %v5632_v29 = vld [vmem:[%s7308_s0 + $0x68] sm:$0xff]   ;;  %v5634_v31 = vld [vmem:[%s7308_s0 + $0x70] sm:$0xff]  }
   0xb   :  { %5340 = vmatpush3.bf16.msra.mxu0 %v5605_v2  ;;  %5602 = vmatpush3.bf16.msra.mxu1 %v5605_v2  ;;  %v5631_v28 = vld [vmem:[%s7308_s0 + $0x260] sm:$0xff]   ;;  %v5633_v30 = vld [vmem:[%s7308_s0 + $0x268] sm:$0xff]   ;;  %v5635_v32 = vld [vmem:[%s7308_s0 + $0x270] sm:$0xff]  }
   0xc   :  { %v5636_v33 = vld [vmem:[%s7308_s0 + $0x78] sm:$0xff]   ;;  %v5638_v35 = vld [vmem:[%s7308_s0 + $0x80] sm:$0xff]   ;;  %v5640_v37 = vld [vmem:[%s7308_s0 + $0x88] sm:$0xff]  }
   0xd   :  { %v5637_v34 = vld [vmem:[%s7308_s0 + $0x278] sm:$0xff]   ;;  %v5639_v36 = vld [vmem:[%s7308_s0 + $0x280] sm:$0xff]   ;;  %v5641_v38 = vld [vmem:[%s7308_s0 + $0x288] sm:$0xff]  }
   0xe   :  { %5342 = vmatmul.mubr.msk.bf16.vlgmr.msra.gmra.mxu0 %vm938_vm0, %v5608_v5  ;;  %5470 = vmatmul.mubr.msk.bf16.vlgmr.msra.gmra.mxu1 %vm938_vm0, %v5609_v6  ;;  %v5642_v39 = vld [vmem:[%s7308_s0 + $0x90] sm:$0xff]   ;;  %v5644_v41 = vld [vmem:[%s7308_s0 + $0x98] sm:$0xff]   ;;  %v5646_v43 = vld [vmem:[%s7308_s0 + $0xa0] sm:$0xff]  }
   0xf   :  { %5345 = vmatprep.mubr.msk.bf16.mxu0 %vm938_vm0, %v5610_v7  ;;  %5473 = vmatprep.mubr.msk.bf16.mxu1 %vm938_vm0, %v5611_v8  ;;  %v5643_v40 = vld [vmem:[%s7308_s0 + $0x290] sm:$0xff]   ;;  %v5645_v42 = vld [vmem:[%s7308_s0 + $0x298] sm:$0xff]   ;;  %v5647_v44 = vld [vmem:[%s7308_s0 + $0x2a0] sm:$0xff]  }
  0x10   :  { %v5648_v45 = vld [vmem:[%s7308_s0 + $0xa8] sm:$0xff]   ;;  %v5650_v47 = vld [vmem:[%s7308_s0 + $0xb0] sm:$0xff]   ;;  %v5652_v49 = vld [vmem:[%s7308_s0 + $0xb8] sm:$0xff]  }
  0x11   :  { %v5649_v46 = vld [vmem:[%s7308_s0 + $0x2a8] sm:$0xff]   ;;  %v5651_v48 = vld [vmem:[%s7308_s0 + $0x2b0] sm:$0xff]   ;;  %v5653_v50 = vld [vmem:[%s7308_s0 + $0x2b8] sm:$0xff]  }
  0x12   :  { %v5654_v51 = vld [vmem:[%s7308_s0 + $0xc0] sm:$0xff]   ;;  %v5656_v53 = vld [vmem:[%s7308_s0 + $0xc8] sm:$0xff]   ;;  %v5658_v55 = vld [vmem:[%s7308_s0 + $0xd0] sm:$0xff]  }
  0x13   :  { %v5655_v52 = vld [vmem:[%s7308_s0 + $0x2c0] sm:$0xff]   ;;  %v5657_v54 = vld [vmem:[%s7308_s0 + $0x2c8] sm:$0xff]   ;;  %v5659_v56 = vld [vmem:[%s7308_s0 + $0x2d0] sm:$0xff]  }
  0x14   :  { %v5660_v57 = vld [vmem:[%s7308_s0 + $0xd8] sm:$0xff]   ;;  %v5662_v59 = vld [vmem:[%s7308_s0 + $0xe0] sm:$0xff]   ;;  %v5664_v61 = vld [vmem:[%s7308_s0 + $0xe8] sm:$0xff]  }
  0x15   :  { %v5661_v58 = vld [vmem:[%s7308_s0 + $0x2d8] sm:$0xff]   ;;  %v5663_v60 = vld [vmem:[%s7308_s0 + $0x2e0] sm:$0xff]   ;;  %v5665_v62 = vld [vmem:[%s7308_s0 + $0x2e8] sm:$0xff]  }
  0x16   :  { %5346 = vmatmul.mubr.msk.bf16.gmra.mxu0 %vm938_vm0, %v5612_v9  ;;  %5474 = vmatmul.mubr.msk.bf16.gmra.mxu1 %vm938_vm0, %v5613_v10  ;;  %v5666_v63 = vld [vmem:[%s7308_s0 + $0xf0] sm:$0xff]   ;;  %v5668_v1 = vld [vmem:[%s7308_s0 + $0xf8] sm:$0xff]   ;;  %v5670_v3 = vld [vmem:[%s7308_s0 + $0x100] sm:$0xff]  }
  0x17   :  { %5349 = vmatprep.mubr.msk.bf16.mxu0 %vm938_vm0, %v5614_v11  ;;  %5477 = vmatprep.mubr.msk.bf16.mxu1 %vm938_vm0, %v5615_v12  ;;  %v5667_v0 = vld [vmem:[%s7308_s0 + $0x2f0] sm:$0xff]   ;;  %v5669_v2 = vld [vmem:[%s7308_s0 + $0x2f8] sm:$0xff]   ;;  %v5671_v4 = vld [vmem:[%s7308_s0 + $0x300] sm:$0xff]  }
  0x18   :  { %v5672_v5 = vld [vmem:[%s7308_s0 + $0x108] sm:$0xff]   ;;  %v5674_v7 = vld [vmem:[%s7308_s0 + $0x110] sm:$0xff]   ;;  %v5676_v9 = vld [vmem:[%s7308_s0 + $0x118] sm:$0xff]  }
  0x19   :  { %v5673_v6 = vld [vmem:[%s7308_s0 + $0x308] sm:$0xff]   ;;  %v5675_v8 = vld [vmem:[%s7308_s0 + $0x310] sm:$0xff]   ;;  %v5677_v10 = vld [vmem:[%s7308_s0 + $0x318] sm:$0xff]  }
  0x1a   :  { %v5678_v11 = vld [vmem:[%s7308_s0 + $0x120] sm:$0xff]  }
  0x1b   :  { %v5679_v12 = vld [vmem:[%s7308_s0 + $0x320] sm:$0xff]  }
  0x1e   :  { %5350 = vmatmul.mubr.msk.bf16.gmra.mxu0 %vm938_vm0, %v5616_v13  ;;  %5478 = vmatmul.mubr.msk.bf16.gmra.mxu1 %vm938_vm0, %v5617_v14  ;;  %v5680_v13 = vld [vmem:[%s7308_s0 + $0x128] sm:$0xff]  }
  0x1f   :  { %5353 = vmatprep.mubr.msk.bf16.mxu0 %vm938_vm0, %v5618_v15  ;;  %5481 = vmatprep.mubr.msk.bf16.mxu1 %vm938_vm0, %v5619_v16  ;;  %v5681_v14 = vld [vmem:[%s7308_s0 + $0x328] sm:$0xff]   ;;  %v5682_v15 = vld [vmem:[%s7308_s0 + $0x130] sm:$0xff]  }
  0x20   :  { %v5683_v16 = vld [vmem:[%s7308_s0 + $0x330] sm:$0xff]  }
  0x26   :  { %5354 = vmatmul.mubr.msk.bf16.gmra.mxu0 %vm938_vm0, %v5620_v17  ;;  %5482 = vmatmul.mubr.msk.bf16.gmra.mxu1 %vm938_vm0, %v5621_v18  ;;  %v5684_v17 = vld [vmem:[%s7308_s0 + $0x138] sm:$0xff]  }
  0x27   :  { %5357 = vmatprep.mubr.msk.bf16.mxu0 %vm938_vm0, %v5622_v19  ;;  %5485 = vmatprep.mubr.msk.bf16.mxu1 %vm938_vm0, %v5623_v20  ;;  %v5685_v18 = vld [vmem:[%s7308_s0 + $0x338] sm:$0xff]   ;;  %v5686_v19 = vld [vmem:[%s7308_s0 + $0x140] sm:$0xff]  }
  0x28   :  { %v5687_v20 = vld [vmem:[%s7308_s0 + $0x340] sm:$0xff]  }
  0x2e   :  { %5358 = vmatmul.mubr.msk.bf16.gmra.mxu0 %vm938_vm0, %v5624_v21  ;;  %5486 = vmatmul.mubr.msk.bf16.gmra.mxu1 %vm938_vm0, %v5625_v22  ;;  %v5688_v21 = vld [vmem:[%s7308_s0 + $0x148] sm:$0xff]  }
  0x2f   :  { %5361 = vmatprep.mubr.msk.bf16.mxu0 %vm938_vm0, %v5626_v23  ;;  %5489 = vmatprep.mubr.msk.bf16.mxu1 %vm938_vm0, %v5627_v24  ;;  %v5689_v22 = vld [vmem:[%s7308_s0 + $0x348] sm:$0xff]   ;;  %v5690_v23 = vld [vmem:[%s7308_s0 + $0x150] sm:$0xff]  }
  0x30   :  { %v5691_v24 = vld [vmem:[%s7308_s0 + $0x350] sm:$0xff]  }
  0x36   :  { %5362 = vmatmul.mubr.msk.bf16.gmra.mxu0 %vm938_vm0, %v5628_v25  ;;  %5490 = vmatmul.mubr.msk.bf16.gmra.mxu1 %vm938_vm0, %v5629_v26  ;;  %v5692_v25 = vld [vmem:[%s7308_s0 + $0x158] sm:$0xff]  }
  0x37   :  { %5365 = vmatprep.mubr.msk.bf16.mxu0 %vm938_vm0, %v5630_v27  ;;  %5493 = vmatprep.mubr.msk.bf16.mxu1 %vm938_vm0, %v5631_v28  ;;  %v5693_v26 = vld [vmem:[%s7308_s0 + $0x358] sm:$0xff]   ;;  %v5694_v27 = vld [vmem:[%s7308_s0 + $0x160] sm:$0xff]  }
  0x38   :  { %v5695_v28 = vld [vmem:[%s7308_s0 + $0x360] sm:$0xff]  }
  0x3e   :  { %5366 = vmatmul.mubr.msk.bf16.gmra.mxu0 %vm938_vm0, %v5632_v29  ;;  %5494 = vmatmul.mubr.msk.bf16.gmra.mxu1 %vm938_vm0, %v5633_v30  ;;  %v5696_v29 = vld [vmem:[%s7308_s0 + $0x168] sm:$0xff]  }
  0x3f   :  { %5369 = vmatprep.mubr.msk.bf16.mxu0 %vm938_vm0, %v5634_v31  ;;  %5497 = vmatprep.mubr.msk.bf16.mxu1 %vm938_vm0, %v5635_v32  ;;  %v5697_v30 = vld [vmem:[%s7308_s0 + $0x368] sm:$0xff]   ;;  %v5698_v31 = vld [vmem:[%s7308_s0 + $0x170] sm:$0xff]  }
  0x40   :  { %v5699_v32 = vld [vmem:[%s7308_s0 + $0x370] sm:$0xff]  }
  0x46   :  { %5370 = vmatmul.mubr.msk.bf16.gmra.mxu0 %vm938_vm0, %v5636_v33  ;;  %5498 = vmatmul.mubr.msk.bf16.gmra.mxu1 %vm938_vm0, %v5637_v34  ;;  %v5700_v33 = vld [vmem:[%s7308_s0 + $0x178] sm:$0xff]  }
  0x47   :  { %5373 = vmatprep.mubr.msk.bf16.mxu0 %vm938_vm0, %v5638_v35  ;;  %5501 = vmatprep.mubr.msk.bf16.mxu1 %vm938_vm0, %v5639_v36  ;;  %v5701_v34 = vld [vmem:[%s7308_s0 + $0x378] sm:$0xff]   ;;  %v5702_v35 = vld [vmem:[%s7308_s0 + $0x180] sm:$0xff]  }
  0x48   :  { %v5703_v36 = vld [vmem:[%s7308_s0 + $0x380] sm:$0xff]  }
  0x4e   :  { %5374 = vmatmul.mubr.msk.bf16.gmra.mxu0 %vm938_vm0, %v5640_v37  ;;  %5502 = vmatmul.mubr.msk.bf16.gmra.mxu1 %vm938_vm0, %v5641_v38  ;;  %v5704_v37 = vld [vmem:[%s7308_s0 + $0x188] sm:$0xff]  }
  0x4f   :  { %5377 = vmatprep.mubr.msk.bf16.mxu0 %vm938_vm0, %v5642_v39  ;;  %5505 = vmatprep.mubr.msk.bf16.mxu1 %vm938_vm0, %v5643_v40  ;;  %v5705_v38 = vld [vmem:[%s7308_s0 + $0x388] sm:$0xff]   ;;  %v5706_v39 = vld [vmem:[%s7308_s0 + $0x190] sm:$0xff]  }
  0x50   :  { %v5707_v40 = vld [vmem:[%s7308_s0 + $0x390] sm:$0xff]  }
  0x56   :  { %5378 = vmatmul.mubr.msk.bf16.gmra.mxu0 %vm938_vm0, %v5644_v41  ;;  %5506 = vmatmul.mubr.msk.bf16.gmra.mxu1 %vm938_vm0, %v5645_v42 }
  0x57   :  { %5381 = vmatprep.mubr.msk.bf16.mxu0 %vm938_vm0, %v5646_v43  ;;  %5509 = vmatprep.mubr.msk.bf16.mxu1 %vm938_vm0, %v5647_v44 }
  0x5e   :  { %5382 = vmatmul.mubr.msk.bf16.gmra.mxu0 %vm938_vm0, %v5648_v45  ;;  %5510 = vmatmul.mubr.msk.bf16.gmra.mxu1 %vm938_vm0, %v5649_v46 }
  0x5f   :  { %5385 = vmatprep.mubr.msk.bf16.mxu0 %vm938_vm0, %v5650_v47  ;;  %5513 = vmatprep.mubr.msk.bf16.mxu1 %vm938_vm0, %v5651_v48 }
  0x66   :  { %5386 = vmatmul.mubr.msk.bf16.gmra.mxu0 %vm938_vm0, %v5652_v49  ;;  %5514 = vmatmul.mubr.msk.bf16.gmra.mxu1 %vm938_vm0, %v5653_v50 }
  0x67   :  { %5389 = vmatprep.mubr.msk.bf16.mxu0 %vm938_vm0, %v5654_v51  ;;  %5517 = vmatprep.mubr.msk.bf16.mxu1 %vm938_vm0, %v5655_v52 }
  0x6e   :  { %5390 = vmatmul.mubr.msk.bf16.gmra.mxu0 %vm938_vm0, %v5656_v53  ;;  %5518 = vmatmul.mubr.msk.bf16.gmra.mxu1 %vm938_vm0, %v5657_v54 }
  0x6f   :  { %5393 = vmatprep.mubr.msk.bf16.mxu0 %vm938_vm0, %v5658_v55  ;;  %5521 = vmatprep.mubr.msk.bf16.mxu1 %vm938_vm0, %v5659_v56  ;;  %v5708_v55 = vld [vmem:[%s7308_s0 + $0x198] sm:$0xff]  }
  0x70   :  { %v5709_v56 = vld [vmem:[%s7308_s0 + $0x398] sm:$0xff]  }
  0x76   :  { %5394 = vmatmul.mubr.msk.bf16.gmra.mxu0 %vm938_vm0, %v5660_v57  ;;  %5522 = vmatmul.mubr.msk.bf16.gmra.mxu1 %vm938_vm0, %v5661_v58 }
  0x77   :  { %5397 = vmatprep.mubr.msk.bf16.mxu0 %vm938_vm0, %v5662_v59  ;;  %5525 = vmatprep.mubr.msk.bf16.mxu1 %vm938_vm0, %v5663_v60  ;;  %v5710_v59 = vld [vmem:[%s7308_s0 + $0x1a0] sm:$0xff]  }
  0x78   :  { %v5711_v60 = vld [vmem:[%s7308_s0 + $0x3a0] sm:$0xff]  }
  0x7e   :  { %5398 = vmatmul.mubr.msk.bf16.gmra.mxu0 %vm938_vm0, %v5664_v61  ;;  %5526 = vmatmul.mubr.msk.bf16.gmra.mxu1 %vm938_vm0, %v5665_v62 }
  0x7f   :  { %5401 = vmatprep.mubr.msk.bf16.mxu0 %vm938_vm0, %v5666_v63  ;;  %5529 = vmatprep.mubr.msk.bf16.mxu1 %vm938_vm0, %v5667_v0 }
  0x86   :  { %5402 = vmatmul.mubr.msk.bf16.gmra.mxu0 %vm938_vm0, %v5668_v1  ;;  %5530 = vmatmul.mubr.msk.bf16.gmra.mxu1 %vm938_vm0, %v5669_v2 }
  0x87   :  { %5405 = vmatprep.mubr.msk.bf16.mxu0 %vm938_vm0, %v5670_v3  ;;  %5533 = vmatprep.mubr.msk.bf16.mxu1 %vm938_vm0, %v5671_v4 }
  0x8e   :  { %5406 = vmatmul.mubr.msk.bf16.gmra.mxu0 %vm938_vm0, %v5672_v5  ;;  %5534 = vmatmul.mubr.msk.bf16.gmra.mxu1 %vm938_vm0, %v5673_v6 }
  0x8f   :  { %5409 = vmatprep.mubr.msk.bf16.mxu0 %vm938_vm0, %v5674_v7  ;;  %5537 = vmatprep.mubr.msk.bf16.mxu1 %vm938_vm0, %v5675_v8 }
  0x96   :  { %5410 = vmatmul.mubr.msk.bf16.gmra.mxu0 %vm938_vm0, %v5676_v9  ;;  %5538 = vmatmul.mubr.msk.bf16.gmra.mxu1 %vm938_vm0, %v5677_v10 }
  0x97   :  { %5413 = vmatprep.mubr.msk.bf16.mxu0 %vm938_vm0, %v5678_v11  ;;  %5541 = vmatprep.mubr.msk.bf16.mxu1 %vm938_vm0, %v5679_v12 }
  0x9e   :  { %5414 = vmatmul.mubr.msk.bf16.gmra.mxu0 %vm938_vm0, %v5680_v13  ;;  %5542 = vmatmul.mubr.msk.bf16.gmra.mxu1 %vm938_vm0, %v5681_v14 }
  0x9f   :  { %5417 = vmatprep.mubr.msk.bf16.mxu0 %vm938_vm0, %v5682_v15  ;;  %5545 = vmatprep.mubr.msk.bf16.mxu1 %vm938_vm0, %v5683_v16 }
  0xa6   :  { %5418 = vmatmul.mubr.msk.bf16.gmra.mxu0 %vm938_vm0, %v5684_v17  ;;  %5546 = vmatmul.mubr.msk.bf16.gmra.mxu1 %vm938_vm0, %v5685_v18 }
  0xa7   :  { %5421 = vmatprep.mubr.msk.bf16.mxu0 %vm938_vm0, %v5686_v19  ;;  %5549 = vmatprep.mubr.msk.bf16.mxu1 %vm938_vm0, %v5687_v20 }
  0xae   :  { %5422 = vmatmul.mubr.msk.bf16.gmra.mxu0 %vm938_vm0, %v5688_v21  ;;  %5550 = vmatmul.mubr.msk.bf16.gmra.mxu1 %vm938_vm0, %v5689_v22 }
  0xaf   :  { %5425 = vmatprep.mubr.msk.bf16.mxu0 %vm938_vm0, %v5690_v23  ;;  %5553 = vmatprep.mubr.msk.bf16.mxu1 %vm938_vm0, %v5691_v24 }
  0xb6   :  { %5426 = vmatmul.mubr.msk.bf16.gmra.mxu0 %vm938_vm0, %v5692_v25  ;;  %5554 = vmatmul.mubr.msk.bf16.gmra.mxu1 %vm938_vm0, %v5693_v26  ;;  %v5712_v26 = vld [vmem:[%s7308_s0 + $0x1a8] sm:$0xff]  }
  0xb7   :  { %5429 = vmatprep.mubr.msk.bf16.mxu0 %vm938_vm0, %v5694_v27  ;;  %5557 = vmatprep.mubr.msk.bf16.mxu1 %vm938_vm0, %v5695_v28  ;;  %v5713_v27 = vld [vmem:[%s7308_s0 + $0x3a8] sm:$0xff]  }
  0xbe   :  { %5430 = vmatmul.mubr.msk.bf16.gmra.mxu0 %vm938_vm0, %v5696_v29  ;;  %5558 = vmatmul.mubr.msk.bf16.gmra.mxu1 %vm938_vm0, %v5697_v30 }
  0xbf   :  { %5433 = vmatprep.mubr.msk.bf16.mxu0 %vm938_vm0, %v5698_v31  ;;  %5561 = vmatprep.mubr.msk.bf16.mxu1 %vm938_vm0, %v5699_v32  ;;  %v5714_v31 = vld [vmem:[%s7308_s0 + $0x1b0] sm:$0xff]  }
  0xc0   :  { %v5715_v32 = vld [vmem:[%s7308_s0 + $0x3b0] sm:$0xff]  }
  0xc6   :  { %5434 = vmatmul.mubr.msk.bf16.gmra.mxu0 %vm938_vm0, %v5700_v33  ;;  %5562 = vmatmul.mubr.msk.bf16.gmra.mxu1 %vm938_vm0, %v5701_v34 }
  0xc7   :  { %5437 = vmatprep.mubr.msk.bf16.mxu0 %vm938_vm0, %v5702_v35  ;;  %5565 = vmatprep.mubr.msk.bf16.mxu1 %vm938_vm0, %v5703_v36 }
  0xce   :  { %v5343_v41 = vpop.f32.mrf.mxu0  ;;  %5438 = vmatmul.mubr.msk.bf16.gmra.mxu0 %vm938_vm0, %v5704_v37  ;;  %v5471_v42 = vpop.f32.mrf.mxu1  ;;  %5566 = vmatmul.mubr.msk.bf16.gmra.mxu1 %vm938_vm0, %v5705_v38 }
  0xcf   :  { %vm2382_vm1 = vcmp.gt.f32.partialorder %v5343_v41, 0.0  ;;  %v2638_v43 = vmul.f32 0.2, %v5343_v41  ;;  %vm2510_vm2 = vcmp.gt.f32.partialorder %v5471_v42, 0.0  ;;  %v2766_v44 = vmul.f32 0.2, %v5471_v42  ;;  %5441 = vmatprep.mubr.msk.bf16.mxu0 %vm938_vm0, %v5706_v39  ;;  %5569 = vmatprep.mubr.msk.bf16.mxu1 %vm938_vm0, %v5707_v40 }
  0xd0   :  { %v1357_v45 = vpop.f32.mrf.mxu0  ;;  %v1869_v46 = vpop.f32.mrf.mxu1 }
  0xd1   :  { %v2894_v47 = vsel %vm2382_vm1, %v5343_v41, %v2638_v43  ;;  %v3022_v48 = vsel %vm2510_vm2, %v5471_v42, %v2766_v44  ;;  %vm2380_vm4 = vcmp.gt.f32.partialorder %v1357_v45, 0.0  ;;  %v2636_v49 = vmul.f32 0.2, %v1357_v45 }
  0xd2   :  { %v4950_v50 = vpack.c.bf16 %v2894_v47, %v2894_v47  ;;  %v5078_v51 = vpack.c.bf16 %v3022_v48, %v3022_v48  ;;  %vm2508_vm5 = vcmp.gt.f32.partialorder %v1869_v46, 0.0  ;;  %v2764_v52 = vmul.f32 0.2, %v1869_v46  ;;  %v5344_v53 = vpop.f32.mrf.mxu0  ;;  %v5472_v54 = vpop.f32.mrf.mxu1 }
  0xd3   :  { %v2892_v57 = vsel %vm2380_vm4, %v1357_v45, %v2636_v49  ;;  %vm2383_vm6 = vcmp.gt.f32.partialorder %v5344_v53, 0.0  ;;  %v2639_v58 = vmul.f32 0.2, %v5344_v53  ;;  %vm2511_vm7 = vcmp.gt.f32.partialorder %v5472_v54, 0.0 }
  0xd4   :  { %4175 = vst.msk [vmem:[%s7309_s4 + $0x8] sm:$0xf] %vm4172_vm3, %v4950_v50  ;;  %4303 = vst.msk [vmem:[%s7309_s4 + $0x208] sm:$0xf] %vm4172_vm3, %v5078_v51  ;;  %v4948_v61 = vpack.c.bf16 %v2892_v57, %v2892_v57  ;;  %v3020_v62 = vsel %vm2508_vm5, %v1869_v46, %v2764_v52  ;;  %v2767_v63 = vmul.f32 0.2, %v5472_v54  ;;  %v1360_v0 = vpop.f32.mrf.mxu0  ;;  %v1872_v1 = vpop.f32.mrf.mxu1 }
  0xd5   :  { %v5076_v2 = vpack.c.bf16 %v3020_v62, %v3020_v62  ;;  %v2895_v3 = vsel %vm2383_vm6, %v5344_v53, %v2639_v58  ;;  %vm2381_vm8 = vcmp.gt.f32.partialorder %v1360_v0, 0.0  ;;  %v2637_v4 = vmul.f32 0.2, %v1360_v0  ;;  %v5716_v62 = vld [vmem:[%s7308_s0 + $0x1b8] sm:$0xff]  }
  0xd6   :  { %4173 = vst.msk [vmem:[%s7309_s4] sm:$0xf] %vm4172_vm3, %v4948_v61  ;;  %v4951_v5 = vpack.c.bf16 %v2895_v3, %v2895_v3  ;;  %v3023_v6 = vsel %vm2511_vm7, %v5472_v54, %v2767_v63  ;;  %vm2509_vm9 = vcmp.gt.f32.partialorder %v1872_v1, 0.0  ;;  %v2765_v7 = vmul.f32 0.2, %v1872_v1  ;;  %v5347_v8 = vpop.f32.mrf.mxu0  ;;  %5442 = vmatmul.mubr.msk.bf16.gmra.mxu0 %vm938_vm0, %v5708_v55  ;;  %v5475_v9 = vpop.f32.mrf.mxu1  ;;  %5570 = vmatmul.mubr.msk.bf16.gmra.mxu1 %vm938_vm0, %v5709_v56  ;;  %v5717_v63 = vld [vmem:[%s7308_s0 + $0x3b8] sm:$0xff]  }
  0xd7   :  { %4301 = vst.msk [vmem:[%s7309_s4 + $0x200] sm:$0xf] %vm4172_vm3, %v5076_v2  ;;  %v5079_v10 = vpack.c.bf16 %v3023_v6, %v3023_v6  ;;  %v2893_v11 = vsel %vm2381_vm8, %v1360_v0, %v2637_v4  ;;  %vm2386_vm10 = vcmp.gt.f32.partialorder %v5347_v8, 0.0  ;;  %v2642_v12 = vmul.f32 0.2, %v5347_v8  ;;  %5445 = vmatprep.mubr.msk.bf16.mxu0 %vm938_vm0, %v5710_v59  ;;  %5573 = vmatprep.mubr.msk.bf16.mxu1 %vm938_vm0, %v5711_v60  ;;  %v5718_v3 = vld [vmem:[%s7308_s0 + $0x1c0] sm:$0xff]  }
  0xd8   :  { %4176 = vst.msk [vmem:[%s7309_s4 + $0xc] sm:$0xf] %vm4172_vm3, %v4951_v5  ;;  %v4949_v13 = vpack.c.bf16 %v2893_v11, %v2893_v11  ;;  %v3021_v14 = vsel %vm2509_vm9, %v1872_v1, %v2765_v7  ;;  %vm2514_vm11 = vcmp.gt.f32.partialorder %v5475_v9, 0.0  ;;  %v2770_v15 = vmul.f32 0.2, %v5475_v9  ;;  %v1373_v16 = vpop.f32.mrf.mxu0  ;;  %v1885_v17 = vpop.f32.mrf.mxu1  ;;  %v5719_v4 = vld [vmem:[%s7308_s0 + $0x3c0] sm:$0xff]  }
  0xd9   :  { %4304 = vst.msk [vmem:[%s7309_s4 + $0x20c] sm:$0xf] %vm4172_vm3, %v5079_v10  ;;  %v5077_v18 = vpack.c.bf16 %v3021_v14, %v3021_v14  ;;  %v2898_v19 = vsel %vm2386_vm10, %v5347_v8, %v2642_v12  ;;  %vm2384_vm12 = vcmp.gt.f32.partialorder %v1373_v16, 0.0  ;;  %v2640_v20 = vmul.f32 0.2, %v1373_v16 }
  0xda   :  { %4174 = vst.msk [vmem:[%s7309_s4 + $0x4] sm:$0xf] %vm4172_vm3, %v4949_v13  ;;  %v4954_v21 = vpack.c.bf16 %v2898_v19, %v2898_v19  ;;  %v3026_v22 = vsel %vm2514_vm11, %v5475_v9, %v2770_v15  ;;  %vm2512_vm13 = vcmp.gt.f32.partialorder %v1885_v17, 0.0  ;;  %v2768_v23 = vmul.f32 0.2, %v1885_v17  ;;  %v5348_v24 = vpop.f32.mrf.mxu0  ;;  %v5476_v25 = vpop.f32.mrf.mxu1 }
  0xdb   :  { %4302 = vst.msk [vmem:[%s7309_s4 + $0x204] sm:$0xf] %vm4172_vm3, %v5077_v18  ;;  %v5082_v28 = vpack.c.bf16 %v3026_v22, %v3026_v22  ;;  %v2896_v29 = vsel %vm2384_vm12, %v1373_v16, %v2640_v20  ;;  %vm2387_vm14 = vcmp.gt.f32.partialorder %v5348_v24, 0.0  ;;  %v2643_v30 = vmul.f32 0.2, %v5348_v24 }
  0xdc   :  { %4179 = vst.msk [vmem:[%s7309_s4 + $0x18] sm:$0xf] %vm4172_vm3, %v4954_v21  ;;  %v4952_v33 = vpack.c.bf16 %v2896_v29, %v2896_v29  ;;  %v3024_v34 = vsel %vm2512_vm13, %v1885_v17, %v2768_v23  ;;  %vm2515_vm15 = vcmp.gt.f32.partialorder %v5476_v25, 0.0  ;;  %v2771_v35 = vmul.f32 0.2, %v5476_v25  ;;  %v1376_v36 = vpop.f32.mrf.mxu0  ;;  %v1888_v37 = vpop.f32.mrf.mxu1 }
  0xdd   :  { %4307 = vst.msk [vmem:[%s7309_s4 + $0x218] sm:$0xf] %vm4172_vm3, %v5082_v28  ;;  %v5080_v38 = vpack.c.bf16 %v3024_v34, %v3024_v34  ;;  %v2899_v39 = vsel %vm2387_vm14, %v5348_v24, %v2643_v30  ;;  %vm2385_vm1 = vcmp.gt.f32.partialorder %v1376_v36, 0.0  ;;  %v2641_v40 = vmul.f32 0.2, %v1376_v36  ;;  %v5720_v34 = vld [vmem:[%s7308_s0 + $0x1c8] sm:$0xff]  }
  0xde   :  { %4177 = vst.msk [vmem:[%s7309_s4 + $0x10] sm:$0xf] %vm4172_vm3, %v4952_v33  ;;  %v4955_v41 = vpack.c.bf16 %v2899_v39, %v2899_v39  ;;  %v3027_v42 = vsel %vm2515_vm15, %v5476_v25, %v2771_v35  ;;  %vm2513_vm2 = vcmp.gt.f32.partialorder %v1888_v37, 0.0  ;;  %v2769_v43 = vmul.f32 0.2, %v1888_v37  ;;  %v5351_v44 = vpop.f32.mrf.mxu0  ;;  %5446 = vmatmul.mubr.msk.bf16.gmra.mxu0 %vm938_vm0, %v5712_v26  ;;  %v5479_v45 = vpop.f32.mrf.mxu1  ;;  %5574 = vmatmul.mubr.msk.bf16.gmra.mxu1 %vm938_vm0, %v5713_v27  ;;  %v5721_v35 = vld [vmem:[%s7308_s0 + $0x3c8] sm:$0xff]  }
  0xdf   :  { %4305 = vst.msk [vmem:[%s7309_s4 + $0x210] sm:$0xf] %vm4172_vm3, %v5080_v38  ;;  %v5083_v46 = vpack.c.bf16 %v3027_v42, %v3027_v42  ;;  %v2897_v47 = vsel %vm2385_vm1, %v1376_v36, %v2641_v40  ;;  %vm2390_vm4 = vcmp.gt.f32.partialorder %v5351_v44, 0.0  ;;  %v2646_v48 = vmul.f32 0.2, %v5351_v44  ;;  %5449 = vmatprep.mubr.msk.bf16.mxu0 %vm938_vm0, %v5714_v31  ;;  %5577 = vmatprep.mubr.msk.bf16.mxu1 %vm938_vm0, %v5715_v32  ;;  %v5722_v39 = vld [vmem:[%s7308_s0 + $0x1d0] sm:$0xff]  }
  0xe0   :  { %4180 = vst.msk [vmem:[%s7309_s4 + $0x1c] sm:$0xf] %vm4172_vm3, %v4955_v41  ;;  %v4953_v49 = vpack.c.bf16 %v2897_v47, %v2897_v47  ;;  %v3025_v50 = vsel %vm2513_vm2, %v1888_v37, %v2769_v43  ;;  %vm2518_vm5 = vcmp.gt.f32.partialorder %v5479_v45, 0.0  ;;  %v2774_v51 = vmul.f32 0.2, %v5479_v45  ;;  %v1389_v52 = vpop.f32.mrf.mxu0  ;;  %v1901_v53 = vpop.f32.mrf.mxu1  ;;  %v5723_v40 = vld [vmem:[%s7308_s0 + $0x3d0] sm:$0xff]  }
  0xe1   :  { %4308 = vst.msk [vmem:[%s7309_s4 + $0x21c] sm:$0xf] %vm4172_vm3, %v5083_v46  ;;  %v5081_v54 = vpack.c.bf16 %v3025_v50, %v3025_v50  ;;  %v2902_v55 = vsel %vm2390_vm4, %v5351_v44, %v2646_v48  ;;  %vm2388_vm6 = vcmp.gt.f32.partialorder %v1389_v52, 0.0  ;;  %v2644_v56 = vmul.f32 0.2, %v1389_v52 }
  0xe2   :  { %4178 = vst.msk [vmem:[%s7309_s4 + $0x14] sm:$0xf] %vm4172_vm3, %v4953_v49  ;;  %v4958_v57 = vpack.c.bf16 %v2902_v55, %v2902_v55  ;;  %v3030_v58 = vsel %vm2518_vm5, %v5479_v45, %v2774_v51  ;;  %vm2516_vm7 = vcmp.gt.f32.partialorder %v1901_v53, 0.0  ;;  %v2772_v59 = vmul.f32 0.2, %v1901_v53  ;;  %v5352_v60 = vpop.f32.mrf.mxu0  ;;  %v5480_v61 = vpop.f32.mrf.mxu1 }
  0xe3   :  { %4306 = vst.msk [vmem:[%s7309_s4 + $0x214] sm:$0xf] %vm4172_vm3, %v5081_v54  ;;  %v5086_v0 = vpack.c.bf16 %v3030_v58, %v3030_v58  ;;  %v2900_v1 = vsel %vm2388_vm6, %v1389_v52, %v2644_v56  ;;  %vm2391_vm8 = vcmp.gt.f32.partialorder %v5352_v60, 0.0  ;;  %v2647_v2 = vmul.f32 0.2, %v5352_v60 }
  0xe4   :  { %4183 = vst.msk [vmem:[%s7309_s4 + $0x28] sm:$0xf] %vm4172_vm3, %v4958_v57  ;;  %v4956_v5 = vpack.c.bf16 %v2900_v1, %v2900_v1  ;;  %v3028_v6 = vsel %vm2516_vm7, %v1901_v53, %v2772_v59  ;;  %vm2519_vm9 = vcmp.gt.f32.partialorder %v5480_v61, 0.0  ;;  %v2775_v7 = vmul.f32 0.2, %v5480_v61  ;;  %v1392_v8 = vpop.f32.mrf.mxu0  ;;  %v1904_v9 = vpop.f32.mrf.mxu1 }
  0xe5   :  { %4311 = vst.msk [vmem:[%s7309_s4 + $0x228] sm:$0xf] %vm4172_vm3, %v5086_v0  ;;  %v5084_v10 = vpack.c.bf16 %v3028_v6, %v3028_v6  ;;  %v2903_v11 = vsel %vm2391_vm8, %v5352_v60, %v2647_v2  ;;  %vm2389_vm10 = vcmp.gt.f32.partialorder %v1392_v8, 0.0  ;;  %v2645_v12 = vmul.f32 0.2, %v1392_v8  ;;  %v5724_v6 = vld [vmem:[%s7308_s0 + $0x1d8] sm:$0xff]  }
  0xe6   :  { %4181 = vst.msk [vmem:[%s7309_s4 + $0x20] sm:$0xf] %vm4172_vm3, %v4956_v5  ;;  %v4959_v13 = vpack.c.bf16 %v2903_v11, %v2903_v11  ;;  %v3031_v14 = vsel %vm2519_vm9, %v5480_v61, %v2775_v7  ;;  %vm2517_vm11 = vcmp.gt.f32.partialorder %v1904_v9, 0.0  ;;  %v2773_v15 = vmul.f32 0.2, %v1904_v9  ;;  %v5355_v16 = vpop.f32.mrf.mxu0  ;;  %5450 = vmatmul.mubr.msk.bf16.gmra.mxu0 %vm938_vm0, %v5716_v62  ;;  %v5483_v17 = vpop.f32.mrf.mxu1  ;;  %5578 = vmatmul.mubr.msk.bf16.gmra.mxu1 %vm938_vm0, %v5717_v63  ;;  %v5725_v7 = vld [vmem:[%s7308_s0 + $0x3d8] sm:$0xff]  }
  0xe7   :  { %4309 = vst.msk [vmem:[%s7309_s4 + $0x220] sm:$0xf] %vm4172_vm3, %v5084_v10  ;;  %v5087_v18 = vpack.c.bf16 %v3031_v14, %v3031_v14  ;;  %v2901_v19 = vsel %vm2389_vm10, %v1392_v8, %v2645_v12  ;;  %vm2394_vm12 = vcmp.gt.f32.partialorder %v5355_v16, 0.0  ;;  %v2650_v20 = vmul.f32 0.2, %v5355_v16  ;;  %5453 = vmatprep.mubr.msk.bf16.mxu0 %vm938_vm0, %v5718_v3  ;;  %5581 = vmatprep.mubr.msk.bf16.mxu1 %vm938_vm0, %v5719_v4  ;;  %v5726_v11 = vld [vmem:[%s7308_s0 + $0x1e0] sm:$0xff]  }
  0xe8   :  { %4184 = vst.msk [vmem:[%s7309_s4 + $0x2c] sm:$0xf] %vm4172_vm3, %v4959_v13  ;;  %v4957_v21 = vpack.c.bf16 %v2901_v19, %v2901_v19  ;;  %v3029_v22 = vsel %vm2517_vm11, %v1904_v9, %v2773_v15  ;;  %vm2522_vm13 = vcmp.gt.f32.partialorder %v5483_v17, 0.0  ;;  %v2778_v23 = vmul.f32 0.2, %v5483_v17  ;;  %v1405_v24 = vpop.f32.mrf.mxu0  ;;  %v1917_v25 = vpop.f32.mrf.mxu1  ;;  %v5727_v12 = vld [vmem:[%s7308_s0 + $0x3e0] sm:$0xff]  }
  0xe9   :  { %4312 = vst.msk [vmem:[%s7309_s4 + $0x22c] sm:$0xf] %vm4172_vm3, %v5087_v18  ;;  %v5085_v26 = vpack.c.bf16 %v3029_v22, %v3029_v22  ;;  %v2906_v27 = vsel %vm2394_vm12, %v5355_v16, %v2650_v20  ;;  %vm2392_vm14 = vcmp.gt.f32.partialorder %v1405_v24, 0.0  ;;  %v2648_v28 = vmul.f32 0.2, %v1405_v24 }
  0xea   :  { %4182 = vst.msk [vmem:[%s7309_s4 + $0x24] sm:$0xf] %vm4172_vm3, %v4957_v21  ;;  %v4962_v29 = vpack.c.bf16 %v2906_v27, %v2906_v27  ;;  %v3034_v30 = vsel %vm2522_vm13, %v5483_v17, %v2778_v23  ;;  %vm2520_vm15 = vcmp.gt.f32.partialorder %v1917_v25, 0.0  ;;  %v2776_v31 = vmul.f32 0.2, %v1917_v25  ;;  %v5356_v32 = vpop.f32.mrf.mxu0  ;;  %v5484_v33 = vpop.f32.mrf.mxu1 }
  0xeb   :  { %4310 = vst.msk [vmem:[%s7309_s4 + $0x224] sm:$0xf] %vm4172_vm3, %v5085_v26  ;;  %v5090_v36 = vpack.c.bf16 %v3034_v30, %v3034_v30  ;;  %v2904_v37 = vsel %vm2392_vm14, %v1405_v24, %v2648_v28  ;;  %vm2395_vm1 = vcmp.gt.f32.partialorder %v5356_v32, 0.0  ;;  %v2651_v38 = vmul.f32 0.2, %v5356_v32 }
  0xec   :  { %4187 = vst.msk [vmem:[%s7309_s4 + $0x38] sm:$0xf] %vm4172_vm3, %v4962_v29  ;;  %v4960_v41 = vpack.c.bf16 %v2904_v37, %v2904_v37  ;;  %v3032_v42 = vsel %vm2520_vm15, %v1917_v25, %v2776_v31  ;;  %vm2523_vm2 = vcmp.gt.f32.partialorder %v5484_v33, 0.0  ;;  %v2779_v43 = vmul.f32 0.2, %v5484_v33  ;;  %v1408_v44 = vpop.f32.mrf.mxu0  ;;  %v1920_v45 = vpop.f32.mrf.mxu1 }
  0xed   :  { %4315 = vst.msk [vmem:[%s7309_s4 + $0x238] sm:$0xf] %vm4172_vm3, %v5090_v36  ;;  %v5088_v46 = vpack.c.bf16 %v3032_v42, %v3032_v42  ;;  %v2907_v47 = vsel %vm2395_vm1, %v5356_v32, %v2651_v38  ;;  %vm2393_vm4 = vcmp.gt.f32.partialorder %v1408_v44, 0.0  ;;  %v2649_v48 = vmul.f32 0.2, %v1408_v44  ;;  %v5728_v42 = vld [vmem:[%s7308_s0 + $0x1e8] sm:$0xff]  }
  0xee   :  { %4185 = vst.msk [vmem:[%s7309_s4 + $0x30] sm:$0xf] %vm4172_vm3, %v4960_v41  ;;  %v4963_v49 = vpack.c.bf16 %v2907_v47, %v2907_v47  ;;  %v3035_v50 = vsel %vm2523_vm2, %v5484_v33, %v2779_v43  ;;  %vm2521_vm5 = vcmp.gt.f32.partialorder %v1920_v45, 0.0  ;;  %v2777_v51 = vmul.f32 0.2, %v1920_v45  ;;  %v5359_v52 = vpop.f32.mrf.mxu0  ;;  %5454 = vmatmul.mubr.msk.bf16.gmra.mxu0 %vm938_vm0, %v5720_v34  ;;  %v5487_v53 = vpop.f32.mrf.mxu1  ;;  %5582 = vmatmul.mubr.msk.bf16.gmra.mxu1 %vm938_vm0, %v5721_v35  ;;  %v5729_v43 = vld [vmem:[%s7308_s0 + $0x3e8] sm:$0xff]  }
  0xef   :  { %4313 = vst.msk [vmem:[%s7309_s4 + $0x230] sm:$0xf] %vm4172_vm3, %v5088_v46  ;;  %v5091_v54 = vpack.c.bf16 %v3035_v50, %v3035_v50  ;;  %v2905_v55 = vsel %vm2393_vm4, %v1408_v44, %v2649_v48  ;;  %vm2398_vm6 = vcmp.gt.f32.partialorder %v5359_v52, 0.0  ;;  %v2654_v56 = vmul.f32 0.2, %v5359_v52  ;;  %5457 = vmatprep.mubr.msk.bf16.mxu0 %vm938_vm0, %v5722_v39  ;;  %5585 = vmatprep.mubr.msk.bf16.mxu1 %vm938_vm0, %v5723_v40  ;;  %v5730_v47 = vld [vmem:[%s7308_s0 + $0x1f0] sm:$0xff]  }
  0xf0   :  { %4188 = vst.msk [vmem:[%s7309_s4 + $0x3c] sm:$0xf] %vm4172_vm3, %v4963_v49  ;;  %v4961_v57 = vpack.c.bf16 %v2905_v55, %v2905_v55  ;;  %v3033_v58 = vsel %vm2521_vm5, %v1920_v45, %v2777_v51  ;;  %vm2526_vm7 = vcmp.gt.f32.partialorder %v5487_v53, 0.0  ;;  %v2782_v59 = vmul.f32 0.2, %v5487_v53  ;;  %v1421_v60 = vpop.f32.mrf.mxu0  ;;  %v1933_v61 = vpop.f32.mrf.mxu1  ;;  %v5731_v48 = vld [vmem:[%s7308_s0 + $0x3f0] sm:$0xff]  }
  0xf1   :  { %4316 = vst.msk [vmem:[%s7309_s4 + $0x23c] sm:$0xf] %vm4172_vm3, %v5091_v54  ;;  %v5089_v62 = vpack.c.bf16 %v3033_v58, %v3033_v58  ;;  %v2910_v63 = vsel %vm2398_vm6, %v5359_v52, %v2654_v56  ;;  %vm2396_vm8 = vcmp.gt.f32.partialorder %v1421_v60, 0.0  ;;  %v2652_v0 = vmul.f32 0.2, %v1421_v60 }
  0xf2   :  { %4186 = vst.msk [vmem:[%s7309_s4 + $0x34] sm:$0xf] %vm4172_vm3, %v4961_v57  ;;  %v4966_v1 = vpack.c.bf16 %v2910_v63, %v2910_v63  ;;  %v3038_v2 = vsel %vm2526_vm7, %v5487_v53, %v2782_v59  ;;  %vm2524_vm9 = vcmp.gt.f32.partialorder %v1933_v61, 0.0  ;;  %v2780_v3 = vmul.f32 0.2, %v1933_v61  ;;  %v5360_v4 = vpop.f32.mrf.mxu0  ;;  %v5488_v5 = vpop.f32.mrf.mxu1 }
  0xf3   :  { %4314 = vst.msk [vmem:[%s7309_s4 + $0x234] sm:$0xf] %vm4172_vm3, %v5089_v62  ;;  %v5094_v8 = vpack.c.bf16 %v3038_v2, %v3038_v2  ;;  %v2908_v9 = vsel %vm2396_vm8, %v1421_v60, %v2652_v0  ;;  %vm2399_vm10 = vcmp.gt.f32.partialorder %v5360_v4, 0.0  ;;  %v2655_v10 = vmul.f32 0.2, %v5360_v4 }
  0xf4   :  { %4191 = vst.msk [vmem:[%s7309_s4 + $0x48] sm:$0xf] %vm4172_vm3, %v4966_v1  ;;  %v4964_v13 = vpack.c.bf16 %v2908_v9, %v2908_v9  ;;  %v3036_v14 = vsel %vm2524_vm9, %v1933_v61, %v2780_v3  ;;  %vm2527_vm11 = vcmp.gt.f32.partialorder %v5488_v5, 0.0  ;;  %v2783_v15 = vmul.f32 0.2, %v5488_v5  ;;  %v1424_v16 = vpop.f32.mrf.mxu0  ;;  %v1936_v17 = vpop.f32.mrf.mxu1 }
  0xf5   :  { %4319 = vst.msk [vmem:[%s7309_s4 + $0x248] sm:$0xf] %vm4172_vm3, %v5094_v8  ;;  %v5092_v18 = vpack.c.bf16 %v3036_v14, %v3036_v14  ;;  %v2911_v19 = vsel %vm2399_vm10, %v5360_v4, %v2655_v10  ;;  %vm2397_vm12 = vcmp.gt.f32.partialorder %v1424_v16, 0.0  ;;  %v2653_v20 = vmul.f32 0.2, %v1424_v16  ;;  %v5732_v14 = vld [vmem:[%s7308_s0 + $0x1f8] sm:$0xff]  }
  0xf6   :  { %4189 = vst.msk [vmem:[%s7309_s4 + $0x40] sm:$0xf] %vm4172_vm3, %v4964_v13  ;;  %v4967_v21 = vpack.c.bf16 %v2911_v19, %v2911_v19  ;;  %v3039_v22 = vsel %vm2527_vm11, %v5488_v5, %v2783_v15  ;;  %vm2525_vm13 = vcmp.gt.f32.partialorder %v1936_v17, 0.0  ;;  %v2781_v23 = vmul.f32 0.2, %v1936_v17  ;;  %v5363_v24 = vpop.f32.mrf.mxu0  ;;  %5458 = vmatmul.mubr.msk.bf16.gmra.mxu0 %vm938_vm0, %v5724_v6  ;;  %v5491_v25 = vpop.f32.mrf.mxu1  ;;  %5586 = vmatmul.mubr.msk.bf16.gmra.mxu1 %vm938_vm0, %v5725_v7  ;;  %v5733_v15 = vld [vmem:[%s7308_s0 + $0x3f8] sm:$0xff]  }
  0xf7   :  { %4317 = vst.msk [vmem:[%s7309_s4 + $0x240] sm:$0xf] %vm4172_vm3, %v5092_v18  ;;  %v5095_v26 = vpack.c.bf16 %v3039_v22, %v3039_v22  ;;  %v2909_v27 = vsel %vm2397_vm12, %v1424_v16, %v2653_v20  ;;  %vm2402_vm14 = vcmp.gt.f32.partialorder %v5363_v24, 0.0  ;;  %v2658_v28 = vmul.f32 0.2, %v5363_v24  ;;  %5461 = vmatprep.mubr.msk.bf16.mxu0 %vm938_vm0, %v5726_v11  ;;  %5589 = vmatprep.mubr.msk.bf16.mxu1 %vm938_vm0, %v5727_v12 }
  0xf8   :  { %4192 = vst.msk [vmem:[%s7309_s4 + $0x4c] sm:$0xf] %vm4172_vm3, %v4967_v21  ;;  %v4965_v29 = vpack.c.bf16 %v2909_v27, %v2909_v27  ;;  %v3037_v30 = vsel %vm2525_vm13, %v1936_v17, %v2781_v23  ;;  %vm2530_vm15 = vcmp.gt.f32.partialorder %v5491_v25, 0.0  ;;  %v2786_v31 = vmul.f32 0.2, %v5491_v25  ;;  %v1437_v32 = vpop.f32.mrf.mxu0  ;;  %v1949_v33 = vpop.f32.mrf.mxu1 }
  0xf9   :  { %4320 = vst.msk [vmem:[%s7309_s4 + $0x24c] sm:$0xf] %vm4172_vm3, %v5095_v26  ;;  %v5093_v34 = vpack.c.bf16 %v3037_v30, %v3037_v30  ;;  %v2914_v35 = vsel %vm2402_vm14, %v5363_v24, %v2658_v28  ;;  %vm2400_vm1 = vcmp.gt.f32.partialorder %v1437_v32, 0.0  ;;  %v2656_v36 = vmul.f32 0.2, %v1437_v32 }
  0xfa   :  { %4190 = vst.msk [vmem:[%s7309_s4 + $0x44] sm:$0xf] %vm4172_vm3, %v4965_v29  ;;  %v4970_v37 = vpack.c.bf16 %v2914_v35, %v2914_v35  ;;  %v3042_v38 = vsel %vm2530_vm15, %v5491_v25, %v2786_v31  ;;  %vm2528_vm2 = vcmp.gt.f32.partialorder %v1949_v33, 0.0  ;;  %v2784_v39 = vmul.f32 0.2, %v1949_v33  ;;  %v5364_v40 = vpop.f32.mrf.mxu0  ;;  %v5492_v41 = vpop.f32.mrf.mxu1 }
  0xfb   :  { %4318 = vst.msk [vmem:[%s7309_s4 + $0x244] sm:$0xf] %vm4172_vm3, %v5093_v34  ;;  %v5098_v44 = vpack.c.bf16 %v3042_v38, %v3042_v38  ;;  %v2912_v45 = vsel %vm2400_vm1, %v1437_v32, %v2656_v36  ;;  %vm2403_vm4 = vcmp.gt.f32.partialorder %v5364_v40, 0.0  ;;  %v2659_v46 = vmul.f32 0.2, %v5364_v40 }
  0xfc   :  { %4195 = vst.msk [vmem:[%s7309_s4 + $0x58] sm:$0xf] %vm4172_vm3, %v4970_v37  ;;  %v4968_v49 = vpack.c.bf16 %v2912_v45, %v2912_v45  ;;  %v3040_v50 = vsel %vm2528_vm2, %v1949_v33, %v2784_v39  ;;  %vm2531_vm5 = vcmp.gt.f32.partialorder %v5492_v41, 0.0  ;;  %v2787_v51 = vmul.f32 0.2, %v5492_v41  ;;  %v1440_v52 = vpop.f32.mrf.mxu0  ;;  %v1952_v53 = vpop.f32.mrf.mxu1 }
  0xfd   :  { %4323 = vst.msk [vmem:[%s7309_s4 + $0x258] sm:$0xf] %vm4172_vm3, %v5098_v44  ;;  %v5096_v54 = vpack.c.bf16 %v3040_v50, %v3040_v50  ;;  %v2915_v55 = vsel %vm2403_vm4, %v5364_v40, %v2659_v46  ;;  %vm2401_vm6 = vcmp.gt.f32.partialorder %v1440_v52, 0.0  ;;  %v2657_v56 = vmul.f32 0.2, %v1440_v52 }
  0xfe   :  { %4193 = vst.msk [vmem:[%s7309_s4 + $0x50] sm:$0xf] %vm4172_vm3, %v4968_v49  ;;  %v4971_v57 = vpack.c.bf16 %v2915_v55, %v2915_v55  ;;  %v3043_v58 = vsel %vm2531_vm5, %v5492_v41, %v2787_v51  ;;  %vm2529_vm7 = vcmp.gt.f32.partialorder %v1952_v53, 0.0  ;;  %v2785_v59 = vmul.f32 0.2, %v1952_v53  ;;  %v5367_v60 = vpop.f32.mrf.mxu0  ;;  %5462 = vmatmul.mubr.msk.bf16.gmra.mxu0 %vm938_vm0, %v5728_v42  ;;  %v5495_v61 = vpop.f32.mrf.mxu1  ;;  %5590 = vmatmul.mubr.msk.bf16.gmra.mxu1 %vm938_vm0, %v5729_v43 }
  0xff   :  { %4321 = vst.msk [vmem:[%s7309_s4 + $0x250] sm:$0xf] %vm4172_vm3, %v5096_v54  ;;  %v5099_v62 = vpack.c.bf16 %v3043_v58, %v3043_v58  ;;  %v2913_v63 = vsel %vm2401_vm6, %v1440_v52, %v2657_v56  ;;  %vm2406_vm8 = vcmp.gt.f32.partialorder %v5367_v60, 0.0  ;;  %v2662_v0 = vmul.f32 0.2, %v5367_v60  ;;  %5465 = vmatprep.mubr.msk.bf16.mxu0 %vm938_vm0, %v5730_v47  ;;  %5593 = vmatprep.mubr.msk.bf16.mxu1 %vm938_vm0, %v5731_v48 }
 0x100   :  { %4196 = vst.msk [vmem:[%s7309_s4 + $0x5c] sm:$0xf] %vm4172_vm3, %v4971_v57  ;;  %v4969_v1 = vpack.c.bf16 %v2913_v63, %v2913_v63  ;;  %v3041_v2 = vsel %vm2529_vm7, %v1952_v53, %v2785_v59  ;;  %vm2534_vm9 = vcmp.gt.f32.partialorder %v5495_v61, 0.0  ;;  %v2790_v3 = vmul.f32 0.2, %v5495_v61  ;;  %v1453_v4 = vpop.f32.mrf.mxu0  ;;  %v1965_v5 = vpop.f32.mrf.mxu1 }
 0x101   :  { %4324 = vst.msk [vmem:[%s7309_s4 + $0x25c] sm:$0xf] %vm4172_vm3, %v5099_v62  ;;  %v5097_v6 = vpack.c.bf16 %v3041_v2, %v3041_v2  ;;  %v2918_v7 = vsel %vm2406_vm8, %v5367_v60, %v2662_v0  ;;  %vm2404_vm10 = vcmp.gt.f32.partialorder %v1453_v4, 0.0  ;;  %v2660_v8 = vmul.f32 0.2, %v1453_v4 }
 0x102   :  { %4194 = vst.msk [vmem:[%s7309_s4 + $0x54] sm:$0xf] %vm4172_vm3, %v4969_v1  ;;  %v4974_v9 = vpack.c.bf16 %v2918_v7, %v2918_v7  ;;  %v3046_v10 = vsel %vm2534_vm9, %v5495_v61, %v2790_v3  ;;  %vm2532_vm11 = vcmp.gt.f32.partialorder %v1965_v5, 0.0  ;;  %v2788_v11 = vmul.f32 0.2, %v1965_v5  ;;  %v5368_v12 = vpop.f32.mrf.mxu0  ;;  %v5496_v13 = vpop.f32.mrf.mxu1 }
 0x103   :  { %4322 = vst.msk [vmem:[%s7309_s4 + $0x254] sm:$0xf] %vm4172_vm3, %v5097_v6  ;;  %v5102_v16 = vpack.c.bf16 %v3046_v10, %v3046_v10  ;;  %v2916_v17 = vsel %vm2404_vm10, %v1453_v4, %v2660_v8  ;;  %vm2407_vm12 = vcmp.gt.f32.partialorder %v5368_v12, 0.0  ;;  %v2663_v18 = vmul.f32 0.2, %v5368_v12 }
 0x104   :  { %4199 = vst.msk [vmem:[%s7309_s4 + $0x68] sm:$0xf] %vm4172_vm3, %v4974_v9  ;;  %v4972_v19 = vpack.c.bf16 %v2916_v17, %v2916_v17  ;;  %v3044_v20 = vsel %vm2532_vm11, %v1965_v5, %v2788_v11  ;;  %vm2535_vm13 = vcmp.gt.f32.partialorder %v5496_v13, 0.0  ;;  %v2791_v21 = vmul.f32 0.2, %v5496_v13  ;;  %v1456_v22 = vpop.f32.mrf.mxu0  ;;  %v1968_v23 = vpop.f32.mrf.mxu1 }
 0x105   :  { %4327 = vst.msk [vmem:[%s7309_s4 + $0x268] sm:$0xf] %vm4172_vm3, %v5102_v16  ;;  %v5100_v24 = vpack.c.bf16 %v3044_v20, %v3044_v20  ;;  %v2919_v25 = vsel %vm2407_vm12, %v5368_v12, %v2663_v18  ;;  %vm2405_vm14 = vcmp.gt.f32.partialorder %v1456_v22, 0.0  ;;  %v2661_v26 = vmul.f32 0.2, %v1456_v22 }
 0x106   :  { %4197 = vst.msk [vmem:[%s7309_s4 + $0x60] sm:$0xf] %vm4172_vm3, %v4972_v19  ;;  %v4975_v27 = vpack.c.bf16 %v2919_v25, %v2919_v25  ;;  %v3047_v28 = vsel %vm2535_vm13, %v5496_v13, %v2791_v21  ;;  %vm2533_vm15 = vcmp.gt.f32.partialorder %v1968_v23, 0.0  ;;  %v2789_v29 = vmul.f32 0.2, %v1968_v23  ;;  %v5371_v30 = vpop.f32.mrf.mxu0  ;;  %5466 = vmatmul.mubr.msk.bf16.gmra.mxu0 %vm938_vm0, %v5732_v14  ;;  %v5499_v31 = vpop.f32.mrf.mxu1  ;;  %5594 = vmatmul.mubr.msk.bf16.gmra.mxu1 %vm938_vm0, %v5733_v15 }
 0x107   :  { %4325 = vst.msk [vmem:[%s7309_s4 + $0x260] sm:$0xf] %vm4172_vm3, %v5100_v24  ;;  %v5103_v32 = vpack.c.bf16 %v3047_v28, %v3047_v28  ;;  %v2917_v33 = vsel %vm2405_vm14, %v1456_v22, %v2661_v26  ;;  %vm2410_vm1 = vcmp.gt.f32.partialorder %v5371_v30, 0.0  ;;  %v2666_v34 = vmul.f32 0.2, %v5371_v30 }
 0x108   :  { %4200 = vst.msk [vmem:[%s7309_s4 + $0x6c] sm:$0xf] %vm4172_vm3, %v4975_v27  ;;  %v4973_v35 = vpack.c.bf16 %v2917_v33, %v2917_v33  ;;  %v3045_v36 = vsel %vm2533_vm15, %v1968_v23, %v2789_v29  ;;  %vm2538_vm2 = vcmp.gt.f32.partialorder %v5499_v31, 0.0  ;;  %v2794_v37 = vmul.f32 0.2, %v5499_v31  ;;  %v1469_v38 = vpop.f32.mrf.mxu0  ;;  %v1981_v39 = vpop.f32.mrf.mxu1 }
 0x109   :  { %4328 = vst.msk [vmem:[%s7309_s4 + $0x26c] sm:$0xf] %vm4172_vm3, %v5103_v32  ;;  %v5101_v40 = vpack.c.bf16 %v3045_v36, %v3045_v36  ;;  %v2922_v41 = vsel %vm2410_vm1, %v5371_v30, %v2666_v34  ;;  %vm2408_vm0 = vcmp.gt.f32.partialorder %v1469_v38, 0.0  ;;  %v2664_v42 = vmul.f32 0.2, %v1469_v38 }
 0x10a   :  { %4198 = vst.msk [vmem:[%s7309_s4 + $0x64] sm:$0xf] %vm4172_vm3, %v4973_v35  ;;  %v4978_v43 = vpack.c.bf16 %v2922_v41, %v2922_v41  ;;  %v3050_v44 = vsel %vm2538_vm2, %v5499_v31, %v2794_v37  ;;  %vm2536_vm4 = vcmp.gt.f32.partialorder %v1981_v39, 0.0  ;;  %v2792_v45 = vmul.f32 0.2, %v1981_v39  ;;  %v5372_v46 = vpop.f32.mrf.mxu0  ;;  %v5500_v47 = vpop.f32.mrf.mxu1 }
 0x10b   :  { %4326 = vst.msk [vmem:[%s7309_s4 + $0x264] sm:$0xf] %vm4172_vm3, %v5101_v40  ;;  %v5106_v48 = vpack.c.bf16 %v3050_v44, %v3050_v44  ;;  %v2920_v49 = vsel %vm2408_vm0, %v1469_v38, %v2664_v42  ;;  %vm2411_vm5 = vcmp.gt.f32.partialorder %v5372_v46, 0.0  ;;  %v2667_v50 = vmul.f32 0.2, %v5372_v46 }
 0x10c   :  { %4203 = vst.msk [vmem:[%s7309_s4 + $0x78] sm:$0xf] %vm4172_vm3, %v4978_v43  ;;  %v4976_v51 = vpack.c.bf16 %v2920_v49, %v2920_v49  ;;  %v3048_v52 = vsel %vm2536_vm4, %v1981_v39, %v2792_v45  ;;  %vm2539_vm6 = vcmp.gt.f32.partialorder %v5500_v47, 0.0  ;;  %v2795_v53 = vmul.f32 0.2, %v5500_v47  ;;  %v1472_v54 = vpop.f32.mrf.mxu0  ;;  %v1984_v55 = vpop.f32.mrf.mxu1 }
 0x10d   :  { %4331 = vst.msk [vmem:[%s7309_s4 + $0x278] sm:$0xf] %vm4172_vm3, %v5106_v48  ;;  %v5104_v56 = vpack.c.bf16 %v3048_v52, %v3048_v52  ;;  %v2923_v57 = vsel %vm2411_vm5, %v5372_v46, %v2667_v50  ;;  %vm2409_vm7 = vcmp.gt.f32.partialorder %v1472_v54, 0.0  ;;  %v2665_v58 = vmul.f32 0.2, %v1472_v54 }
 0x10e   :  { %4201 = vst.msk [vmem:[%s7309_s4 + $0x70] sm:$0xf] %vm4172_vm3, %v4976_v51  ;;  %v4979_v59 = vpack.c.bf16 %v2923_v57, %v2923_v57  ;;  %v3051_v60 = vsel %vm2539_vm6, %v5500_v47, %v2795_v53  ;;  %vm2537_vm8 = vcmp.gt.f32.partialorder %v1984_v55, 0.0  ;;  %v2793_v61 = vmul.f32 0.2, %v1984_v55  ;;  %v5375_v62 = vpop.f32.mrf.mxu0  ;;  %v5503_v63 = vpop.f32.mrf.mxu1 }
 0x10f   :  { %4329 = vst.msk [vmem:[%s7309_s4 + $0x270] sm:$0xf] %vm4172_vm3, %v5104_v56  ;;  %v5107_v0 = vpack.c.bf16 %v3051_v60, %v3051_v60  ;;  %v2921_v1 = vsel %vm2409_vm7, %v1472_v54, %v2665_v58  ;;  %vm2414_vm9 = vcmp.gt.f32.partialorder %v5375_v62, 0.0  ;;  %v2670_v2 = vmul.f32 0.2, %v5375_v62 }
 0x110   :  { %4204 = vst.msk [vmem:[%s7309_s4 + $0x7c] sm:$0xf] %vm4172_vm3, %v4979_v59  ;;  %v4977_v3 = vpack.c.bf16 %v2921_v1, %v2921_v1  ;;  %v3049_v4 = vsel %vm2537_vm8, %v1984_v55, %v2793_v61  ;;  %vm2542_vm10 = vcmp.gt.f32.partialorder %v5503_v63, 0.0  ;;  %v2798_v5 = vmul.f32 0.2, %v5503_v63  ;;  %v1485_v6 = vpop.f32.mrf.mxu0  ;;  %v1997_v7 = vpop.f32.mrf.mxu1 }
 0x111   :  { %4332 = vst.msk [vmem:[%s7309_s4 + $0x27c] sm:$0xf] %vm4172_vm3, %v5107_v0  ;;  %v5105_v8 = vpack.c.bf16 %v3049_v4, %v3049_v4  ;;  %v2926_v9 = vsel %vm2414_vm9, %v5375_v62, %v2670_v2  ;;  %vm2412_vm11 = vcmp.gt.f32.partialorder %v1485_v6, 0.0  ;;  %v2668_v10 = vmul.f32 0.2, %v1485_v6 }
 0x112   :  { %4202 = vst.msk [vmem:[%s7309_s4 + $0x74] sm:$0xf] %vm4172_vm3, %v4977_v3  ;;  %v4982_v11 = vpack.c.bf16 %v2926_v9, %v2926_v9  ;;  %v3054_v12 = vsel %vm2542_vm10, %v5503_v63, %v2798_v5  ;;  %vm2540_vm12 = vcmp.gt.f32.partialorder %v1997_v7, 0.0  ;;  %v2796_v13 = vmul.f32 0.2, %v1997_v7  ;;  %v5376_v14 = vpop.f32.mrf.mxu0  ;;  %v5504_v15 = vpop.f32.mrf.mxu1 }
 0x113   :  { %4330 = vst.msk [vmem:[%s7309_s4 + $0x274] sm:$0xf] %vm4172_vm3, %v5105_v8  ;;  %v5110_v16 = vpack.c.bf16 %v3054_v12, %v3054_v12  ;;  %v2924_v17 = vsel %vm2412_vm11, %v1485_v6, %v2668_v10  ;;  %vm2415_vm13 = vcmp.gt.f32.partialorder %v5376_v14, 0.0  ;;  %v2671_v18 = vmul.f32 0.2, %v5376_v14 }
 0x114   :  { %4207 = vst.msk [vmem:[%s7309_s4 + $0x88] sm:$0xf] %vm4172_vm3, %v4982_v11  ;;  %v4980_v19 = vpack.c.bf16 %v2924_v17, %v2924_v17  ;;  %v3052_v20 = vsel %vm2540_vm12, %v1997_v7, %v2796_v13  ;;  %vm2543_vm14 = vcmp.gt.f32.partialorder %v5504_v15, 0.0  ;;  %v2799_v21 = vmul.f32 0.2, %v5504_v15  ;;  %v1488_v22 = vpop.f32.mrf.mxu0  ;;  %v2000_v23 = vpop.f32.mrf.mxu1 }
 0x115   :  { %4335 = vst.msk [vmem:[%s7309_s4 + $0x288] sm:$0xf] %vm4172_vm3, %v5110_v16  ;;  %v5108_v24 = vpack.c.bf16 %v3052_v20, %v3052_v20  ;;  %v2927_v25 = vsel %vm2415_vm13, %v5376_v14, %v2671_v18  ;;  %vm2413_vm15 = vcmp.gt.f32.partialorder %v1488_v22, 0.0  ;;  %v2669_v26 = vmul.f32 0.2, %v1488_v22 }
 0x116   :  { %4205 = vst.msk [vmem:[%s7309_s4 + $0x80] sm:$0xf] %vm4172_vm3, %v4980_v19  ;;  %v4983_v27 = vpack.c.bf16 %v2927_v25, %v2927_v25  ;;  %v3055_v28 = vsel %vm2543_vm14, %v5504_v15, %v2799_v21  ;;  %vm2541_vm1 = vcmp.gt.f32.partialorder %v2000_v23, 0.0  ;;  %v2797_v29 = vmul.f32 0.2, %v2000_v23  ;;  %v5379_v30 = vpop.f32.mrf.mxu0  ;;  %v5507_v31 = vpop.f32.mrf.mxu1 }
 0x117   :  { %4333 = vst.msk [vmem:[%s7309_s4 + $0x280] sm:$0xf] %vm4172_vm3, %v5108_v24  ;;  %v5111_v32 = vpack.c.bf16 %v3055_v28, %v3055_v28  ;;  %v2925_v33 = vsel %vm2413_vm15, %v1488_v22, %v2669_v26  ;;  %vm2418_vm2 = vcmp.gt.f32.partialorder %v5379_v30, 0.0  ;;  %v2674_v34 = vmul.f32 0.2, %v5379_v30 }
 0x118   :  { %4208 = vst.msk [vmem:[%s7309_s4 + $0x8c] sm:$0xf] %vm4172_vm3, %v4983_v27  ;;  %v4981_v35 = vpack.c.bf16 %v2925_v33, %v2925_v33  ;;  %v3053_v36 = vsel %vm2541_vm1, %v2000_v23, %v2797_v29  ;;  %vm2546_vm0 = vcmp.gt.f32.partialorder %v5507_v31, 0.0  ;;  %v2802_v37 = vmul.f32 0.2, %v5507_v31  ;;  %v1501_v38 = vpop.f32.mrf.mxu0  ;;  %v2013_v39 = vpop.f32.mrf.mxu1 }
 0x119   :  { %4336 = vst.msk [vmem:[%s7309_s4 + $0x28c] sm:$0xf] %vm4172_vm3, %v5111_v32  ;;  %v5109_v40 = vpack.c.bf16 %v3053_v36, %v3053_v36  ;;  %v2930_v41 = vsel %vm2418_vm2, %v5379_v30, %v2674_v34  ;;  %vm2416_vm4 = vcmp.gt.f32.partialorder %v1501_v38, 0.0  ;;  %v2672_v42 = vmul.f32 0.2, %v1501_v38 }
 0x11a   :  { %4206 = vst.msk [vmem:[%s7309_s4 + $0x84] sm:$0xf] %vm4172_vm3, %v4981_v35  ;;  %v4986_v43 = vpack.c.bf16 %v2930_v41, %v2930_v41  ;;  %v3058_v44 = vsel %vm2546_vm0, %v5507_v31, %v2802_v37  ;;  %vm2544_vm5 = vcmp.gt.f32.partialorder %v2013_v39, 0.0  ;;  %v2800_v45 = vmul.f32 0.2, %v2013_v39  ;;  %v5380_v46 = vpop.f32.mrf.mxu0  ;;  %v5508_v47 = vpop.f32.mrf.mxu1 }
 0x11b   :  { %4334 = vst.msk [vmem:[%s7309_s4 + $0x284] sm:$0xf] %vm4172_vm3, %v5109_v40  ;;  %v5114_v48 = vpack.c.bf16 %v3058_v44, %v3058_v44  ;;  %v2928_v49 = vsel %vm2416_vm4, %v1501_v38, %v2672_v42  ;;  %vm2419_vm6 = vcmp.gt.f32.partialorder %v5380_v46, 0.0  ;;  %v2675_v50 = vmul.f32 0.2, %v5380_v46 }
 0x11c   :  { %4211 = vst.msk [vmem:[%s7309_s4 + $0x98] sm:$0xf] %vm4172_vm3, %v4986_v43  ;;  %v4984_v51 = vpack.c.bf16 %v2928_v49, %v2928_v49  ;;  %v3056_v52 = vsel %vm2544_vm5, %v2013_v39, %v2800_v45  ;;  %vm2547_vm7 = vcmp.gt.f32.partialorder %v5508_v47, 0.0  ;;  %v2803_v53 = vmul.f32 0.2, %v5508_v47  ;;  %v1504_v54 = vpop.f32.mrf.mxu0  ;;  %v2016_v55 = vpop.f32.mrf.mxu1 }
 0x11d   :  { %4339 = vst.msk [vmem:[%s7309_s4 + $0x298] sm:$0xf] %vm4172_vm3, %v5114_v48  ;;  %v5112_v56 = vpack.c.bf16 %v3056_v52, %v3056_v52  ;;  %v2931_v57 = vsel %vm2419_vm6, %v5380_v46, %v2675_v50  ;;  %vm2417_vm8 = vcmp.gt.f32.partialorder %v1504_v54, 0.0  ;;  %v2673_v58 = vmul.f32 0.2, %v1504_v54 }
 0x11e   :  { %4209 = vst.msk [vmem:[%s7309_s4 + $0x90] sm:$0xf] %vm4172_vm3, %v4984_v51  ;;  %v4987_v59 = vpack.c.bf16 %v2931_v57, %v2931_v57  ;;  %v3059_v60 = vsel %vm2547_vm7, %v5508_v47, %v2803_v53  ;;  %vm2545_vm9 = vcmp.gt.f32.partialorder %v2016_v55, 0.0  ;;  %v2801_v61 = vmul.f32 0.2, %v2016_v55  ;;  %v5383_v62 = vpop.f32.mrf.mxu0  ;;  %v5511_v63 = vpop.f32.mrf.mxu1 }
 0x11f   :  { %4337 = vst.msk [vmem:[%s7309_s4 + $0x290] sm:$0xf] %vm4172_vm3, %v5112_v56  ;;  %v5115_v0 = vpack.c.bf16 %v3059_v60, %v3059_v60  ;;  %v2929_v1 = vsel %vm2417_vm8, %v1504_v54, %v2673_v58  ;;  %vm2422_vm10 = vcmp.gt.f32.partialorder %v5383_v62, 0.0  ;;  %v2678_v2 = vmul.f32 0.2, %v5383_v62 }
 0x120   :  { %4212 = vst.msk [vmem:[%s7309_s4 + $0x9c] sm:$0xf] %vm4172_vm3, %v4987_v59  ;;  %v4985_v3 = vpack.c.bf16 %v2929_v1, %v2929_v1  ;;  %v3057_v4 = vsel %vm2545_vm9, %v2016_v55, %v2801_v61  ;;  %vm2550_vm11 = vcmp.gt.f32.partialorder %v5511_v63, 0.0  ;;  %v2806_v5 = vmul.f32 0.2, %v5511_v63  ;;  %v1517_v6 = vpop.f32.mrf.mxu0  ;;  %v2029_v7 = vpop.f32.mrf.mxu1 }
 0x121   :  { %4340 = vst.msk [vmem:[%s7309_s4 + $0x29c] sm:$0xf] %vm4172_vm3, %v5115_v0  ;;  %v5113_v8 = vpack.c.bf16 %v3057_v4, %v3057_v4  ;;  %v2934_v9 = vsel %vm2422_vm10, %v5383_v62, %v2678_v2  ;;  %vm2420_vm12 = vcmp.gt.f32.partialorder %v1517_v6, 0.0  ;;  %v2676_v10 = vmul.f32 0.2, %v1517_v6 }
 0x122   :  { %4210 = vst.msk [vmem:[%s7309_s4 + $0x94] sm:$0xf] %vm4172_vm3, %v4985_v3  ;;  %v4990_v11 = vpack.c.bf16 %v2934_v9, %v2934_v9  ;;  %v3062_v12 = vsel %vm2550_vm11, %v5511_v63, %v2806_v5  ;;  %vm2548_vm13 = vcmp.gt.f32.partialorder %v2029_v7, 0.0  ;;  %v2804_v13 = vmul.f32 0.2, %v2029_v7  ;;  %v5384_v14 = vpop.f32.mrf.mxu0  ;;  %v5512_v15 = vpop.f32.mrf.mxu1 }
 0x123   :  { %4338 = vst.msk [vmem:[%s7309_s4 + $0x294] sm:$0xf] %vm4172_vm3, %v5113_v8  ;;  %v5118_v16 = vpack.c.bf16 %v3062_v12, %v3062_v12  ;;  %v2932_v17 = vsel %vm2420_vm12, %v1517_v6, %v2676_v10  ;;  %vm2423_vm14 = vcmp.gt.f32.partialorder %v5384_v14, 0.0  ;;  %v2679_v18 = vmul.f32 0.2, %v5384_v14 }
 0x124   :  { %4215 = vst.msk [vmem:[%s7309_s4 + $0xa8] sm:$0xf] %vm4172_vm3, %v4990_v11  ;;  %v4988_v19 = vpack.c.bf16 %v2932_v17, %v2932_v17  ;;  %v3060_v20 = vsel %vm2548_vm13, %v2029_v7, %v2804_v13  ;;  %vm2551_vm15 = vcmp.gt.f32.partialorder %v5512_v15, 0.0  ;;  %v2807_v21 = vmul.f32 0.2, %v5512_v15  ;;  %v1520_v22 = vpop.f32.mrf.mxu0  ;;  %v2032_v23 = vpop.f32.mrf.mxu1 }
 0x125   :  { %4343 = vst.msk [vmem:[%s7309_s4 + $0x2a8] sm:$0xf] %vm4172_vm3, %v5118_v16  ;;  %v5116_v24 = vpack.c.bf16 %v3060_v20, %v3060_v20  ;;  %v2935_v25 = vsel %vm2423_vm14, %v5384_v14, %v2679_v18  ;;  %vm2421_vm1 = vcmp.gt.f32.partialorder %v1520_v22, 0.0  ;;  %v2677_v26 = vmul.f32 0.2, %v1520_v22 }
 0x126   :  { %4213 = vst.msk [vmem:[%s7309_s4 + $0xa0] sm:$0xf] %vm4172_vm3, %v4988_v19  ;;  %v4991_v27 = vpack.c.bf16 %v2935_v25, %v2935_v25  ;;  %v3063_v28 = vsel %vm2551_vm15, %v5512_v15, %v2807_v21  ;;  %vm2549_vm2 = vcmp.gt.f32.partialorder %v2032_v23, 0.0  ;;  %v2805_v29 = vmul.f32 0.2, %v2032_v23  ;;  %v5387_v30 = vpop.f32.mrf.mxu0  ;;  %v5515_v31 = vpop.f32.mrf.mxu1 }
 0x127   :  { %4341 = vst.msk [vmem:[%s7309_s4 + $0x2a0] sm:$0xf] %vm4172_vm3, %v5116_v24  ;;  %v5119_v32 = vpack.c.bf16 %v3063_v28, %v3063_v28  ;;  %v2933_v33 = vsel %vm2421_vm1, %v1520_v22, %v2677_v26  ;;  %vm2426_vm0 = vcmp.gt.f32.partialorder %v5387_v30, 0.0  ;;  %v2682_v34 = vmul.f32 0.2, %v5387_v30 }
 0x128   :  { %4216 = vst.msk [vmem:[%s7309_s4 + $0xac] sm:$0xf] %vm4172_vm3, %v4991_v27  ;;  %v4989_v35 = vpack.c.bf16 %v2933_v33, %v2933_v33  ;;  %v3061_v36 = vsel %vm2549_vm2, %v2032_v23, %v2805_v29  ;;  %vm2554_vm4 = vcmp.gt.f32.partialorder %v5515_v31, 0.0  ;;  %v2810_v37 = vmul.f32 0.2, %v5515_v31  ;;  %v1533_v38 = vpop.f32.mrf.mxu0  ;;  %v2045_v39 = vpop.f32.mrf.mxu1 }
 0x129   :  { %4344 = vst.msk [vmem:[%s7309_s4 + $0x2ac] sm:$0xf] %vm4172_vm3, %v5119_v32  ;;  %v5117_v40 = vpack.c.bf16 %v3061_v36, %v3061_v36  ;;  %v2938_v41 = vsel %vm2426_vm0, %v5387_v30, %v2682_v34  ;;  %vm2424_vm5 = vcmp.gt.f32.partialorder %v1533_v38, 0.0  ;;  %v2680_v42 = vmul.f32 0.2, %v1533_v38 }
 0x12a   :  { %4214 = vst.msk [vmem:[%s7309_s4 + $0xa4] sm:$0xf] %vm4172_vm3, %v4989_v35  ;;  %v4994_v43 = vpack.c.bf16 %v2938_v41, %v2938_v41  ;;  %v3066_v44 = vsel %vm2554_vm4, %v5515_v31, %v2810_v37  ;;  %vm2552_vm6 = vcmp.gt.f32.partialorder %v2045_v39, 0.0  ;;  %v2808_v45 = vmul.f32 0.2, %v2045_v39  ;;  %v5388_v46 = vpop.f32.mrf.mxu0  ;;  %v5516_v47 = vpop.f32.mrf.mxu1 }
 0x12b   :  { %4342 = vst.msk [vmem:[%s7309_s4 + $0x2a4] sm:$0xf] %vm4172_vm3, %v5117_v40  ;;  %v5122_v48 = vpack.c.bf16 %v3066_v44, %v3066_v44  ;;  %v2936_v49 = vsel %vm2424_vm5, %v1533_v38, %v2680_v42  ;;  %vm2427_vm7 = vcmp.gt.f32.partialorder %v5388_v46, 0.0  ;;  %v2683_v50 = vmul.f32 0.2, %v5388_v46 }
 0x12c   :  { %4219 = vst.msk [vmem:[%s7309_s4 + $0xb8] sm:$0xf] %vm4172_vm3, %v4994_v43  ;;  %v4992_v51 = vpack.c.bf16 %v2936_v49, %v2936_v49  ;;  %v3064_v52 = vsel %vm2552_vm6, %v2045_v39, %v2808_v45  ;;  %vm2555_vm8 = vcmp.gt.f32.partialorder %v5516_v47, 0.0  ;;  %v2811_v53 = vmul.f32 0.2, %v5516_v47  ;;  %v1536_v54 = vpop.f32.mrf.mxu0  ;;  %v2048_v55 = vpop.f32.mrf.mxu1 }
 0x12d   :  { %4347 = vst.msk [vmem:[%s7309_s4 + $0x2b8] sm:$0xf] %vm4172_vm3, %v5122_v48  ;;  %v5120_v56 = vpack.c.bf16 %v3064_v52, %v3064_v52  ;;  %v2939_v57 = vsel %vm2427_vm7, %v5388_v46, %v2683_v50  ;;  %vm2425_vm9 = vcmp.gt.f32.partialorder %v1536_v54, 0.0  ;;  %v2681_v58 = vmul.f32 0.2, %v1536_v54 }
 0x12e   :  { %4217 = vst.msk [vmem:[%s7309_s4 + $0xb0] sm:$0xf] %vm4172_vm3, %v4992_v51  ;;  %v4995_v59 = vpack.c.bf16 %v2939_v57, %v2939_v57  ;;  %v3067_v60 = vsel %vm2555_vm8, %v5516_v47, %v2811_v53  ;;  %vm2553_vm10 = vcmp.gt.f32.partialorder %v2048_v55, 0.0  ;;  %v2809_v61 = vmul.f32 0.2, %v2048_v55  ;;  %v5391_v62 = vpop.f32.mrf.mxu0  ;;  %v5519_v63 = vpop.f32.mrf.mxu1 }
 0x12f   :  { %4345 = vst.msk [vmem:[%s7309_s4 + $0x2b0] sm:$0xf] %vm4172_vm3, %v5120_v56  ;;  %v5123_v0 = vpack.c.bf16 %v3067_v60, %v3067_v60  ;;  %v2937_v1 = vsel %vm2425_vm9, %v1536_v54, %v2681_v58  ;;  %vm2430_vm11 = vcmp.gt.f32.partialorder %v5391_v62, 0.0  ;;  %v2686_v2 = vmul.f32 0.2, %v5391_v62 }
 0x130   :  { %4220 = vst.msk [vmem:[%s7309_s4 + $0xbc] sm:$0xf] %vm4172_vm3, %v4995_v59  ;;  %v4993_v3 = vpack.c.bf16 %v2937_v1, %v2937_v1  ;;  %v3065_v4 = vsel %vm2553_vm10, %v2048_v55, %v2809_v61  ;;  %vm2558_vm12 = vcmp.gt.f32.partialorder %v5519_v63, 0.0  ;;  %v2814_v5 = vmul.f32 0.2, %v5519_v63  ;;  %v1549_v6 = vpop.f32.mrf.mxu0  ;;  %v2061_v7 = vpop.f32.mrf.mxu1 }
 0x131   :  { %4348 = vst.msk [vmem:[%s7309_s4 + $0x2bc] sm:$0xf] %vm4172_vm3, %v5123_v0  ;;  %v5121_v8 = vpack.c.bf16 %v3065_v4, %v3065_v4  ;;  %v2942_v9 = vsel %vm2430_vm11, %v5391_v62, %v2686_v2  ;;  %vm2428_vm13 = vcmp.gt.f32.partialorder %v1549_v6, 0.0  ;;  %v2684_v10 = vmul.f32 0.2, %v1549_v6 }
 0x132   :  { %4218 = vst.msk [vmem:[%s7309_s4 + $0xb4] sm:$0xf] %vm4172_vm3, %v4993_v3  ;;  %v4998_v11 = vpack.c.bf16 %v2942_v9, %v2942_v9  ;;  %v3070_v12 = vsel %vm2558_vm12, %v5519_v63, %v2814_v5  ;;  %vm2556_vm14 = vcmp.gt.f32.partialorder %v2061_v7, 0.0  ;;  %v2812_v13 = vmul.f32 0.2, %v2061_v7  ;;  %v5392_v14 = vpop.f32.mrf.mxu0  ;;  %v5520_v15 = vpop.f32.mrf.mxu1 }
 0x133   :  { %4346 = vst.msk [vmem:[%s7309_s4 + $0x2b4] sm:$0xf] %vm4172_vm3, %v5121_v8  ;;  %v5126_v16 = vpack.c.bf16 %v3070_v12, %v3070_v12  ;;  %v2940_v17 = vsel %vm2428_vm13, %v1549_v6, %v2684_v10  ;;  %vm2431_vm15 = vcmp.gt.f32.partialorder %v5392_v14, 0.0  ;;  %v2687_v18 = vmul.f32 0.2, %v5392_v14 }
 0x134   :  { %4223 = vst.msk [vmem:[%s7309_s4 + $0xc8] sm:$0xf] %vm4172_vm3, %v4998_v11  ;;  %v4996_v19 = vpack.c.bf16 %v2940_v17, %v2940_v17  ;;  %v3068_v20 = vsel %vm2556_vm14, %v2061_v7, %v2812_v13  ;;  %vm2559_vm1 = vcmp.gt.f32.partialorder %v5520_v15, 0.0  ;;  %v2815_v21 = vmul.f32 0.2, %v5520_v15  ;;  %v1552_v22 = vpop.f32.mrf.mxu0  ;;  %v2064_v23 = vpop.f32.mrf.mxu1 }
 0x135   :  { %4351 = vst.msk [vmem:[%s7309_s4 + $0x2c8] sm:$0xf] %vm4172_vm3, %v5126_v16  ;;  %v5124_v24 = vpack.c.bf16 %v3068_v20, %v3068_v20  ;;  %v2943_v25 = vsel %vm2431_vm15, %v5392_v14, %v2687_v18  ;;  %vm2429_vm2 = vcmp.gt.f32.partialorder %v1552_v22, 0.0  ;;  %v2685_v26 = vmul.f32 0.2, %v1552_v22 }
 0x136   :  { %4221 = vst.msk [vmem:[%s7309_s4 + $0xc0] sm:$0xf] %vm4172_vm3, %v4996_v19  ;;  %v4999_v27 = vpack.c.bf16 %v2943_v25, %v2943_v25  ;;  %v3071_v28 = vsel %vm2559_vm1, %v5520_v15, %v2815_v21  ;;  %vm2557_vm0 = vcmp.gt.f32.partialorder %v2064_v23, 0.0  ;;  %v2813_v29 = vmul.f32 0.2, %v2064_v23  ;;  %v5395_v30 = vpop.f32.mrf.mxu0  ;;  %v5523_v31 = vpop.f32.mrf.mxu1 }
 0x137   :  { %4349 = vst.msk [vmem:[%s7309_s4 + $0x2c0] sm:$0xf] %vm4172_vm3, %v5124_v24  ;;  %v5127_v32 = vpack.c.bf16 %v3071_v28, %v3071_v28  ;;  %v2941_v33 = vsel %vm2429_vm2, %v1552_v22, %v2685_v26  ;;  %vm2434_vm4 = vcmp.gt.f32.partialorder %v5395_v30, 0.0  ;;  %v2690_v34 = vmul.f32 0.2, %v5395_v30 }
 0x138   :  { %4224 = vst.msk [vmem:[%s7309_s4 + $0xcc] sm:$0xf] %vm4172_vm3, %v4999_v27  ;;  %v4997_v35 = vpack.c.bf16 %v2941_v33, %v2941_v33  ;;  %v3069_v36 = vsel %vm2557_vm0, %v2064_v23, %v2813_v29  ;;  %vm2562_vm5 = vcmp.gt.f32.partialorder %v5523_v31, 0.0  ;;  %v2818_v37 = vmul.f32 0.2, %v5523_v31  ;;  %v1565_v38 = vpop.f32.mrf.mxu0  ;;  %v2077_v39 = vpop.f32.mrf.mxu1 }
 0x139   :  { %4352 = vst.msk [vmem:[%s7309_s4 + $0x2cc] sm:$0xf] %vm4172_vm3, %v5127_v32  ;;  %v5125_v40 = vpack.c.bf16 %v3069_v36, %v3069_v36  ;;  %v2946_v41 = vsel %vm2434_vm4, %v5395_v30, %v2690_v34  ;;  %vm2432_vm6 = vcmp.gt.f32.partialorder %v1565_v38, 0.0  ;;  %v2688_v42 = vmul.f32 0.2, %v1565_v38 }
 0x13a   :  { %4222 = vst.msk [vmem:[%s7309_s4 + $0xc4] sm:$0xf] %vm4172_vm3, %v4997_v35  ;;  %v5002_v43 = vpack.c.bf16 %v2946_v41, %v2946_v41  ;;  %v3074_v44 = vsel %vm2562_vm5, %v5523_v31, %v2818_v37  ;;  %vm2560_vm7 = vcmp.gt.f32.partialorder %v2077_v39, 0.0  ;;  %v2816_v45 = vmul.f32 0.2, %v2077_v39  ;;  %v5396_v46 = vpop.f32.mrf.mxu0  ;;  %v5524_v47 = vpop.f32.mrf.mxu1 }
 0x13b   :  { %4350 = vst.msk [vmem:[%s7309_s4 + $0x2c4] sm:$0xf] %vm4172_vm3, %v5125_v40  ;;  %v5130_v48 = vpack.c.bf16 %v3074_v44, %v3074_v44  ;;  %v2944_v49 = vsel %vm2432_vm6, %v1565_v38, %v2688_v42  ;;  %vm2435_vm8 = vcmp.gt.f32.partialorder %v5396_v46, 0.0  ;;  %v2691_v50 = vmul.f32 0.2, %v5396_v46 }
 0x13c   :  { %4227 = vst.msk [vmem:[%s7309_s4 + $0xd8] sm:$0xf] %vm4172_vm3, %v5002_v43  ;;  %v5000_v51 = vpack.c.bf16 %v2944_v49, %v2944_v49  ;;  %v3072_v52 = vsel %vm2560_vm7, %v2077_v39, %v2816_v45  ;;  %vm2563_vm9 = vcmp.gt.f32.partialorder %v5524_v47, 0.0  ;;  %v2819_v53 = vmul.f32 0.2, %v5524_v47  ;;  %v1568_v54 = vpop.f32.mrf.mxu0  ;;  %v2080_v55 = vpop.f32.mrf.mxu1 }
 0x13d   :  { %4355 = vst.msk [vmem:[%s7309_s4 + $0x2d8] sm:$0xf] %vm4172_vm3, %v5130_v48  ;;  %v5128_v56 = vpack.c.bf16 %v3072_v52, %v3072_v52  ;;  %v2947_v57 = vsel %vm2435_vm8, %v5396_v46, %v2691_v50  ;;  %vm2433_vm10 = vcmp.gt.f32.partialorder %v1568_v54, 0.0  ;;  %v2689_v58 = vmul.f32 0.2, %v1568_v54 }
 0x13e   :  { %4225 = vst.msk [vmem:[%s7309_s4 + $0xd0] sm:$0xf] %vm4172_vm3, %v5000_v51  ;;  %v5003_v59 = vpack.c.bf16 %v2947_v57, %v2947_v57  ;;  %v3075_v60 = vsel %vm2563_vm9, %v5524_v47, %v2819_v53  ;;  %vm2561_vm11 = vcmp.gt.f32.partialorder %v2080_v55, 0.0  ;;  %v2817_v61 = vmul.f32 0.2, %v2080_v55  ;;  %v5399_v62 = vpop.f32.mrf.mxu0  ;;  %v5527_v63 = vpop.f32.mrf.mxu1 }
 0x13f   :  { %4353 = vst.msk [vmem:[%s7309_s4 + $0x2d0] sm:$0xf] %vm4172_vm3, %v5128_v56  ;;  %v5131_v0 = vpack.c.bf16 %v3075_v60, %v3075_v60  ;;  %v2945_v1 = vsel %vm2433_vm10, %v1568_v54, %v2689_v58  ;;  %vm2438_vm12 = vcmp.gt.f32.partialorder %v5399_v62, 0.0  ;;  %v2694_v2 = vmul.f32 0.2, %v5399_v62 }
 0x140   :  { %4228 = vst.msk [vmem:[%s7309_s4 + $0xdc] sm:$0xf] %vm4172_vm3, %v5003_v59  ;;  %v5001_v3 = vpack.c.bf16 %v2945_v1, %v2945_v1  ;;  %v3073_v4 = vsel %vm2561_vm11, %v2080_v55, %v2817_v61  ;;  %vm2566_vm13 = vcmp.gt.f32.partialorder %v5527_v63, 0.0  ;;  %v2822_v5 = vmul.f32 0.2, %v5527_v63  ;;  %v1581_v6 = vpop.f32.mrf.mxu0  ;;  %v2093_v7 = vpop.f32.mrf.mxu1 }
 0x141   :  { %4356 = vst.msk [vmem:[%s7309_s4 + $0x2dc] sm:$0xf] %vm4172_vm3, %v5131_v0  ;;  %v5129_v8 = vpack.c.bf16 %v3073_v4, %v3073_v4  ;;  %v2950_v9 = vsel %vm2438_vm12, %v5399_v62, %v2694_v2  ;;  %vm2436_vm14 = vcmp.gt.f32.partialorder %v1581_v6, 0.0  ;;  %v2692_v10 = vmul.f32 0.2, %v1581_v6 }
 0x142   :  { %4226 = vst.msk [vmem:[%s7309_s4 + $0xd4] sm:$0xf] %vm4172_vm3, %v5001_v3  ;;  %v5006_v11 = vpack.c.bf16 %v2950_v9, %v2950_v9  ;;  %v3078_v12 = vsel %vm2566_vm13, %v5527_v63, %v2822_v5  ;;  %vm2564_vm15 = vcmp.gt.f32.partialorder %v2093_v7, 0.0  ;;  %v2820_v13 = vmul.f32 0.2, %v2093_v7  ;;  %v5400_v14 = vpop.f32.mrf.mxu0  ;;  %v5528_v15 = vpop.f32.mrf.mxu1 }
 0x143   :  { %4354 = vst.msk [vmem:[%s7309_s4 + $0x2d4] sm:$0xf] %vm4172_vm3, %v5129_v8  ;;  %v5134_v16 = vpack.c.bf16 %v3078_v12, %v3078_v12  ;;  %v2948_v17 = vsel %vm2436_vm14, %v1581_v6, %v2692_v10  ;;  %vm2439_vm1 = vcmp.gt.f32.partialorder %v5400_v14, 0.0  ;;  %v2695_v18 = vmul.f32 0.2, %v5400_v14 }
 0x144   :  { %4231 = vst.msk [vmem:[%s7309_s4 + $0xe8] sm:$0xf] %vm4172_vm3, %v5006_v11  ;;  %v5004_v19 = vpack.c.bf16 %v2948_v17, %v2948_v17  ;;  %v3076_v20 = vsel %vm2564_vm15, %v2093_v7, %v2820_v13  ;;  %vm2567_vm2 = vcmp.gt.f32.partialorder %v5528_v15, 0.0  ;;  %v2823_v21 = vmul.f32 0.2, %v5528_v15  ;;  %v1584_v22 = vpop.f32.mrf.mxu0  ;;  %v2096_v23 = vpop.f32.mrf.mxu1 }
 0x145   :  { %4359 = vst.msk [vmem:[%s7309_s4 + $0x2e8] sm:$0xf] %vm4172_vm3, %v5134_v16  ;;  %v5132_v24 = vpack.c.bf16 %v3076_v20, %v3076_v20  ;;  %v2951_v25 = vsel %vm2439_vm1, %v5400_v14, %v2695_v18  ;;  %vm2437_vm0 = vcmp.gt.f32.partialorder %v1584_v22, 0.0  ;;  %v2693_v26 = vmul.f32 0.2, %v1584_v22 }
 0x146   :  { %4229 = vst.msk [vmem:[%s7309_s4 + $0xe0] sm:$0xf] %vm4172_vm3, %v5004_v19  ;;  %v5007_v27 = vpack.c.bf16 %v2951_v25, %v2951_v25  ;;  %v3079_v28 = vsel %vm2567_vm2, %v5528_v15, %v2823_v21  ;;  %vm2565_vm4 = vcmp.gt.f32.partialorder %v2096_v23, 0.0  ;;  %v2821_v29 = vmul.f32 0.2, %v2096_v23  ;;  %v5403_v30 = vpop.f32.mrf.mxu0  ;;  %v5531_v31 = vpop.f32.mrf.mxu1 }
 0x147   :  { %4357 = vst.msk [vmem:[%s7309_s4 + $0x2e0] sm:$0xf] %vm4172_vm3, %v5132_v24  ;;  %v5135_v32 = vpack.c.bf16 %v3079_v28, %v3079_v28  ;;  %v2949_v33 = vsel %vm2437_vm0, %v1584_v22, %v2693_v26  ;;  %vm2442_vm5 = vcmp.gt.f32.partialorder %v5403_v30, 0.0  ;;  %v2698_v34 = vmul.f32 0.2, %v5403_v30 }
 0x148   :  { %4232 = vst.msk [vmem:[%s7309_s4 + $0xec] sm:$0xf] %vm4172_vm3, %v5007_v27  ;;  %v5005_v35 = vpack.c.bf16 %v2949_v33, %v2949_v33  ;;  %v3077_v36 = vsel %vm2565_vm4, %v2096_v23, %v2821_v29  ;;  %vm2570_vm6 = vcmp.gt.f32.partialorder %v5531_v31, 0.0  ;;  %v2826_v37 = vmul.f32 0.2, %v5531_v31  ;;  %v1597_v38 = vpop.f32.mrf.mxu0  ;;  %v2109_v39 = vpop.f32.mrf.mxu1 }
 0x149   :  { %4360 = vst.msk [vmem:[%s7309_s4 + $0x2ec] sm:$0xf] %vm4172_vm3, %v5135_v32  ;;  %v5133_v40 = vpack.c.bf16 %v3077_v36, %v3077_v36  ;;  %v2954_v41 = vsel %vm2442_vm5, %v5403_v30, %v2698_v34  ;;  %vm2440_vm7 = vcmp.gt.f32.partialorder %v1597_v38, 0.0  ;;  %v2696_v42 = vmul.f32 0.2, %v1597_v38 }
 0x14a   :  { %4230 = vst.msk [vmem:[%s7309_s4 + $0xe4] sm:$0xf] %vm4172_vm3, %v5005_v35  ;;  %v5010_v43 = vpack.c.bf16 %v2954_v41, %v2954_v41  ;;  %v3082_v44 = vsel %vm2570_vm6, %v5531_v31, %v2826_v37  ;;  %vm2568_vm8 = vcmp.gt.f32.partialorder %v2109_v39, 0.0  ;;  %v2824_v45 = vmul.f32 0.2, %v2109_v39  ;;  %v5404_v46 = vpop.f32.mrf.mxu0  ;;  %v5532_v47 = vpop.f32.mrf.mxu1 }
 0x14b   :  { %4358 = vst.msk [vmem:[%s7309_s4 + $0x2e4] sm:$0xf] %vm4172_vm3, %v5133_v40  ;;  %v5138_v48 = vpack.c.bf16 %v3082_v44, %v3082_v44  ;;  %v2952_v49 = vsel %vm2440_vm7, %v1597_v38, %v2696_v42  ;;  %vm2443_vm9 = vcmp.gt.f32.partialorder %v5404_v46, 0.0  ;;  %v2699_v50 = vmul.f32 0.2, %v5404_v46 }
 0x14c   :  { %4235 = vst.msk [vmem:[%s7309_s4 + $0xf8] sm:$0xf] %vm4172_vm3, %v5010_v43  ;;  %v5008_v51 = vpack.c.bf16 %v2952_v49, %v2952_v49  ;;  %v3080_v52 = vsel %vm2568_vm8, %v2109_v39, %v2824_v45  ;;  %vm2571_vm10 = vcmp.gt.f32.partialorder %v5532_v47, 0.0  ;;  %v2827_v53 = vmul.f32 0.2, %v5532_v47  ;;  %v1600_v54 = vpop.f32.mrf.mxu0  ;;  %v2112_v55 = vpop.f32.mrf.mxu1 }
 0x14d   :  { %4363 = vst.msk [vmem:[%s7309_s4 + $0x2f8] sm:$0xf] %vm4172_vm3, %v5138_v48  ;;  %v5136_v56 = vpack.c.bf16 %v3080_v52, %v3080_v52  ;;  %v2955_v57 = vsel %vm2443_vm9, %v5404_v46, %v2699_v50  ;;  %vm2441_vm11 = vcmp.gt.f32.partialorder %v1600_v54, 0.0  ;;  %v2697_v58 = vmul.f32 0.2, %v1600_v54 }
 0x14e   :  { %4233 = vst.msk [vmem:[%s7309_s4 + $0xf0] sm:$0xf] %vm4172_vm3, %v5008_v51  ;;  %v5011_v59 = vpack.c.bf16 %v2955_v57, %v2955_v57  ;;  %v3083_v60 = vsel %vm2571_vm10, %v5532_v47, %v2827_v53  ;;  %vm2569_vm12 = vcmp.gt.f32.partialorder %v2112_v55, 0.0  ;;  %v2825_v61 = vmul.f32 0.2, %v2112_v55  ;;  %v5407_v62 = vpop.f32.mrf.mxu0  ;;  %v5535_v63 = vpop.f32.mrf.mxu1 }
 0x14f   :  { %4361 = vst.msk [vmem:[%s7309_s4 + $0x2f0] sm:$0xf] %vm4172_vm3, %v5136_v56  ;;  %v5139_v0 = vpack.c.bf16 %v3083_v60, %v3083_v60  ;;  %v2953_v1 = vsel %vm2441_vm11, %v1600_v54, %v2697_v58  ;;  %vm2446_vm13 = vcmp.gt.f32.partialorder %v5407_v62, 0.0  ;;  %v2702_v2 = vmul.f32 0.2, %v5407_v62 }
 0x150   :  { %4236 = vst.msk [vmem:[%s7309_s4 + $0xfc] sm:$0xf] %vm4172_vm3, %v5011_v59  ;;  %v5009_v3 = vpack.c.bf16 %v2953_v1, %v2953_v1  ;;  %v3081_v4 = vsel %vm2569_vm12, %v2112_v55, %v2825_v61  ;;  %vm2574_vm14 = vcmp.gt.f32.partialorder %v5535_v63, 0.0  ;;  %v2830_v5 = vmul.f32 0.2, %v5535_v63  ;;  %v1613_v6 = vpop.f32.mrf.mxu0  ;;  %v2125_v7 = vpop.f32.mrf.mxu1 }
 0x151   :  { %4364 = vst.msk [vmem:[%s7309_s4 + $0x2fc] sm:$0xf] %vm4172_vm3, %v5139_v0  ;;  %v5137_v8 = vpack.c.bf16 %v3081_v4, %v3081_v4  ;;  %v2958_v9 = vsel %vm2446_vm13, %v5407_v62, %v2702_v2  ;;  %vm2444_vm15 = vcmp.gt.f32.partialorder %v1613_v6, 0.0  ;;  %v2700_v10 = vmul.f32 0.2, %v1613_v6 }
 0x152   :  { %4234 = vst.msk [vmem:[%s7309_s4 + $0xf4] sm:$0xf] %vm4172_vm3, %v5009_v3  ;;  %v5014_v11 = vpack.c.bf16 %v2958_v9, %v2958_v9  ;;  %v3086_v12 = vsel %vm2574_vm14, %v5535_v63, %v2830_v5  ;;  %vm2572_vm1 = vcmp.gt.f32.partialorder %v2125_v7, 0.0  ;;  %v2828_v13 = vmul.f32 0.2, %v2125_v7  ;;  %v5408_v14 = vpop.f32.mrf.mxu0  ;;  %v5536_v15 = vpop.f32.mrf.mxu1 }
 0x153   :  { %4362 = vst.msk [vmem:[%s7309_s4 + $0x2f4] sm:$0xf] %vm4172_vm3, %v5137_v8  ;;  %v5142_v16 = vpack.c.bf16 %v3086_v12, %v3086_v12  ;;  %v2956_v17 = vsel %vm2444_vm15, %v1613_v6, %v2700_v10  ;;  %vm2447_vm2 = vcmp.gt.f32.partialorder %v5408_v14, 0.0  ;;  %v2703_v18 = vmul.f32 0.2, %v5408_v14 }
 0x154   :  { %4239 = vst.msk [vmem:[%s7309_s4 + $0x108] sm:$0xf] %vm4172_vm3, %v5014_v11  ;;  %v5012_v19 = vpack.c.bf16 %v2956_v17, %v2956_v17  ;;  %v3084_v20 = vsel %vm2572_vm1, %v2125_v7, %v2828_v13  ;;  %vm2575_vm0 = vcmp.gt.f32.partialorder %v5536_v15, 0.0  ;;  %v2831_v21 = vmul.f32 0.2, %v5536_v15  ;;  %v1616_v22 = vpop.f32.mrf.mxu0  ;;  %v2128_v23 = vpop.f32.mrf.mxu1 }
 0x155   :  { %4367 = vst.msk [vmem:[%s7309_s4 + $0x308] sm:$0xf] %vm4172_vm3, %v5142_v16  ;;  %v5140_v24 = vpack.c.bf16 %v3084_v20, %v3084_v20  ;;  %v2959_v25 = vsel %vm2447_vm2, %v5408_v14, %v2703_v18  ;;  %vm2445_vm4 = vcmp.gt.f32.partialorder %v1616_v22, 0.0  ;;  %v2701_v26 = vmul.f32 0.2, %v1616_v22 }
 0x156   :  { %4237 = vst.msk [vmem:[%s7309_s4 + $0x100] sm:$0xf] %vm4172_vm3, %v5012_v19  ;;  %v5015_v27 = vpack.c.bf16 %v2959_v25, %v2959_v25  ;;  %v3087_v28 = vsel %vm2575_vm0, %v5536_v15, %v2831_v21  ;;  %vm2573_vm5 = vcmp.gt.f32.partialorder %v2128_v23, 0.0  ;;  %v2829_v29 = vmul.f32 0.2, %v2128_v23  ;;  %v5411_v30 = vpop.f32.mrf.mxu0  ;;  %v5539_v31 = vpop.f32.mrf.mxu1 }
 0x157   :  { %4365 = vst.msk [vmem:[%s7309_s4 + $0x300] sm:$0xf] %vm4172_vm3, %v5140_v24  ;;  %v5143_v32 = vpack.c.bf16 %v3087_v28, %v3087_v28  ;;  %v2957_v33 = vsel %vm2445_vm4, %v1616_v22, %v2701_v26  ;;  %vm2450_vm6 = vcmp.gt.f32.partialorder %v5411_v30, 0.0  ;;  %v2706_v34 = vmul.f32 0.2, %v5411_v30 }
 0x158   :  { %4240 = vst.msk [vmem:[%s7309_s4 + $0x10c] sm:$0xf] %vm4172_vm3, %v5015_v27  ;;  %v5013_v35 = vpack.c.bf16 %v2957_v33, %v2957_v33  ;;  %v3085_v36 = vsel %vm2573_vm5, %v2128_v23, %v2829_v29  ;;  %vm2578_vm7 = vcmp.gt.f32.partialorder %v5539_v31, 0.0  ;;  %v2834_v37 = vmul.f32 0.2, %v5539_v31  ;;  %v1629_v38 = vpop.f32.mrf.mxu0  ;;  %v2141_v39 = vpop.f32.mrf.mxu1 }
 0x159   :  { %4368 = vst.msk [vmem:[%s7309_s4 + $0x30c] sm:$0xf] %vm4172_vm3, %v5143_v32  ;;  %v5141_v40 = vpack.c.bf16 %v3085_v36, %v3085_v36  ;;  %v2962_v41 = vsel %vm2450_vm6, %v5411_v30, %v2706_v34  ;;  %vm2448_vm8 = vcmp.gt.f32.partialorder %v1629_v38, 0.0  ;;  %v2704_v42 = vmul.f32 0.2, %v1629_v38 }
 0x15a   :  { %4238 = vst.msk [vmem:[%s7309_s4 + $0x104] sm:$0xf] %vm4172_vm3, %v5013_v35  ;;  %v5018_v43 = vpack.c.bf16 %v2962_v41, %v2962_v41  ;;  %v3090_v44 = vsel %vm2578_vm7, %v5539_v31, %v2834_v37  ;;  %vm2576_vm9 = vcmp.gt.f32.partialorder %v2141_v39, 0.0  ;;  %v2832_v45 = vmul.f32 0.2, %v2141_v39  ;;  %v5412_v46 = vpop.f32.mrf.mxu0  ;;  %v5540_v47 = vpop.f32.mrf.mxu1 }
 0x15b   :  { %4366 = vst.msk [vmem:[%s7309_s4 + $0x304] sm:$0xf] %vm4172_vm3, %v5141_v40  ;;  %v5146_v48 = vpack.c.bf16 %v3090_v44, %v3090_v44  ;;  %v2960_v49 = vsel %vm2448_vm8, %v1629_v38, %v2704_v42  ;;  %vm2451_vm10 = vcmp.gt.f32.partialorder %v5412_v46, 0.0  ;;  %v2707_v50 = vmul.f32 0.2, %v5412_v46 }
 0x15c   :  { %4243 = vst.msk [vmem:[%s7309_s4 + $0x118] sm:$0xf] %vm4172_vm3, %v5018_v43  ;;  %v5016_v51 = vpack.c.bf16 %v2960_v49, %v2960_v49  ;;  %v3088_v52 = vsel %vm2576_vm9, %v2141_v39, %v2832_v45  ;;  %vm2579_vm11 = vcmp.gt.f32.partialorder %v5540_v47, 0.0  ;;  %v2835_v53 = vmul.f32 0.2, %v5540_v47  ;;  %v1632_v54 = vpop.f32.mrf.mxu0  ;;  %v2144_v55 = vpop.f32.mrf.mxu1 }
 0x15d   :  { %4371 = vst.msk [vmem:[%s7309_s4 + $0x318] sm:$0xf] %vm4172_vm3, %v5146_v48  ;;  %v5144_v56 = vpack.c.bf16 %v3088_v52, %v3088_v52  ;;  %v2963_v57 = vsel %vm2451_vm10, %v5412_v46, %v2707_v50  ;;  %vm2449_vm12 = vcmp.gt.f32.partialorder %v1632_v54, 0.0  ;;  %v2705_v58 = vmul.f32 0.2, %v1632_v54 }
 0x15e   :  { %4241 = vst.msk [vmem:[%s7309_s4 + $0x110] sm:$0xf] %vm4172_vm3, %v5016_v51  ;;  %v5019_v59 = vpack.c.bf16 %v2963_v57, %v2963_v57  ;;  %v3091_v60 = vsel %vm2579_vm11, %v5540_v47, %v2835_v53  ;;  %vm2577_vm13 = vcmp.gt.f32.partialorder %v2144_v55, 0.0  ;;  %v2833_v61 = vmul.f32 0.2, %v2144_v55  ;;  %v5415_v62 = vpop.f32.mrf.mxu0  ;;  %v5543_v63 = vpop.f32.mrf.mxu1 }
 0x15f   :  { %4369 = vst.msk [vmem:[%s7309_s4 + $0x310] sm:$0xf] %vm4172_vm3, %v5144_v56  ;;  %v5147_v0 = vpack.c.bf16 %v3091_v60, %v3091_v60  ;;  %v2961_v1 = vsel %vm2449_vm12, %v1632_v54, %v2705_v58  ;;  %vm2454_vm14 = vcmp.gt.f32.partialorder %v5415_v62, 0.0  ;;  %v2710_v2 = vmul.f32 0.2, %v5415_v62 }
 0x160   :  { %4244 = vst.msk [vmem:[%s7309_s4 + $0x11c] sm:$0xf] %vm4172_vm3, %v5019_v59  ;;  %v5017_v3 = vpack.c.bf16 %v2961_v1, %v2961_v1  ;;  %v3089_v4 = vsel %vm2577_vm13, %v2144_v55, %v2833_v61  ;;  %vm2582_vm15 = vcmp.gt.f32.partialorder %v5543_v63, 0.0  ;;  %v2838_v5 = vmul.f32 0.2, %v5543_v63  ;;  %v1645_v6 = vpop.f32.mrf.mxu0  ;;  %v2157_v7 = vpop.f32.mrf.mxu1 }
 0x161   :  { %4372 = vst.msk [vmem:[%s7309_s4 + $0x31c] sm:$0xf] %vm4172_vm3, %v5147_v0  ;;  %v5145_v8 = vpack.c.bf16 %v3089_v4, %v3089_v4  ;;  %v2966_v9 = vsel %vm2454_vm14, %v5415_v62, %v2710_v2  ;;  %vm2452_vm1 = vcmp.gt.f32.partialorder %v1645_v6, 0.0  ;;  %v2708_v10 = vmul.f32 0.2, %v1645_v6 }
 0x162   :  { %4242 = vst.msk [vmem:[%s7309_s4 + $0x114] sm:$0xf] %vm4172_vm3, %v5017_v3  ;;  %v5022_v11 = vpack.c.bf16 %v2966_v9, %v2966_v9  ;;  %v3094_v12 = vsel %vm2582_vm15, %v5543_v63, %v2838_v5  ;;  %vm2580_vm2 = vcmp.gt.f32.partialorder %v2157_v7, 0.0  ;;  %v2836_v13 = vmul.f32 0.2, %v2157_v7  ;;  %v5416_v14 = vpop.f32.mrf.mxu0  ;;  %v5544_v15 = vpop.f32.mrf.mxu1 }
 0x163   :  { %4370 = vst.msk [vmem:[%s7309_s4 + $0x314] sm:$0xf] %vm4172_vm3, %v5145_v8  ;;  %v5150_v16 = vpack.c.bf16 %v3094_v12, %v3094_v12  ;;  %v2964_v17 = vsel %vm2452_vm1, %v1645_v6, %v2708_v10  ;;  %vm2455_vm0 = vcmp.gt.f32.partialorder %v5416_v14, 0.0  ;;  %v2711_v18 = vmul.f32 0.2, %v5416_v14 }
 0x164   :  { %4247 = vst.msk [vmem:[%s7309_s4 + $0x128] sm:$0xf] %vm4172_vm3, %v5022_v11  ;;  %v5020_v19 = vpack.c.bf16 %v2964_v17, %v2964_v17  ;;  %v3092_v20 = vsel %vm2580_vm2, %v2157_v7, %v2836_v13  ;;  %vm2583_vm4 = vcmp.gt.f32.partialorder %v5544_v15, 0.0  ;;  %v2839_v21 = vmul.f32 0.2, %v5544_v15  ;;  %v1648_v22 = vpop.f32.mrf.mxu0  ;;  %v2160_v23 = vpop.f32.mrf.mxu1 }
 0x165   :  { %4375 = vst.msk [vmem:[%s7309_s4 + $0x328] sm:$0xf] %vm4172_vm3, %v5150_v16  ;;  %v5148_v24 = vpack.c.bf16 %v3092_v20, %v3092_v20  ;;  %v2967_v25 = vsel %vm2455_vm0, %v5416_v14, %v2711_v18  ;;  %vm2453_vm5 = vcmp.gt.f32.partialorder %v1648_v22, 0.0  ;;  %v2709_v26 = vmul.f32 0.2, %v1648_v22 }
 0x166   :  { %4245 = vst.msk [vmem:[%s7309_s4 + $0x120] sm:$0xf] %vm4172_vm3, %v5020_v19  ;;  %v5023_v27 = vpack.c.bf16 %v2967_v25, %v2967_v25  ;;  %v3095_v28 = vsel %vm2583_vm4, %v5544_v15, %v2839_v21  ;;  %vm2581_vm6 = vcmp.gt.f32.partialorder %v2160_v23, 0.0  ;;  %v2837_v29 = vmul.f32 0.2, %v2160_v23  ;;  %v5419_v30 = vpop.f32.mrf.mxu0  ;;  %v5547_v31 = vpop.f32.mrf.mxu1 }
 0x167   :  { %4373 = vst.msk [vmem:[%s7309_s4 + $0x320] sm:$0xf] %vm4172_vm3, %v5148_v24  ;;  %v5151_v32 = vpack.c.bf16 %v3095_v28, %v3095_v28  ;;  %v2965_v33 = vsel %vm2453_vm5, %v1648_v22, %v2709_v26  ;;  %vm2458_vm7 = vcmp.gt.f32.partialorder %v5419_v30, 0.0  ;;  %v2714_v34 = vmul.f32 0.2, %v5419_v30 }
 0x168   :  { %4248 = vst.msk [vmem:[%s7309_s4 + $0x12c] sm:$0xf] %vm4172_vm3, %v5023_v27  ;;  %v5021_v35 = vpack.c.bf16 %v2965_v33, %v2965_v33  ;;  %v3093_v36 = vsel %vm2581_vm6, %v2160_v23, %v2837_v29  ;;  %vm2586_vm8 = vcmp.gt.f32.partialorder %v5547_v31, 0.0  ;;  %v2842_v37 = vmul.f32 0.2, %v5547_v31  ;;  %v1661_v38 = vpop.f32.mrf.mxu0  ;;  %v2173_v39 = vpop.f32.mrf.mxu1 }
 0x169   :  { %4376 = vst.msk [vmem:[%s7309_s4 + $0x32c] sm:$0xf] %vm4172_vm3, %v5151_v32  ;;  %v5149_v40 = vpack.c.bf16 %v3093_v36, %v3093_v36  ;;  %v2970_v41 = vsel %vm2458_vm7, %v5419_v30, %v2714_v34  ;;  %vm2456_vm9 = vcmp.gt.f32.partialorder %v1661_v38, 0.0  ;;  %v2712_v42 = vmul.f32 0.2, %v1661_v38 }
 0x16a   :  { %4246 = vst.msk [vmem:[%s7309_s4 + $0x124] sm:$0xf] %vm4172_vm3, %v5021_v35  ;;  %v5026_v43 = vpack.c.bf16 %v2970_v41, %v2970_v41  ;;  %v3098_v44 = vsel %vm2586_vm8, %v5547_v31, %v2842_v37  ;;  %vm2584_vm10 = vcmp.gt.f32.partialorder %v2173_v39, 0.0  ;;  %v2840_v45 = vmul.f32 0.2, %v2173_v39  ;;  %v5420_v46 = vpop.f32.mrf.mxu0  ;;  %v5548_v47 = vpop.f32.mrf.mxu1 }
 0x16b   :  { %4374 = vst.msk [vmem:[%s7309_s4 + $0x324] sm:$0xf] %vm4172_vm3, %v5149_v40  ;;  %v5154_v48 = vpack.c.bf16 %v3098_v44, %v3098_v44  ;;  %v2968_v49 = vsel %vm2456_vm9, %v1661_v38, %v2712_v42  ;;  %vm2459_vm11 = vcmp.gt.f32.partialorder %v5420_v46, 0.0  ;;  %v2715_v50 = vmul.f32 0.2, %v5420_v46 }
 0x16c   :  { %4251 = vst.msk [vmem:[%s7309_s4 + $0x138] sm:$0xf] %vm4172_vm3, %v5026_v43  ;;  %v5024_v51 = vpack.c.bf16 %v2968_v49, %v2968_v49  ;;  %v3096_v52 = vsel %vm2584_vm10, %v2173_v39, %v2840_v45  ;;  %vm2587_vm12 = vcmp.gt.f32.partialorder %v5548_v47, 0.0  ;;  %v2843_v53 = vmul.f32 0.2, %v5548_v47  ;;  %v1664_v54 = vpop.f32.mrf.mxu0  ;;  %v2176_v55 = vpop.f32.mrf.mxu1 }
 0x16d   :  { %4379 = vst.msk [vmem:[%s7309_s4 + $0x338] sm:$0xf] %vm4172_vm3, %v5154_v48  ;;  %v5152_v56 = vpack.c.bf16 %v3096_v52, %v3096_v52  ;;  %v2971_v57 = vsel %vm2459_vm11, %v5420_v46, %v2715_v50  ;;  %vm2457_vm13 = vcmp.gt.f32.partialorder %v1664_v54, 0.0  ;;  %v2713_v58 = vmul.f32 0.2, %v1664_v54 }
 0x16e   :  { %4249 = vst.msk [vmem:[%s7309_s4 + $0x130] sm:$0xf] %vm4172_vm3, %v5024_v51  ;;  %v5027_v59 = vpack.c.bf16 %v2971_v57, %v2971_v57  ;;  %v3099_v60 = vsel %vm2587_vm12, %v5548_v47, %v2843_v53  ;;  %vm2585_vm14 = vcmp.gt.f32.partialorder %v2176_v55, 0.0  ;;  %v2841_v61 = vmul.f32 0.2, %v2176_v55  ;;  %v5423_v62 = vpop.f32.mrf.mxu0  ;;  %v5551_v63 = vpop.f32.mrf.mxu1 }
 0x16f   :  { %4377 = vst.msk [vmem:[%s7309_s4 + $0x330] sm:$0xf] %vm4172_vm3, %v5152_v56  ;;  %v5155_v0 = vpack.c.bf16 %v3099_v60, %v3099_v60  ;;  %v2969_v1 = vsel %vm2457_vm13, %v1664_v54, %v2713_v58  ;;  %vm2462_vm15 = vcmp.gt.f32.partialorder %v5423_v62, 0.0  ;;  %v2718_v2 = vmul.f32 0.2, %v5423_v62 }
 0x170   :  { %4252 = vst.msk [vmem:[%s7309_s4 + $0x13c] sm:$0xf] %vm4172_vm3, %v5027_v59  ;;  %v5025_v3 = vpack.c.bf16 %v2969_v1, %v2969_v1  ;;  %v3097_v4 = vsel %vm2585_vm14, %v2176_v55, %v2841_v61  ;;  %vm2590_vm1 = vcmp.gt.f32.partialorder %v5551_v63, 0.0  ;;  %v2846_v5 = vmul.f32 0.2, %v5551_v63  ;;  %v1677_v6 = vpop.f32.mrf.mxu0  ;;  %v2189_v7 = vpop.f32.mrf.mxu1 }
 0x171   :  { %4380 = vst.msk [vmem:[%s7309_s4 + $0x33c] sm:$0xf] %vm4172_vm3, %v5155_v0  ;;  %v5153_v8 = vpack.c.bf16 %v3097_v4, %v3097_v4  ;;  %v2974_v9 = vsel %vm2462_vm15, %v5423_v62, %v2718_v2  ;;  %vm2460_vm2 = vcmp.gt.f32.partialorder %v1677_v6, 0.0  ;;  %v2716_v10 = vmul.f32 0.2, %v1677_v6 }
 0x172   :  { %4250 = vst.msk [vmem:[%s7309_s4 + $0x134] sm:$0xf] %vm4172_vm3, %v5025_v3  ;;  %v5030_v11 = vpack.c.bf16 %v2974_v9, %v2974_v9  ;;  %v3102_v12 = vsel %vm2590_vm1, %v5551_v63, %v2846_v5  ;;  %vm2588_vm0 = vcmp.gt.f32.partialorder %v2189_v7, 0.0  ;;  %v2844_v13 = vmul.f32 0.2, %v2189_v7  ;;  %v5424_v14 = vpop.f32.mrf.mxu0  ;;  %v5552_v15 = vpop.f32.mrf.mxu1 }
 0x173   :  { %4378 = vst.msk [vmem:[%s7309_s4 + $0x334] sm:$0xf] %vm4172_vm3, %v5153_v8  ;;  %v5158_v16 = vpack.c.bf16 %v3102_v12, %v3102_v12  ;;  %v2972_v17 = vsel %vm2460_vm2, %v1677_v6, %v2716_v10  ;;  %vm2463_vm4 = vcmp.gt.f32.partialorder %v5424_v14, 0.0  ;;  %v2719_v18 = vmul.f32 0.2, %v5424_v14 }
 0x174   :  { %4255 = vst.msk [vmem:[%s7309_s4 + $0x148] sm:$0xf] %vm4172_vm3, %v5030_v11  ;;  %v5028_v19 = vpack.c.bf16 %v2972_v17, %v2972_v17  ;;  %v3100_v20 = vsel %vm2588_vm0, %v2189_v7, %v2844_v13  ;;  %vm2591_vm5 = vcmp.gt.f32.partialorder %v5552_v15, 0.0  ;;  %v2847_v21 = vmul.f32 0.2, %v5552_v15  ;;  %v1680_v22 = vpop.f32.mrf.mxu0  ;;  %v2192_v23 = vpop.f32.mrf.mxu1 }
 0x175   :  { %4383 = vst.msk [vmem:[%s7309_s4 + $0x348] sm:$0xf] %vm4172_vm3, %v5158_v16  ;;  %v5156_v24 = vpack.c.bf16 %v3100_v20, %v3100_v20  ;;  %v2975_v25 = vsel %vm2463_vm4, %v5424_v14, %v2719_v18  ;;  %vm2461_vm6 = vcmp.gt.f32.partialorder %v1680_v22, 0.0  ;;  %v2717_v26 = vmul.f32 0.2, %v1680_v22 }
 0x176   :  { %4253 = vst.msk [vmem:[%s7309_s4 + $0x140] sm:$0xf] %vm4172_vm3, %v5028_v19  ;;  %v5031_v27 = vpack.c.bf16 %v2975_v25, %v2975_v25  ;;  %v3103_v28 = vsel %vm2591_vm5, %v5552_v15, %v2847_v21  ;;  %vm2589_vm7 = vcmp.gt.f32.partialorder %v2192_v23, 0.0  ;;  %v2845_v29 = vmul.f32 0.2, %v2192_v23  ;;  %v5427_v30 = vpop.f32.mrf.mxu0  ;;  %v5555_v31 = vpop.f32.mrf.mxu1 }
 0x177   :  { %4381 = vst.msk [vmem:[%s7309_s4 + $0x340] sm:$0xf] %vm4172_vm3, %v5156_v24  ;;  %v5159_v32 = vpack.c.bf16 %v3103_v28, %v3103_v28  ;;  %v2973_v33 = vsel %vm2461_vm6, %v1680_v22, %v2717_v26  ;;  %vm2466_vm8 = vcmp.gt.f32.partialorder %v5427_v30, 0.0  ;;  %v2722_v34 = vmul.f32 0.2, %v5427_v30 }
 0x178   :  { %4256 = vst.msk [vmem:[%s7309_s4 + $0x14c] sm:$0xf] %vm4172_vm3, %v5031_v27  ;;  %v5029_v35 = vpack.c.bf16 %v2973_v33, %v2973_v33  ;;  %v3101_v36 = vsel %vm2589_vm7, %v2192_v23, %v2845_v29  ;;  %vm2594_vm9 = vcmp.gt.f32.partialorder %v5555_v31, 0.0  ;;  %v2850_v37 = vmul.f32 0.2, %v5555_v31  ;;  %v1693_v38 = vpop.f32.mrf.mxu0  ;;  %v2205_v39 = vpop.f32.mrf.mxu1 }
 0x179   :  { %4384 = vst.msk [vmem:[%s7309_s4 + $0x34c] sm:$0xf] %vm4172_vm3, %v5159_v32  ;;  %v5157_v40 = vpack.c.bf16 %v3101_v36, %v3101_v36  ;;  %v2978_v41 = vsel %vm2466_vm8, %v5427_v30, %v2722_v34  ;;  %vm2464_vm10 = vcmp.gt.f32.partialorder %v1693_v38, 0.0  ;;  %v2720_v42 = vmul.f32 0.2, %v1693_v38 }
 0x17a   :  { %4254 = vst.msk [vmem:[%s7309_s4 + $0x144] sm:$0xf] %vm4172_vm3, %v5029_v35  ;;  %v5034_v43 = vpack.c.bf16 %v2978_v41, %v2978_v41  ;;  %v3106_v44 = vsel %vm2594_vm9, %v5555_v31, %v2850_v37  ;;  %vm2592_vm11 = vcmp.gt.f32.partialorder %v2205_v39, 0.0  ;;  %v2848_v45 = vmul.f32 0.2, %v2205_v39  ;;  %v5428_v46 = vpop.f32.mrf.mxu0  ;;  %v5556_v47 = vpop.f32.mrf.mxu1 }
 0x17b   :  { %4382 = vst.msk [vmem:[%s7309_s4 + $0x344] sm:$0xf] %vm4172_vm3, %v5157_v40  ;;  %v5162_v48 = vpack.c.bf16 %v3106_v44, %v3106_v44  ;;  %v2976_v49 = vsel %vm2464_vm10, %v1693_v38, %v2720_v42  ;;  %vm2467_vm12 = vcmp.gt.f32.partialorder %v5428_v46, 0.0  ;;  %v2723_v50 = vmul.f32 0.2, %v5428_v46 }
 0x17c   :  { %4259 = vst.msk [vmem:[%s7309_s4 + $0x158] sm:$0xf] %vm4172_vm3, %v5034_v43  ;;  %v5032_v51 = vpack.c.bf16 %v2976_v49, %v2976_v49  ;;  %v3104_v52 = vsel %vm2592_vm11, %v2205_v39, %v2848_v45  ;;  %vm2595_vm13 = vcmp.gt.f32.partialorder %v5556_v47, 0.0  ;;  %v2851_v53 = vmul.f32 0.2, %v5556_v47  ;;  %v1696_v54 = vpop.f32.mrf.mxu0  ;;  %v2208_v55 = vpop.f32.mrf.mxu1 }
 0x17d   :  { %4387 = vst.msk [vmem:[%s7309_s4 + $0x358] sm:$0xf] %vm4172_vm3, %v5162_v48  ;;  %v5160_v56 = vpack.c.bf16 %v3104_v52, %v3104_v52  ;;  %v2979_v57 = vsel %vm2467_vm12, %v5428_v46, %v2723_v50  ;;  %vm2465_vm14 = vcmp.gt.f32.partialorder %v1696_v54, 0.0  ;;  %v2721_v58 = vmul.f32 0.2, %v1696_v54 }
 0x17e   :  { %4257 = vst.msk [vmem:[%s7309_s4 + $0x150] sm:$0xf] %vm4172_vm3, %v5032_v51  ;;  %v5035_v59 = vpack.c.bf16 %v2979_v57, %v2979_v57  ;;  %v3107_v60 = vsel %vm2595_vm13, %v5556_v47, %v2851_v53  ;;  %vm2593_vm15 = vcmp.gt.f32.partialorder %v2208_v55, 0.0  ;;  %v2849_v61 = vmul.f32 0.2, %v2208_v55  ;;  %v5431_v62 = vpop.f32.mrf.mxu0  ;;  %v5559_v63 = vpop.f32.mrf.mxu1 }
 0x17f   :  { %4385 = vst.msk [vmem:[%s7309_s4 + $0x350] sm:$0xf] %vm4172_vm3, %v5160_v56  ;;  %v5163_v0 = vpack.c.bf16 %v3107_v60, %v3107_v60  ;;  %v2977_v1 = vsel %vm2465_vm14, %v1696_v54, %v2721_v58  ;;  %vm2470_vm1 = vcmp.gt.f32.partialorder %v5431_v62, 0.0  ;;  %v2726_v2 = vmul.f32 0.2, %v5431_v62 }
 0x180   :  { %4260 = vst.msk [vmem:[%s7309_s4 + $0x15c] sm:$0xf] %vm4172_vm3, %v5035_v59  ;;  %v5033_v3 = vpack.c.bf16 %v2977_v1, %v2977_v1  ;;  %v3105_v4 = vsel %vm2593_vm15, %v2208_v55, %v2849_v61  ;;  %vm2598_vm2 = vcmp.gt.f32.partialorder %v5559_v63, 0.0  ;;  %v2854_v5 = vmul.f32 0.2, %v5559_v63  ;;  %v1709_v6 = vpop.f32.mrf.mxu0  ;;  %v2221_v7 = vpop.f32.mrf.mxu1 }
 0x181   :  { %4388 = vst.msk [vmem:[%s7309_s4 + $0x35c] sm:$0xf] %vm4172_vm3, %v5163_v0  ;;  %v5161_v8 = vpack.c.bf16 %v3105_v4, %v3105_v4  ;;  %v2982_v9 = vsel %vm2470_vm1, %v5431_v62, %v2726_v2  ;;  %vm2468_vm0 = vcmp.gt.f32.partialorder %v1709_v6, 0.0  ;;  %v2724_v10 = vmul.f32 0.2, %v1709_v6 }
 0x182   :  { %4258 = vst.msk [vmem:[%s7309_s4 + $0x154] sm:$0xf] %vm4172_vm3, %v5033_v3  ;;  %v5038_v11 = vpack.c.bf16 %v2982_v9, %v2982_v9  ;;  %v3110_v12 = vsel %vm2598_vm2, %v5559_v63, %v2854_v5  ;;  %vm2596_vm4 = vcmp.gt.f32.partialorder %v2221_v7, 0.0  ;;  %v2852_v13 = vmul.f32 0.2, %v2221_v7  ;;  %v5432_v14 = vpop.f32.mrf.mxu0  ;;  %v5560_v15 = vpop.f32.mrf.mxu1 }
 0x183   :  { %4386 = vst.msk [vmem:[%s7309_s4 + $0x354] sm:$0xf] %vm4172_vm3, %v5161_v8  ;;  %v5166_v16 = vpack.c.bf16 %v3110_v12, %v3110_v12  ;;  %v2980_v17 = vsel %vm2468_vm0, %v1709_v6, %v2724_v10  ;;  %vm2471_vm5 = vcmp.gt.f32.partialorder %v5432_v14, 0.0  ;;  %v2727_v18 = vmul.f32 0.2, %v5432_v14 }
 0x184   :  { %4263 = vst.msk [vmem:[%s7309_s4 + $0x168] sm:$0xf] %vm4172_vm3, %v5038_v11  ;;  %v5036_v19 = vpack.c.bf16 %v2980_v17, %v2980_v17  ;;  %v3108_v20 = vsel %vm2596_vm4, %v2221_v7, %v2852_v13  ;;  %vm2599_vm6 = vcmp.gt.f32.partialorder %v5560_v15, 0.0  ;;  %v2855_v21 = vmul.f32 0.2, %v5560_v15  ;;  %v1712_v22 = vpop.f32.mrf.mxu0  ;;  %v2224_v23 = vpop.f32.mrf.mxu1 }
 0x185   :  { %4391 = vst.msk [vmem:[%s7309_s4 + $0x368] sm:$0xf] %vm4172_vm3, %v5166_v16  ;;  %v5164_v24 = vpack.c.bf16 %v3108_v20, %v3108_v20  ;;  %v2983_v25 = vsel %vm2471_vm5, %v5432_v14, %v2727_v18  ;;  %vm2469_vm7 = vcmp.gt.f32.partialorder %v1712_v22, 0.0  ;;  %v2725_v26 = vmul.f32 0.2, %v1712_v22 }
 0x186   :  { %4261 = vst.msk [vmem:[%s7309_s4 + $0x160] sm:$0xf] %vm4172_vm3, %v5036_v19  ;;  %v5039_v27 = vpack.c.bf16 %v2983_v25, %v2983_v25  ;;  %v3111_v28 = vsel %vm2599_vm6, %v5560_v15, %v2855_v21  ;;  %vm2597_vm8 = vcmp.gt.f32.partialorder %v2224_v23, 0.0  ;;  %v2853_v29 = vmul.f32 0.2, %v2224_v23  ;;  %v5435_v30 = vpop.f32.mrf.mxu0  ;;  %v5563_v31 = vpop.f32.mrf.mxu1 }
 0x187   :  { %4389 = vst.msk [vmem:[%s7309_s4 + $0x360] sm:$0xf] %vm4172_vm3, %v5164_v24  ;;  %v5167_v32 = vpack.c.bf16 %v3111_v28, %v3111_v28  ;;  %v2981_v33 = vsel %vm2469_vm7, %v1712_v22, %v2725_v26  ;;  %vm2474_vm9 = vcmp.gt.f32.partialorder %v5435_v30, 0.0  ;;  %v2730_v34 = vmul.f32 0.2, %v5435_v30 }
 0x188   :  { %4264 = vst.msk [vmem:[%s7309_s4 + $0x16c] sm:$0xf] %vm4172_vm3, %v5039_v27  ;;  %v5037_v35 = vpack.c.bf16 %v2981_v33, %v2981_v33  ;;  %v3109_v36 = vsel %vm2597_vm8, %v2224_v23, %v2853_v29  ;;  %vm2602_vm10 = vcmp.gt.f32.partialorder %v5563_v31, 0.0  ;;  %v2858_v37 = vmul.f32 0.2, %v5563_v31  ;;  %v1725_v38 = vpop.f32.mrf.mxu0  ;;  %v2237_v39 = vpop.f32.mrf.mxu1 }
 0x189   :  { %4392 = vst.msk [vmem:[%s7309_s4 + $0x36c] sm:$0xf] %vm4172_vm3, %v5167_v32  ;;  %v5165_v40 = vpack.c.bf16 %v3109_v36, %v3109_v36  ;;  %v2986_v41 = vsel %vm2474_vm9, %v5435_v30, %v2730_v34  ;;  %vm2472_vm11 = vcmp.gt.f32.partialorder %v1725_v38, 0.0  ;;  %v2728_v42 = vmul.f32 0.2, %v1725_v38 }
 0x18a   :  { %4262 = vst.msk [vmem:[%s7309_s4 + $0x164] sm:$0xf] %vm4172_vm3, %v5037_v35  ;;  %v5042_v43 = vpack.c.bf16 %v2986_v41, %v2986_v41  ;;  %v3114_v44 = vsel %vm2602_vm10, %v5563_v31, %v2858_v37  ;;  %vm2600_vm12 = vcmp.gt.f32.partialorder %v2237_v39, 0.0  ;;  %v2856_v45 = vmul.f32 0.2, %v2237_v39  ;;  %v5436_v46 = vpop.f32.mrf.mxu0  ;;  %v5564_v47 = vpop.f32.mrf.mxu1 }
 0x18b   :  { %4390 = vst.msk [vmem:[%s7309_s4 + $0x364] sm:$0xf] %vm4172_vm3, %v5165_v40  ;;  %v5170_v48 = vpack.c.bf16 %v3114_v44, %v3114_v44  ;;  %v2984_v49 = vsel %vm2472_vm11, %v1725_v38, %v2728_v42  ;;  %vm2475_vm13 = vcmp.gt.f32.partialorder %v5436_v46, 0.0  ;;  %v2731_v50 = vmul.f32 0.2, %v5436_v46 }
 0x18c   :  { %4267 = vst.msk [vmem:[%s7309_s4 + $0x178] sm:$0xf] %vm4172_vm3, %v5042_v43  ;;  %v5040_v51 = vpack.c.bf16 %v2984_v49, %v2984_v49  ;;  %v3112_v52 = vsel %vm2600_vm12, %v2237_v39, %v2856_v45  ;;  %vm2603_vm14 = vcmp.gt.f32.partialorder %v5564_v47, 0.0  ;;  %v2859_v53 = vmul.f32 0.2, %v5564_v47  ;;  %v1728_v54 = vpop.f32.mrf.mxu0  ;;  %v2240_v55 = vpop.f32.mrf.mxu1 }
 0x18d   :  { %4395 = vst.msk [vmem:[%s7309_s4 + $0x378] sm:$0xf] %vm4172_vm3, %v5170_v48  ;;  %v5168_v56 = vpack.c.bf16 %v3112_v52, %v3112_v52  ;;  %v2987_v57 = vsel %vm2475_vm13, %v5436_v46, %v2731_v50  ;;  %vm2473_vm15 = vcmp.gt.f32.partialorder %v1728_v54, 0.0  ;;  %v2729_v58 = vmul.f32 0.2, %v1728_v54 }
 0x18e   :  { %4265 = vst.msk [vmem:[%s7309_s4 + $0x170] sm:$0xf] %vm4172_vm3, %v5040_v51  ;;  %v5043_v59 = vpack.c.bf16 %v2987_v57, %v2987_v57  ;;  %v3115_v60 = vsel %vm2603_vm14, %v5564_v47, %v2859_v53  ;;  %vm2601_vm1 = vcmp.gt.f32.partialorder %v2240_v55, 0.0  ;;  %v2857_v61 = vmul.f32 0.2, %v2240_v55  ;;  %v5439_v62 = vpop.f32.mrf.mxu0  ;;  %v5567_v63 = vpop.f32.mrf.mxu1 }
 0x18f   :  { %4393 = vst.msk [vmem:[%s7309_s4 + $0x370] sm:$0xf] %vm4172_vm3, %v5168_v56  ;;  %v5171_v0 = vpack.c.bf16 %v3115_v60, %v3115_v60  ;;  %v2985_v1 = vsel %vm2473_vm15, %v1728_v54, %v2729_v58  ;;  %vm2478_vm2 = vcmp.gt.f32.partialorder %v5439_v62, 0.0  ;;  %v2734_v2 = vmul.f32 0.2, %v5439_v62 }
 0x190   :  { %4268 = vst.msk [vmem:[%s7309_s4 + $0x17c] sm:$0xf] %vm4172_vm3, %v5043_v59  ;;  %v5041_v3 = vpack.c.bf16 %v2985_v1, %v2985_v1  ;;  %v3113_v4 = vsel %vm2601_vm1, %v2240_v55, %v2857_v61  ;;  %vm2606_vm0 = vcmp.gt.f32.partialorder %v5567_v63, 0.0  ;;  %v2862_v5 = vmul.f32 0.2, %v5567_v63  ;;  %v1741_v6 = vpop.f32.mrf.mxu0  ;;  %v2253_v7 = vpop.f32.mrf.mxu1 }
 0x191   :  { %4396 = vst.msk [vmem:[%s7309_s4 + $0x37c] sm:$0xf] %vm4172_vm3, %v5171_v0  ;;  %v5169_v8 = vpack.c.bf16 %v3113_v4, %v3113_v4  ;;  %v2990_v9 = vsel %vm2478_vm2, %v5439_v62, %v2734_v2  ;;  %vm2476_vm4 = vcmp.gt.f32.partialorder %v1741_v6, 0.0  ;;  %v2732_v10 = vmul.f32 0.2, %v1741_v6 }
 0x192   :  { %4266 = vst.msk [vmem:[%s7309_s4 + $0x174] sm:$0xf] %vm4172_vm3, %v5041_v3  ;;  %v5046_v11 = vpack.c.bf16 %v2990_v9, %v2990_v9  ;;  %v3118_v12 = vsel %vm2606_vm0, %v5567_v63, %v2862_v5  ;;  %vm2604_vm5 = vcmp.gt.f32.partialorder %v2253_v7, 0.0  ;;  %v2860_v13 = vmul.f32 0.2, %v2253_v7  ;;  %v5440_v14 = vpop.f32.mrf.mxu0  ;;  %v5568_v15 = vpop.f32.mrf.mxu1 }
 0x193   :  { %4394 = vst.msk [vmem:[%s7309_s4 + $0x374] sm:$0xf] %vm4172_vm3, %v5169_v8  ;;  %v5174_v16 = vpack.c.bf16 %v3118_v12, %v3118_v12  ;;  %v2988_v17 = vsel %vm2476_vm4, %v1741_v6, %v2732_v10  ;;  %vm2479_vm6 = vcmp.gt.f32.partialorder %v5440_v14, 0.0  ;;  %v2735_v18 = vmul.f32 0.2, %v5440_v14 }
 0x194   :  { %4271 = vst.msk [vmem:[%s7309_s4 + $0x188] sm:$0xf] %vm4172_vm3, %v5046_v11  ;;  %v5044_v19 = vpack.c.bf16 %v2988_v17, %v2988_v17  ;;  %v3116_v20 = vsel %vm2604_vm5, %v2253_v7, %v2860_v13  ;;  %vm2607_vm7 = vcmp.gt.f32.partialorder %v5568_v15, 0.0  ;;  %v2863_v21 = vmul.f32 0.2, %v5568_v15  ;;  %v1744_v22 = vpop.f32.mrf.mxu0  ;;  %v2256_v23 = vpop.f32.mrf.mxu1 }
 0x195   :  { %4399 = vst.msk [vmem:[%s7309_s4 + $0x388] sm:$0xf] %vm4172_vm3, %v5174_v16  ;;  %v5172_v24 = vpack.c.bf16 %v3116_v20, %v3116_v20  ;;  %v2991_v25 = vsel %vm2479_vm6, %v5440_v14, %v2735_v18  ;;  %vm2477_vm8 = vcmp.gt.f32.partialorder %v1744_v22, 0.0  ;;  %v2733_v26 = vmul.f32 0.2, %v1744_v22 }
 0x196   :  { %4269 = vst.msk [vmem:[%s7309_s4 + $0x180] sm:$0xf] %vm4172_vm3, %v5044_v19  ;;  %v5047_v27 = vpack.c.bf16 %v2991_v25, %v2991_v25  ;;  %v3119_v28 = vsel %vm2607_vm7, %v5568_v15, %v2863_v21  ;;  %vm2605_vm9 = vcmp.gt.f32.partialorder %v2256_v23, 0.0  ;;  %v2861_v29 = vmul.f32 0.2, %v2256_v23  ;;  %v5443_v30 = vpop.f32.mrf.mxu0  ;;  %v5571_v31 = vpop.f32.mrf.mxu1 }
 0x197   :  { %4397 = vst.msk [vmem:[%s7309_s4 + $0x380] sm:$0xf] %vm4172_vm3, %v5172_v24  ;;  %v5175_v32 = vpack.c.bf16 %v3119_v28, %v3119_v28  ;;  %v2989_v33 = vsel %vm2477_vm8, %v1744_v22, %v2733_v26  ;;  %vm2482_vm10 = vcmp.gt.f32.partialorder %v5443_v30, 0.0  ;;  %v2738_v34 = vmul.f32 0.2, %v5443_v30 }
 0x198   :  { %4272 = vst.msk [vmem:[%s7309_s4 + $0x18c] sm:$0xf] %vm4172_vm3, %v5047_v27  ;;  %v5045_v35 = vpack.c.bf16 %v2989_v33, %v2989_v33  ;;  %v3117_v36 = vsel %vm2605_vm9, %v2256_v23, %v2861_v29  ;;  %vm2610_vm11 = vcmp.gt.f32.partialorder %v5571_v31, 0.0  ;;  %v2866_v37 = vmul.f32 0.2, %v5571_v31  ;;  %v1757_v38 = vpop.f32.mrf.mxu0  ;;  %v2269_v39 = vpop.f32.mrf.mxu1 }
 0x199   :  { %4400 = vst.msk [vmem:[%s7309_s4 + $0x38c] sm:$0xf] %vm4172_vm3, %v5175_v32  ;;  %v5173_v40 = vpack.c.bf16 %v3117_v36, %v3117_v36  ;;  %v2994_v41 = vsel %vm2482_vm10, %v5443_v30, %v2738_v34  ;;  %vm2480_vm12 = vcmp.gt.f32.partialorder %v1757_v38, 0.0  ;;  %v2736_v42 = vmul.f32 0.2, %v1757_v38 }
 0x19a   :  { %4270 = vst.msk [vmem:[%s7309_s4 + $0x184] sm:$0xf] %vm4172_vm3, %v5045_v35  ;;  %v5050_v43 = vpack.c.bf16 %v2994_v41, %v2994_v41  ;;  %v3122_v44 = vsel %vm2610_vm11, %v5571_v31, %v2866_v37  ;;  %vm2608_vm13 = vcmp.gt.f32.partialorder %v2269_v39, 0.0  ;;  %v2864_v45 = vmul.f32 0.2, %v2269_v39  ;;  %v5444_v46 = vpop.f32.mrf.mxu0  ;;  %v5572_v47 = vpop.f32.mrf.mxu1 }
 0x19b   :  { %4398 = vst.msk [vmem:[%s7309_s4 + $0x384] sm:$0xf] %vm4172_vm3, %v5173_v40  ;;  %v5178_v48 = vpack.c.bf16 %v3122_v44, %v3122_v44  ;;  %v2992_v49 = vsel %vm2480_vm12, %v1757_v38, %v2736_v42  ;;  %vm2483_vm14 = vcmp.gt.f32.partialorder %v5444_v46, 0.0  ;;  %v2739_v50 = vmul.f32 0.2, %v5444_v46 }
 0x19c   :  { %4275 = vst.msk [vmem:[%s7309_s4 + $0x198] sm:$0xf] %vm4172_vm3, %v5050_v43  ;;  %v5048_v51 = vpack.c.bf16 %v2992_v49, %v2992_v49  ;;  %v3120_v52 = vsel %vm2608_vm13, %v2269_v39, %v2864_v45  ;;  %vm2611_vm15 = vcmp.gt.f32.partialorder %v5572_v47, 0.0  ;;  %v2867_v53 = vmul.f32 0.2, %v5572_v47  ;;  %v1760_v54 = vpop.f32.mrf.mxu0  ;;  %v2272_v55 = vpop.f32.mrf.mxu1 }
 0x19d   :  { %4403 = vst.msk [vmem:[%s7309_s4 + $0x398] sm:$0xf] %vm4172_vm3, %v5178_v48  ;;  %v5176_v56 = vpack.c.bf16 %v3120_v52, %v3120_v52  ;;  %v2995_v57 = vsel %vm2483_vm14, %v5444_v46, %v2739_v50  ;;  %vm2481_vm1 = vcmp.gt.f32.partialorder %v1760_v54, 0.0  ;;  %v2737_v58 = vmul.f32 0.2, %v1760_v54 }
 0x19e   :  { %4273 = vst.msk [vmem:[%s7309_s4 + $0x190] sm:$0xf] %vm4172_vm3, %v5048_v51  ;;  %v5051_v59 = vpack.c.bf16 %v2995_v57, %v2995_v57  ;;  %v3123_v60 = vsel %vm2611_vm15, %v5572_v47, %v2867_v53  ;;  %vm2609_vm2 = vcmp.gt.f32.partialorder %v2272_v55, 0.0  ;;  %v2865_v61 = vmul.f32 0.2, %v2272_v55  ;;  %v5447_v62 = vpop.f32.mrf.mxu0  ;;  %v5575_v63 = vpop.f32.mrf.mxu1 }
 0x19f   :  { %4401 = vst.msk [vmem:[%s7309_s4 + $0x390] sm:$0xf] %vm4172_vm3, %v5176_v56  ;;  %v5179_v0 = vpack.c.bf16 %v3123_v60, %v3123_v60  ;;  %v2993_v1 = vsel %vm2481_vm1, %v1760_v54, %v2737_v58  ;;  %vm2486_vm0 = vcmp.gt.f32.partialorder %v5447_v62, 0.0  ;;  %v2742_v2 = vmul.f32 0.2, %v5447_v62 }
 0x1a0   :  { %4276 = vst.msk [vmem:[%s7309_s4 + $0x19c] sm:$0xf] %vm4172_vm3, %v5051_v59  ;;  %v5049_v3 = vpack.c.bf16 %v2993_v1, %v2993_v1  ;;  %v3121_v4 = vsel %vm2609_vm2, %v2272_v55, %v2865_v61  ;;  %vm2614_vm4 = vcmp.gt.f32.partialorder %v5575_v63, 0.0  ;;  %v2870_v5 = vmul.f32 0.2, %v5575_v63  ;;  %v1773_v6 = vpop.f32.mrf.mxu0  ;;  %v2285_v7 = vpop.f32.mrf.mxu1 }
 0x1a1   :  { %4404 = vst.msk [vmem:[%s7309_s4 + $0x39c] sm:$0xf] %vm4172_vm3, %v5179_v0  ;;  %v5177_v8 = vpack.c.bf16 %v3121_v4, %v3121_v4  ;;  %v2998_v9 = vsel %vm2486_vm0, %v5447_v62, %v2742_v2  ;;  %vm2484_vm5 = vcmp.gt.f32.partialorder %v1773_v6, 0.0  ;;  %v2740_v10 = vmul.f32 0.2, %v1773_v6 }
 0x1a2   :  { %4274 = vst.msk [vmem:[%s7309_s4 + $0x194] sm:$0xf] %vm4172_vm3, %v5049_v3  ;;  %v5054_v11 = vpack.c.bf16 %v2998_v9, %v2998_v9  ;;  %v3126_v12 = vsel %vm2614_vm4, %v5575_v63, %v2870_v5  ;;  %vm2612_vm6 = vcmp.gt.f32.partialorder %v2285_v7, 0.0  ;;  %v2868_v13 = vmul.f32 0.2, %v2285_v7  ;;  %v5448_v14 = vpop.f32.mrf.mxu0  ;;  %v5576_v15 = vpop.f32.mrf.mxu1 }
 0x1a3   :  { %4402 = vst.msk [vmem:[%s7309_s4 + $0x394] sm:$0xf] %vm4172_vm3, %v5177_v8  ;;  %v5182_v16 = vpack.c.bf16 %v3126_v12, %v3126_v12  ;;  %v2996_v17 = vsel %vm2484_vm5, %v1773_v6, %v2740_v10  ;;  %vm2487_vm7 = vcmp.gt.f32.partialorder %v5448_v14, 0.0  ;;  %v2743_v18 = vmul.f32 0.2, %v5448_v14 }
 0x1a4   :  { %4279 = vst.msk [vmem:[%s7309_s4 + $0x1a8] sm:$0xf] %vm4172_vm3, %v5054_v11  ;;  %v5052_v19 = vpack.c.bf16 %v2996_v17, %v2996_v17  ;;  %v3124_v20 = vsel %vm2612_vm6, %v2285_v7, %v2868_v13  ;;  %vm2615_vm8 = vcmp.gt.f32.partialorder %v5576_v15, 0.0  ;;  %v2871_v21 = vmul.f32 0.2, %v5576_v15  ;;  %v1776_v22 = vpop.f32.mrf.mxu0  ;;  %v2288_v23 = vpop.f32.mrf.mxu1 }
 0x1a5   :  { %4407 = vst.msk [vmem:[%s7309_s4 + $0x3a8] sm:$0xf] %vm4172_vm3, %v5182_v16  ;;  %v5180_v24 = vpack.c.bf16 %v3124_v20, %v3124_v20  ;;  %v2999_v25 = vsel %vm2487_vm7, %v5448_v14, %v2743_v18  ;;  %vm2485_vm9 = vcmp.gt.f32.partialorder %v1776_v22, 0.0  ;;  %v2741_v26 = vmul.f32 0.2, %v1776_v22 }
 0x1a6   :  { %4277 = vst.msk [vmem:[%s7309_s4 + $0x1a0] sm:$0xf] %vm4172_vm3, %v5052_v19  ;;  %v5055_v27 = vpack.c.bf16 %v2999_v25, %v2999_v25  ;;  %v3127_v28 = vsel %vm2615_vm8, %v5576_v15, %v2871_v21  ;;  %vm2613_vm10 = vcmp.gt.f32.partialorder %v2288_v23, 0.0  ;;  %v2869_v29 = vmul.f32 0.2, %v2288_v23  ;;  %v5451_v30 = vpop.f32.mrf.mxu0  ;;  %v5579_v31 = vpop.f32.mrf.mxu1 }
 0x1a7   :  { %4405 = vst.msk [vmem:[%s7309_s4 + $0x3a0] sm:$0xf] %vm4172_vm3, %v5180_v24  ;;  %v5183_v32 = vpack.c.bf16 %v3127_v28, %v3127_v28  ;;  %v2997_v33 = vsel %vm2485_vm9, %v1776_v22, %v2741_v26  ;;  %vm2490_vm11 = vcmp.gt.f32.partialorder %v5451_v30, 0.0  ;;  %v2746_v34 = vmul.f32 0.2, %v5451_v30 }
 0x1a8   :  { %4280 = vst.msk [vmem:[%s7309_s4 + $0x1ac] sm:$0xf] %vm4172_vm3, %v5055_v27  ;;  %v5053_v35 = vpack.c.bf16 %v2997_v33, %v2997_v33  ;;  %v3125_v36 = vsel %vm2613_vm10, %v2288_v23, %v2869_v29  ;;  %vm2618_vm12 = vcmp.gt.f32.partialorder %v5579_v31, 0.0  ;;  %v2874_v37 = vmul.f32 0.2, %v5579_v31  ;;  %v1789_v38 = vpop.f32.mrf.mxu0  ;;  %v2301_v39 = vpop.f32.mrf.mxu1 }
 0x1a9   :  { %4408 = vst.msk [vmem:[%s7309_s4 + $0x3ac] sm:$0xf] %vm4172_vm3, %v5183_v32  ;;  %v5181_v40 = vpack.c.bf16 %v3125_v36, %v3125_v36  ;;  %v3002_v41 = vsel %vm2490_vm11, %v5451_v30, %v2746_v34  ;;  %vm2488_vm13 = vcmp.gt.f32.partialorder %v1789_v38, 0.0  ;;  %v2744_v42 = vmul.f32 0.2, %v1789_v38 }
 0x1aa   :  { %4278 = vst.msk [vmem:[%s7309_s4 + $0x1a4] sm:$0xf] %vm4172_vm3, %v5053_v35  ;;  %v5058_v43 = vpack.c.bf16 %v3002_v41, %v3002_v41  ;;  %v3130_v44 = vsel %vm2618_vm12, %v5579_v31, %v2874_v37  ;;  %vm2616_vm14 = vcmp.gt.f32.partialorder %v2301_v39, 0.0  ;;  %v2872_v45 = vmul.f32 0.2, %v2301_v39  ;;  %v5452_v46 = vpop.f32.mrf.mxu0  ;;  %v5580_v47 = vpop.f32.mrf.mxu1 }
 0x1ab   :  { %4406 = vst.msk [vmem:[%s7309_s4 + $0x3a4] sm:$0xf] %vm4172_vm3, %v5181_v40  ;;  %v5186_v48 = vpack.c.bf16 %v3130_v44, %v3130_v44  ;;  %v3000_v49 = vsel %vm2488_vm13, %v1789_v38, %v2744_v42  ;;  %vm2491_vm15 = vcmp.gt.f32.partialorder %v5452_v46, 0.0  ;;  %v2747_v50 = vmul.f32 0.2, %v5452_v46 }
 0x1ac   :  { %4283 = vst.msk [vmem:[%s7309_s4 + $0x1b8] sm:$0xf] %vm4172_vm3, %v5058_v43  ;;  %v5056_v51 = vpack.c.bf16 %v3000_v49, %v3000_v49  ;;  %v3128_v52 = vsel %vm2616_vm14, %v2301_v39, %v2872_v45  ;;  %vm2619_vm1 = vcmp.gt.f32.partialorder %v5580_v47, 0.0  ;;  %v2875_v53 = vmul.f32 0.2, %v5580_v47  ;;  %v1792_v54 = vpop.f32.mrf.mxu0  ;;  %v2304_v55 = vpop.f32.mrf.mxu1 }
 0x1ad   :  { %4411 = vst.msk [vmem:[%s7309_s4 + $0x3b8] sm:$0xf] %vm4172_vm3, %v5186_v48  ;;  %v5184_v56 = vpack.c.bf16 %v3128_v52, %v3128_v52  ;;  %v3003_v57 = vsel %vm2491_vm15, %v5452_v46, %v2747_v50  ;;  %vm2489_vm2 = vcmp.gt.f32.partialorder %v1792_v54, 0.0  ;;  %v2745_v58 = vmul.f32 0.2, %v1792_v54 }
 0x1ae   :  { %4281 = vst.msk [vmem:[%s7309_s4 + $0x1b0] sm:$0xf] %vm4172_vm3, %v5056_v51  ;;  %v5059_v59 = vpack.c.bf16 %v3003_v57, %v3003_v57  ;;  %v3131_v60 = vsel %vm2619_vm1, %v5580_v47, %v2875_v53  ;;  %vm2617_vm0 = vcmp.gt.f32.partialorder %v2304_v55, 0.0  ;;  %v2873_v61 = vmul.f32 0.2, %v2304_v55  ;;  %v5455_v62 = vpop.f32.mrf.mxu0  ;;  %v5583_v63 = vpop.f32.mrf.mxu1 }
 0x1af   :  { %4409 = vst.msk [vmem:[%s7309_s4 + $0x3b0] sm:$0xf] %vm4172_vm3, %v5184_v56  ;;  %v5187_v0 = vpack.c.bf16 %v3131_v60, %v3131_v60  ;;  %v3001_v1 = vsel %vm2489_vm2, %v1792_v54, %v2745_v58  ;;  %vm2494_vm4 = vcmp.gt.f32.partialorder %v5455_v62, 0.0  ;;  %v2750_v2 = vmul.f32 0.2, %v5455_v62 }
 0x1b0   :  { %4284 = vst.msk [vmem:[%s7309_s4 + $0x1bc] sm:$0xf] %vm4172_vm3, %v5059_v59  ;;  %v5057_v3 = vpack.c.bf16 %v3001_v1, %v3001_v1  ;;  %v3129_v4 = vsel %vm2617_vm0, %v2304_v55, %v2873_v61  ;;  %vm2622_vm5 = vcmp.gt.f32.partialorder %v5583_v63, 0.0  ;;  %v2878_v5 = vmul.f32 0.2, %v5583_v63  ;;  %v1805_v6 = vpop.f32.mrf.mxu0  ;;  %v2317_v7 = vpop.f32.mrf.mxu1 }
 0x1b1   :  { %4412 = vst.msk [vmem:[%s7309_s4 + $0x3bc] sm:$0xf] %vm4172_vm3, %v5187_v0  ;;  %v5185_v8 = vpack.c.bf16 %v3129_v4, %v3129_v4  ;;  %v3006_v9 = vsel %vm2494_vm4, %v5455_v62, %v2750_v2  ;;  %vm2492_vm6 = vcmp.gt.f32.partialorder %v1805_v6, 0.0  ;;  %v2748_v10 = vmul.f32 0.2, %v1805_v6 }
 0x1b2   :  { %4282 = vst.msk [vmem:[%s7309_s4 + $0x1b4] sm:$0xf] %vm4172_vm3, %v5057_v3  ;;  %v5062_v11 = vpack.c.bf16 %v3006_v9, %v3006_v9  ;;  %v3134_v12 = vsel %vm2622_vm5, %v5583_v63, %v2878_v5  ;;  %vm2620_vm7 = vcmp.gt.f32.partialorder %v2317_v7, 0.0  ;;  %v2876_v13 = vmul.f32 0.2, %v2317_v7  ;;  %v5456_v14 = vpop.f32.mrf.mxu0  ;;  %v5584_v15 = vpop.f32.mrf.mxu1 }
 0x1b3   :  { %4410 = vst.msk [vmem:[%s7309_s4 + $0x3b4] sm:$0xf] %vm4172_vm3, %v5185_v8  ;;  %v5190_v16 = vpack.c.bf16 %v3134_v12, %v3134_v12  ;;  %v3004_v17 = vsel %vm2492_vm6, %v1805_v6, %v2748_v10  ;;  %vm2495_vm8 = vcmp.gt.f32.partialorder %v5456_v14, 0.0  ;;  %v2751_v18 = vmul.f32 0.2, %v5456_v14 }
 0x1b4   :  { %4287 = vst.msk [vmem:[%s7309_s4 + $0x1c8] sm:$0xf] %vm4172_vm3, %v5062_v11  ;;  %v5060_v19 = vpack.c.bf16 %v3004_v17, %v3004_v17  ;;  %v3132_v20 = vsel %vm2620_vm7, %v2317_v7, %v2876_v13  ;;  %vm2623_vm9 = vcmp.gt.f32.partialorder %v5584_v15, 0.0  ;;  %v2879_v21 = vmul.f32 0.2, %v5584_v15  ;;  %v1808_v22 = vpop.f32.mrf.mxu0  ;;  %v2320_v23 = vpop.f32.mrf.mxu1 }
 0x1b5   :  { %4415 = vst.msk [vmem:[%s7309_s4 + $0x3c8] sm:$0xf] %vm4172_vm3, %v5190_v16  ;;  %v5188_v24 = vpack.c.bf16 %v3132_v20, %v3132_v20  ;;  %v3007_v25 = vsel %vm2495_vm8, %v5456_v14, %v2751_v18  ;;  %vm2493_vm10 = vcmp.gt.f32.partialorder %v1808_v22, 0.0  ;;  %v2749_v26 = vmul.f32 0.2, %v1808_v22 }
 0x1b6   :  { %4285 = vst.msk [vmem:[%s7309_s4 + $0x1c0] sm:$0xf] %vm4172_vm3, %v5060_v19  ;;  %v5063_v27 = vpack.c.bf16 %v3007_v25, %v3007_v25  ;;  %v3135_v28 = vsel %vm2623_vm9, %v5584_v15, %v2879_v21  ;;  %vm2621_vm11 = vcmp.gt.f32.partialorder %v2320_v23, 0.0  ;;  %v2877_v29 = vmul.f32 0.2, %v2320_v23  ;;  %v5459_v30 = vpop.f32.mrf.mxu0  ;;  %v5587_v31 = vpop.f32.mrf.mxu1 }
 0x1b7   :  { %4413 = vst.msk [vmem:[%s7309_s4 + $0x3c0] sm:$0xf] %vm4172_vm3, %v5188_v24  ;;  %v5191_v32 = vpack.c.bf16 %v3135_v28, %v3135_v28  ;;  %v3005_v33 = vsel %vm2493_vm10, %v1808_v22, %v2749_v26  ;;  %vm2498_vm12 = vcmp.gt.f32.partialorder %v5459_v30, 0.0  ;;  %v2754_v34 = vmul.f32 0.2, %v5459_v30 }
 0x1b8   :  { %4288 = vst.msk [vmem:[%s7309_s4 + $0x1cc] sm:$0xf] %vm4172_vm3, %v5063_v27  ;;  %v5061_v35 = vpack.c.bf16 %v3005_v33, %v3005_v33  ;;  %v3133_v36 = vsel %vm2621_vm11, %v2320_v23, %v2877_v29  ;;  %vm2626_vm13 = vcmp.gt.f32.partialorder %v5587_v31, 0.0  ;;  %v2882_v37 = vmul.f32 0.2, %v5587_v31  ;;  %v1821_v38 = vpop.f32.mrf.mxu0  ;;  %v2333_v39 = vpop.f32.mrf.mxu1 }
 0x1b9   :  { %4416 = vst.msk [vmem:[%s7309_s4 + $0x3cc] sm:$0xf] %vm4172_vm3, %v5191_v32  ;;  %v5189_v40 = vpack.c.bf16 %v3133_v36, %v3133_v36  ;;  %v3010_v41 = vsel %vm2498_vm12, %v5459_v30, %v2754_v34  ;;  %vm2496_vm14 = vcmp.gt.f32.partialorder %v1821_v38, 0.0  ;;  %v2752_v42 = vmul.f32 0.2, %v1821_v38 }
 0x1ba   :  { %4286 = vst.msk [vmem:[%s7309_s4 + $0x1c4] sm:$0xf] %vm4172_vm3, %v5061_v35  ;;  %v5066_v43 = vpack.c.bf16 %v3010_v41, %v3010_v41  ;;  %v3138_v44 = vsel %vm2626_vm13, %v5587_v31, %v2882_v37  ;;  %vm2624_vm15 = vcmp.gt.f32.partialorder %v2333_v39, 0.0  ;;  %v2880_v45 = vmul.f32 0.2, %v2333_v39  ;;  %v5460_v46 = vpop.f32.mrf.mxu0  ;;  %v5588_v47 = vpop.f32.mrf.mxu1 }
 0x1bb   :  { %4414 = vst.msk [vmem:[%s7309_s4 + $0x3c4] sm:$0xf] %vm4172_vm3, %v5189_v40  ;;  %v5194_v48 = vpack.c.bf16 %v3138_v44, %v3138_v44  ;;  %v3008_v49 = vsel %vm2496_vm14, %v1821_v38, %v2752_v42  ;;  %vm2499_vm1 = vcmp.gt.f32.partialorder %v5460_v46, 0.0  ;;  %v2755_v50 = vmul.f32 0.2, %v5460_v46 }
 0x1bc   :  { %4291 = vst.msk [vmem:[%s7309_s4 + $0x1d8] sm:$0xf] %vm4172_vm3, %v5066_v43  ;;  %v5064_v51 = vpack.c.bf16 %v3008_v49, %v3008_v49  ;;  %v3136_v52 = vsel %vm2624_vm15, %v2333_v39, %v2880_v45  ;;  %vm2627_vm2 = vcmp.gt.f32.partialorder %v5588_v47, 0.0  ;;  %v2883_v53 = vmul.f32 0.2, %v5588_v47  ;;  %v1824_v54 = vpop.f32.mrf.mxu0  ;;  %v2336_v55 = vpop.f32.mrf.mxu1 }
 0x1bd   :  { %4419 = vst.msk [vmem:[%s7309_s4 + $0x3d8] sm:$0xf] %vm4172_vm3, %v5194_v48  ;;  %v5192_v56 = vpack.c.bf16 %v3136_v52, %v3136_v52  ;;  %v3011_v57 = vsel %vm2499_vm1, %v5460_v46, %v2755_v50  ;;  %vm2497_vm0 = vcmp.gt.f32.partialorder %v1824_v54, 0.0  ;;  %v2753_v58 = vmul.f32 0.2, %v1824_v54 }
 0x1be   :  { %4289 = vst.msk [vmem:[%s7309_s4 + $0x1d0] sm:$0xf] %vm4172_vm3, %v5064_v51  ;;  %v5067_v59 = vpack.c.bf16 %v3011_v57, %v3011_v57  ;;  %v3139_v60 = vsel %vm2627_vm2, %v5588_v47, %v2883_v53  ;;  %vm2625_vm4 = vcmp.gt.f32.partialorder %v2336_v55, 0.0  ;;  %v2881_v61 = vmul.f32 0.2, %v2336_v55  ;;  %v5463_v62 = vpop.f32.mrf.mxu0  ;;  %v5591_v63 = vpop.f32.mrf.mxu1 }
 0x1bf   :  { %4417 = vst.msk [vmem:[%s7309_s4 + $0x3d0] sm:$0xf] %vm4172_vm3, %v5192_v56  ;;  %v5195_v0 = vpack.c.bf16 %v3139_v60, %v3139_v60  ;;  %v3009_v1 = vsel %vm2497_vm0, %v1824_v54, %v2753_v58  ;;  %vm2502_vm5 = vcmp.gt.f32.partialorder %v5463_v62, 0.0  ;;  %v2758_v2 = vmul.f32 0.2, %v5463_v62 }
 0x1c0   :  { %4292 = vst.msk [vmem:[%s7309_s4 + $0x1dc] sm:$0xf] %vm4172_vm3, %v5067_v59  ;;  %v5065_v3 = vpack.c.bf16 %v3009_v1, %v3009_v1  ;;  %v3137_v4 = vsel %vm2625_vm4, %v2336_v55, %v2881_v61  ;;  %vm2630_vm6 = vcmp.gt.f32.partialorder %v5591_v63, 0.0  ;;  %v2886_v5 = vmul.f32 0.2, %v5591_v63  ;;  %v1837_v6 = vpop.f32.mrf.mxu0  ;;  %v2349_v7 = vpop.f32.mrf.mxu1 }
 0x1c1   :  { %4420 = vst.msk [vmem:[%s7309_s4 + $0x3dc] sm:$0xf] %vm4172_vm3, %v5195_v0  ;;  %v5193_v8 = vpack.c.bf16 %v3137_v4, %v3137_v4  ;;  %v3014_v9 = vsel %vm2502_vm5, %v5463_v62, %v2758_v2  ;;  %vm2500_vm7 = vcmp.gt.f32.partialorder %v1837_v6, 0.0  ;;  %v2756_v10 = vmul.f32 0.2, %v1837_v6 }
 0x1c2   :  { %4290 = vst.msk [vmem:[%s7309_s4 + $0x1d4] sm:$0xf] %vm4172_vm3, %v5065_v3  ;;  %v5070_v11 = vpack.c.bf16 %v3014_v9, %v3014_v9  ;;  %v3142_v12 = vsel %vm2630_vm6, %v5591_v63, %v2886_v5  ;;  %vm2628_vm8 = vcmp.gt.f32.partialorder %v2349_v7, 0.0  ;;  %v2884_v13 = vmul.f32 0.2, %v2349_v7  ;;  %v5464_v14 = vpop.f32.mrf.mxu0  ;;  %v5592_v15 = vpop.f32.mrf.mxu1 }
 0x1c3   :  { %4418 = vst.msk [vmem:[%s7309_s4 + $0x3d4] sm:$0xf] %vm4172_vm3, %v5193_v8  ;;  %v5198_v16 = vpack.c.bf16 %v3142_v12, %v3142_v12  ;;  %v3012_v17 = vsel %vm2500_vm7, %v1837_v6, %v2756_v10  ;;  %vm2503_vm9 = vcmp.gt.f32.partialorder %v5464_v14, 0.0  ;;  %v2759_v18 = vmul.f32 0.2, %v5464_v14 }
 0x1c4   :  { %4295 = vst.msk [vmem:[%s7309_s4 + $0x1e8] sm:$0xf] %vm4172_vm3, %v5070_v11  ;;  %v5068_v19 = vpack.c.bf16 %v3012_v17, %v3012_v17  ;;  %v3140_v20 = vsel %vm2628_vm8, %v2349_v7, %v2884_v13  ;;  %vm2631_vm10 = vcmp.gt.f32.partialorder %v5592_v15, 0.0  ;;  %v2887_v21 = vmul.f32 0.2, %v5592_v15  ;;  %v1840_v22 = vpop.f32.mrf.mxu0  ;;  %v2352_v23 = vpop.f32.mrf.mxu1 }
 0x1c5   :  { %4423 = vst.msk [vmem:[%s7309_s4 + $0x3e8] sm:$0xf] %vm4172_vm3, %v5198_v16  ;;  %v5196_v24 = vpack.c.bf16 %v3140_v20, %v3140_v20  ;;  %v3015_v25 = vsel %vm2503_vm9, %v5464_v14, %v2759_v18  ;;  %vm2501_vm11 = vcmp.gt.f32.partialorder %v1840_v22, 0.0  ;;  %v2757_v26 = vmul.f32 0.2, %v1840_v22 }
 0x1c6   :  { %4293 = vst.msk [vmem:[%s7309_s4 + $0x1e0] sm:$0xf] %vm4172_vm3, %v5068_v19  ;;  %v5071_v27 = vpack.c.bf16 %v3015_v25, %v3015_v25  ;;  %v3143_v28 = vsel %vm2631_vm10, %v5592_v15, %v2887_v21  ;;  %vm2629_vm12 = vcmp.gt.f32.partialorder %v2352_v23, 0.0  ;;  %v2885_v29 = vmul.f32 0.2, %v2352_v23  ;;  %v5467_v30 = vpop.f32.mrf.mxu0  ;;  %v5595_v31 = vpop.f32.mrf.mxu1 }
 0x1c7   :  { %4421 = vst.msk [vmem:[%s7309_s4 + $0x3e0] sm:$0xf] %vm4172_vm3, %v5196_v24  ;;  %v5199_v32 = vpack.c.bf16 %v3143_v28, %v3143_v28  ;;  %v3013_v33 = vsel %vm2501_vm11, %v1840_v22, %v2757_v26  ;;  %vm2506_vm13 = vcmp.gt.f32.partialorder %v5467_v30, 0.0  ;;  %v2762_v34 = vmul.f32 0.2, %v5467_v30 }
 0x1c8   :  { %4296 = vst.msk [vmem:[%s7309_s4 + $0x1ec] sm:$0xf] %vm4172_vm3, %v5071_v27  ;;  %v5069_v35 = vpack.c.bf16 %v3013_v33, %v3013_v33  ;;  %v3141_v36 = vsel %vm2629_vm12, %v2352_v23, %v2885_v29  ;;  %vm2634_vm14 = vcmp.gt.f32.partialorder %v5595_v31, 0.0  ;;  %v2890_v37 = vmul.f32 0.2, %v5595_v31  ;;  %v1853_v38 = vpop.f32.mrf.mxu0  ;;  %v2365_v39 = vpop.f32.mrf.mxu1 }
 0x1c9   :  { %4424 = vst.msk [vmem:[%s7309_s4 + $0x3ec] sm:$0xf] %vm4172_vm3, %v5199_v32  ;;  %v5197_v40 = vpack.c.bf16 %v3141_v36, %v3141_v36  ;;  %v3018_v41 = vsel %vm2506_vm13, %v5467_v30, %v2762_v34  ;;  %vm2504_vm15 = vcmp.gt.f32.partialorder %v1853_v38, 0.0  ;;  %v2760_v42 = vmul.f32 0.2, %v1853_v38 }
 0x1ca   :  { %4294 = vst.msk [vmem:[%s7309_s4 + $0x1e4] sm:$0xf] %vm4172_vm3, %v5069_v35  ;;  %v5074_v43 = vpack.c.bf16 %v3018_v41, %v3018_v41  ;;  %v3146_v44 = vsel %vm2634_vm14, %v5595_v31, %v2890_v37  ;;  %vm2632_vm1 = vcmp.gt.f32.partialorder %v2365_v39, 0.0  ;;  %v2888_v45 = vmul.f32 0.2, %v2365_v39  ;;  %v5468_v46 = vpop.f32.mrf.mxu0  ;;  %v5596_v47 = vpop.f32.mrf.mxu1 }
 0x1cb   :  { %4422 = vst.msk [vmem:[%s7309_s4 + $0x3e4] sm:$0xf] %vm4172_vm3, %v5197_v40  ;;  %v5202_v48 = vpack.c.bf16 %v3146_v44, %v3146_v44  ;;  %v3016_v49 = vsel %vm2504_vm15, %v1853_v38, %v2760_v42  ;;  %vm2507_vm2 = vcmp.gt.f32.partialorder %v5468_v46, 0.0  ;;  %v2763_v50 = vmul.f32 0.2, %v5468_v46 }
 0x1cc   :  { %4299 = vst.msk [vmem:[%s7309_s4 + $0x1f8] sm:$0xf] %vm4172_vm3, %v5074_v43  ;;  %v5072_v51 = vpack.c.bf16 %v3016_v49, %v3016_v49  ;;  %v3144_v52 = vsel %vm2632_vm1, %v2365_v39, %v2888_v45  ;;  %vm2635_vm0 = vcmp.gt.f32.partialorder %v5596_v47, 0.0  ;;  %v2891_v53 = vmul.f32 0.2, %v5596_v47  ;;  %v1856_v54 = vpop.f32.mrf.mxu0  ;;  %v2368_v55 = vpop.f32.mrf.mxu1 }
 0x1cd   :  { %4427 = vst.msk [vmem:[%s7309_s4 + $0x3f8] sm:$0xf] %vm4172_vm3, %v5202_v48  ;;  %v5200_v56 = vpack.c.bf16 %v3144_v52, %v3144_v52  ;;  %v3019_v57 = vsel %vm2507_vm2, %v5468_v46, %v2763_v50  ;;  %vm2505_vm4 = vcmp.gt.f32.partialorder %v1856_v54, 0.0  ;;  %v2761_v58 = vmul.f32 0.2, %v1856_v54 }
 0x1ce   :  { %4297 = vst.msk [vmem:[%s7309_s4 + $0x1f0] sm:$0xf] %vm4172_vm3, %v5072_v51  ;;  %v5075_v59 = vpack.c.bf16 %v3019_v57, %v3019_v57  ;;  %v3147_v60 = vsel %vm2635_vm0, %v5596_v47, %v2891_v53  ;;  %vm2633_vm5 = vcmp.gt.f32.partialorder %v2368_v55, 0.0  ;;  %v2889_v61 = vmul.f32 0.2, %v2368_v55 }
 0x1cf   :  { %4425 = vst.msk [vmem:[%s7309_s4 + $0x3f0] sm:$0xf] %vm4172_vm3, %v5200_v56  ;;  %v5203_v62 = vpack.c.bf16 %v3147_v60, %v3147_v60  ;;  %v3017_v63 = vsel %vm2505_vm4, %v1856_v54, %v2761_v58 }
 0x1d0   :  { %4300 = vst.msk [vmem:[%s7309_s4 + $0x1fc] sm:$0xf] %vm4172_vm3, %v5075_v59  ;;  %v5073_v0 = vpack.c.bf16 %v3017_v63, %v3017_v63  ;;  %v3145_v1 = vsel %vm2633_vm5, %v2368_v55, %v2889_v61 }
 0x1d1   :  { %4428 = vst.msk [vmem:[%s7309_s4 + $0x3fc] sm:$0xf] %vm4172_vm3, %v5203_v62  ;;  %v5201_v2 = vpack.c.bf16 %v3145_v1, %v3145_v1 }
 0x1d2   :  { %4298 = vst.msk [vmem:[%s7309_s4 + $0x1f4] sm:$0xf] %vm4172_vm3, %v5073_v0 }
 0x1d3   :  { %4426 = vst.msk [vmem:[%s7309_s4 + $0x3f4] sm:$0xf] %vm4172_vm3, %v5201_v2 }

// kernel: discriminator_forward.6
= control target key start
LH: loop header
LB: loop body
LE: loop exit
PB: predicated region body
PF: predicated region fallthrough
CT: control target
= control target key end

     0   :  { %vm627_vm0 = vcmask 130048   ;;  %s4685_s1 = inlined_call_operand.vmem [shape: bf16[128,16], index: 1, kind: input, shape index: {}]   ;;  %s4686_s0 = inlined_call_operand.vmem [shape: bf16[512,128], index: 0, kind: input, shape index: {}]   ;;  %s4687_s2 = inlined_call_operand.vmem [shape: f32[1,16], index: 2, kind: input, shape index: {}]   ;;  %s4688_s3 = inlined_call_operand.vmem [shape: f32[1,16], index: 3, kind: input, shape index: {}]   ;;  %s4689_s4 = inlined_call_operand.vmem [shape: bf16[512,16], index: 4, kind: output, shape index: {}]  }
   0x1   :  { %v2056_v0 = vld [vmem:[%s4685_s1 + $0x38] sm:$0xff]   ;;  %v2057_v1 = vld [vmem:[%s4685_s1 + $0x30] sm:$0xff]   ;;  %v2058_v2 = vld [vmem:[%s4685_s1 + $0x28] sm:$0xff]  }
   0x2   :  { %1960 = vmatprep.subr.bf16.mxu0 %v2056_v0  ;;  %2040 = vmatprep.subr.bf16.mxu1 %v2056_v0  ;;  %v2059_v3 = vld [vmem:[%s4685_s1 + $0x20] sm:$0xff]   ;;  %v2060_v5 = vld [vmem:[%s4685_s1 + $0x18] sm:$0xff]   ;;  %v2061_v6 = vld [vmem:[%s4685_s1 + $0x10] sm:$0xff]  }
   0x3   :  { %1961 = vmatpush3.bf16.msra.mxu0 %v2056_v0  ;;  %2048 = vmatpush3.bf16.msra.mxu1 %v2056_v0  ;;  %v2064_v4 = vld [vmem:[%s4686_s0] sm:$0xff]   ;;  %v2062_v7 = vld [vmem:[%s4685_s1 + $0x8] sm:$0xff]   ;;  %v2066_v11 = vld [vmem:[%s4686_s0 + $0x10] sm:$0xff]  }
   0x4   :  { %1962 = vmatprep.subr.bf16.mxu0 %v2057_v1  ;;  %2041 = vmatprep.subr.bf16.mxu1 %v2057_v1  ;;  %v2063_v8 = vld [vmem:[%s4685_s1] sm:$0xff]   ;;  %v2065_v10 = vld [vmem:[%s4686_s0 + $0x8] sm:$0xff]   ;;  %v2082_v13 = vld [vmem:[%s4686_s0 + $0x90] sm:$0xff]  }
   0x5   :  { %1976 = vmatprep.mubr.bf16.mxu0 %v2064_v4  ;;  %v2080_v9 = vld [vmem:[%s4686_s0 + $0x80] sm:$0xff]   ;;  %v2081_v12 = vld [vmem:[%s4686_s0 + $0x88] sm:$0xff]   ;;  %v2067_v14 = vld [vmem:[%s4686_s0 + $0x18] sm:$0xff]  }
   0x6   :  { %2008 = vmatprep.mubr.bf16.mxu1 %v2080_v9  ;;  %v2068_v15 = vld [vmem:[%s4686_s0 + $0x20] sm:$0xff]   ;;  %v2083_v16 = vld [vmem:[%s4686_s0 + $0x98] sm:$0xff]   ;;  %v2069_v18 = vld [vmem:[%s4686_s0 + $0x28] sm:$0xff]  }
   0x7   :  { %1963 = vmatpush3.bf16.msra.mxu0 %v2057_v1  ;;  %2049 = vmatpush3.bf16.msra.mxu1 %v2057_v1  ;;  %v2084_v17 = vld [vmem:[%s4686_s0 + $0xa0] sm:$0xff]   ;;  %v2085_v19 = vld [vmem:[%s4686_s0 + $0xa8] sm:$0xff]   ;;  %v2070_v20 = vld [vmem:[%s4686_s0 + $0x30] sm:$0xff]  }
   0x8   :  { %1964 = vmatprep.subr.bf16.mxu0 %v2058_v2  ;;  %2042 = vmatprep.subr.bf16.mxu1 %v2058_v2  ;;  %v2086_v21 = vld [vmem:[%s4686_s0 + $0xb0] sm:$0xff]   ;;  %v2071_v22 = vld [vmem:[%s4686_s0 + $0x38] sm:$0xff]   ;;  %v2072_v24 = vld [vmem:[%s4686_s0 + $0x40] sm:$0xff]  }
   0x9   :  { %v2087_v23 = vld [vmem:[%s4686_s0 + $0xb8] sm:$0xff]   ;;  %v2088_v25 = vld [vmem:[%s4686_s0 + $0xc0] sm:$0xff]   ;;  %v2073_v26 = vld [vmem:[%s4686_s0 + $0x48] sm:$0xff]  }
   0xa   :  { %v2089_v27 = vld [vmem:[%s4686_s0 + $0xc8] sm:$0xff]   ;;  %v2074_v28 = vld [vmem:[%s4686_s0 + $0x50] sm:$0xff]   ;;  %v2075_v30 = vld [vmem:[%s4686_s0 + $0x58] sm:$0xff]  }
   0xb   :  { %1965 = vmatpush3.bf16.msra.mxu0 %v2058_v2  ;;  %2050 = vmatpush3.bf16.msra.mxu1 %v2058_v2  ;;  %v2090_v29 = vld [vmem:[%s4686_s0 + $0xd0] sm:$0xff]   ;;  %v2091_v31 = vld [vmem:[%s4686_s0 + $0xd8] sm:$0xff]   ;;  %v2076_v32 = vld [vmem:[%s4686_s0 + $0x60] sm:$0xff]  }
   0xc   :  { %1966 = vmatprep.subr.bf16.mxu0 %v2059_v3  ;;  %2043 = vmatprep.subr.bf16.mxu1 %v2059_v3  ;;  %v2092_v33 = vld [vmem:[%s4686_s0 + $0xe0] sm:$0xff]   ;;  %v2077_v34 = vld [vmem:[%s4686_s0 + $0x68] sm:$0xff]   ;;  %v2078_v36 = vld [vmem:[%s4686_s0 + $0x70] sm:$0xff]  }
   0xd   :  { %v2093_v35 = vld [vmem:[%s4686_s0 + $0xe8] sm:$0xff]   ;;  %v2094_v37 = vld [vmem:[%s4686_s0 + $0xf0] sm:$0xff]   ;;  %v2079_v38 = vld [vmem:[%s4686_s0 + $0x78] sm:$0xff]  }
   0xe   :  { %v2095_v39 = vld [vmem:[%s4686_s0 + $0xf8] sm:$0xff]  }
   0xf   :  { %1967 = vmatpush3.bf16.msra.mxu0 %v2059_v3  ;;  %2051 = vmatpush3.bf16.msra.mxu1 %v2059_v3 }
  0x10   :  { %1968 = vmatprep.subr.bf16.mxu0 %v2060_v5  ;;  %2044 = vmatprep.subr.bf16.mxu1 %v2060_v5 }
  0x13   :  { %1969 = vmatpush3.bf16.msra.mxu0 %v2060_v5  ;;  %2052 = vmatpush3.bf16.msra.mxu1 %v2060_v5 }
  0x14   :  { %1970 = vmatprep.subr.bf16.mxu0 %v2061_v6  ;;  %2045 = vmatprep.subr.bf16.mxu1 %v2061_v6 }
  0x17   :  { %1971 = vmatpush3.bf16.msra.mxu0 %v2061_v6  ;;  %2053 = vmatpush3.bf16.msra.mxu1 %v2061_v6 }
  0x18   :  { %1972 = vmatprep.subr.bf16.mxu0 %v2062_v7  ;;  %2046 = vmatprep.subr.bf16.mxu1 %v2062_v7 }
  0x1b   :  { %1973 = vmatpush3.bf16.msra.mxu0 %v2062_v7  ;;  %2054 = vmatpush3.bf16.msra.mxu1 %v2062_v7 }
  0x1c   :  { %1974 = vmatprep.subr.bf16.mxu0 %v2063_v8  ;;  %2047 = vmatprep.subr.bf16.mxu1 %v2063_v8 }
  0x1f   :  { %1975 = vmatpush3.bf16.msra.mxu0 %v2063_v8  ;;  %2055 = vmatpush3.bf16.msra.mxu1 %v2063_v8 }
  0x22   :  { %1977 = vmatmul.mubr.bf16.vlgmr.msra.gmra.mxu0 %v2065_v10  ;;  %2009 = vmatmul.mubr.bf16.vlgmr.msra.gmra.mxu1 %v2081_v12 }
  0x23   :  { %1980 = vmatprep.mubr.bf16.mxu0 %v2066_v11  ;;  %2012 = vmatprep.mubr.bf16.mxu1 %v2082_v13 }
  0x2a   :  { %1981 = vmatmul.mubr.bf16.gmra.mxu0 %v2067_v14  ;;  %2013 = vmatmul.mubr.bf16.gmra.mxu1 %v2083_v16 }
  0x2b   :  { %1984 = vmatprep.mubr.bf16.mxu0 %v2068_v15  ;;  %2016 = vmatprep.mubr.bf16.mxu1 %v2084_v17 }
  0x32   :  { %1985 = vmatmul.mubr.bf16.gmra.mxu0 %v2069_v18  ;;  %2017 = vmatmul.mubr.bf16.gmra.mxu1 %v2085_v19 }
  0x33   :  { %1988 = vmatprep.mubr.bf16.mxu0 %v2070_v20  ;;  %2020 = vmatprep.mubr.bf16.mxu1 %v2086_v21 }
  0x3a   :  { %1989 = vmatmul.mubr.bf16.gmra.mxu0 %v2071_v22  ;;  %2021 = vmatmul.mubr.bf16.gmra.mxu1 %v2087_v23 }
  0x3b   :  { %1992 = vmatprep.mubr.bf16.mxu0 %v2072_v24  ;;  %2024 = vmatprep.mubr.bf16.mxu1 %v2088_v25 }
  0x42   :  { %1993 = vmatmul.mubr.bf16.gmra.mxu0 %v2073_v26  ;;  %2025 = vmatmul.mubr.bf16.gmra.mxu1 %v2089_v27 }
  0x43   :  { %1996 = vmatprep.mubr.bf16.mxu0 %v2074_v28  ;;  %2028 = vmatprep.mubr.bf16.mxu1 %v2090_v29 }
  0x4a   :  { %1997 = vmatmul.mubr.bf16.gmra.mxu0 %v2075_v30  ;;  %2029 = vmatmul.mubr.bf16.gmra.mxu1 %v2091_v31 }
  0x4b   :  { %2000 = vmatprep.mubr.bf16.mxu0 %v2076_v32  ;;  %2032 = vmatprep.mubr.bf16.mxu1 %v2092_v33 }
  0x52   :  { %2001 = vmatmul.mubr.bf16.gmra.mxu0 %v2077_v34  ;;  %2033 = vmatmul.mubr.bf16.gmra.mxu1 %v2093_v35 }
  0x53   :  { %2004 = vmatprep.mubr.bf16.mxu0 %v2078_v36  ;;  %2036 = vmatprep.mubr.bf16.mxu1 %v2094_v37 }
  0x5a   :  { %2005 = vmatmul.mubr.bf16.gmra.mxu0 %v2079_v38  ;;  %2037 = vmatmul.mubr.bf16.gmra.mxu1 %v2095_v39 }
  0xe2   :  { %v2243_v40 = vpop.f32.mrf.mxu0  ;;  %v2249_v43 = vpop.f32.mrf.mxu1 }
  0xe3   :  { %v631_v50 = vsel %vm627_vm0, %v2243_v40, 0.0 }
  0xe4   :  { %v2245_v41 = vpop.f32.mrf.mxu0  ;;  %v2259_v49 = vpop.f32.mrf.mxu1 }
  0xe5   :  { %v628_v45 = vsel %vm627_vm0, %v2245_v41, 0.0 }
  0xe6   :  { %v2247_v42 = vpop.f32.mrf.mxu0  ;;  %v2269_v56 = vpop.f32.mrf.mxu1 }
  0xe7   :  { %v633_v53 = vsel %vm627_vm0, %v2247_v42, 0.0 }
  0xe8   :  { %v2251_v44 = vpop.f32.mrf.mxu0  ;;  %v2279_v63 = vpop.f32.mrf.mxu1 }
  0xe9   :  { %v629_v46 = vsel %vm627_vm0, %v2251_v44, 0.0 }
  0xea   :  { %v630_v47 = vadd.f32 %v629_v46, %v628_v45  ;;  %v2257_v48 = vpop.f32.mrf.mxu0  ;;  %v2289_v6 = vpop.f32.mrf.mxu1 }
  0xeb   :  { %v639_v0 = vsel %vm627_vm0, %v2257_v48, 0.0 }
  0xec   :  { %v632_v51 = vadd.f32 %v631_v50, %v630_v47  ;;  %v2263_v52 = vpop.f32.mrf.mxu0  ;;  %v2299_v13 = vpop.f32.mrf.mxu1 }
  0xed   :  { %v635_v57 = vsel %vm627_vm0, %v2263_v52, 0.0 }
  0xee   :  { %v634_v54 = vadd.f32 %v633_v53, %v632_v51  ;;  %v2267_v55 = vpop.f32.mrf.mxu0  ;;  %v2309_v20 = vpop.f32.mrf.mxu1 }
  0xef   :  { %v641_v3 = vsel %vm627_vm0, %v2267_v55, 0.0 }
  0xf0   :  { %v636_v58 = vadd.f32 %v635_v57, %v634_v54  ;;  %v2273_v59 = vpop.f32.mrf.mxu0  ;;  %v2319_v27 = vpop.f32.mrf.mxu1 }
  0xf1   :  { %v637_v60 = vsel %vm627_vm0, %v2273_v59, 0.0 }
  0xf2   :  { %v638_v61 = vadd.f32 %v637_v60, %v636_v58  ;;  %v2277_v62 = vpop.f32.mrf.mxu0  ;;  %v2329_v34 = vpop.f32.mrf.mxu1 }
  0xf3   :  { %v647_v14 = vsel %vm627_vm0, %v2277_v62, 0.0  ;;  %4757 = vst [vmem:[#allocation2_spill] sm:$0xff] %v2329_v34 }
  0xf4   :  { %v640_v1 = vadd.f32 %v639_v0, %v638_v61  ;;  %v2283_v2 = vpop.f32.mrf.mxu0  ;;  %v2339_v46 = vpop.f32.mrf.mxu1 }
  0xf5   :  { %v643_v7 = vsel %vm627_vm0, %v2283_v2, 0.0  ;;  %4758 = vst [vmem:[#allocation3_spill] sm:$0xff] %v2339_v46 }
  0xf6   :  { %v642_v4 = vadd.f32 %v641_v3, %v640_v1  ;;  %v2287_v5 = vpop.f32.mrf.mxu0  ;;  %v2349_v58 = vpop.f32.mrf.mxu1 }
  0xf7   :  { %v649_v17 = vsel %vm627_vm0, %v2287_v5, 0.0 }
  0xf8   :  { %v644_v8 = vadd.f32 %v643_v7, %v642_v4  ;;  %v2293_v9 = vpop.f32.mrf.mxu0  ;;  %v2359_v7 = vpop.f32.mrf.mxu1 }
  0xf9   :  { %v645_v10 = vsel %vm627_vm0, %v2293_v9, 0.0 }
  0xfa   :  { %v646_v11 = vadd.f32 %v645_v10, %v644_v8  ;;  %v2297_v12 = vpop.f32.mrf.mxu0 }
  0xfb   :  { %v655_v28 = vsel %vm627_vm0, %v2297_v12, 0.0 }
  0xfc   :  { %v648_v15 = vadd.f32 %v647_v14, %v646_v11  ;;  %v2303_v16 = vpop.f32.mrf.mxu0 }
  0xfd   :  { %v651_v21 = vsel %vm627_vm0, %v2303_v16, 0.0 }
  0xfe   :  { %v650_v18 = vadd.f32 %v649_v17, %v648_v15  ;;  %v2307_v19 = vpop.f32.mrf.mxu0 }
  0xff   :  { %v657_v31 = vsel %vm627_vm0, %v2307_v19, 0.0 }
 0x100   :  { %v652_v22 = vadd.f32 %v651_v21, %v650_v18  ;;  %v2313_v23 = vpop.f32.mrf.mxu0  ;;  %v2369_v18 = vpop.f32.mrf.mxu1 }
 0x101   :  { %v653_v24 = vsel %vm627_vm0, %v2313_v23, 0.0  ;;  %4759 = vst [vmem:[#allocation4_spill] sm:$0xff] %v2369_v18 }
 0x102   :  { %v654_v25 = vadd.f32 %v653_v24, %v652_v22  ;;  %v2317_v26 = vpop.f32.mrf.mxu0 }
 0x103   :  { %v663_v47 = vsel %vm627_vm0, %v2317_v26, 0.0 }
 0x104   :  { %v656_v29 = vadd.f32 %v655_v28, %v654_v25  ;;  %v2323_v30 = vpop.f32.mrf.mxu0 }
 0x105   :  { %v659_v35 = vsel %vm627_vm0, %v2323_v30, 0.0 }
 0x106   :  { %v658_v32 = vadd.f32 %v657_v31, %v656_v29  ;;  %v2327_v33 = vpop.f32.mrf.mxu0  ;;  %v2379_v31 = vpop.f32.mrf.mxu1 }
 0x107   :  { %v665_v53 = vsel %vm627_vm0, %v2327_v33, 0.0  ;;  %4760 = vst [vmem:[#allocation5_spill] sm:$0xff] %v2379_v31 }
 0x108   :  { %v660_v36 = vadd.f32 %v659_v35, %v658_v32  ;;  %v2333_v37 = vpop.f32.mrf.mxu0 }
 0x109   :  { %v661_v38 = vsel %vm627_vm0, %v2333_v37, 0.0 }
 0x10a   :  { %v662_v39 = vadd.f32 %v661_v38, %v660_v36  ;;  %v2337_v45 = vpop.f32.mrf.mxu0 }
 0x10b   :  { %v671_v8 = vsel %vm627_vm0, %v2337_v45, 0.0 }
 0x10c   :  { %v664_v50 = vadd.f32 %v663_v47, %v662_v39  ;;  %v2343_v51 = vpop.f32.mrf.mxu0 }
 0x10d   :  { %v667_v60 = vsel %vm627_vm0, %v2343_v51, 0.0 }
 0x10e   :  { %v666_v54 = vadd.f32 %v665_v53, %v664_v50  ;;  %v2347_v57 = vpop.f32.mrf.mxu0  ;;  %v2389_v50 = vpop.f32.mrf.mxu1 }
 0x10f   :  { %v673_v14 = vsel %vm627_vm0, %v2347_v57, 0.0 }
 0x110   :  { %v668_v61 = vadd.f32 %v667_v60, %v666_v54  ;;  %v2353_v0 = vpop.f32.mrf.mxu0 }
 0x111   :  { %v669_v1 = vsel %vm627_vm0, %v2353_v0, 0.0 }
 0x112   :  { %v670_v3 = vadd.f32 %v669_v1, %v668_v61  ;;  %v2357_v4 = vpop.f32.mrf.mxu0 }
 0x113   :  { %v679_v32 = vsel %vm627_vm0, %v2357_v4, 0.0 }
 0x114   :  { %v672_v10 = vadd.f32 %v671_v8, %v670_v3  ;;  %v2363_v11 = vpop.f32.mrf.mxu0  ;;  %v2397_v3 = vpop.f32.mrf.mxu1 }
 0x115   :  { %v675_v21 = vsel %vm627_vm0, %v2363_v11, 0.0 }
 0x116   :  { %v674_v15 = vadd.f32 %v673_v14, %v672_v10  ;;  %v2367_v17 = vpop.f32.mrf.mxu0 }
 0x117   :  { %v681_v38 = vsel %vm627_vm0, %v2367_v17, 0.0 }
 0x118   :  { %v676_v22 = vadd.f32 %v675_v21, %v674_v15  ;;  %v2373_v24 = vpop.f32.mrf.mxu0  ;;  %v2403_v21 = vpop.f32.mrf.mxu1 }
 0x119   :  { %v677_v25 = vsel %vm627_vm0, %v2373_v24, 0.0  ;;  %4761 = vst [vmem:[#allocation6_spill] sm:$0xff] %v2403_v21 }
 0x11a   :  { %v678_v28 = vadd.f32 %v677_v25, %v676_v22  ;;  %v2377_v29 = vpop.f32.mrf.mxu0  ;;  %v691_v22 = vsel %vm627_vm0, %v2259_v49, 0.0 }
 0x11b   :  { %v687_v8 = vsel %vm627_vm0, %v2377_v29, 0.0 }
 0x11c   :  { %v680_v35 = vadd.f32 %v679_v32, %v678_v28  ;;  %v2383_v36 = vpop.f32.mrf.mxu0  ;;  %v693_v28 = vsel %vm627_vm0, %v2279_v63, 0.0 }
 0x11d   :  { %v683_v53 = vsel %vm627_vm0, %v2383_v36, 0.0 }
 0x11e   :  { %v682_v39 = vadd.f32 %v681_v38, %v680_v35  ;;  %v2387_v47 = vpop.f32.mrf.mxu0  ;;  %v2409_v35 = vpop.f32.mrf.mxu1  ;;  %v695_v38 = vsel %vm627_vm0, %v2249_v43, 0.0 }
 0x11f   :  { %v689_v14 = vsel %vm627_vm0, %v2387_v47, 0.0  ;;  %4762 = vst [vmem:[#allocation7_spill] sm:$0xff] %v2409_v35 }
 0x120   :  { %v684_v54 = vadd.f32 %v683_v53, %v682_v39  ;;  %v2393_v60 = vpop.f32.mrf.mxu0  ;;  %v697_v53 = vsel %vm627_vm0, %v2269_v56, 0.0 }
 0x121   :  { %v685_v61 = vsel %vm627_vm0, %v2393_v60, 0.0 }
 0x122   :  { %v686_v1 = vadd.f32 %v685_v61, %v684_v54  ;;  %v2415_v61 = vpop.f32.mrf.mxu1 }
 0x124   :  { %v688_v10 = vadd.f32 %v687_v8, %v686_v1  ;;  %v699_v1 = vsel %vm627_vm0, %v2299_v13, 0.0 }
 0x126   :  { %v690_v15 = vadd.f32 %v689_v14, %v688_v10  ;;  %v701_v10 = vsel %vm627_vm0, %v2319_v27, 0.0 }
 0x128   :  { %v692_v25 = vadd.f32 %v691_v22, %v690_v15  ;;  %v2421_v15 = vpop.f32.mrf.mxu1  ;;  %v703_v22 = vsel %vm627_vm0, %v2289_v6, 0.0 }
 0x12a   :  { %v694_v32 = vadd.f32 %v693_v28, %v692_v25  ;;  %v705_v28 = vsel %vm627_vm0, %v2309_v20, 0.0 }
 0x12c   :  { %v696_v39 = vadd.f32 %v695_v38, %v694_v32  ;;  %v2427_v38 = vpop.f32.mrf.mxu1 }
 0x12d   :  { %4763 = vst [vmem:[#allocation8_spill] sm:$0xff] %v2427_v38 }
 0x12e   :  { %v698_v54 = vadd.f32 %v697_v53, %v696_v39  ;;  %v707_v39 = vsel %vm627_vm0, %v2339_v46, 0.0  ;;  %v715_v46 = vsel %vm627_vm0, %v2379_v31, 0.0  ;;  %v723_v31 = vsel %vm627_vm0, %v2409_v35, 0.0 }
 0x130   :  { %v700_v8 = vadd.f32 %v699_v1, %v698_v54  ;;  %v709_v54 = vsel %vm627_vm0, %v2359_v7, 0.0 }
 0x132   :  { %v702_v14 = vadd.f32 %v701_v10, %v700_v8  ;;  %v2433_v8 = vpop.f32.mrf.mxu1  ;;  %v711_v10 = vsel %vm627_vm0, %v2329_v34, 0.0  ;;  %v719_v34 = vsel %vm627_vm0, %v2369_v18, 0.0  ;;  %v727_v18 = vsel %vm627_vm0, %v2403_v21, 0.0 }
 0x133   :  { %4764 = vst [vmem:[#allocation9_spill] sm:$0xff] %v2433_v8  ;;  %v731_v35 = vsel %vm627_vm0, %v2433_v8, 0.0  ;;  %v735_v21 = vsel %vm627_vm0, %v2427_v38, 0.0 }
 0x134   :  { %v704_v25 = vadd.f32 %v703_v22, %v702_v14  ;;  %v713_v22 = vsel %vm627_vm0, %v2349_v58, 0.0 }
 0x136   :  { %v706_v32 = vadd.f32 %v705_v28, %v704_v25  ;;  %v2439_v28 = vpop.f32.mrf.mxu1 }
 0x137   :  { %4765 = vst [vmem:[#allocation10_spill] sm:$0xff] %v2439_v28 }
 0x138   :  { %v708_v53 = vadd.f32 %v707_v39, %v706_v32  ;;  %v717_v39 = vsel %vm627_vm0, %v2397_v3, 0.0 }
 0x13a   :  { %v710_v1 = vadd.f32 %v709_v54, %v708_v53  ;;  %v2445_v54 = vpop.f32.mrf.mxu1 }
 0x13c   :  { %v712_v14 = vadd.f32 %v711_v10, %v710_v1  ;;  %v721_v10 = vsel %vm627_vm0, %v2389_v50, 0.0 }
 0x13e   :  { %v714_v25 = vadd.f32 %v713_v22, %v712_v14  ;;  %v2451_v22 = vpop.f32.mrf.mxu1 }
 0x13f   :  { %4766 = vst [vmem:[#allocation11_spill] sm:$0xff] %v2451_v22  ;;  %v743_v38 = vsel %vm627_vm0, %v2451_v22, 0.0 }
 0x140   :  { %v716_v32 = vadd.f32 %v715_v46, %v714_v25  ;;  %v725_v25 = vsel %vm627_vm0, %v2421_v15, 0.0 }
 0x142   :  { %v718_v53 = vadd.f32 %v717_v39, %v716_v32  ;;  %v2457_v39 = vpop.f32.mrf.mxu1 }
 0x143   :  { %4767 = vst [vmem:[#allocation12_spill] sm:$0xff] %v2457_v39  ;;  %v739_v8 = vsel %vm627_vm0, %v2457_v39, 0.0 }
 0x144   :  { %v720_v1 = vadd.f32 %v719_v34, %v718_v53  ;;  %v729_v53 = vsel %vm627_vm0, %v2415_v61, 0.0 }
 0x146   :  { %v722_v14 = vadd.f32 %v721_v10, %v720_v1  ;;  %v2463_v10 = vpop.f32.mrf.mxu1 }
 0x147   :  { %4768 = vst [vmem:[#allocation13_spill] sm:$0xff] %v2463_v10 }
 0x148   :  { %v724_v46 = vadd.f32 %v723_v31, %v722_v14  ;;  %v733_v14 = vsel %vm627_vm0, %v2445_v54, 0.0 }
 0x14a   :  { %v726_v32 = vadd.f32 %v725_v25, %v724_v46  ;;  %v2469_v25 = vpop.f32.mrf.mxu1 }
 0x14b   :  { %4769 = vst [vmem:[#allocation14_spill] sm:$0xff] %v2469_v25 }
 0x14c   :  { %v728_v34 = vadd.f32 %v727_v18, %v726_v32  ;;  %v737_v32 = vsel %vm627_vm0, %v2439_v28, 0.0 }
 0x14e   :  { %v730_v1 = vadd.f32 %v729_v53, %v728_v34  ;;  %v2475_v53 = vpop.f32.mrf.mxu1 }
 0x14f   :  { %v751_v22 = vsel %vm627_vm0, %v2475_v53, 0.0 }
 0x150   :  { %v732_v31 = vadd.f32 %v731_v35, %v730_v1  ;;  %v741_v1 = vsel %vm627_vm0, %v2469_v25, 0.0 }
 0x152   :  { %v734_v46 = vadd.f32 %v733_v14, %v732_v31  ;;  %v2481_v14 = vpop.f32.mrf.mxu1 }
 0x153   :  { %4770 = vst [vmem:[#allocation15_spill] sm:$0xff] %v2481_v14  ;;  %v747_v39 = vsel %vm627_vm0, %v2481_v14, 0.0 }
 0x154   :  { %v736_v18 = vadd.f32 %v735_v21, %v734_v46  ;;  %v745_v46 = vsel %vm627_vm0, %v2463_v10, 0.0 }
 0x156   :  { %v738_v34 = vadd.f32 %v737_v32, %v736_v18  ;;  %v2487_v32 = vpop.f32.mrf.mxu1 }
 0x158   :  { %v740_v35 = vadd.f32 %v739_v8, %v738_v34  ;;  %v2491_v34 = vpop.f32.mrf.mxu1 }
 0x159   :  { %4771 = vst [vmem:[#allocation16_spill] sm:$0xff] %v2491_v34 }
 0x15a   :  { %v742_v31 = vadd.f32 %v741_v1, %v740_v35  ;;  %v749_v35 = vsel %vm627_vm0, %v2491_v34, 0.0 }
 0x15c   :  { %v744_v21 = vadd.f32 %v743_v38, %v742_v31  ;;  %v753_v31 = vsel %vm627_vm0, %v2487_v32, 0.0 }
 0x15e   :  { %v746_v18 = vadd.f32 %v745_v46, %v744_v21 }
 0x160   :  { %v748_v8 = vadd.f32 %v747_v39, %v746_v18 }
 0x162   :  { %v750_v1 = vadd.f32 %v749_v35, %v748_v8 }
 0x164   :  { %v752_v38 = vadd.f32 %v751_v22, %v750_v1 }
 0x166   :  { %v754_v21 = vadd.f32 %v753_v31, %v752_v38 }
 0x168   :  { %v755_v46 = vrot.slane %v754_v21, 4 }
 0x16a   :  { %v756_v10 = vadd.f32 %v755_v46, %v754_v21 }
 0x16c   :  { %v757_v25 = vrot.slane %v756_v10, 2 }
 0x16e   :  { %v758_v28 = vadd.f32 %v757_v25, %v756_v10 }
 0x170   :  { %v759_v14 = vrot.slane %v758_v28, 1 }
 0x172   :  { %v760_v39 = vadd.f32 %v759_v14, %v758_v28 }
 0x174   :  { %v2499_v18 = vmul.f32 0.001953125, %v760_v39 }
 0x176   :  { %v2503_v34 = vsub.f32 %v2245_v41, %v2499_v18  ;;  %v2507_v8 = vsub.f32 %v2251_v44, %v2499_v18  ;;  %v2511_v22 = vsub.f32 %v2243_v40, %v2499_v18  ;;  %v2515_v35 = vsub.f32 %v2247_v42, %v2499_v18 }
 0x177   :  { %v2523_v41 = vsub.f32 %v2263_v52, %v2499_v18  ;;  %v2529_v40 = vsub.f32 %v2273_v59, %v2499_v18  ;;  %v2537_v38 = vsub.f32 %v2257_v48, %v2499_v18  ;;  %v2544_v59 = vsub.f32 %v2267_v55, %v2499_v18 }
 0x178   :  { %v827_v28 = vmul.f32 %v2503_v34, %v2503_v34  ;;  %v828_v10 = vmul.f32 %v2507_v8, %v2507_v8  ;;  %v829_v44 = vmul.f32 %v2511_v22, %v2511_v22  ;;  %v830_v42 = vmul.f32 %v2515_v35, %v2515_v35 }
 0x179   :  { %v831_v52 = vmul.f32 %v2523_v41, %v2523_v41  ;;  %v832_v46 = vmul.f32 %v2529_v40, %v2529_v40  ;;  %v2551_v48 = vsub.f32 %v2283_v2, %v2499_v18  ;;  %v2558_v55 = vsub.f32 %v2293_v9, %v2499_v18 }
 0x17a   :  { %v891_v25 = vsel %vm627_vm0, %v827_v28, 0.0  ;;  %v892_v14 = vsel %vm627_vm0, %v828_v10, 0.0  ;;  %v894_v31 = vsel %vm627_vm0, %v829_v44, 0.0  ;;  %v896_v39 = vsel %vm627_vm0, %v830_v42, 0.0 }
 0x17b   :  { %v893_v1 = vadd.f32 %v892_v14, %v891_v25  ;;  %v833_v10 = vmul.f32 %v2537_v38, %v2537_v38  ;;  %v898_v44 = vsel %vm627_vm0, %v831_v52, 0.0  ;;  %v834_v14 = vmul.f32 %v2544_v59, %v2544_v59 }
 0x17c   :  { %v900_v42 = vsel %vm627_vm0, %v832_v46, 0.0  ;;  %v2565_v2 = vsub.f32 %v2277_v62, %v2499_v18  ;;  %v2572_v9 = vsub.f32 %v2287_v5, %v2499_v18  ;;  %v2579_v62 = vsub.f32 %v2303_v16, %v2499_v18 }
 0x17d   :  { %v895_v21 = vadd.f32 %v894_v31, %v893_v1  ;;  %v835_v31 = vmul.f32 %v2551_v48, %v2551_v48  ;;  %v902_v52 = vsel %vm627_vm0, %v833_v10, 0.0  ;;  %v904_v46 = vsel %vm627_vm0, %v834_v14, 0.0 }
 0x17e   :  { %v2586_v5 = vsub.f32 %v2313_v23, %v2499_v18  ;;  %v2593_v16 = vsub.f32 %v2297_v12, %v2499_v18  ;;  %v2600_v23 = vsub.f32 %v2307_v19, %v2499_v18  ;;  %v2607_v12 = vsub.f32 %v2323_v30, %v2499_v18 }
 0x17f   :  { %v897_v28 = vadd.f32 %v896_v39, %v895_v21  ;;  %v836_v39 = vmul.f32 %v2558_v55, %v2558_v55  ;;  %v906_v10 = vsel %vm627_vm0, %v835_v31, 0.0  ;;  %v2614_v19 = vsub.f32 %v2333_v37, %v2499_v18 }
 0x180   :  { %v2621_v30 = vsub.f32 %v2317_v26, %v2499_v18  ;;  %v2628_v37 = vsub.f32 %v2327_v33, %v2499_v18  ;;  %v2635_v26 = vsub.f32 %v2343_v51, %v2499_v18  ;;  %v2642_v33 = vsub.f32 %v2353_v0, %v2499_v18 }
 0x181   :  { %v899_v25 = vadd.f32 %v898_v44, %v897_v28  ;;  %v837_v44 = vmul.f32 %v2565_v2, %v2565_v2  ;;  %v908_v14 = vsel %vm627_vm0, %v836_v39, 0.0  ;;  %v2649_v51 = vsub.f32 %v2337_v45, %v2499_v18 }
 0x182   :  { %v2656_v0 = vsub.f32 %v2347_v57, %v2499_v18  ;;  %v2663_v45 = vsub.f32 %v2363_v11, %v2499_v18  ;;  %v2670_v57 = vsub.f32 %v2373_v24, %v2499_v18  ;;  %v2677_v11 = vsub.f32 %v2357_v4, %v2499_v18 }
 0x183   :  { %v901_v1 = vadd.f32 %v900_v42, %v899_v25  ;;  %v838_v42 = vmul.f32 %v2572_v9, %v2572_v9  ;;  %v910_v31 = vsel %vm627_vm0, %v837_v44, 0.0  ;;  %v2684_v24 = vsub.f32 %v2367_v17, %v2499_v18 }
 0x184   :  { %v2691_v4 = vsub.f32 %v2383_v36, %v2499_v18  ;;  %v2698_v17 = vsub.f32 %v2393_v60, %v2499_v18  ;;  %v2705_v36 = vsub.f32 %v2377_v29, %v2499_v18  ;;  %v2712_v60 = vsub.f32 %v2387_v47, %v2499_v18 }
 0x185   :  { %v903_v21 = vadd.f32 %v902_v52, %v901_v1  ;;  %v839_v52 = vmul.f32 %v2579_v62, %v2579_v62  ;;  %v912_v39 = vsel %vm627_vm0, %v838_v42, 0.0  ;;  %v2719_v29 = vsub.f32 %v2259_v49, %v2499_v18 }
 0x186   :  { %v2726_v47 = vsub.f32 %v2279_v63, %v2499_v18  ;;  %v2733_v49 = vsub.f32 %v2249_v43, %v2499_v18  ;;  %v2740_v63 = vsub.f32 %v2269_v56, %v2499_v18  ;;  %v2747_v43 = vsub.f32 %v2299_v13, %v2499_v18 }
 0x187   :  { %v905_v28 = vadd.f32 %v904_v46, %v903_v21  ;;  %v840_v46 = vmul.f32 %v2586_v5, %v2586_v5  ;;  %v914_v44 = vsel %vm627_vm0, %v839_v52, 0.0  ;;  %v2754_v56 = vsub.f32 %v2319_v27, %v2499_v18 }
 0x188   :  { %v2761_v13 = vsub.f32 %v2289_v6, %v2499_v18  ;;  %v2768_v27 = vsub.f32 %v2309_v20, %v2499_v18  ;;  %v2782_v20 = vsub.f32 %v2359_v7, %v2499_v18  ;;  %v2796_v7 = vsub.f32 %v2349_v58, %v2499_v18 }
 0x189   :  { %v907_v25 = vadd.f32 %v906_v10, %v905_v28  ;;  %v841_v10 = vmul.f32 %v2593_v16, %v2593_v16  ;;  %v916_v42 = vsel %vm627_vm0, %v840_v46, 0.0  ;;  %v2810_v58 = vsub.f32 %v2397_v3, %v2499_v18 }
 0x18a   :  { %v2824_v3 = vsub.f32 %v2389_v50, %v2499_v18  ;;  %v2838_v50 = vsub.f32 %v2421_v15, %v2499_v18  ;;  %v2852_v15 = vsub.f32 %v2415_v61, %v2499_v18  ;;  %v2866_v61 = vsub.f32 %v2445_v54, %v2499_v18 }
 0x18b   :  { %v909_v1 = vadd.f32 %v908_v14, %v907_v25  ;;  %v842_v14 = vmul.f32 %v2600_v23, %v2600_v23  ;;  %v918_v52 = vsel %vm627_vm0, %v841_v10, 0.0 }
 0x18c   :  { %4780 = vst [vmem:[#allocation17_spill] sm:$0xff] %v2824_v3  ;;  %4783 = vst [vmem:[#allocation18_spill] sm:$0xff] %v2838_v50 }
 0x18d   :  { %v911_v21 = vadd.f32 %v910_v31, %v909_v1  ;;  %v843_v31 = vmul.f32 %v2607_v12, %v2607_v12  ;;  %v920_v46 = vsel %vm627_vm0, %v842_v14, 0.0  ;;  %4786 = vst [vmem:[#allocation19_spill] sm:$0xff] %v2852_v15  ;;  %4789 = vst [vmem:[#allocation20_spill] sm:$0xff] %v2866_v61 }
 0x18f   :  { %v913_v28 = vadd.f32 %v912_v39, %v911_v21  ;;  %v844_v39 = vmul.f32 %v2614_v19, %v2614_v19  ;;  %v922_v10 = vsel %vm627_vm0, %v843_v31, 0.0 }
 0x191   :  { %v915_v25 = vadd.f32 %v914_v44, %v913_v28  ;;  %v845_v44 = vmul.f32 %v2621_v30, %v2621_v30  ;;  %v924_v14 = vsel %vm627_vm0, %v844_v39, 0.0 }
 0x193   :  { %v917_v1 = vadd.f32 %v916_v42, %v915_v25  ;;  %v846_v42 = vmul.f32 %v2628_v37, %v2628_v37  ;;  %v926_v31 = vsel %vm627_vm0, %v845_v44, 0.0 }
 0x195   :  { %v919_v21 = vadd.f32 %v918_v52, %v917_v1  ;;  %v847_v52 = vmul.f32 %v2635_v26, %v2635_v26  ;;  %v928_v39 = vsel %vm627_vm0, %v846_v42, 0.0 }
 0x197   :  { %v921_v28 = vadd.f32 %v920_v46, %v919_v21  ;;  %v848_v46 = vmul.f32 %v2642_v33, %v2642_v33  ;;  %v930_v44 = vsel %vm627_vm0, %v847_v52, 0.0 }
 0x199   :  { %v923_v25 = vadd.f32 %v922_v10, %v921_v28  ;;  %v849_v10 = vmul.f32 %v2649_v51, %v2649_v51  ;;  %v932_v42 = vsel %vm627_vm0, %v848_v46, 0.0 }
 0x19b   :  { %v925_v1 = vadd.f32 %v924_v14, %v923_v25  ;;  %v850_v14 = vmul.f32 %v2656_v0, %v2656_v0  ;;  %v934_v52 = vsel %vm627_vm0, %v849_v10, 0.0 }
 0x19d   :  { %v927_v21 = vadd.f32 %v926_v31, %v925_v1  ;;  %v851_v31 = vmul.f32 %v2663_v45, %v2663_v45  ;;  %v936_v46 = vsel %vm627_vm0, %v850_v14, 0.0 }
 0x19f   :  { %v929_v28 = vadd.f32 %v928_v39, %v927_v21  ;;  %v852_v39 = vmul.f32 %v2670_v57, %v2670_v57  ;;  %v938_v10 = vsel %vm627_vm0, %v851_v31, 0.0 }
 0x1a1   :  { %v931_v25 = vadd.f32 %v930_v44, %v929_v28  ;;  %v853_v44 = vmul.f32 %v2677_v11, %v2677_v11  ;;  %v940_v14 = vsel %vm627_vm0, %v852_v39, 0.0 }
 0x1a3   :  { %v933_v1 = vadd.f32 %v932_v42, %v931_v25  ;;  %v854_v42 = vmul.f32 %v2684_v24, %v2684_v24  ;;  %v942_v31 = vsel %vm627_vm0, %v853_v44, 0.0 }
 0x1a5   :  { %v935_v21 = vadd.f32 %v934_v52, %v933_v1  ;;  %v855_v52 = vmul.f32 %v2691_v4, %v2691_v4  ;;  %v944_v39 = vsel %vm627_vm0, %v854_v42, 0.0 }
 0x1a7   :  { %v937_v28 = vadd.f32 %v936_v46, %v935_v21  ;;  %v856_v46 = vmul.f32 %v2698_v17, %v2698_v17  ;;  %v946_v44 = vsel %vm627_vm0, %v855_v52, 0.0 }
 0x1a9   :  { %v939_v25 = vadd.f32 %v938_v10, %v937_v28  ;;  %v857_v10 = vmul.f32 %v2705_v36, %v2705_v36  ;;  %v948_v42 = vsel %vm627_vm0, %v856_v46, 0.0 }
 0x1ab   :  { %v941_v1 = vadd.f32 %v940_v14, %v939_v25  ;;  %v858_v14 = vmul.f32 %v2712_v60, %v2712_v60  ;;  %v950_v52 = vsel %vm627_vm0, %v857_v10, 0.0 }
 0x1ad   :  { %v943_v21 = vadd.f32 %v942_v31, %v941_v1  ;;  %v859_v31 = vmul.f32 %v2719_v29, %v2719_v29  ;;  %v952_v46 = vsel %vm627_vm0, %v858_v14, 0.0 }
 0x1af   :  { %v945_v28 = vadd.f32 %v944_v39, %v943_v21  ;;  %v860_v39 = vmul.f32 %v2726_v47, %v2726_v47  ;;  %v954_v10 = vsel %vm627_vm0, %v859_v31, 0.0 }
 0x1b1   :  { %v947_v25 = vadd.f32 %v946_v44, %v945_v28  ;;  %v861_v44 = vmul.f32 %v2733_v49, %v2733_v49  ;;  %v956_v14 = vsel %vm627_vm0, %v860_v39, 0.0 }
 0x1b3   :  { %v949_v1 = vadd.f32 %v948_v42, %v947_v25  ;;  %v862_v42 = vmul.f32 %v2740_v63, %v2740_v63  ;;  %v958_v31 = vsel %vm627_vm0, %v861_v44, 0.0 }
 0x1b5   :  { %v951_v21 = vadd.f32 %v950_v52, %v949_v1  ;;  %v863_v52 = vmul.f32 %v2747_v43, %v2747_v43  ;;  %v960_v39 = vsel %vm627_vm0, %v862_v42, 0.0 }
 0x1b7   :  { %v953_v28 = vadd.f32 %v952_v46, %v951_v21  ;;  %v864_v46 = vmul.f32 %v2754_v56, %v2754_v56  ;;  %v962_v44 = vsel %vm627_vm0, %v863_v52, 0.0 }
 0x1b9   :  { %v955_v25 = vadd.f32 %v954_v10, %v953_v28  ;;  %v4772_v10 = vld [vmem:[#allocation3_spill] sm:$0xff]  ;;  %v964_v42 = vsel %vm627_vm0, %v864_v46, 0.0 }
 0x1ba   :  { %v2775_v6 = vsub.f32 %v4772_v10, %v2499_v18 }
 0x1bb   :  { %v957_v1 = vadd.f32 %v956_v14, %v955_v25  ;;  %v865_v25 = vmul.f32 %v2761_v13, %v2761_v13 }
 0x1bc   :  { %4773 = vst [vmem:[#allocation3_spill] sm:$0xff] %v2775_v6  ;;  %v867_v10 = vmul.f32 %v2775_v6, %v2775_v6 }
 0x1bd   :  { %v959_v21 = vadd.f32 %v958_v31, %v957_v1  ;;  %v866_v1 = vmul.f32 %v2768_v27, %v2768_v27  ;;  %v966_v52 = vsel %vm627_vm0, %v865_v25, 0.0 }
 0x1be   :  { %v970_v25 = vsel %vm627_vm0, %v867_v10, 0.0 }
 0x1bf   :  { %v961_v28 = vadd.f32 %v960_v39, %v959_v21  ;;  %v4774_v21 = vld [vmem:[#allocation2_spill] sm:$0xff]  ;;  %v968_v46 = vsel %vm627_vm0, %v866_v1, 0.0 }
 0x1c0   :  { %v2789_v39 = vsub.f32 %v4774_v21, %v2499_v18 }
 0x1c1   :  { %v963_v14 = vadd.f32 %v962_v44, %v961_v28  ;;  %v868_v44 = vmul.f32 %v2782_v20, %v2782_v20 }
 0x1c2   :  { %4775 = vst [vmem:[#allocation2_spill] sm:$0xff] %v2789_v39  ;;  %v869_v6 = vmul.f32 %v2789_v39, %v2789_v39 }
 0x1c3   :  { %v965_v31 = vadd.f32 %v964_v42, %v963_v14  ;;  %v4776_v42 = vld [vmem:[#allocation5_spill] sm:$0xff]  ;;  %v972_v1 = vsel %vm627_vm0, %v868_v44, 0.0 }
 0x1c4   :  { %v2803_v21 = vsub.f32 %v4776_v42, %v2499_v18  ;;  %v974_v10 = vsel %vm627_vm0, %v869_v6, 0.0 }
 0x1c5   :  { %v967_v28 = vadd.f32 %v966_v52, %v965_v31  ;;  %v870_v52 = vmul.f32 %v2796_v7, %v2796_v7 }
 0x1c6   :  { %4777 = vst [vmem:[#allocation5_spill] sm:$0xff] %v2803_v21  ;;  %v871_v39 = vmul.f32 %v2803_v21, %v2803_v21 }
 0x1c7   :  { %v969_v14 = vadd.f32 %v968_v46, %v967_v28  ;;  %v4778_v46 = vld [vmem:[#allocation4_spill] sm:$0xff]  ;;  %v976_v44 = vsel %vm627_vm0, %v870_v52, 0.0 }
 0x1c8   :  { %v2817_v42 = vsub.f32 %v4778_v46, %v2499_v18  ;;  %v978_v6 = vsel %vm627_vm0, %v871_v39, 0.0 }
 0x1c9   :  { %v971_v31 = vadd.f32 %v970_v25, %v969_v14  ;;  %v872_v25 = vmul.f32 %v2810_v58, %v2810_v58 }
 0x1ca   :  { %4779 = vst [vmem:[#allocation4_spill] sm:$0xff] %v2817_v42  ;;  %v873_v21 = vmul.f32 %v2817_v42, %v2817_v42 }
 0x1cb   :  { %v973_v28 = vadd.f32 %v972_v1, %v971_v31  ;;  %v4781_v1 = vld [vmem:[#allocation7_spill] sm:$0xff]  ;;  %v980_v52 = vsel %vm627_vm0, %v872_v25, 0.0 }
 0x1cc   :  { %v2831_v46 = vsub.f32 %v4781_v1, %v2499_v18  ;;  %v982_v39 = vsel %vm627_vm0, %v873_v21, 0.0 }
 0x1cd   :  { %v975_v14 = vadd.f32 %v974_v10, %v973_v28  ;;  %v874_v10 = vmul.f32 %v2824_v3, %v2824_v3 }
 0x1ce   :  { %4782 = vst [vmem:[#allocation7_spill] sm:$0xff] %v2831_v46  ;;  %v875_v42 = vmul.f32 %v2831_v46, %v2831_v46 }
 0x1cf   :  { %v977_v31 = vadd.f32 %v976_v44, %v975_v14  ;;  %v4784_v44 = vld [vmem:[#allocation6_spill] sm:$0xff]  ;;  %v984_v25 = vsel %vm627_vm0, %v874_v10, 0.0 }
 0x1d0   :  { %v2845_v1 = vsub.f32 %v4784_v44, %v2499_v18  ;;  %v986_v21 = vsel %vm627_vm0, %v875_v42, 0.0 }
 0x1d1   :  { %v979_v28 = vadd.f32 %v978_v6, %v977_v31  ;;  %v876_v6 = vmul.f32 %v2838_v50, %v2838_v50 }
 0x1d2   :  { %4785 = vst [vmem:[#allocation6_spill] sm:$0xff] %v2845_v1  ;;  %v877_v46 = vmul.f32 %v2845_v1, %v2845_v1 }
 0x1d3   :  { %v981_v14 = vadd.f32 %v980_v52, %v979_v28  ;;  %v4787_v52 = vld [vmem:[#allocation9_spill] sm:$0xff]  ;;  %v988_v10 = vsel %vm627_vm0, %v876_v6, 0.0 }
 0x1d4   :  { %v2859_v44 = vsub.f32 %v4787_v52, %v2499_v18  ;;  %v990_v42 = vsel %vm627_vm0, %v877_v46, 0.0 }
 0x1d5   :  { %v983_v31 = vadd.f32 %v982_v39, %v981_v14  ;;  %v878_v39 = vmul.f32 %v2852_v15, %v2852_v15  ;;  %v880_v15 = vmul.f32 %v2866_v61, %v2866_v61 }
 0x1d6   :  { %4788 = vst [vmem:[#allocation9_spill] sm:$0xff] %v2859_v44  ;;  %v879_v1 = vmul.f32 %v2859_v44, %v2859_v44 }
 0x1d7   :  { %v985_v28 = vadd.f32 %v984_v25, %v983_v31  ;;  %v4790_v25 = vld [vmem:[#allocation8_spill] sm:$0xff]  ;;  %v992_v6 = vsel %vm627_vm0, %v878_v39, 0.0  ;;  %v996_v61 = vsel %vm627_vm0, %v880_v15, 0.0  ;;  %v4801_v15 = vld [vmem:[#allocation15_spill] sm:$0xff] }
 0x1d8   :  { %v2873_v52 = vsub.f32 %v4790_v25, %v2499_v18  ;;  %v994_v44 = vsel %vm627_vm0, %v879_v1, 0.0  ;;  %v4799_v1 = vld [vmem:[#allocation13_spill] sm:$0xff] }
 0x1d9   :  { %v987_v14 = vadd.f32 %v986_v21, %v985_v28  ;;  %v4792_v21 = vld [vmem:[#allocation10_spill] sm:$0xff] }
 0x1da   :  { %4791 = vst [vmem:[#allocation8_spill] sm:$0xff] %v2873_v52  ;;  %v2880_v54 = vsub.f32 %v4792_v21, %v2499_v18  ;;  %v881_v50 = vmul.f32 %v2873_v52, %v2873_v52 }
 0x1db   :  { %v989_v31 = vadd.f32 %v988_v10, %v987_v14  ;;  %v4794_v10 = vld [vmem:[#allocation12_spill] sm:$0xff] }
 0x1dc   :  { %4793 = vst [vmem:[#allocation10_spill] sm:$0xff] %v2880_v54  ;;  %v819_v25 = vsub.f32 %v4794_v10, %v2499_v18  ;;  %v882_v21 = vmul.f32 %v2880_v54, %v2880_v54  ;;  %v998_v52 = vsel %vm627_vm0, %v881_v50, 0.0 }
 0x1dd   :  { %v991_v28 = vadd.f32 %v990_v42, %v989_v31  ;;  %v4795_v31 = vld [vmem:[#allocation14_spill] sm:$0xff] }
 0x1de   :  { %v2892_v42 = vsub.f32 %v4795_v31, %v2499_v18  ;;  %v883_v10 = vmul.f32 %v819_v25, %v819_v25  ;;  %v1000_v31 = vsel %vm627_vm0, %v882_v21, 0.0 }
 0x1df   :  { %v993_v14 = vadd.f32 %v992_v6, %v991_v28  ;;  %v4797_v28 = vld [vmem:[#allocation11_spill] sm:$0xff] }
 0x1e0   :  { %4796 = vst [vmem:[#allocation12_spill] sm:$0xff] %v2892_v42  ;;  %v2899_v6 = vsub.f32 %v4797_v28, %v2499_v18  ;;  %v1002_v50 = vsel %vm627_vm0, %v883_v10, 0.0 }
 0x1e1   :  { %v995_v46 = vadd.f32 %v994_v44, %v993_v14  ;;  %v2904_v44 = vsub.f32 %v4799_v1, %v2499_v18  ;;  %v884_v14 = vmul.f32 %v2892_v42, %v2892_v42 }
 0x1e2   :  { %4798 = vst [vmem:[#allocation14_spill] sm:$0xff] %v2899_v6 }
 0x1e3   :  { %v997_v39 = vadd.f32 %v996_v61, %v995_v46  ;;  %4800 = vst [vmem:[#allocation11_spill] sm:$0xff] %v2904_v44  ;;  %v2911_v61 = vsub.f32 %v4801_v15, %v2499_v18  ;;  %v885_v46 = vmul.f32 %v2899_v6, %v2899_v6  ;;  %v886_v1 = vmul.f32 %v2904_v44, %v2904_v44 }
 0x1e4   :  { %v1004_v21 = vsel %vm627_vm0, %v884_v14, 0.0 }
 0x1e5   :  { %v999_v3 = vadd.f32 %v998_v52, %v997_v39  ;;  %4802 = vst [vmem:[#allocation13_spill] sm:$0xff] %v2911_v61  ;;  %v4803_v39 = vld [vmem:[#allocation16_spill] sm:$0xff]  ;;  %v887_v15 = vmul.f32 %v2911_v61, %v2911_v61  ;;  %v1006_v10 = vsel %vm627_vm0, %v885_v46, 0.0  ;;  %v1008_v14 = vsel %vm627_vm0, %v886_v1, 0.0 }
 0x1e6   :  { %v2918_v28 = vsub.f32 %v4803_v39, %v2499_v18 }
 0x1e7   :  { %v1001_v54 = vadd.f32 %v1000_v31, %v999_v3  ;;  %v2925_v31 = vsub.f32 %v2475_v53, %v2499_v18 }
 0x1e8   :  { %4804 = vst [vmem:[#allocation15_spill] sm:$0xff] %v2918_v28  ;;  %v888_v39 = vmul.f32 %v2918_v28, %v2918_v28 }
 0x1e9   :  { %v1003_v52 = vadd.f32 %v1002_v50, %v1001_v54  ;;  %4805 = vst [vmem:[#allocation16_spill] sm:$0xff] %v2925_v31  ;;  %v2932_v50 = vsub.f32 %v2487_v32, %v2499_v18  ;;  %v889_v53 = vmul.f32 %v2925_v31, %v2925_v31 }
 0x1eb   :  { %v1005_v3 = vadd.f32 %v1004_v21, %v1003_v52  ;;  %v1010_v21 = vsel %vm627_vm0, %v887_v15, 0.0  ;;  %v890_v46 = vmul.f32 %v2932_v50, %v2932_v50  ;;  %v1014_v32 = vsel %vm627_vm0, %v889_v53, 0.0  ;;  %v4809_v53 = vld [vmem:[#allocation5_spill] sm:$0xff] }
 0x1ed   :  { %v1007_v54 = vadd.f32 %v1006_v10, %v1005_v3  ;;  %v1012_v3 = vsel %vm627_vm0, %v888_v39, 0.0  ;;  %v1016_v28 = vsel %vm627_vm0, %v890_v46, 0.0 }
 0x1ef   :  { %v1009_v52 = vadd.f32 %v1008_v14, %v1007_v54 }
 0x1f1   :  { %v1011_v44 = vadd.f32 %v1010_v21, %v1009_v52 }
 0x1f3   :  { %v1013_v10 = vadd.f32 %v1012_v3, %v1011_v44  ;;  %v4810_v3 = vld [vmem:[#allocation4_spill] sm:$0xff] }
 0x1f5   :  { %v1015_v18 = vadd.f32 %v1014_v32, %v1013_v10  ;;  %v4811_v10 = vld [vmem:[#allocation17_spill] sm:$0xff] }
 0x1f7   :  { %v1017_v61 = vadd.f32 %v1016_v28, %v1015_v18  ;;  %v4812_v18 = vld [vmem:[#allocation7_spill] sm:$0xff] }
 0x1f9   :  { %v1018_v1 = vrot.slane %v1017_v61, 4 }
 0x1fb   :  { %v1019_v54 = vadd.f32 %v1018_v1, %v1017_v61  ;;  %v4813_v1 = vld [vmem:[#allocation18_spill] sm:$0xff] }
 0x1fd   :  { %v1020_v14 = vrot.slane %v1019_v54, 2 }
 0x1ff   :  { %v1021_v6 = vadd.f32 %v1020_v14, %v1019_v54  ;;  %v4814_v14 = vld [vmem:[#allocation6_spill] sm:$0xff] }
 0x201   :  { %v1022_v31 = vrot.slane %v1021_v6, 1 }
 0x203   :  { %v1023_v42 = vadd.f32 %v1022_v31, %v1021_v6  ;;  %v4808_v31 = vld [vmem:[#allocation2_spill] sm:$0xff] }
 0x205   :  { %v1024_v15 = vmul.f32 0.001953125, %v1023_v42 }
 0x207   :  { %v1025_v52 = vadd.f32 1e-05, %v1024_v15  ;;  %v4816_v15 = vld [vmem:[#allocation19_spill] sm:$0xff] }
 0x209   :  { %2096 = vrsqrt.f32 %v1025_v52 }
 0x216   :  { %v2945_v21 = vpop.eup %2096 }
 0x217   :  { %v2949_v44 = vmul.f32 %v2945_v21, %v2503_v34  ;;  %v2953_v39 = vmul.f32 %v2945_v21, %v2507_v8  ;;  %v2956_v28 = vmul.f32 %v2945_v21, %v819_v25  ;;  %v2960_v61 = vmul.f32 %v2945_v21, %v2511_v22  ;;  %v4807_v25 = vld [vmem:[#allocation3_spill] sm:$0xff] }
 0x218   :  { %v2964_v42 = vmul.f32 %v2945_v21, %v2515_v35  ;;  %v2968_v6 = vmul.f32 %v2945_v21, %v2523_v41  ;;  %v2972_v34 = vmul.f32 %v2945_v21, %v2529_v40  ;;  %v2976_v8 = vmul.f32 %v2945_v21, %v2537_v38 }
 0x219   :  { %4806 = vst [vmem:[#allocation21_spill] sm:$0xff] %v2956_v28  ;;  %v2980_v22 = vmul.f32 %v2945_v21, %v2544_v59  ;;  %v2984_v35 = vmul.f32 %v2945_v21, %v2551_v48  ;;  %v2988_v41 = vmul.f32 %v2945_v21, %v2558_v55  ;;  %v2992_v40 = vmul.f32 %v2945_v21, %v2565_v2  ;;  %v4826_v28 = vld [vmem:[#allocation12_spill] sm:$0xff] }
 0x21a   :  { %v2996_v38 = vmul.f32 %v2945_v21, %v2572_v9  ;;  %v3000_v59 = vmul.f32 %v2945_v21, %v2579_v62  ;;  %v3004_v48 = vmul.f32 %v2945_v21, %v2586_v5  ;;  %v3008_v55 = vmul.f32 %v2945_v21, %v2593_v16 }
 0x21b   :  { %v3012_v2 = vmul.f32 %v2945_v21, %v2600_v23  ;;  %v3016_v9 = vmul.f32 %v2945_v21, %v2607_v12  ;;  %v3020_v62 = vmul.f32 %v2945_v21, %v2614_v19  ;;  %v3024_v5 = vmul.f32 %v2945_v21, %v2621_v30 }
 0x21c   :  { %v3028_v16 = vmul.f32 %v2945_v21, %v2628_v37  ;;  %v3032_v23 = vmul.f32 %v2945_v21, %v2635_v26  ;;  %v3036_v12 = vmul.f32 %v2945_v21, %v2642_v33  ;;  %v3040_v19 = vmul.f32 %v2945_v21, %v2649_v51 }
 0x21d   :  { %v3044_v30 = vmul.f32 %v2945_v21, %v2656_v0  ;;  %v3048_v37 = vmul.f32 %v2945_v21, %v2663_v45  ;;  %v3052_v26 = vmul.f32 %v2945_v21, %v2670_v57  ;;  %v3056_v33 = vmul.f32 %v2945_v21, %v2677_v11 }
 0x21e   :  { %v3060_v51 = vmul.f32 %v2945_v21, %v2684_v24  ;;  %v3064_v0 = vmul.f32 %v2945_v21, %v2691_v4  ;;  %v3068_v45 = vmul.f32 %v2945_v21, %v2698_v17  ;;  %v3072_v57 = vmul.f32 %v2945_v21, %v2705_v36 }
 0x21f   :  { %v3076_v11 = vmul.f32 %v2945_v21, %v2712_v60  ;;  %v3080_v24 = vmul.f32 %v2945_v21, %v2719_v29  ;;  %v3084_v4 = vmul.f32 %v2945_v21, %v2726_v47  ;;  %v3088_v17 = vmul.f32 %v2945_v21, %v2733_v49 }
 0x220   :  { %v3092_v36 = vmul.f32 %v2945_v21, %v2740_v63  ;;  %v3096_v60 = vmul.f32 %v2945_v21, %v2747_v43  ;;  %v3100_v29 = vmul.f32 %v2945_v21, %v2754_v56  ;;  %v3104_v47 = vmul.f32 %v2945_v21, %v2761_v13 }
 0x221   :  { %v3108_v49 = vmul.f32 %v2945_v21, %v2768_v27  ;;  %v3112_v63 = vmul.f32 %v2945_v21, %v4807_v25  ;;  %v3116_v43 = vmul.f32 %v2945_v21, %v2782_v20  ;;  %v3120_v56 = vmul.f32 %v2945_v21, %v4808_v31  ;;  %v4818_v25 = vld [vmem:[#allocation9_spill] sm:$0xff] }
 0x222   :  { %v3124_v13 = vmul.f32 %v2945_v21, %v2796_v7  ;;  %v3128_v27 = vmul.f32 %v2945_v21, %v4809_v53  ;;  %v3132_v46 = vmul.f32 %v2945_v21, %v2810_v58  ;;  %v3136_v20 = vmul.f32 %v2945_v21, %v4810_v3  ;;  %v4820_v53 = vld [vmem:[#allocation20_spill] sm:$0xff] }
 0x223   :  { %v3140_v32 = vmul.f32 %v2945_v21, %v4811_v10  ;;  %v3144_v7 = vmul.f32 %v2945_v21, %v4812_v18  ;;  %v3148_v54 = vmul.f32 %v2945_v21, %v4813_v1  ;;  %v3152_v58 = vmul.f32 %v2945_v21, %v4814_v14  ;;  %v3169_v10 = vld [vmem:[%s4687_s2] ss:$0 sm:$0xff]  ;;  %v4822_v18 = vld [vmem:[#allocation8_spill] sm:$0xff] }
 0x224   :  { %v3156_v52 = vmul.f32 %v2945_v21, %v4816_v15  ;;  %v3160_v31 = vmul.f32 %v2945_v21, %v4818_v25  ;;  %v3164_v3 = vmul.f32 %v2945_v21, %v4820_v53  ;;  %v3173_v1 = vmul.f32 %v2945_v21, %v4822_v18  ;;  %v4824_v14 = vld [vmem:[#allocation10_spill] sm:$0xff] }
 0x225   :  { %4815 = vst [vmem:[#allocation3_spill] sm:$0xff] %v3152_v58  ;;  %v3177_v15 = vmul.f32 %v2945_v21, %v4824_v14  ;;  %v3181_v25 = vmul.f32 %v2945_v21, %v4826_v28  ;;  %v4829_v58 = vld [vmem:[#allocation13_spill] sm:$0xff] }
 0x226   :  { %4817 = vst [vmem:[#allocation2_spill] sm:$0xff] %v3156_v52  ;;  %4819 = vst [vmem:[#allocation5_spill] sm:$0xff] %v3160_v31  ;;  %v4827_v31 = vld [vmem:[#allocation14_spill] sm:$0xff]  ;;  %v3193_v18 = vmul.f32 %v2945_v21, %v4829_v58  ;;  %v3213_v58 = vmul.f32 %v3169_v10, %v2953_v39  ;;  %v3237_v39 = vmul.f32 %v3169_v10, %v2980_v22 }
 0x227   :  { %4821 = vst [vmem:[#allocation4_spill] sm:$0xff] %v3164_v3  ;;  %4823 = vst [vmem:[#allocation17_spill] sm:$0xff] %v3173_v1  ;;  %v3185_v53 = vmul.f32 %v2945_v21, %v4827_v31  ;;  %v4828_v3 = vld [vmem:[#allocation11_spill] sm:$0xff]  ;;  %v3205_v31 = vmul.f32 %v2945_v21, %v2932_v50  ;;  %v3225_v50 = vmul.f32 %v3169_v10, %v2968_v6 }
 0x228   :  { %4825 = vst [vmem:[#allocation7_spill] sm:$0xff] %v3177_v15  ;;  %v3189_v52 = vmul.f32 %v2945_v21, %v4828_v3  ;;  %v4830_v1 = vld [vmem:[#allocation15_spill] sm:$0xff]  ;;  %v4831_v15 = vld [vmem:[#allocation16_spill] sm:$0xff]  ;;  %v3209_v3 = vmul.f32 %v3169_v10, %v2949_v44  ;;  %v3233_v44 = vmul.f32 %v3169_v10, %v2976_v8  ;;  %v3249_v6 = vmul.f32 %v3169_v10, %v2992_v40 }
 0x229   :  { %v3197_v14 = vmul.f32 %v2945_v21, %v4830_v1  ;;  %v3201_v28 = vmul.f32 %v2945_v21, %v4831_v15  ;;  %v3217_v1 = vmul.f32 %v3169_v10, %v2960_v61  ;;  %v3221_v15 = vmul.f32 %v3169_v10, %v2964_v42 }
 0x22a   :  { %v3229_v21 = vmul.f32 %v3169_v10, %v2972_v34  ;;  %v3241_v61 = vmul.f32 %v3169_v10, %v2984_v35  ;;  %v3245_v42 = vmul.f32 %v3169_v10, %v2988_v41  ;;  %v3253_v34 = vmul.f32 %v3169_v10, %v2996_v38 }
 0x22b   :  { %v3257_v8 = vmul.f32 %v3169_v10, %v3000_v59  ;;  %v3261_v22 = vmul.f32 %v3169_v10, %v3004_v48  ;;  %v3265_v35 = vmul.f32 %v3169_v10, %v3008_v55  ;;  %v3269_v41 = vmul.f32 %v3169_v10, %v3012_v2 }
 0x22c   :  { %v3273_v40 = vmul.f32 %v3169_v10, %v3016_v9  ;;  %v3277_v38 = vmul.f32 %v3169_v10, %v3020_v62  ;;  %v3281_v59 = vmul.f32 %v3169_v10, %v3024_v5  ;;  %v3285_v48 = vmul.f32 %v3169_v10, %v3028_v16 }
 0x22d   :  { %v3289_v55 = vmul.f32 %v3169_v10, %v3032_v23  ;;  %v3293_v2 = vmul.f32 %v3169_v10, %v3036_v12  ;;  %v3297_v9 = vmul.f32 %v3169_v10, %v3040_v19  ;;  %v3301_v62 = vmul.f32 %v3169_v10, %v3044_v30 }
 0x22e   :  { %v3305_v5 = vmul.f32 %v3169_v10, %v3048_v37  ;;  %v3309_v16 = vmul.f32 %v3169_v10, %v3052_v26  ;;  %v3313_v23 = vmul.f32 %v3169_v10, %v3056_v33  ;;  %v3317_v12 = vmul.f32 %v3169_v10, %v3060_v51 }
 0x22f   :  { %v3321_v19 = vmul.f32 %v3169_v10, %v3064_v0  ;;  %v3325_v30 = vmul.f32 %v3169_v10, %v3068_v45  ;;  %v3329_v37 = vmul.f32 %v3169_v10, %v3072_v57  ;;  %v3333_v26 = vmul.f32 %v3169_v10, %v3076_v11 }
 0x230   :  { %v3337_v33 = vmul.f32 %v3169_v10, %v3080_v24  ;;  %v3341_v51 = vmul.f32 %v3169_v10, %v3084_v4  ;;  %v3345_v0 = vmul.f32 %v3169_v10, %v3088_v17  ;;  %v3349_v45 = vmul.f32 %v3169_v10, %v3092_v36 }
 0x231   :  { %v3353_v57 = vmul.f32 %v3169_v10, %v3096_v60  ;;  %v3357_v11 = vmul.f32 %v3169_v10, %v3100_v29  ;;  %v3361_v24 = vmul.f32 %v3169_v10, %v3104_v47  ;;  %v3365_v4 = vmul.f32 %v3169_v10, %v3108_v49 }
 0x232   :  { %v3369_v17 = vmul.f32 %v3169_v10, %v3112_v63  ;;  %v3373_v36 = vmul.f32 %v3169_v10, %v3116_v43  ;;  %v3377_v60 = vmul.f32 %v3169_v10, %v3120_v56  ;;  %v3381_v29 = vmul.f32 %v3169_v10, %v3124_v13 }
 0x233   :  { %v3385_v47 = vmul.f32 %v3169_v10, %v3128_v27  ;;  %v3389_v49 = vmul.f32 %v3169_v10, %v3132_v46  ;;  %v3393_v63 = vmul.f32 %v3169_v10, %v3136_v20  ;;  %v3397_v43 = vmul.f32 %v3169_v10, %v3140_v32  ;;  %v4836_v27 = vld [vmem:[#allocation3_spill] sm:$0xff] }
 0x234   :  { %v3401_v56 = vmul.f32 %v3169_v10, %v3144_v7  ;;  %v3405_v13 = vmul.f32 %v3169_v10, %v3148_v54  ;;  %v3409_v46 = vmul.f32 %v3169_v10, %v4836_v27  ;;  %v3430_v27 = vld [vmem:[%s4688_s3] ss:$0 sm:$0xff] }
 0x235   :  { %4832 = vst [vmem:[#allocation18_spill] sm:$0xff] %v3389_v49  ;;  %4833 = vst [vmem:[#allocation6_spill] sm:$0xff] %v3393_v63  ;;  %v4838_v49 = vld [vmem:[#allocation2_spill] sm:$0xff]  ;;  %v4840_v63 = vld [vmem:[#allocation5_spill] sm:$0xff] }
 0x236   :  { %4834 = vst [vmem:[#allocation19_spill] sm:$0xff] %v3397_v43  ;;  %4835 = vst [vmem:[#allocation9_spill] sm:$0xff] %v3401_v56  ;;  %v3413_v20 = vmul.f32 %v3169_v10, %v4838_v49  ;;  %v3417_v32 = vmul.f32 %v3169_v10, %v4840_v63  ;;  %v4841_v43 = vld [vmem:[#allocation4_spill] sm:$0xff]  ;;  %v4842_v56 = vld [vmem:[#allocation17_spill] sm:$0xff] }
 0x237   :  { %4837 = vst [vmem:[#allocation20_spill] sm:$0xff] %v3409_v46  ;;  %v3421_v7 = vmul.f32 %v3169_v10, %v4841_v43  ;;  %v3425_v54 = vmul.f32 %v3169_v10, %v4842_v56  ;;  %v4844_v46 = vld [vmem:[#allocation7_spill] sm:$0xff]  ;;  %v3442_v43 = vmul.f32 %v3169_v10, %v3181_v25  ;;  %v3446_v56 = vmul.f32 %v3169_v10, %v3185_v53 }
 0x238   :  { %4839 = vst [vmem:[#allocation8_spill] sm:$0xff] %v3413_v20  ;;  %v3434_v49 = vmul.f32 %v3169_v10, %v4844_v46  ;;  %v4845_v20 = vld [vmem:[#allocation21_spill] sm:$0xff]  ;;  %v3454_v46 = vmul.f32 %v3169_v10, %v3193_v18  ;;  %v3462_v25 = vmul.f32 %v3169_v10, %v3201_v28  ;;  %v3466_v53 = vmul.f32 %v3169_v10, %v3205_v31 }
 0x239   :  { %4843 = vst [vmem:[#allocation10_spill] sm:$0xff] %v3425_v54  ;;  %v3438_v63 = vmul.f32 %v3169_v10, %v4845_v20  ;;  %v3450_v54 = vmul.f32 %v3169_v10, %v3189_v52  ;;  %v3458_v20 = vmul.f32 %v3169_v10, %v3197_v14  ;;  %v3470_v52 = vadd.f32 %v3430_v27, %v3209_v3 }
 0x23a   :  { %v3474_v18 = vadd.f32 %v3430_v27, %v3213_v58  ;;  %v3478_v14 = vadd.f32 %v3430_v27, %v3217_v1  ;;  %v3482_v28 = vadd.f32 %v3430_v27, %v3221_v15  ;;  %v3486_v10 = vadd.f32 %v3430_v27, %v3225_v50 }
 0x23b   :  { %v3490_v31 = vadd.f32 %v3430_v27, %v3229_v21  ;;  %v3494_v3 = vadd.f32 %v3430_v27, %v3233_v44  ;;  %v3498_v58 = vadd.f32 %v3430_v27, %v3237_v39  ;;  %v3502_v1 = vadd.f32 %v3430_v27, %v3241_v61 }
 0x23c   :  { %v3506_v15 = vadd.f32 %v3430_v27, %v3245_v42  ;;  %v3510_v50 = vadd.f32 %v3430_v27, %v3249_v6  ;;  %v3514_v21 = vadd.f32 %v3430_v27, %v3253_v34  ;;  %v3518_v44 = vadd.f32 %v3430_v27, %v3257_v8 }
 0x23d   :  { %v3522_v39 = vadd.f32 %v3430_v27, %v3261_v22  ;;  %v3526_v61 = vadd.f32 %v3430_v27, %v3265_v35  ;;  %v3530_v42 = vadd.f32 %v3430_v27, %v3269_v41  ;;  %v3534_v6 = vadd.f32 %v3430_v27, %v3273_v40 }
 0x23e   :  { %v3538_v34 = vadd.f32 %v3430_v27, %v3277_v38  ;;  %v3542_v8 = vadd.f32 %v3430_v27, %v3281_v59  ;;  %v3546_v22 = vadd.f32 %v3430_v27, %v3285_v48  ;;  %v3550_v35 = vadd.f32 %v3430_v27, %v3289_v55 }
 0x23f   :  { %v3554_v41 = vadd.f32 %v3430_v27, %v3293_v2  ;;  %v3558_v40 = vadd.f32 %v3430_v27, %v3297_v9  ;;  %v3562_v38 = vadd.f32 %v3430_v27, %v3301_v62  ;;  %v3566_v59 = vadd.f32 %v3430_v27, %v3305_v5 }
 0x240   :  { %v3570_v48 = vadd.f32 %v3430_v27, %v3309_v16  ;;  %v3574_v55 = vadd.f32 %v3430_v27, %v3313_v23  ;;  %v3578_v2 = vadd.f32 %v3430_v27, %v3317_v12  ;;  %v3582_v9 = vadd.f32 %v3430_v27, %v3321_v19 }
 0x241   :  { %v3586_v62 = vadd.f32 %v3430_v27, %v3325_v30  ;;  %v3590_v5 = vadd.f32 %v3430_v27, %v3329_v37  ;;  %v3594_v16 = vadd.f32 %v3430_v27, %v3333_v26  ;;  %v3598_v23 = vadd.f32 %v3430_v27, %v3337_v33 }
 0x242   :  { %v3602_v12 = vadd.f32 %v3430_v27, %v3341_v51  ;;  %v3606_v19 = vadd.f32 %v3430_v27, %v3345_v0  ;;  %v3610_v30 = vadd.f32 %v3430_v27, %v3349_v45  ;;  %v3614_v37 = vadd.f32 %v3430_v27, %v3353_v57 }
 0x243   :  { %v3618_v26 = vadd.f32 %v3430_v27, %v3357_v11  ;;  %v3622_v33 = vadd.f32 %v3430_v27, %v3361_v24  ;;  %v3626_v51 = vadd.f32 %v3430_v27, %v3365_v4  ;;  %v3630_v0 = vadd.f32 %v3430_v27, %v3369_v17  ;;  %v4850_v4 = vld [vmem:[#allocation18_spill] sm:$0xff] }
 0x244   :  { %v3634_v45 = vadd.f32 %v3430_v27, %v3373_v36  ;;  %v3638_v57 = vadd.f32 %v3430_v27, %v3377_v60  ;;  %v3642_v11 = vadd.f32 %v3430_v27, %v3381_v29  ;;  %v3646_v24 = vadd.f32 %v3430_v27, %v3385_v47 }
 0x245   :  { %4846 = vst [vmem:[#allocation12_spill] sm:$0xff] %v3630_v0  ;;  %v3650_v17 = vadd.f32 %v3430_v27, %v4850_v4  ;;  %v4852_v0 = vld [vmem:[#allocation6_spill] sm:$0xff]  ;;  %v3666_v47 = vadd.f32 %v3430_v27, %v3405_v13  ;;  %vm1233_vm1 = vcmp.gt.f32.partialorder %v3470_v52, 0.0  ;;  %vm1234_vm2 = vcmp.gt.f32.partialorder %v3474_v18, 0.0 }
 0x246   :  { %4847 = vst [vmem:[#allocation14_spill] sm:$0xff] %v3634_v45  ;;  %4848 = vst [vmem:[#allocation11_spill] sm:$0xff] %v3638_v57  ;;  %v3654_v36 = vadd.f32 %v3430_v27, %v4852_v0  ;;  %v4853_v45 = vld [vmem:[#allocation19_spill] sm:$0xff]  ;;  %v4854_v57 = vld [vmem:[#allocation9_spill] sm:$0xff]  ;;  %vm1235_vm3 = vcmp.gt.f32.partialorder %v3478_v14, 0.0  ;;  %vm1236_vm4 = vcmp.gt.f32.partialorder %v3482_v28, 0.0 }
 0x247   :  { %4849 = vst [vmem:[#allocation13_spill] sm:$0xff] %v3646_v24  ;;  %4851 = vst [vmem:[#allocation15_spill] sm:$0xff] %v3650_v17  ;;  %v3658_v60 = vadd.f32 %v3430_v27, %v4853_v45  ;;  %v3662_v29 = vadd.f32 %v3430_v27, %v4854_v57  ;;  %v4857_v24 = vld [vmem:[#allocation20_spill] sm:$0xff]  ;;  %v3678_v45 = vadd.f32 %v3430_v27, %v3417_v32  ;;  %vm1237_vm5 = vcmp.gt.f32.partialorder %v3486_v10, 0.0 }
 0x248   :  { %4856 = vst [vmem:[#allocation3_spill] sm:$0xff] %v3666_v47  ;;  %v3670_v4 = vadd.f32 %v3430_v27, %v4857_v24  ;;  %v4859_v17 = vld [vmem:[#allocation8_spill] sm:$0xff]  ;;  %v3682_v57 = vadd.f32 %v3430_v27, %v3421_v7  ;;  %v3690_v24 = vadd.f32 %v3430_v27, %v3434_v49  ;;  %v3698_v32 = vadd.f32 %v3430_v27, %v3442_v43 }
 0x249   :  { %4855 = vst [vmem:[#allocation16_spill] sm:$0xff] %v3662_v29  ;;  %v3674_v0 = vadd.f32 %v3430_v27, %v4859_v17  ;;  %4861 = vst [vmem:[#allocation4_spill] sm:$0xff] %v3678_v45  ;;  %v4863_v29 = vld [vmem:[#allocation10_spill] sm:$0xff]  ;;  %v3694_v17 = vadd.f32 %v3430_v27, %v3438_v63  ;;  %v3702_v7 = vadd.f32 %v3430_v27, %v3446_v56  ;;  %vm1238_vm6 = vcmp.gt.f32.partialorder %v3490_v31, 0.0 }
 0x24a   :  { %4858 = vst [vmem:[#allocation2_spill] sm:$0xff] %v3670_v4  ;;  %4862 = vst [vmem:[#allocation17_spill] sm:$0xff] %v3682_v57  ;;  %v3686_v13 = vadd.f32 %v3430_v27, %v4863_v29  ;;  %v3706_v29 = vadd.f32 %v3430_v27, %v3450_v54  ;;  %v3710_v49 = vadd.f32 %v3430_v27, %v3454_v46  ;;  %vm1239_vm7 = vcmp.gt.f32.partialorder %v3494_v3, 0.0 }
 0x24b   :  { %4860 = vst [vmem:[#allocation5_spill] sm:$0xff] %v3674_v0  ;;  %4865 = vst [vmem:[#allocation21_spill] sm:$0xff] %v3690_v24  ;;  %v3714_v63 = vadd.f32 %v3430_v27, %v3458_v20  ;;  %vm1240_vm8 = vcmp.gt.f32.partialorder %v3498_v58, 0.0  ;;  %vm1241_vm9 = vcmp.gt.f32.partialorder %v3502_v1, 0.0  ;;  %v3727_v54 = vadd.f32 %v3430_v27, %v3462_v25 }
 0x24c   :  { %4864 = vst [vmem:[#allocation7_spill] sm:$0xff] %v3686_v13  ;;  %4866 = vst [vmem:[#allocation18_spill] sm:$0xff] %v3694_v17  ;;  %vm1242_vm10 = vcmp.gt.f32.partialorder %v3506_v15, 0.0  ;;  %v1297_v43 = vmul.f32 0.2, %v3470_v52  ;;  %v3735_v20 = vadd.f32 %v3430_v27, %v3466_v53  ;;  %vm1243_vm11 = vcmp.gt.f32.partialorder %v3510_v50, 0.0 }
 0x24d   :  { %4867 = vst [vmem:[#allocation6_spill] sm:$0xff] %v3698_v32  ;;  %4868 = vst [vmem:[#allocation19_spill] sm:$0xff] %v3702_v7  ;;  %v1298_v56 = vmul.f32 0.2, %v3474_v18  ;;  %v1299_v46 = vmul.f32 0.2, %v3478_v14 }
 0x24e   :  { %4869 = vst [vmem:[#allocation9_spill] sm:$0xff] %v3706_v29  ;;  %4870 = vst [vmem:[#allocation20_spill] sm:$0xff] %v3710_v49  ;;  %v1301_v49 = vmul.f32 0.2, %v3486_v10  ;;  %v1302_v25 = vmul.f32 0.2, %v3490_v31  ;;  %v3748_v27 = vsel %vm1233_vm1, %v3470_v52, %v1297_v43 }
 0x24f   :  { %4871 = vst [vmem:[#allocation8_spill] sm:$0xff] %v3714_v63  ;;  %4872 = vst [vmem:[#allocation10_spill] sm:$0xff] %v3727_v54  ;;  %v1300_v63 = vmul.f32 0.2, %v3482_v28  ;;  %vm1244_vm12 = vcmp.gt.f32.partialorder %v3514_v21, 0.0  ;;  %vm1245_vm13 = vcmp.gt.f32.partialorder %v3518_v44, 0.0  ;;  %v3759_v17 = vsel %vm1234_vm2, %v3474_v18, %v1298_v56 }
 0x250   :  { %4873 = vst [vmem:[#allocation22_spill] sm:$0xff] %v3735_v20  ;;  %v1303_v54 = vmul.f32 0.2, %v3494_v3  ;;  %v1304_v29 = vmul.f32 0.2, %v3498_v58  ;;  %4874 = vst [vmem:[#allocation23_spill] sm:$0xff] %v3748_v27  ;;  %v3774_v27 = vsel %vm1235_vm3, %v3478_v14, %v1299_v46 }
 0x251   :  { %v1305_v7 = vmul.f32 0.2, %v3502_v1  ;;  %v1306_v53 = vmul.f32 0.2, %v3506_v15  ;;  %v1307_v20 = vmul.f32 0.2, %v3510_v50  ;;  %v3789_v13 = vsel %vm1236_vm4, %v3482_v28, %v1300_v63 }
 0x252   :  { %v3754_v32 = vmul.f32 0.2, %v3514_v21  ;;  %4875 = vst [vmem:[#allocation24_spill] sm:$0xff] %v3759_v17  ;;  %vm1246_vm14 = vcmp.gt.f32.partialorder %v3522_v39, 0.0  ;;  %v3763_v24 = vmul.f32 0.2, %v3518_v44 }
 0x253   :  { %v3766_v52 = vmul.f32 0.2, %v3522_v39  ;;  %v3769_v43 = vmul.f32 0.2, %v3526_v61  ;;  %4876 = vst [vmem:[#allocation25_spill] sm:$0xff] %v3774_v27  ;;  %vm1247_vm15 = vcmp.gt.f32.partialorder %v3526_v61, 0.0 }
 0x254   :  { %v3778_v18 = vmul.f32 0.2, %v3530_v42  ;;  %v3781_v56 = vmul.f32 0.2, %v3534_v6  ;;  %v3784_v17 = vmul.f32 0.2, %v3538_v34 }
 0x255   :  { %4878 = vst [vmem:[#allocation27_spill] sm:$0xff] %v3789_v13  ;;  %vm1248_vm0 = vcmp.gt.f32.partialorder %v3530_v42, 0.0  ;;  %v3793_v14 = vmul.f32 0.2, %v3542_v8  ;;  %v3796_v46 = vmul.f32 0.2, %v3546_v22 }
 0x256   :  { %4877 = vst [vmem:[#allocation26_spill] sm:$0xff] %v3784_v17  ;;  %v3799_v27 = vmul.f32 0.2, %v3550_v35  ;;  %v3804_v17 = vsel %vm1237_vm5, %v3486_v10, %v1301_v49  ;;  %vm1249_vm1 = vcmp.gt.f32.partialorder %v3534_v6, 0.0  ;;  %v3808_v28 = vmul.f32 0.2, %v3554_v41 }
 0x257   :  { %4880 = vst [vmem:[#allocation29_spill] sm:$0xff] %v3804_v17  ;;  %v3811_v63 = vmul.f32 0.2, %v3558_v40  ;;  %v3814_v13 = vmul.f32 0.2, %v3562_v38  ;;  %vm1250_vm2 = vcmp.gt.f32.partialorder %v3538_v34, 0.0 }
 0x258   :  { %4879 = vst [vmem:[#allocation28_spill] sm:$0xff] %v3799_v27  ;;  %v3819_v27 = vsel %vm1238_vm6, %v3490_v31, %v1302_v25  ;;  %v3823_v10 = vmul.f32 0.2, %v3566_v59  ;;  %v3826_v49 = vmul.f32 0.2, %v3570_v48  ;;  %vm1251_vm3 = vcmp.gt.f32.partialorder %v3542_v8, 0.0 }
 0x259   :  { %4881 = vst [vmem:[#allocation30_spill] sm:$0xff] %v3814_v13  ;;  %4882 = vst [vmem:[#allocation31_spill] sm:$0xff] %v3819_v27  ;;  %v3829_v17 = vmul.f32 0.2, %v3574_v55  ;;  %v3834_v13 = vsel %vm1239_vm7, %v3494_v3, %v1303_v54  ;;  %v3838_v31 = vmul.f32 0.2, %v3578_v2 }
 0x25a   :  { %4884 = vst [vmem:[#allocation33_spill] sm:$0xff] %v3834_v13  ;;  %v3841_v25 = vmul.f32 0.2, %v3582_v9  ;;  %v3844_v27 = vmul.f32 0.2, %v3586_v62  ;;  %vm1252_vm4 = vcmp.gt.f32.partialorder %v3546_v22, 0.0 }
 0x25b   :  { %4883 = vst [vmem:[#allocation32_spill] sm:$0xff] %v3829_v17  ;;  %v3849_v17 = vsel %vm1240_vm8, %v3498_v58, %v1304_v29  ;;  %v3855_v3 = vmul.f32 0.2, %v3590_v5  ;;  %v3858_v54 = vmul.f32 0.2, %v3594_v16  ;;  %v3866_v58 = vsel %vm1241_vm9, %v3502_v1, %v1305_v7 }
 0x25c   :  { %4885 = vst [vmem:[#allocation34_spill] sm:$0xff] %v3849_v17  ;;  %v3861_v13 = vmul.f32 0.2, %v3598_v23  ;;  %4887 = vst [vmem:[#allocation36_spill] sm:$0xff] %v3866_v58  ;;  %vm1255_vm7 = vcmp.gt.f32.partialorder %v3558_v40, 0.0  ;;  %v3884_v1 = vsel %vm1242_vm10, %v3506_v15, %v1306_v53  ;;  %vm1259_vm9 = vcmp.gt.f32.partialorder %v3574_v55, 0.0 }
 0x25d   :  { %v3873_v29 = vmul.f32 0.2, %v3602_v12  ;;  %v3876_v17 = vmul.f32 0.2, %v3606_v19  ;;  %4889 = vst [vmem:[#allocation38_spill] sm:$0xff] %v3884_v1  ;;  %v3902_v15 = vsel %vm1243_vm11, %v3510_v50, %v1307_v20  ;;  %vm1263_vm10 = vcmp.gt.f32.partialorder %v3590_v5, 0.0 }
 0x25e   :  { %4886 = vst [vmem:[#allocation35_spill] sm:$0xff] %v3861_v13  ;;  %v3879_v13 = vmul.f32 0.2, %v3610_v30  ;;  %v3891_v7 = vmul.f32 0.2, %v3614_v37  ;;  %4893 = vst [vmem:[#allocation42_spill] sm:$0xff] %v3902_v15  ;;  %v3921_v50 = vsel %vm1244_vm12, %v3514_v21, %v3754_v32  ;;  %v3940_v21 = vsel %vm1245_vm13, %v3518_v44, %v3763_v24 }
 0x25f   :  { %v3894_v58 = vmul.f32 0.2, %v3618_v26  ;;  %v3909_v53 = vmul.f32 0.2, %v3626_v51  ;;  %v4895_v1 = vld [vmem:[#allocation12_spill] sm:$0xff]  ;;  %4899 = vst [vmem:[#allocation44_spill] sm:$0xff] %v3921_v50  ;;  %v3959_v44 = vsel %vm1246_vm14, %v3522_v39, %v3766_v52  ;;  %v3978_v39 = vsel %vm1247_vm15, %v3526_v61, %v3769_v43 }
 0x260   :  { %4888 = vst [vmem:[#allocation37_spill] sm:$0xff] %v3879_v13  ;;  %4890 = vst [vmem:[#allocation39_spill] sm:$0xff] %v3891_v7  ;;  %v3897_v13 = vmul.f32 0.2, %v3622_v33  ;;  %vm1267_vm11 = vcmp.gt.f32.partialorder %v3606_v19, 0.0  ;;  %v4900_v20 = vld [vmem:[#allocation11_spill] sm:$0xff]  ;;  %v3997_v61 = vsel %vm1248_vm0, %v3530_v42, %v3778_v18  ;;  %v4010_v42 = vsel %vm1249_vm1, %v3534_v6, %v3781_v56 }
 0x261   :  { %4891 = vst [vmem:[#allocation40_spill] sm:$0xff] %v3894_v58  ;;  %4894 = vst [vmem:[#allocation43_spill] sm:$0xff] %v3909_v53  ;;  %v3912_v58 = vmul.f32 0.2, %v4895_v1  ;;  %v3928_v15 = vmul.f32 0.2, %v4900_v20 }
 0x262   :  { %4892 = vst [vmem:[#allocation41_spill] sm:$0xff] %v3897_v13  ;;  %v4897_v13 = vld [vmem:[#allocation14_spill] sm:$0xff]  ;;  %4904 = vst [vmem:[#allocation45_spill] sm:$0xff] %v3940_v21  ;;  %vm1271_vm12 = vcmp.gt.f32.partialorder %v3622_v33, 0.0  ;;  %v4905_v32 = vld [vmem:[#allocation15_spill] sm:$0xff]  ;;  %vm1275_vm13 = vcmp.gt.f32.partialorder %v4900_v20, 0.0 }
 0x263   :  { %4896 = vst [vmem:[#allocation12_spill] sm:$0xff] %v3912_v58  ;;  %v3915_v7 = vmul.f32 0.2, %v4897_v13  ;;  %v3931_v58 = vmul.f32 0.2, %v3642_v11  ;;  %4908 = vst [vmem:[#allocation47_spill] sm:$0xff] %v3959_v44 }
 0x264   :  { %v3947_v50 = vmul.f32 0.2, %v4905_v32  ;;  %v4909_v24 = vld [vmem:[#allocation16_spill] sm:$0xff]  ;;  %4912 = vst [vmem:[#allocation49_spill] sm:$0xff] %v3978_v39  ;;  %vm1279_vm14 = vcmp.gt.f32.partialorder %v3654_v36, 0.0  ;;  %4916 = vst [vmem:[#allocation53_spill] sm:$0xff] %v3997_v61 }
 0x265   :  { %4898 = vst [vmem:[#allocation14_spill] sm:$0xff] %v3915_v7  ;;  %4901 = vst [vmem:[#allocation11_spill] sm:$0xff] %v3931_v58  ;;  %v4902_v7 = vld [vmem:[#allocation13_spill] sm:$0xff]  ;;  %v3950_v58 = vmul.f32 0.2, %v3654_v36  ;;  %vm1283_vm15 = vcmp.gt.f32.partialorder %v3670_v4, 0.0 }
 0x266   :  { %v3934_v53 = vmul.f32 0.2, %v4902_v7  ;;  %v3966_v21 = vmul.f32 0.2, %v4909_v24  ;;  %v3985_v52 = vmul.f32 0.2, %v3674_v0 }
 0x267   :  { %4906 = vst [vmem:[#allocation15_spill] sm:$0xff] %v3950_v58  ;;  %v3969_v58 = vmul.f32 0.2, %v3666_v47  ;;  %v3988_v44 = vmul.f32 0.2, %v3678_v45  ;;  %v4917_v43 = vld [vmem:[#allocation7_spill] sm:$0xff] }
 0x268   :  { %4903 = vst [vmem:[#allocation13_spill] sm:$0xff] %v3934_v53  ;;  %v3953_v53 = vmul.f32 0.2, %v3658_v60  ;;  %4913 = vst [vmem:[#allocation50_spill] sm:$0xff] %v3985_v52  ;;  %v1351_v39 = vmul.f32 0.2, %v4917_v43 }
 0x269   :  { %4910 = vst [vmem:[#allocation16_spill] sm:$0xff] %v3969_v58  ;;  %4914 = vst [vmem:[#allocation51_spill] sm:$0xff] %v3988_v44  ;;  %v4918_v44 = vld [vmem:[#allocation21_spill] sm:$0xff]  ;;  %v4919_v47 = vld [vmem:[#allocation18_spill] sm:$0xff]  ;;  %vm1287_vm0 = vcmp.gt.f32.partialorder %v4917_v43, 0.0  ;;  %vm4931_vm8 = vcmp.gt.f32.partialorder %v3550_v35, 0.0 }
 0x26a   :  { %4907 = vst [vmem:[#allocation46_spill] sm:$0xff] %v3953_v53  ;;  %v3972_v53 = vmul.f32 0.2, %v3670_v4  ;;  %v1352_v52 = vmul.f32 0.2, %v4918_v44  ;;  %4920 = vst [vmem:[#allocation54_spill] sm:$0xff] %v4010_v42 }
 0x26b   :  { %v4921_v18 = vld [vmem:[#allocation6_spill] sm:$0xff]  ;;  %v4923_v0 = vld [vmem:[#allocation9_spill] sm:$0xff]  ;;  %v4926_v56 = vld [vmem:[#allocation20_spill] sm:$0xff] }
 0x26c   :  { %4911 = vst [vmem:[#allocation48_spill] sm:$0xff] %v3972_v53  ;;  %v3991_v53 = vmul.f32 0.2, %v3682_v57  ;;  %v1354_v61 = vmul.f32 0.2, %v4921_v18  ;;  %v4922_v57 = vld [vmem:[#allocation19_spill] sm:$0xff] }
 0x26d   :  { %v1355_v45 = vmul.f32 0.2, %v4922_v57  ;;  %v1356_v4 = vmul.f32 0.2, %v4923_v0  ;;  %v4924_v58 = vld [vmem:[#allocation26_spill] sm:$0xff]  ;;  %vm1291_vm1 = vcmp.gt.f32.partialorder %v4922_v57, 0.0 }
 0x26e   :  { %4915 = vst [vmem:[#allocation52_spill] sm:$0xff] %v3991_v53  ;;  %v1353_v53 = vmul.f32 0.2, %v4919_v47  ;;  %v4023_v6 = vsel %vm1250_vm2, %v3538_v34, %v4924_v58  ;;  %vm1293_vm5 = vcmp.gt.f32.partialorder %v4926_v56, 0.0  ;;  %v4927_v42 = vld [vmem:[#allocation8_spill] sm:$0xff]  ;;  %v4928_v44 = vld [vmem:[#allocation10_spill] sm:$0xff]  ;;  %v4036_v34 = vsel %vm1251_vm3, %v3542_v8, %v3793_v14 }
 0x26f   :  { %4925 = vst [vmem:[#allocation19_spill] sm:$0xff] %v4023_v6  ;;  %v1357_v18 = vmul.f32 0.2, %v4926_v56  ;;  %v1358_v47 = vmul.f32 0.2, %v4927_v42  ;;  %vm1295_vm2 = vcmp.gt.f32.partialorder %v4928_v44, 0.0  ;;  %v4045_v56 = vsel %vm1252_vm4, %v3546_v22, %v3796_v46 }
 0x270   :  { %v1359_v43 = vmul.f32 0.2, %v4928_v44  ;;  %v4929_v58 = vld [vmem:[#allocation22_spill] sm:$0xff]  ;;  %v4930_v42 = vld [vmem:[#allocation28_spill] sm:$0xff]  ;;  %vm4932_vm3 = vcmp.gt.f32.partialorder %v3554_v41, 0.0  ;;  %v4063_v14 = vsel %vm1255_vm7, %v3558_v40, %v3811_v63  ;;  %vm4934_vm4 = vcmp.gt.f32.partialorder %v3562_v38, 0.0 }
 0x271   :  { %vm1296_vm6 = vcmp.gt.f32.partialorder %v4929_v58, 0.0  ;;  %v1360_v6 = vmul.f32 0.2, %v4929_v58  ;;  %v4051_v0 = vsel %vm4931_vm8, %v3550_v35, %v4930_v42  ;;  %v4057_v8 = vsel %vm4932_vm3, %v3554_v41, %v3808_v28  ;;  %v4933_v22 = vld [vmem:[#allocation30_spill] sm:$0xff]  ;;  %v4937_v40 = vld [vmem:[#allocation32_spill] sm:$0xff] }
 0x272   :  { %v4069_v46 = vsel %vm4934_vm4, %v3562_v38, %v4933_v22  ;;  %vm4935_vm8 = vcmp.gt.f32.partialorder %v3566_v59, 0.0  ;;  %vm4936_vm3 = vcmp.gt.f32.partialorder %v3570_v48, 0.0  ;;  %v4087_v28 = vsel %vm1259_vm9, %v3574_v55, %v4937_v40  ;;  %v4971_v40 = vld [vmem:[#allocation2_spill] sm:$0xff] }
 0x273   :  { %v4075_v35 = vsel %vm4935_vm8, %v3566_v59, %v3823_v10  ;;  %v4081_v41 = vsel %vm4936_vm3, %v3570_v48, %v3826_v49  ;;  %vm4938_vm7 = vcmp.gt.f32.partialorder %v3578_v2, 0.0  ;;  %vm4939_vm4 = vcmp.gt.f32.partialorder %v3582_v9, 0.0 }
 0x274   :  { %v4093_v38 = vsel %vm4938_vm7, %v3578_v2, %v3838_v31  ;;  %v4099_v59 = vsel %vm4939_vm4, %v3582_v9, %v3841_v25  ;;  %vm4940_vm8 = vcmp.gt.f32.partialorder %v3586_v62, 0.0  ;;  %vm1681_vm9 = vcmask 125952   ;;  %v4942_v9 = vld [vmem:[#allocation35_spill] sm:$0xff] }
 0x275   :  { %v4105_v48 = vsel %vm4940_vm8, %v3586_v62, %v3844_v27  ;;  %v4111_v55 = vsel %vm1263_vm10, %v3590_v5, %v3855_v3  ;;  %vm4941_vm3 = vcmp.gt.f32.partialorder %v3594_v16, 0.0  ;;  %vm4943_vm7 = vcmp.gt.f32.partialorder %v3598_v23, 0.0 }
 0x276   :  { %v4117_v2 = vsel %vm4941_vm3, %v3594_v16, %v3858_v54  ;;  %v4123_v63 = vsel %vm4943_vm7, %v3598_v23, %v4942_v9  ;;  %vm4944_vm4 = vcmp.gt.f32.partialorder %v3602_v12, 0.0  ;;  %v4135_v5 = vsel %vm1267_vm11, %v3606_v19, %v3876_v17  ;;  %v4945_v16 = vld [vmem:[#allocation37_spill] sm:$0xff]  ;;  %v4947_v23 = vld [vmem:[#allocation39_spill] sm:$0xff] }
 0x277   :  { %v4129_v62 = vsel %vm4944_vm4, %v3602_v12, %v3873_v29  ;;  %vm4946_vm10 = vcmp.gt.f32.partialorder %v3610_v30, 0.0  ;;  %vm4948_vm8 = vcmp.gt.f32.partialorder %v3614_v37, 0.0  ;;  %v4949_v12 = vld [vmem:[#allocation40_spill] sm:$0xff]  ;;  %vm4950_vm3 = vcmp.gt.f32.partialorder %v3618_v26, 0.0  ;;  %v4951_v19 = vld [vmem:[#allocation41_spill] sm:$0xff] }
 0x278   :  { %v4141_v27 = vsel %vm4946_vm10, %v3610_v30, %v4945_v16  ;;  %v4147_v10 = vsel %vm4948_vm8, %v3614_v37, %v4947_v23  ;;  %v4153_v49 = vsel %vm4950_vm3, %v3618_v26, %v4949_v12  ;;  %v4159_v17 = vsel %vm1271_vm12, %v3622_v33, %v4951_v19  ;;  %v4952_v30 = vld [vmem:[#allocation43_spill] sm:$0xff]  ;;  %v4954_v37 = vld [vmem:[#allocation12_spill] sm:$0xff]  ;;  %v4956_v26 = vld [vmem:[#allocation14_spill] sm:$0xff] }
 0x279   :  { %vm4953_vm11 = vcmp.gt.f32.partialorder %v3626_v51, 0.0  ;;  %vm4955_vm7 = vcmp.gt.f32.partialorder %v4895_v1, 0.0  ;;  %vm4957_vm4 = vcmp.gt.f32.partialorder %v4897_v13, 0.0  ;;  %v4183_v33 = vsel %vm1275_vm13, %v4900_v20, %v3928_v15  ;;  %v4960_v29 = vld [vmem:[#allocation13_spill] sm:$0xff]  ;;  %v4963_v15 = vld [vmem:[#allocation15_spill] sm:$0xff]  ;;  %v4978_v19 = vld [vmem:[#allocation52_spill] sm:$0xff] }
 0x27a   :  { %v4165_v31 = vsel %vm4953_vm11, %v3626_v51, %v4952_v30  ;;  %v4171_v25 = vsel %vm4955_vm7, %v4895_v1, %v4954_v37  ;;  %v4177_v3 = vsel %vm4957_vm4, %v4897_v13, %v4956_v26  ;;  %v4958_v51 = vld [vmem:[#allocation11_spill] sm:$0xff]  ;;  %vm4959_vm12 = vcmp.gt.f32.partialorder %v3642_v11, 0.0  ;;  %v4973_v16 = vld [vmem:[#allocation5_spill] sm:$0xff] }
 0x27b   :  { %v4189_v54 = vsel %vm4959_vm12, %v3642_v11, %v4958_v51  ;;  %vm4961_vm10 = vcmp.gt.f32.partialorder %v4902_v7, 0.0  ;;  %vm4962_vm8 = vcmp.gt.f32.partialorder %v4905_v32, 0.0  ;;  %v4207_v20 = vsel %vm1279_vm14, %v3654_v36, %v4963_v15  ;;  %v4964_v11 = vld [vmem:[#allocation46_spill] sm:$0xff]  ;;  %v4970_v36 = vld [vmem:[#allocation48_spill] sm:$0xff]  ;;  %v4979_v30 = vld [vmem:[#allocation17_spill] sm:$0xff] }
 0x27c   :  { %v4195_v1 = vsel %vm4961_vm10, %v4902_v7, %v4960_v29  ;;  %v4201_v13 = vsel %vm4962_vm8, %v4905_v32, %v3947_v50  ;;  %vm4965_vm13 = vcmp.gt.f32.partialorder %v3658_v60, 0.0  ;;  %vm4966_vm3 = vcmp.gt.f32.partialorder %v4909_v24, 0.0  ;;  %v4967_v50 = vld [vmem:[#allocation16_spill] sm:$0xff]  ;;  %v4968_v32 = vld [vmem:[#allocation3_spill] sm:$0xff]  ;;  %v4982_v29 = vld [vmem:[#allocation21_spill] sm:$0xff] }
 0x27d   :  { %v4213_v42 = vsel %vm4965_vm13, %v3658_v60, %v4964_v11  ;;  %v4219_v7 = vsel %vm4966_vm3, %v4909_v24, %v3966_v21  ;;  %vm4969_vm11 = vcmp.gt.f32.partialorder %v4968_v32, 0.0  ;;  %v4231_v9 = vsel %vm1283_vm15, %v4971_v40, %v4970_v36  ;;  %v4972_v60 = vld [vmem:[#allocation50_spill] sm:$0xff]  ;;  %v4975_v21 = vld [vmem:[#allocation51_spill] sm:$0xff]  ;;  %v4976_v24 = vld [vmem:[#allocation4_spill] sm:$0xff] }
 0x27e   :  { %v4225_v22 = vsel %vm4969_vm11, %v4968_v32, %v4967_v50  ;;  %vm4974_vm14 = vcmp.gt.f32.partialorder %v4973_v16, 0.0  ;;  %vm4977_vm7 = vcmp.gt.f32.partialorder %v4976_v24, 0.0  ;;  %vm4980_vm4 = vcmp.gt.f32.partialorder %v4979_v30, 0.0  ;;  %v4981_v26 = vld [vmem:[#allocation7_spill] sm:$0xff]  ;;  %v4984_v11 = vld [vmem:[#allocation18_spill] sm:$0xff]  ;;  %v4988_v40 = vld [vmem:[#allocation9_spill] sm:$0xff] }
 0x27f   :  { %v4237_v23 = vsel %vm4974_vm14, %v4973_v16, %v4972_v60  ;;  %v4243_v12 = vsel %vm4977_vm7, %v4976_v24, %v4975_v21  ;;  %v4249_v37 = vsel %vm4980_vm4, %v4979_v30, %v4978_v19  ;;  %v4254_v51 = vsel %vm1287_vm0, %v4981_v26, %v1351_v39  ;;  %v4986_v32 = vld [vmem:[#allocation6_spill] sm:$0xff]  ;;  %v4990_v60 = vld [vmem:[#allocation20_spill] sm:$0xff]  ;;  %v4995_v19 = vld [vmem:[#allocation25_spill] sm:$0xff] }
 0x280   :  { %vm4983_vm15 = vcmp.gt.f32.partialorder %v4982_v29, 0.0  ;;  %vm4985_vm12 = vcmp.gt.f32.partialorder %v4984_v11, 0.0  ;;  %vm4987_vm10 = vcmp.gt.f32.partialorder %v4986_v32, 0.0  ;;  %v4274_v39 = vsel %vm1291_vm1, %v4922_v57, %v1355_v45  ;;  %v4991_v16 = vld [vmem:[#allocation8_spill] sm:$0xff]  ;;  %v4993_v57 = vld [vmem:[#allocation23_spill] sm:$0xff] }
 0x281   :  { %v4259_v15 = vsel %vm4983_vm15, %v4982_v29, %v1352_v52  ;;  %v4264_v50 = vsel %vm4985_vm12, %v4984_v11, %v1353_v53  ;;  %v4269_v36 = vsel %vm4987_vm10, %v4986_v32, %v1354_v61  ;;  %vm4989_vm0 = vcmp.gt.f32.partialorder %v4988_v40, 0.0  ;;  %v4996_v30 = vld [vmem:[#allocation27_spill] sm:$0xff]  ;;  %v4997_v29 = vld [vmem:[#allocation29_spill] sm:$0xff]  ;;  %v5000_v32 = vld [vmem:[#allocation34_spill] sm:$0xff] }
 0x282   :  { %v4279_v52 = vsel %vm4989_vm0, %v4988_v40, %v1356_v4  ;;  %v4284_v53 = vsel %vm1293_vm5, %v4990_v60, %v1357_v18  ;;  %vm4992_vm8 = vcmp.gt.f32.partialorder %v4991_v16, 0.0  ;;  %v4294_v45 = vsel %vm1295_vm2, %v4928_v44, %v1359_v43  ;;  %v4994_v18 = vld [vmem:[#allocation24_spill] sm:$0xff]  ;;  %v4998_v43 = vld [vmem:[#allocation31_spill] sm:$0xff] }
 0x283   :  { %v4289_v61 = vsel %vm4992_vm8, %v4991_v16, %v1358_v47  ;;  %v4299_v4 = vsel %vm1296_vm6, %v4929_v58, %v1360_v6  ;;  %v1856_v21 = vpack.c.bf16 %v4993_v57, %v4993_v57  ;;  %v1857_v24 = vpack.c.bf16 %v4994_v18, %v4994_v18  ;;  %v4999_v6 = vld [vmem:[#allocation33_spill] sm:$0xff]  ;;  %v5001_v60 = vld [vmem:[#allocation36_spill] sm:$0xff]  ;;  %v5002_v57 = vld [vmem:[#allocation38_spill] sm:$0xff] }
 0x284   :  { %v1858_v47 = vpack.c.bf16 %v4995_v19, %v4995_v19  ;;  %v1859_v26 = vpack.c.bf16 %v4996_v30, %v4996_v30  ;;  %v1860_v44 = vpack.c.bf16 %v4997_v29, %v4997_v29  ;;  %v1861_v11 = vpack.c.bf16 %v4998_v43, %v4998_v43  ;;  %v5003_v19 = vld [vmem:[#allocation42_spill] sm:$0xff]  ;;  %v5004_v29 = vld [vmem:[#allocation44_spill] sm:$0xff] }
 0x285   :  { %v1862_v58 = vpack.c.bf16 %v4999_v6, %v4999_v6  ;;  %v1863_v40 = vpack.c.bf16 %v5000_v32, %v5000_v32  ;;  %v1864_v16 = vpack.c.bf16 %v5001_v60, %v5001_v60  ;;  %v1865_v18 = vpack.c.bf16 %v5002_v57, %v5002_v57  ;;  %1682 = vst.msk [vmem:[%s4689_s4] sm:$0xf] %vm1681_vm9, %v1856_v21  ;;  %v5005_v6 = vld [vmem:[#allocation45_spill] sm:$0xff]  ;;  %v5006_v60 = vld [vmem:[#allocation47_spill] sm:$0xff] }
 0x286   :  { %1683 = vst.msk [vmem:[%s4689_s4 + $0x4] sm:$0xf] %vm1681_vm9, %v1857_v24  ;;  %v1866_v30 = vpack.c.bf16 %v5003_v19, %v5003_v19  ;;  %v1867_v43 = vpack.c.bf16 %v5004_v29, %v5004_v29  ;;  %v1868_v32 = vpack.c.bf16 %v5005_v6, %v5005_v6  ;;  %v1869_v57 = vpack.c.bf16 %v5006_v60, %v5006_v60  ;;  %v5007_v21 = vld [vmem:[#allocation49_spill] sm:$0xff]  ;;  %v5009_v29 = vld [vmem:[#allocation54_spill] sm:$0xff] }
 0x287   :  { %1684 = vst.msk [vmem:[%s4689_s4 + $0x8] sm:$0xf] %vm1681_vm9, %v1858_v47  ;;  %1685 = vst.msk [vmem:[%s4689_s4 + $0xc] sm:$0xf] %vm1681_vm9, %v1859_v26  ;;  %v1870_v24 = vpack.c.bf16 %v5007_v21, %v5007_v21  ;;  %v5008_v19 = vld [vmem:[#allocation53_spill] sm:$0xff]  ;;  %v1872_v6 = vpack.c.bf16 %v5009_v29, %v5009_v29  ;;  %v5010_v26 = vld [vmem:[#allocation19_spill] sm:$0xff] }
 0x288   :  { %1686 = vst.msk [vmem:[%s4689_s4 + $0x10] sm:$0xf] %vm1681_vm9, %v1860_v44  ;;  %1687 = vst.msk [vmem:[%s4689_s4 + $0x14] sm:$0xf] %vm1681_vm9, %v1861_v11  ;;  %v1871_v47 = vpack.c.bf16 %v5008_v19, %v5008_v19  ;;  %v1873_v60 = vpack.c.bf16 %v5010_v26, %v5010_v26  ;;  %v1874_v44 = vpack.c.bf16 %v4036_v34, %v4036_v34 }
 0x289   :  { %1688 = vst.msk [vmem:[%s4689_s4 + $0x18] sm:$0xf] %vm1681_vm9, %v1862_v58  ;;  %1689 = vst.msk [vmem:[%s4689_s4 + $0x1c] sm:$0xf] %vm1681_vm9, %v1863_v40  ;;  %v1875_v11 = vpack.c.bf16 %v4045_v56, %v4045_v56  ;;  %v1876_v58 = vpack.c.bf16 %v4051_v0, %v4051_v0  ;;  %v1877_v40 = vpack.c.bf16 %v4057_v8, %v4057_v8 }
 0x28a   :  { %1690 = vst.msk [vmem:[%s4689_s4 + $0x20] sm:$0xf] %vm1681_vm9, %v1864_v16  ;;  %1691 = vst.msk [vmem:[%s4689_s4 + $0x24] sm:$0xf] %vm1681_vm9, %v1865_v18  ;;  %v1878_v0 = vpack.c.bf16 %v4063_v14, %v4063_v14  ;;  %v1879_v56 = vpack.c.bf16 %v4069_v46, %v4069_v46  ;;  %v1880_v34 = vpack.c.bf16 %v4075_v35, %v4075_v35 }
 0x28b   :  { %1692 = vst.msk [vmem:[%s4689_s4 + $0x28] sm:$0xf] %vm1681_vm9, %v1866_v30  ;;  %1693 = vst.msk [vmem:[%s4689_s4 + $0x2c] sm:$0xf] %vm1681_vm9, %v1867_v43  ;;  %v1881_v8 = vpack.c.bf16 %v4081_v41, %v4081_v41  ;;  %v1882_v14 = vpack.c.bf16 %v4087_v28, %v4087_v28  ;;  %v1883_v46 = vpack.c.bf16 %v4093_v38, %v4093_v38 }
 0x28c   :  { %1694 = vst.msk [vmem:[%s4689_s4 + $0x30] sm:$0xf] %vm1681_vm9, %v1868_v32  ;;  %1695 = vst.msk [vmem:[%s4689_s4 + $0x34] sm:$0xf] %vm1681_vm9, %v1869_v57  ;;  %v1884_v35 = vpack.c.bf16 %v4099_v59, %v4099_v59  ;;  %v1885_v41 = vpack.c.bf16 %v4105_v48, %v4105_v48  ;;  %v1886_v28 = vpack.c.bf16 %v4111_v55, %v4111_v55 }
 0x28d   :  { %1696 = vst.msk [vmem:[%s4689_s4 + $0x38] sm:$0xf] %vm1681_vm9, %v1870_v24  ;;  %1697 = vst.msk [vmem:[%s4689_s4 + $0x3c] sm:$0xf] %vm1681_vm9, %v1871_v47  ;;  %v1887_v38 = vpack.c.bf16 %v4117_v2, %v4117_v2  ;;  %v1888_v59 = vpack.c.bf16 %v4123_v63, %v4123_v63  ;;  %v1889_v48 = vpack.c.bf16 %v4129_v62, %v4129_v62 }
 0x28e   :  { %1698 = vst.msk [vmem:[%s4689_s4 + $0x40] sm:$0xf] %vm1681_vm9, %v1872_v6  ;;  %1699 = vst.msk [vmem:[%s4689_s4 + $0x44] sm:$0xf] %vm1681_vm9, %v1873_v60  ;;  %v1890_v55 = vpack.c.bf16 %v4135_v5, %v4135_v5  ;;  %v1891_v2 = vpack.c.bf16 %v4141_v27, %v4141_v27  ;;  %v1892_v63 = vpack.c.bf16 %v4147_v10, %v4147_v10 }
 0x28f   :  { %1700 = vst.msk [vmem:[%s4689_s4 + $0x48] sm:$0xf] %vm1681_vm9, %v1874_v44  ;;  %1701 = vst.msk [vmem:[%s4689_s4 + $0x4c] sm:$0xf] %vm1681_vm9, %v1875_v11  ;;  %v1893_v62 = vpack.c.bf16 %v4153_v49, %v4153_v49  ;;  %v1894_v5 = vpack.c.bf16 %v4159_v17, %v4159_v17  ;;  %v1895_v27 = vpack.c.bf16 %v4165_v31, %v4165_v31 }
 0x290   :  { %1702 = vst.msk [vmem:[%s4689_s4 + $0x50] sm:$0xf] %vm1681_vm9, %v1876_v58  ;;  %1703 = vst.msk [vmem:[%s4689_s4 + $0x54] sm:$0xf] %vm1681_vm9, %v1877_v40  ;;  %v1896_v10 = vpack.c.bf16 %v4171_v25, %v4171_v25  ;;  %v1897_v49 = vpack.c.bf16 %v4177_v3, %v4177_v3  ;;  %v1898_v17 = vpack.c.bf16 %v4183_v33, %v4183_v33 }
 0x291   :  { %1704 = vst.msk [vmem:[%s4689_s4 + $0x58] sm:$0xf] %vm1681_vm9, %v1878_v0  ;;  %1705 = vst.msk [vmem:[%s4689_s4 + $0x5c] sm:$0xf] %vm1681_vm9, %v1879_v56  ;;  %v1899_v31 = vpack.c.bf16 %v4189_v54, %v4189_v54  ;;  %v1900_v25 = vpack.c.bf16 %v4195_v1, %v4195_v1  ;;  %v1901_v3 = vpack.c.bf16 %v4201_v13, %v4201_v13 }
 0x292   :  { %1706 = vst.msk [vmem:[%s4689_s4 + $0x60] sm:$0xf] %vm1681_vm9, %v1880_v34  ;;  %1707 = vst.msk [vmem:[%s4689_s4 + $0x64] sm:$0xf] %vm1681_vm9, %v1881_v8  ;;  %v1902_v33 = vpack.c.bf16 %v4207_v20, %v4207_v20  ;;  %v1903_v54 = vpack.c.bf16 %v4213_v42, %v4213_v42  ;;  %v1904_v1 = vpack.c.bf16 %v4219_v7, %v4219_v7 }
 0x293   :  { %1708 = vst.msk [vmem:[%s4689_s4 + $0x68] sm:$0xf] %vm1681_vm9, %v1882_v14  ;;  %1709 = vst.msk [vmem:[%s4689_s4 + $0x6c] sm:$0xf] %vm1681_vm9, %v1883_v46  ;;  %v1905_v13 = vpack.c.bf16 %v4225_v22, %v4225_v22  ;;  %v1906_v20 = vpack.c.bf16 %v4231_v9, %v4231_v9  ;;  %v1907_v42 = vpack.c.bf16 %v4237_v23, %v4237_v23 }
 0x294   :  { %1710 = vst.msk [vmem:[%s4689_s4 + $0x70] sm:$0xf] %vm1681_vm9, %v1884_v35  ;;  %1711 = vst.msk [vmem:[%s4689_s4 + $0x74] sm:$0xf] %vm1681_vm9, %v1885_v41  ;;  %v1908_v7 = vpack.c.bf16 %v4243_v12, %v4243_v12  ;;  %v1909_v22 = vpack.c.bf16 %v4249_v37, %v4249_v37  ;;  %v1910_v9 = vpack.c.bf16 %v4254_v51, %v4254_v51 }
 0x295   :  { %1712 = vst.msk [vmem:[%s4689_s4 + $0x78] sm:$0xf] %vm1681_vm9, %v1886_v28  ;;  %1713 = vst.msk [vmem:[%s4689_s4 + $0x7c] sm:$0xf] %vm1681_vm9, %v1887_v38  ;;  %v1911_v23 = vpack.c.bf16 %v4259_v15, %v4259_v15  ;;  %v1912_v12 = vpack.c.bf16 %v4264_v50, %v4264_v50  ;;  %v1913_v37 = vpack.c.bf16 %v4269_v36, %v4269_v36 }
 0x296   :  { %1714 = vst.msk [vmem:[%s4689_s4 + $0x80] sm:$0xf] %vm1681_vm9, %v1888_v59  ;;  %1715 = vst.msk [vmem:[%s4689_s4 + $0x84] sm:$0xf] %vm1681_vm9, %v1889_v48  ;;  %v1914_v51 = vpack.c.bf16 %v4274_v39, %v4274_v39  ;;  %v1915_v15 = vpack.c.bf16 %v4279_v52, %v4279_v52  ;;  %v1916_v50 = vpack.c.bf16 %v4284_v53, %v4284_v53 }
 0x297   :  { %1716 = vst.msk [vmem:[%s4689_s4 + $0x88] sm:$0xf] %vm1681_vm9, %v1890_v55  ;;  %1717 = vst.msk [vmem:[%s4689_s4 + $0x8c] sm:$0xf] %vm1681_vm9, %v1891_v2  ;;  %v1917_v36 = vpack.c.bf16 %v4289_v61, %v4289_v61  ;;  %v1918_v39 = vpack.c.bf16 %v4294_v45, %v4294_v45  ;;  %v1919_v52 = vpack.c.bf16 %v4299_v4, %v4299_v4 }
 0x298   :  { %1718 = vst.msk [vmem:[%s4689_s4 + $0x90] sm:$0xf] %vm1681_vm9, %v1892_v63  ;;  %1719 = vst.msk [vmem:[%s4689_s4 + $0x94] sm:$0xf] %vm1681_vm9, %v1893_v62 }
 0x299   :  { %1720 = vst.msk [vmem:[%s4689_s4 + $0x98] sm:$0xf] %vm1681_vm9, %v1894_v5  ;;  %1721 = vst.msk [vmem:[%s4689_s4 + $0x9c] sm:$0xf] %vm1681_vm9, %v1895_v27 }
 0x29a   :  { %1722 = vst.msk [vmem:[%s4689_s4 + $0xa0] sm:$0xf] %vm1681_vm9, %v1896_v10  ;;  %1723 = vst.msk [vmem:[%s4689_s4 + $0xa4] sm:$0xf] %vm1681_vm9, %v1897_v49 }
 0x29b   :  { %1724 = vst.msk [vmem:[%s4689_s4 + $0xa8] sm:$0xf] %vm1681_vm9, %v1898_v17  ;;  %1725 = vst.msk [vmem:[%s4689_s4 + $0xac] sm:$0xf] %vm1681_vm9, %v1899_v31 }
 0x29c   :  { %1726 = vst.msk [vmem:[%s4689_s4 + $0xb0] sm:$0xf] %vm1681_vm9, %v1900_v25  ;;  %1727 = vst.msk [vmem:[%s4689_s4 + $0xb4] sm:$0xf] %vm1681_vm9, %v1901_v3 }
 0x29d   :  { %1728 = vst.msk [vmem:[%s4689_s4 + $0xb8] sm:$0xf] %vm1681_vm9, %v1902_v33  ;;  %1729 = vst.msk [vmem:[%s4689_s4 + $0xbc] sm:$0xf] %vm1681_vm9, %v1903_v54 }
 0x29e   :  { %1730 = vst.msk [vmem:[%s4689_s4 + $0xc0] sm:$0xf] %vm1681_vm9, %v1904_v1  ;;  %1731 = vst.msk [vmem:[%s4689_s4 + $0xc4] sm:$0xf] %vm1681_vm9, %v1905_v13 }
 0x29f   :  { %1732 = vst.msk [vmem:[%s4689_s4 + $0xc8] sm:$0xf] %vm1681_vm9, %v1906_v20  ;;  %1733 = vst.msk [vmem:[%s4689_s4 + $0xcc] sm:$0xf] %vm1681_vm9, %v1907_v42 }
 0x2a0   :  { %1734 = vst.msk [vmem:[%s4689_s4 + $0xd0] sm:$0xf] %vm1681_vm9, %v1908_v7  ;;  %1735 = vst.msk [vmem:[%s4689_s4 + $0xd4] sm:$0xf] %vm1681_vm9, %v1909_v22 }
 0x2a1   :  { %1736 = vst.msk [vmem:[%s4689_s4 + $0xd8] sm:$0xf] %vm1681_vm9, %v1910_v9  ;;  %1737 = vst.msk [vmem:[%s4689_s4 + $0xdc] sm:$0xf] %vm1681_vm9, %v1911_v23 }
 0x2a2   :  { %1738 = vst.msk [vmem:[%s4689_s4 + $0xe0] sm:$0xf] %vm1681_vm9, %v1912_v12  ;;  %1739 = vst.msk [vmem:[%s4689_s4 + $0xe4] sm:$0xf] %vm1681_vm9, %v1913_v37 }
 0x2a3   :  { %1740 = vst.msk [vmem:[%s4689_s4 + $0xe8] sm:$0xf] %vm1681_vm9, %v1914_v51  ;;  %1741 = vst.msk [vmem:[%s4689_s4 + $0xec] sm:$0xf] %vm1681_vm9, %v1915_v15 }
 0x2a4   :  { %1742 = vst.msk [vmem:[%s4689_s4 + $0xf0] sm:$0xf] %vm1681_vm9, %v1916_v50  ;;  %1743 = vst.msk [vmem:[%s4689_s4 + $0xf4] sm:$0xf] %vm1681_vm9, %v1917_v36 }
 0x2a5   :  { %1744 = vst.msk [vmem:[%s4689_s4 + $0xf8] sm:$0xf] %vm1681_vm9, %v1918_v39  ;;  %1745 = vst.msk [vmem:[%s4689_s4 + $0xfc] sm:$0xf] %vm1681_vm9, %v1919_v52 }

// kernel: discriminator_forward.7
= control target key start
LH: loop header
LB: loop body
LE: loop exit
PB: predicated region body
PF: predicated region fallthrough
CT: control target
= control target key end

     0   :  { %vm339_vm0 = vcmask 261120   ;;  %s1138_s1 = inlined_call_operand.vmem [shape: bf16[256,32], index: 1, kind: input, shape index: {}]   ;;  %s1139_s0 = inlined_call_operand.vmem [shape: bf16[128,256], index: 0, kind: input, shape index: {}]   ;;  %s1140_s2 = inlined_call_operand.vmem [shape: f32[1,32], index: 2, kind: input, shape index: {}]   ;;  %s1141_s3 = inlined_call_operand.vmem [shape: f32[1,32], index: 3, kind: input, shape index: {}]   ;;  %s1142_s4 = inlined_call_operand.vmem [shape: bf16[128,32], index: 4, kind: output, shape index: {}]  }
   0x1   :  { %v792_v0 = vld [vmem:[%s1138_s1 + $0x78] sm:$0xff]   ;;  %v794_v2 = vld [vmem:[%s1138_s1 + $0x70] sm:$0xff]   ;;  %v796_v4 = vld [vmem:[%s1138_s1 + $0x68] sm:$0xff]  }
   0x2   :  { %v793_v1 = vld [vmem:[%s1138_s1 + $0x38] sm:$0xff]   ;;  %712 = vmatprep.subr.bf16.mxu0 %v792_v0  ;;  %776 = vmatprep.subr.bf16.mxu1 %v792_v0  ;;  %v795_v3 = vld [vmem:[%s1138_s1 + $0x30] sm:$0xff]   ;;  %v797_v5 = vld [vmem:[%s1138_s1 + $0x28] sm:$0xff]  }
   0x3   :  { %713 = vmatpush3.bf16.msra.mxu0 %v793_v1  ;;  %784 = vmatpush3.bf16.msra.mxu1 %v793_v1  ;;  %v798_v6 = vld [vmem:[%s1138_s1 + $0x60] sm:$0xff]   ;;  %v800_v8 = vld [vmem:[%s1138_s1 + $0x58] sm:$0xff]   ;;  %v802_v10 = vld [vmem:[%s1138_s1 + $0x50] sm:$0xff]  }
   0x4   :  { %714 = vmatprep.subr.bf16.mxu0 %v794_v2  ;;  %777 = vmatprep.subr.bf16.mxu1 %v794_v2  ;;  %v799_v7 = vld [vmem:[%s1138_s1 + $0x20] sm:$0xff]   ;;  %v801_v9 = vld [vmem:[%s1138_s1 + $0x18] sm:$0xff]   ;;  %v803_v12 = vld [vmem:[%s1138_s1 + $0x10] sm:$0xff]  }
   0x5   :  { %v810_v11 = vld [vmem:[%s1139_s0 + $0x4] ss:$8 sps:$4 sm:$0xff]   ;;  %v808_v18 = vld [vmem:[%s1139_s0] ss:$8 sps:$4 sm:$0xff]   ;;  %v811_v20 = vld [vmem:[%s1139_s0 + $0x14] ss:$8 sps:$4 sm:$0xff]  }
   0x6   :  { %v816_v13 = vld [vmem:[%s1139_s0 + $0x44] ss:$8 sps:$4 sm:$0xff]   ;;  %274 = vmatprep.mubr.bf16.mxu0 %v810_v11  ;;  %v814_v19 = vld [vmem:[%s1139_s0 + $0x40] ss:$8 sps:$4 sm:$0xff]   ;;  %v820_v21 = vld [vmem:[%s1139_s0 + $0x54] ss:$8 sps:$4 sm:$0xff]  }
   0x7   :  { %715 = vmatpush3.bf16.msra.mxu0 %v795_v3  ;;  %785 = vmatpush3.bf16.msra.mxu1 %v795_v3  ;;  %v804_v14 = vld [vmem:[%s1138_s1 + $0x48] sm:$0xff]   ;;  %v806_v16 = vld [vmem:[%s1138_s1 + $0x40] sm:$0xff]   ;;  %v813_v22 = vld [vmem:[%s1139_s0 + $0x10] ss:$8 sps:$4 sm:$0xff]  }
   0x8   :  { %716 = vmatprep.subr.bf16.mxu0 %v796_v4  ;;  %778 = vmatprep.subr.bf16.mxu1 %v796_v4  ;;  %v805_v15 = vld [vmem:[%s1138_s1 + $0x8] sm:$0xff]   ;;  %v807_v17 = vld [vmem:[%s1138_s1] sm:$0xff]   ;;  %v822_v23 = vld [vmem:[%s1139_s0 + $0x50] ss:$8 sps:$4 sm:$0xff]  }
   0x9   :  { %306 = vmatprep.mubr.bf16.mxu1 %v816_v13  ;;  %v817_v24 = vld [vmem:[%s1139_s0 + $0x24] ss:$8 sps:$4 sm:$0xff]   ;;  %v819_v26 = vld [vmem:[%s1139_s0 + $0x20] ss:$8 sps:$4 sm:$0xff]   ;;  %v823_v28 = vld [vmem:[%s1139_s0 + $0x34] ss:$8 sps:$4 sm:$0xff]  }
   0xa   :  { %v826_v25 = vld [vmem:[%s1139_s0 + $0x64] ss:$8 sps:$4 sm:$0xff]   ;;  %v828_v27 = vld [vmem:[%s1139_s0 + $0x60] ss:$8 sps:$4 sm:$0xff]   ;;  %v829_v29 = vld [vmem:[%s1139_s0 + $0x74] ss:$8 sps:$4 sm:$0xff]  }
   0xb   :  { %717 = vmatpush3.bf16.msra.mxu0 %v797_v5  ;;  %786 = vmatpush3.bf16.msra.mxu1 %v797_v5  ;;  %v825_v30 = vld [vmem:[%s1139_s0 + $0x30] ss:$8 sps:$4 sm:$0xff]  }
   0xc   :  { %718 = vmatprep.subr.bf16.mxu0 %v798_v6  ;;  %779 = vmatprep.subr.bf16.mxu1 %v798_v6  ;;  %v831_v31 = vld [vmem:[%s1139_s0 + $0x70] ss:$8 sps:$4 sm:$0xff]  }
   0xf   :  { %719 = vmatpush3.bf16.msra.mxu0 %v799_v7  ;;  %787 = vmatpush3.bf16.msra.mxu1 %v799_v7 }
  0x10   :  { %720 = vmatprep.subr.bf16.mxu0 %v800_v8  ;;  %780 = vmatprep.subr.bf16.mxu1 %v800_v8 }
  0x13   :  { %721 = vmatpush3.bf16.msra.mxu0 %v801_v9  ;;  %788 = vmatpush3.bf16.msra.mxu1 %v801_v9 }
  0x14   :  { %722 = vmatprep.subr.bf16.mxu0 %v802_v10  ;;  %781 = vmatprep.subr.bf16.mxu1 %v802_v10 }
  0x17   :  { %723 = vmatpush3.bf16.msra.mxu0 %v803_v12  ;;  %789 = vmatpush3.bf16.msra.mxu1 %v803_v12 }
  0x18   :  { %724 = vmatprep.subr.bf16.mxu0 %v804_v14  ;;  %782 = vmatprep.subr.bf16.mxu1 %v804_v14 }
  0x1b   :  { %725 = vmatpush3.bf16.msra.mxu0 %v805_v15  ;;  %790 = vmatpush3.bf16.msra.mxu1 %v805_v15 }
  0x1c   :  { %726 = vmatprep.subr.bf16.mxu0 %v806_v16  ;;  %783 = vmatprep.subr.bf16.mxu1 %v806_v16 }
  0x1f   :  { %727 = vmatpush3.bf16.msra.mxu0 %v807_v17  ;;  %791 = vmatpush3.bf16.msra.mxu1 %v807_v17 }
  0x22   :  { %275 = vmatmul.mubr.bf16.vlgmr.msra.gmra.mxu0 %v808_v18  ;;  %307 = vmatmul.mubr.bf16.vlgmr.msra.gmra.mxu1 %v814_v19 }
  0x23   :  { %282 = vmatprep.mubr.bf16.mxu0 %v811_v20  ;;  %314 = vmatprep.mubr.bf16.mxu1 %v820_v21 }
  0x2a   :  { %283 = vmatmul.mubr.bf16.gmra.mxu0 %v813_v22  ;;  %315 = vmatmul.mubr.bf16.gmra.mxu1 %v822_v23 }
  0x2b   :  { %290 = vmatprep.mubr.bf16.mxu0 %v817_v24  ;;  %322 = vmatprep.mubr.bf16.mxu1 %v826_v25 }
  0x32   :  { %291 = vmatmul.mubr.bf16.gmra.mxu0 %v819_v26  ;;  %323 = vmatmul.mubr.bf16.gmra.mxu1 %v828_v27 }
  0x33   :  { %298 = vmatprep.mubr.bf16.mxu0 %v823_v28  ;;  %330 = vmatprep.mubr.bf16.mxu1 %v829_v29 }
  0x3a   :  { %299 = vmatmul.mubr.bf16.gmra.mxu0 %v825_v30  ;;  %331 = vmatmul.mubr.bf16.gmra.mxu1 %v831_v31 }
  0xe2   :  { %v728_v32 = vpop.f32.mrf.mxu0  ;;  %v752_v33 = vpop.f32.mrf.mxu1 }
  0xe4   :  { %v729_v34 = vpop.f32.mrf.mxu0  ;;  %v753_v35 = vpop.f32.mrf.mxu1 }
  0xe5   :  { %v957_v51 = vadd.f32 %v729_v34, %v728_v32  ;;  %v754_v16 = vadd.f32 %v753_v35, %v752_v33 }
  0xe6   :  { %v731_v36 = vpop.f32.mrf.mxu0  ;;  %v755_v37 = vpop.f32.mrf.mxu1 }
  0xe7   :  { %v340_v58 = vsel %vm339_vm0, %v957_v51, 0.0  ;;  %v355_v23 = vsel %vm339_vm0, %v754_v16, 0.0 }
  0xe8   :  { %v732_v38 = vpop.f32.mrf.mxu0  ;;  %v756_v39 = vpop.f32.mrf.mxu1 }
  0xe9   :  { %v955_v48 = vadd.f32 %v732_v38, %v731_v36  ;;  %v757_v19 = vadd.f32 %v756_v39, %v755_v37 }
  0xea   :  { %v734_v40 = vpop.f32.mrf.mxu0  ;;  %v758_v41 = vpop.f32.mrf.mxu1 }
  0xeb   :  { %v341_v55 = vsel %vm339_vm0, %v955_v48, 0.0  ;;  %v357_v26 = vsel %vm339_vm0, %v757_v19, 0.0 }
  0xec   :  { %v735_v42 = vpop.f32.mrf.mxu0  ;;  %v759_v43 = vpop.f32.mrf.mxu1  ;;  %v342_v61 = vadd.f32 %v341_v55, %v340_v58 }
  0xed   :  { %v959_v52 = vadd.f32 %v735_v42, %v734_v40  ;;  %v760_v24 = vadd.f32 %v759_v43, %v758_v41 }
  0xee   :  { %v737_v44 = vpop.f32.mrf.mxu0  ;;  %v761_v45 = vpop.f32.mrf.mxu1 }
  0xef   :  { %v343_v59 = vsel %vm339_vm0, %v959_v52, 0.0  ;;  %v359_v30 = vsel %vm339_vm0, %v760_v24, 0.0 }
  0xf0   :  { %v738_v46 = vpop.f32.mrf.mxu0  ;;  %v762_v47 = vpop.f32.mrf.mxu1  ;;  %v344_v2 = vadd.f32 %v343_v59, %v342_v61 }
  0xf1   :  { %v963_v56 = vadd.f32 %v738_v46, %v737_v44  ;;  %v763_v27 = vadd.f32 %v762_v47, %v761_v45 }
  0xf2   :  { %v740_v49 = vpop.f32.mrf.mxu0  ;;  %v764_v50 = vpop.f32.mrf.mxu1 }
  0xf3   :  { %v345_v0 = vsel %vm339_vm0, %v963_v56, 0.0  ;;  %v361_v33 = vsel %vm339_vm0, %v763_v27, 0.0 }
  0xf4   :  { %v741_v53 = vpop.f32.mrf.mxu0  ;;  %v765_v54 = vpop.f32.mrf.mxu1  ;;  %v346_v5 = vadd.f32 %v345_v0, %v344_v2 }
  0xf5   :  { %v969_v60 = vadd.f32 %v741_v53, %v740_v49  ;;  %v766_v31 = vadd.f32 %v765_v54, %v764_v50 }
  0xf6   :  { %v743_v57 = vpop.f32.mrf.mxu0  ;;  %v767_v63 = vpop.f32.mrf.mxu1 }
  0xf7   :  { %v347_v4 = vsel %vm339_vm0, %v969_v60, 0.0  ;;  %v363_v37 = vsel %vm339_vm0, %v766_v31, 0.0 }
  0xf8   :  { %v744_v62 = vpop.f32.mrf.mxu0  ;;  %v768_v7 = vpop.f32.mrf.mxu1  ;;  %v348_v10 = vadd.f32 %v347_v4, %v346_v5 }
  0xf9   :  { %v745_v1 = vadd.f32 %v744_v62, %v743_v57  ;;  %v769_v34 = vadd.f32 %v768_v7, %v767_v63 }
  0xfa   :  { %v746_v3 = vpop.f32.mrf.mxu0  ;;  %v770_v15 = vpop.f32.mrf.mxu1 }
  0xfb   :  { %v349_v8 = vsel %vm339_vm0, %v745_v1, 0.0  ;;  %v365_v40 = vsel %vm339_vm0, %v769_v34, 0.0 }
  0xfc   :  { %v747_v6 = vpop.f32.mrf.mxu0  ;;  %v350_v13 = vadd.f32 %v349_v8, %v348_v10  ;;  %v771_v22 = vpop.f32.mrf.mxu1 }
  0xfd   :  { %v748_v9 = vadd.f32 %v747_v6, %v746_v3  ;;  %v772_v38 = vadd.f32 %v771_v22, %v770_v15 }
  0xfe   :  { %v749_v11 = vpop.f32.mrf.mxu0  ;;  %v773_v29 = vpop.f32.mrf.mxu1 }
  0xff   :  { %v351_v12 = vsel %vm339_vm0, %v748_v9, 0.0  ;;  %v367_v43 = vsel %vm339_vm0, %v772_v38, 0.0 }
 0x100   :  { %v750_v14 = vpop.f32.mrf.mxu0  ;;  %v352_v18 = vadd.f32 %v351_v12, %v350_v13  ;;  %v774_v36 = vpop.f32.mrf.mxu1 }
 0x101   :  { %v751_v17 = vadd.f32 %v750_v14, %v749_v11  ;;  %v775_v41 = vadd.f32 %v774_v36, %v773_v29 }
 0x103   :  { %v353_v20 = vsel %vm339_vm0, %v751_v17, 0.0  ;;  %v369_v45 = vsel %vm339_vm0, %v775_v41, 0.0 }
 0x104   :  { %v354_v21 = vadd.f32 %v353_v20, %v352_v18 }
 0x106   :  { %v356_v25 = vadd.f32 %v355_v23, %v354_v21 }
 0x108   :  { %v358_v28 = vadd.f32 %v357_v26, %v356_v25 }
 0x10a   :  { %v360_v32 = vadd.f32 %v359_v30, %v358_v28 }
 0x10c   :  { %v362_v35 = vadd.f32 %v361_v33, %v360_v32 }
 0x10e   :  { %v364_v39 = vadd.f32 %v363_v37, %v362_v35 }
 0x110   :  { %v366_v42 = vadd.f32 %v365_v40, %v364_v39 }
 0x112   :  { %v368_v44 = vadd.f32 %v367_v43, %v366_v42 }
 0x114   :  { %v370_v46 = vadd.f32 %v369_v45, %v368_v44 }
 0x116   :  { %v371_v47 = vrot.slane %v370_v46, 4 }
 0x118   :  { %v372_v49 = vadd.f32 %v371_v47, %v370_v46 }
 0x11a   :  { %v373_v50 = vrot.slane %v372_v49, 2 }
 0x11c   :  { %v374_v53 = vadd.f32 %v373_v50, %v372_v49 }
 0x11e   :  { %v375_v54 = vrot.slane %v374_v53, 1 }
 0x120   :  { %v376_v55 = vadd.f32 %v375_v54, %v374_v53 }
 0x122   :  { %v378_v57 = vmul.f32 0.0078125, %v376_v55 }
 0x124   :  { %v987_v58 = vsub.f32 %v957_v51, %v378_v57  ;;  %v990_v59 = vsub.f32 %v955_v48, %v378_v57  ;;  %v993_v61 = vsub.f32 %v959_v52, %v378_v57  ;;  %v996_v62 = vsub.f32 %v963_v56, %v378_v57 }
 0x125   :  { %v1003_v2 = vsub.f32 %v969_v60, %v378_v57  ;;  %v1007_v48 = vsub.f32 %v745_v1, %v378_v57  ;;  %v1013_v5 = vsub.f32 %v748_v9, %v378_v57  ;;  %v1018_v8 = vsub.f32 %v751_v17, %v378_v57 }
 0x126   :  { %v395_v63 = vmul.f32 %v987_v58, %v987_v58  ;;  %v396_v0 = vmul.f32 %v990_v59, %v990_v59  ;;  %v397_v51 = vmul.f32 %v993_v61, %v993_v61  ;;  %v398_v52 = vmul.f32 %v996_v62, %v996_v62 }
 0x127   :  { %v399_v6 = vmul.f32 %v1003_v2, %v1003_v2  ;;  %v400_v1 = vmul.f32 %v1007_v48, %v1007_v48  ;;  %v1023_v12 = vsub.f32 %v754_v16, %v378_v57  ;;  %v401_v9 = vmul.f32 %v1013_v5, %v1013_v5 }
 0x128   :  { %v411_v56 = vsel %vm339_vm0, %v395_v63, 0.0  ;;  %v412_v3 = vsel %vm339_vm0, %v396_v0, 0.0  ;;  %v414_v60 = vsel %vm339_vm0, %v397_v51, 0.0  ;;  %v416_v10 = vsel %vm339_vm0, %v398_v52, 0.0 }
 0x129   :  { %v413_v4 = vadd.f32 %v412_v3, %v411_v56  ;;  %v418_v13 = vsel %vm339_vm0, %v399_v6, 0.0  ;;  %v388_v15 = vsub.f32 %v757_v19, %v378_v57  ;;  %v402_v18 = vmul.f32 %v1018_v8, %v1018_v8 }
 0x12a   :  { %v420_v17 = vsel %vm339_vm0, %v400_v1, 0.0  ;;  %v389_v21 = vsub.f32 %v760_v24, %v378_v57  ;;  %v403_v22 = vmul.f32 %v1023_v12, %v1023_v12  ;;  %v422_v16 = vsel %vm339_vm0, %v401_v9, 0.0 }
 0x12b   :  { %v415_v7 = vadd.f32 %v414_v60, %v413_v4  ;;  %v390_v25 = vsub.f32 %v763_v27, %v378_v57  ;;  %v404_v26 = vmul.f32 %v388_v15, %v388_v15  ;;  %v424_v28 = vsel %vm339_vm0, %v402_v18, 0.0  ;;  %v678_v18 = vld [vmem:[%s1140_s2] ss:$0 sm:$0xff] }
 0x12c   :  { %v391_v30 = vsub.f32 %v766_v31, %v378_v57  ;;  %v405_v19 = vmul.f32 %v389_v21, %v389_v21  ;;  %v426_v32 = vsel %vm339_vm0, %v403_v22, 0.0  ;;  %v392_v35 = vsub.f32 %v769_v34, %v378_v57 }
 0x12d   :  { %v417_v11 = vadd.f32 %v416_v10, %v415_v7  ;;  %v406_v36 = vmul.f32 %v390_v25, %v390_v25  ;;  %v428_v24 = vsel %vm339_vm0, %v404_v26, 0.0  ;;  %v393_v39 = vsub.f32 %v772_v38, %v378_v57 }
 0x12e   :  { %v407_v40 = vmul.f32 %v391_v30, %v391_v30  ;;  %v430_v42 = vsel %vm339_vm0, %v405_v19, 0.0  ;;  %v394_v27 = vsub.f32 %v775_v41, %v378_v57  ;;  %v408_v44 = vmul.f32 %v392_v35, %v392_v35  ;;  %v679_v19 = vld [vmem:[%s1141_s3] ss:$0 sm:$0xff] }
 0x12f   :  { %v419_v14 = vadd.f32 %v418_v13, %v417_v11  ;;  %v432_v45 = vsel %vm339_vm0, %v406_v36, 0.0  ;;  %v409_v31 = vmul.f32 %v393_v39, %v393_v39 }
 0x130   :  { %v434_v47 = vsel %vm339_vm0, %v407_v40, 0.0  ;;  %v410_v50 = vmul.f32 %v394_v27, %v394_v27  ;;  %v436_v34 = vsel %vm339_vm0, %v408_v44, 0.0 }
 0x131   :  { %v421_v20 = vadd.f32 %v420_v17, %v419_v14  ;;  %v438_v54 = vsel %vm339_vm0, %v409_v31, 0.0 }
 0x132   :  { %v440_v55 = vsel %vm339_vm0, %v410_v50, 0.0 }
 0x133   :  { %v423_v23 = vadd.f32 %v422_v16, %v421_v20 }
 0x135   :  { %v425_v29 = vadd.f32 %v424_v28, %v423_v23 }
 0x137   :  { %v427_v33 = vadd.f32 %v426_v32, %v425_v29 }
 0x139   :  { %v429_v37 = vadd.f32 %v428_v24, %v427_v33 }
 0x13b   :  { %v431_v43 = vadd.f32 %v430_v42, %v429_v37 }
 0x13d   :  { %v433_v46 = vadd.f32 %v432_v45, %v431_v43 }
 0x13f   :  { %v435_v49 = vadd.f32 %v434_v47, %v433_v46 }
 0x141   :  { %v437_v53 = vadd.f32 %v436_v34, %v435_v49 }
 0x143   :  { %v439_v38 = vadd.f32 %v438_v54, %v437_v53 }
 0x145   :  { %v441_v63 = vadd.f32 %v440_v55, %v439_v38 }
 0x147   :  { %v442_v0 = vrot.slane %v441_v63, 4 }
 0x149   :  { %v443_v41 = vadd.f32 %v442_v0, %v441_v63 }
 0x14b   :  { %v444_v57 = vrot.slane %v443_v41, 2 }
 0x14d   :  { %v445_v51 = vadd.f32 %v444_v57, %v443_v41 }
 0x14f   :  { %v446_v52 = vrot.slane %v445_v51, 1 }
 0x151   :  { %v447_v56 = vadd.f32 %v446_v52, %v445_v51 }
 0x153   :  { %v448_v3 = vmul.f32 0.0078125, %v447_v56 }
 0x155   :  { %v449_v4 = vadd.f32 1e-05, %v448_v3 }
 0x157   :  { %832 = vrsqrt.f32 %v449_v4 }
 0x164   :  { %v833_v6 = vpop.eup %832 }
 0x165   :  { %v451_v60 = vmul.f32 %v833_v6, %v987_v58  ;;  %v452_v7 = vmul.f32 %v833_v6, %v990_v59  ;;  %v453_v1 = vmul.f32 %v833_v6, %v993_v61  ;;  %v454_v10 = vmul.f32 %v833_v6, %v996_v62 }
 0x166   :  { %v455_v11 = vmul.f32 %v833_v6, %v1003_v2  ;;  %v456_v9 = vmul.f32 %v833_v6, %v1007_v48  ;;  %v457_v13 = vmul.f32 %v833_v6, %v1013_v5  ;;  %v458_v14 = vmul.f32 %v833_v6, %v1018_v8 }
 0x167   :  { %v459_v58 = vmul.f32 %v833_v6, %v1023_v12  ;;  %v460_v17 = vmul.f32 %v833_v6, %v388_v15  ;;  %v461_v59 = vmul.f32 %v833_v6, %v389_v21  ;;  %v462_v20 = vmul.f32 %v833_v6, %v390_v25 }
 0x168   :  { %v463_v61 = vmul.f32 %v833_v6, %v391_v30  ;;  %v464_v22 = vmul.f32 %v833_v6, %v392_v35  ;;  %v465_v62 = vmul.f32 %v833_v6, %v393_v39  ;;  %v466_v16 = vmul.f32 %v833_v6, %v394_v27 }
 0x169   :  { %v474_v2 = vmul.f32 %v678_v18, %v451_v60  ;;  %v475_v23 = vmul.f32 %v678_v18, %v452_v7  ;;  %v476_v48 = vmul.f32 %v678_v18, %v453_v1  ;;  %v477_v26 = vmul.f32 %v678_v18, %v454_v10 }
 0x16a   :  { %v478_v5 = vmul.f32 %v678_v18, %v455_v11  ;;  %v479_v28 = vmul.f32 %v678_v18, %v456_v9  ;;  %v480_v8 = vmul.f32 %v678_v18, %v457_v13  ;;  %v481_v29 = vmul.f32 %v678_v18, %v458_v14 }
 0x16b   :  { %v482_v12 = vmul.f32 %v678_v18, %v459_v58  ;;  %v483_v15 = vmul.f32 %v678_v18, %v460_v17  ;;  %v484_v21 = vmul.f32 %v678_v18, %v461_v59  ;;  %v485_v25 = vmul.f32 %v678_v18, %v462_v20 }
 0x16c   :  { %v486_v30 = vmul.f32 %v678_v18, %v463_v61  ;;  %v487_v32 = vmul.f32 %v678_v18, %v464_v22  ;;  %v488_v33 = vmul.f32 %v678_v18, %v465_v62  ;;  %v489_v35 = vmul.f32 %v678_v18, %v466_v16 }
 0x16d   :  { %v497_v36 = vadd.f32 %v679_v19, %v474_v2  ;;  %v498_v24 = vadd.f32 %v679_v19, %v475_v23  ;;  %v499_v37 = vadd.f32 %v679_v19, %v476_v48  ;;  %v500_v39 = vadd.f32 %v679_v19, %v477_v26 }
 0x16e   :  { %v501_v40 = vadd.f32 %v679_v19, %v478_v5  ;;  %v502_v42 = vadd.f32 %v679_v19, %v479_v28  ;;  %v503_v43 = vadd.f32 %v679_v19, %v480_v8  ;;  %v504_v27 = vadd.f32 %v679_v19, %v481_v29 }
 0x16f   :  { %v505_v44 = vadd.f32 %v679_v19, %v482_v12  ;;  %v506_v45 = vadd.f32 %v679_v19, %v483_v15  ;;  %v507_v46 = vadd.f32 %v679_v19, %v484_v21  ;;  %v508_v31 = vadd.f32 %v679_v19, %v485_v25 }
 0x170   :  { %v509_v47 = vadd.f32 %v679_v19, %v486_v30  ;;  %v510_v49 = vadd.f32 %v679_v19, %v487_v32  ;;  %v511_v50 = vadd.f32 %v679_v19, %v488_v33  ;;  %v512_v34 = vadd.f32 %v679_v19, %v489_v35 }
 0x171   :  { %vm514_vm2 = vcmp.gt.f32.partialorder %v498_v24, 0.0  ;;  %vm515_vm3 = vcmp.gt.f32.partialorder %v499_v37, 0.0  ;;  %vm516_vm4 = vcmp.gt.f32.partialorder %v500_v39, 0.0  ;;  %vm517_vm5 = vcmp.gt.f32.partialorder %v501_v40, 0.0 }
 0x172   :  { %vm518_vm6 = vcmp.gt.f32.partialorder %v502_v42, 0.0  ;;  %vm520_vm8 = vcmp.gt.f32.partialorder %v504_v27, 0.0  ;;  %vm521_vm9 = vcmp.gt.f32.partialorder %v505_v44, 0.0  ;;  %vm522_vm10 = vcmp.gt.f32.partialorder %v506_v45, 0.0 }
 0x173   :  { %vm523_vm11 = vcmp.gt.f32.partialorder %v507_v46, 0.0  ;;  %vm524_vm12 = vcmp.gt.f32.partialorder %v508_v31, 0.0  ;;  %vm525_vm13 = vcmp.gt.f32.partialorder %v509_v47, 0.0  ;;  %vm526_vm14 = vcmp.gt.f32.partialorder %v510_v49, 0.0 }
 0x174   :  { %vm527_vm15 = vcmp.gt.f32.partialorder %v511_v50, 0.0  ;;  %vm528_vm0 = vcmp.gt.f32.partialorder %v512_v34, 0.0  ;;  %v529_v53 = vmul.f32 0.2, %v497_v36  ;;  %v530_v54 = vmul.f32 0.2, %v498_v24 }
 0x175   :  { %v531_v38 = vmul.f32 0.2, %v499_v37  ;;  %v532_v55 = vmul.f32 0.2, %v500_v39  ;;  %v533_v63 = vmul.f32 0.2, %v501_v40 }
 0x176   :  { %v534_v0 = vmul.f32 0.2, %v502_v42  ;;  %v535_v41 = vmul.f32 0.2, %v503_v43  ;;  %v536_v57 = vmul.f32 0.2, %v504_v27  ;;  %v546_v6 = vsel %vm514_vm2, %v498_v24, %v530_v54 }
 0x177   :  { %v537_v51 = vmul.f32 0.2, %v505_v44  ;;  %vm1143_vm7 = vcmp.gt.f32.partialorder %v497_v36, 0.0  ;;  %v538_v56 = vmul.f32 0.2, %v506_v45  ;;  %v547_v10 = vsel %vm515_vm3, %v499_v37, %v531_v38 }
 0x178   :  { %v545_v52 = vsel %vm1143_vm7, %v497_v36, %v529_v53  ;;  %v539_v3 = vmul.f32 0.2, %v507_v46  ;;  %v540_v4 = vmul.f32 0.2, %v508_v31  ;;  %v541_v60 = vmul.f32 0.2, %v509_v47 }
 0x179   :  { %v542_v7 = vmul.f32 0.2, %v510_v49  ;;  %v543_v1 = vmul.f32 0.2, %v511_v50  ;;  %v544_v11 = vmul.f32 0.2, %v512_v34  ;;  %v548_v9 = vsel %vm516_vm4, %v500_v39, %v532_v55 }
 0x17a   :  { %v549_v13 = vsel %vm517_vm5, %v501_v40, %v533_v63  ;;  %v550_v14 = vsel %vm518_vm6, %v502_v42, %v534_v0  ;;  %vm1144_vm1 = vcmp.gt.f32.partialorder %v503_v43, 0.0  ;;  %v552_v58 = vsel %vm520_vm8, %v504_v27, %v536_v57 }
 0x17b   :  { %v551_v18 = vsel %vm1144_vm1, %v503_v43, %v535_v41  ;;  %v553_v17 = vsel %vm521_vm9, %v505_v44, %v537_v51  ;;  %v554_v59 = vsel %vm522_vm10, %v506_v45, %v538_v56  ;;  %v555_v20 = vsel %vm523_vm11, %v507_v46, %v539_v3 }
 0x17c   :  { %v556_v61 = vsel %vm524_vm12, %v508_v31, %v540_v4  ;;  %v557_v22 = vsel %vm525_vm13, %v509_v47, %v541_v60  ;;  %v558_v62 = vsel %vm526_vm14, %v510_v49, %v542_v7  ;;  %v559_v16 = vsel %vm527_vm15, %v511_v50, %v543_v1 }
 0x17d   :  { %v560_v2 = vsel %vm528_vm0, %v512_v34, %v544_v11  ;;  %v696_v23 = vpack.c.bf16 %v545_v52, %v545_v52  ;;  %v697_v48 = vpack.c.bf16 %v546_v6, %v546_v6  ;;  %v698_v26 = vpack.c.bf16 %v547_v10, %v547_v10 }
 0x17e   :  { %v699_v5 = vpack.c.bf16 %v548_v9, %v548_v9  ;;  %v700_v28 = vpack.c.bf16 %v549_v13, %v549_v13  ;;  %v701_v8 = vpack.c.bf16 %v550_v14, %v550_v14  ;;  %v702_v29 = vpack.c.bf16 %v551_v18, %v551_v18 }
 0x17f   :  { %v703_v19 = vpack.c.bf16 %v552_v58, %v552_v58  ;;  %v704_v12 = vpack.c.bf16 %v553_v17, %v553_v17  ;;  %v705_v15 = vpack.c.bf16 %v554_v59, %v554_v59  ;;  %vm1145_vm1 = vcmask 257024  }
 0x180   :  { %626 = vst.msk [vmem:[%s1142_s4] sm:$0xf] %vm1145_vm1, %v696_v23  ;;  %vm1146_vm2 = vmmov %vm1145_vm1  ;;  %v706_v21 = vpack.c.bf16 %v555_v20, %v555_v20  ;;  %v707_v25 = vpack.c.bf16 %v556_v61, %v556_v61  ;;  %v708_v30 = vpack.c.bf16 %v557_v22, %v557_v22  ;;  %v709_v32 = vpack.c.bf16 %v558_v62, %v558_v62 }
 0x181   :  { %627 = vst.msk [vmem:[%s1142_s4 + $0x4] sm:$0xf] %vm1146_vm2, %v697_v48  ;;  %vm1147_vm3 = vmmov %vm1145_vm1  ;;  %v710_v33 = vpack.c.bf16 %v559_v16, %v559_v16  ;;  %v711_v35 = vpack.c.bf16 %v560_v2, %v560_v2 }
 0x182   :  { %628 = vst.msk [vmem:[%s1142_s4 + $0x8] sm:$0xf] %vm1147_vm3, %v698_v26  ;;  %vm1148_vm4 = vmmov %vm1145_vm1 }
 0x183   :  { %629 = vst.msk [vmem:[%s1142_s4 + $0xc] sm:$0xf] %vm1148_vm4, %v699_v5  ;;  %vm1149_vm5 = vmmov %vm1145_vm1 }
 0x184   :  { %630 = vst.msk [vmem:[%s1142_s4 + $0x10] sm:$0xf] %vm1149_vm5, %v700_v28  ;;  %vm1150_vm6 = vmmov %vm1145_vm1 }
 0x185   :  { %631 = vst.msk [vmem:[%s1142_s4 + $0x14] sm:$0xf] %vm1150_vm6, %v701_v8  ;;  %vm1151_vm7 = vmmov %vm1145_vm1 }
 0x186   :  { %632 = vst.msk [vmem:[%s1142_s4 + $0x18] sm:$0xf] %vm1151_vm7, %v702_v29  ;;  %vm1152_vm8 = vmmov %vm1145_vm1 }
 0x187   :  { %633 = vst.msk [vmem:[%s1142_s4 + $0x1c] sm:$0xf] %vm1152_vm8, %v703_v19  ;;  %vm1153_vm9 = vmmov %vm1145_vm1 }
 0x188   :  { %634 = vst.msk [vmem:[%s1142_s4 + $0x20] sm:$0xf] %vm1153_vm9, %v704_v12  ;;  %vm1154_vm10 = vmmov %vm1145_vm1 }
 0x189   :  { %635 = vst.msk [vmem:[%s1142_s4 + $0x24] sm:$0xf] %vm1154_vm10, %v705_v15  ;;  %vm1155_vm11 = vmmov %vm1145_vm1 }
 0x18a   :  { %636 = vst.msk [vmem:[%s1142_s4 + $0x28] sm:$0xf] %vm1155_vm11, %v706_v21  ;;  %vm1156_vm12 = vmmov %vm1145_vm1 }
 0x18b   :  { %637 = vst.msk [vmem:[%s1142_s4 + $0x2c] sm:$0xf] %vm1156_vm12, %v707_v25  ;;  %vm1157_vm13 = vmmov %vm1145_vm1 }
 0x18c   :  { %638 = vst.msk [vmem:[%s1142_s4 + $0x30] sm:$0xf] %vm1157_vm13, %v708_v30  ;;  %vm1158_vm14 = vmmov %vm1145_vm1 }
 0x18d   :  { %639 = vst.msk [vmem:[%s1142_s4 + $0x34] sm:$0xf] %vm1158_vm14, %v709_v32  ;;  %vm1159_vm15 = vmmov %vm1145_vm1 }
 0x18e   :  { %640 = vst.msk [vmem:[%s1142_s4 + $0x38] sm:$0xf] %vm1159_vm15, %v710_v33  ;;  %vm1160_vm0 = vmmov %vm1145_vm1 }
 0x18f   :  { %641 = vst.msk [vmem:[%s1142_s4 + $0x3c] sm:$0xf] %vm1160_vm0, %v711_v35 }

// kernel: discriminator_forward.8
= control target key start
LH: loop header
LB: loop body
LE: loop exit
PB: predicated region body
PF: predicated region fallthrough
CT: control target
= control target key end

     0   :  { %vm420_vm0 = vcmask 523264   ;;  %vm514_vm5 = vcmask 519168   ;;  %s846_s1 = inlined_call_operand.vmem [shape: bf16[512,64], index: 1, kind: input, shape index: {}]   ;;  %s847_s0 = inlined_call_operand.vmem [shape: bf16[32,512], index: 0, kind: input, shape index: {}]   ;;  %s848_s2 = inlined_call_operand.vmem [shape: f32[1,64], index: 2, kind: input, shape index: {}]   ;;  %s849_s3 = inlined_call_operand.vmem [shape: f32[1,64], index: 3, kind: input, shape index: {}]   ;;  %s850_s4 = inlined_call_operand.vmem [shape: bf16[32,64], index: 4, kind: output, shape index: {}]  }
   0x1   :  { %v629_v0 = vld [vmem:[%s846_s1 + $0x78] sm:$0xff]   ;;  %v633_v4 = vld [vmem:[%s846_s1 + $0x70] sm:$0xff]   ;;  %v637_v8 = vld [vmem:[%s846_s1 + $0x68] sm:$0xff]  }
   0x2   :  { %v630_v1 = vld [vmem:[%s846_s1 + $0xf8] sm:$0xff]   ;;  %573 = vmatprep.subr.bf16.mxu0 %v629_v0  ;;  %v634_v5 = vld [vmem:[%s846_s1 + $0xf0] sm:$0xff]   ;;  %v638_v9 = vld [vmem:[%s846_s1 + $0xe8] sm:$0xff]  }
   0x3   :  { %v631_v2 = vld [vmem:[%s846_s1 + $0x38] sm:$0xff]   ;;  %601 = vmatprep.subr.bf16.mxu1 %v630_v1  ;;  %v635_v6 = vld [vmem:[%s846_s1 + $0x30] sm:$0xff]   ;;  %v639_v10 = vld [vmem:[%s846_s1 + $0x28] sm:$0xff]  }
   0x4   :  { %v632_v3 = vld [vmem:[%s846_s1 + $0xb8] sm:$0xff]   ;;  %574 = vmatpush3.bf16.msra.mxu0 %v631_v2  ;;  %v636_v7 = vld [vmem:[%s846_s1 + $0xb0] sm:$0xff]   ;;  %v640_v11 = vld [vmem:[%s846_s1 + $0xa8] sm:$0xff]  }
   0x5   :  { %602 = vmatpush3.bf16.msra.mxu1 %v632_v3  ;;  %575 = vmatprep.subr.bf16.mxu0 %v633_v4  ;;  %v641_v12 = vld [vmem:[%s846_s1 + $0x60] sm:$0xff]   ;;  %v645_v16 = vld [vmem:[%s846_s1 + $0x58] sm:$0xff]   ;;  %v649_v20 = vld [vmem:[%s846_s1 + $0x50] sm:$0xff]  }
   0x6   :  { %603 = vmatprep.subr.bf16.mxu1 %v634_v5  ;;  %v642_v13 = vld [vmem:[%s846_s1 + $0xe0] sm:$0xff]   ;;  %v646_v17 = vld [vmem:[%s846_s1 + $0xd8] sm:$0xff]   ;;  %v650_v21 = vld [vmem:[%s846_s1 + $0xd0] sm:$0xff]  }
   0x7   :  { %v643_v14 = vld [vmem:[%s846_s1 + $0x20] sm:$0xff]   ;;  %v647_v18 = vld [vmem:[%s846_s1 + $0x18] sm:$0xff]   ;;  %v651_v22 = vld [vmem:[%s846_s1 + $0x10] sm:$0xff]  }
   0x8   :  { %576 = vmatpush3.bf16.msra.mxu0 %v635_v6  ;;  %v644_v15 = vld [vmem:[%s846_s1 + $0xa0] sm:$0xff]   ;;  %v648_v19 = vld [vmem:[%s846_s1 + $0x98] sm:$0xff]   ;;  %v652_v23 = vld [vmem:[%s846_s1 + $0x90] sm:$0xff]  }
   0x9   :  { %604 = vmatpush3.bf16.msra.mxu1 %v636_v7  ;;  %577 = vmatprep.subr.bf16.mxu0 %v637_v8  ;;  %v653_v24 = vld [vmem:[%s846_s1 + $0x48] sm:$0xff]   ;;  %v657_v28 = vld [vmem:[%s846_s1 + $0x40] sm:$0xff]  }
   0xa   :  { %605 = vmatprep.subr.bf16.mxu1 %v638_v9  ;;  %v654_v25 = vld [vmem:[%s846_s1 + $0xc8] sm:$0xff]   ;;  %v658_v29 = vld [vmem:[%s846_s1 + $0xc0] sm:$0xff]  }
   0xb   :  { %v655_v26 = vld [vmem:[%s846_s1 + $0x8] sm:$0xff]   ;;  %v659_v30 = vld [vmem:[%s846_s1] sm:$0xff]  }
   0xc   :  { %578 = vmatpush3.bf16.msra.mxu0 %v639_v10  ;;  %v656_v27 = vld [vmem:[%s846_s1 + $0x88] sm:$0xff]   ;;  %v660_v31 = vld [vmem:[%s846_s1 + $0x80] sm:$0xff]  }
   0xd   :  { %606 = vmatpush3.bf16.msra.mxu1 %v640_v11  ;;  %579 = vmatprep.subr.bf16.mxu0 %v641_v12  ;;  %v661_v32 = vld [vmem:[%s847_s0] ss:$16 sps:$4 sm:$0xff]   ;;  %v663_v33 = vld [vmem:[%s847_s0 + $0x4] ss:$16 sps:$4 sm:$0xff]   ;;  %v664_v34 = vld [vmem:[%s847_s0 + $0x8] ss:$16 sps:$4 sm:$0xff]  }
   0xe   :  { %607 = vmatprep.subr.bf16.mxu1 %v642_v13  ;;  %v666_v35 = vld [vmem:[%s847_s0 + $0xc] ss:$16 sps:$4 sm:$0xff]   ;;  %354 = vmatprep.mubr.bf16.mxu0 %v663_v33  ;;  %v667_v36 = vld [vmem:[%s847_s0 + $0x24] ss:$16 sps:$4 sm:$0xff]   ;;  %v671_v38 = vld [vmem:[%s847_s0 + $0x20] ss:$16 sps:$4 sm:$0xff]  }
   0xf   :  { %403 = vmatprep.mubr.bf16.mxu1 %v666_v35  ;;  %v669_v37 = vld [vmem:[%s847_s0 + $0x2c] ss:$16 sps:$4 sm:$0xff]   ;;  %v672_v39 = vld [vmem:[%s847_s0 + $0x28] ss:$16 sps:$4 sm:$0xff]  }
  0x10   :  { %580 = vmatpush3.bf16.msra.mxu0 %v643_v14 }
  0x11   :  { %608 = vmatpush3.bf16.msra.mxu1 %v644_v15  ;;  %581 = vmatprep.subr.bf16.mxu0 %v645_v16 }
  0x12   :  { %609 = vmatprep.subr.bf16.mxu1 %v646_v17 }
  0x14   :  { %582 = vmatpush3.bf16.msra.mxu0 %v647_v18 }
  0x15   :  { %610 = vmatpush3.bf16.msra.mxu1 %v648_v19  ;;  %583 = vmatprep.subr.bf16.mxu0 %v649_v20 }
  0x16   :  { %611 = vmatprep.subr.bf16.mxu1 %v650_v21 }
  0x18   :  { %584 = vmatpush3.bf16.msra.mxu0 %v651_v22 }
  0x19   :  { %612 = vmatpush3.bf16.msra.mxu1 %v652_v23  ;;  %585 = vmatprep.subr.bf16.mxu0 %v653_v24 }
  0x1a   :  { %613 = vmatprep.subr.bf16.mxu1 %v654_v25 }
  0x1c   :  { %586 = vmatpush3.bf16.msra.mxu0 %v655_v26 }
  0x1d   :  { %614 = vmatpush3.bf16.msra.mxu1 %v656_v27  ;;  %587 = vmatprep.subr.bf16.mxu0 %v657_v28 }
  0x1e   :  { %615 = vmatprep.subr.bf16.mxu1 %v658_v29 }
  0x20   :  { %588 = vmatpush3.bf16.msra.mxu0 %v659_v30 }
  0x21   :  { %616 = vmatpush3.bf16.msra.mxu1 %v660_v31 }
  0x23   :  { %355 = vmatmul.mubr.bf16.vlgmr.msra.gmra.mxu0 %v661_v32 }
  0x24   :  { %404 = vmatmul.mubr.bf16.vlgmr.msra.gmra.mxu1 %v664_v34  ;;  %362 = vmatprep.mubr.bf16.mxu0 %v667_v36 }
  0x25   :  { %411 = vmatprep.mubr.bf16.mxu1 %v669_v37 }
  0x2b   :  { %363 = vmatmul.mubr.bf16.gmra.mxu0 %v671_v38 }
  0x2c   :  { %412 = vmatmul.mubr.bf16.gmra.mxu1 %v672_v39 }
  0xe3   :  { %v589_v40 = vpop.f32.mrf.mxu0 }
  0xe4   :  { %v617_v41 = vpop.f32.mrf.mxu1 }
  0xe5   :  { %v590_v42 = vpop.f32.mrf.mxu0 }
  0xe6   :  { %v618_v43 = vpop.f32.mrf.mxu1  ;;  %v591_v49 = vadd.f32 %v590_v42, %v589_v40  ;;  %v563_v42 = vld [vmem:[%s848_s2] ss:$0 sm:$0xff] }
  0xe7   :  { %v592_v44 = vpop.f32.mrf.mxu0  ;;  %v619_v50 = vadd.f32 %v618_v43, %v617_v41 }
  0xe8   :  { %v620_v45 = vpop.f32.mrf.mxu1 }
  0xe9   :  { %v593_v46 = vpop.f32.mrf.mxu0  ;;  %v406_v58 = vadd.f32 %v619_v50, %v591_v49 }
  0xea   :  { %v594_v47 = vadd.f32 %v593_v46, %v592_v44  ;;  %v621_v48 = vpop.f32.mrf.mxu1 }
  0xeb   :  { %v622_v51 = vadd.f32 %v621_v48, %v620_v45  ;;  %v595_v52 = vpop.f32.mrf.mxu0  ;;  %v421_v3 = vsel %vm420_vm0, %v406_v58, 0.0 }
  0xec   :  { %v623_v53 = vpop.f32.mrf.mxu1 }
  0xed   :  { %v409_v54 = vadd.f32 %v622_v51, %v594_v47  ;;  %v596_v55 = vpop.f32.mrf.mxu0  ;;  %v564_v47 = vld [vmem:[%s849_s3] ss:$0 sm:$0xff] }
  0xee   :  { %v597_v56 = vadd.f32 %v596_v55, %v595_v52  ;;  %v624_v57 = vpop.f32.mrf.mxu1 }
  0xef   :  { %v625_v59 = vadd.f32 %v624_v57, %v623_v53  ;;  %v598_v60 = vpop.f32.mrf.mxu0  ;;  %v422_v62 = vsel %vm420_vm0, %v409_v54, 0.0 }
  0xf0   :  { %v626_v61 = vpop.f32.mrf.mxu1  ;;  %v423_v6 = vadd.f32 %v422_v62, %v421_v3 }
  0xf1   :  { %v414_v63 = vadd.f32 %v625_v59, %v597_v56  ;;  %v599_v0 = vpop.f32.mrf.mxu0 }
  0xf2   :  { %v600_v1 = vadd.f32 %v599_v0, %v598_v60  ;;  %v627_v2 = vpop.f32.mrf.mxu1 }
  0xf3   :  { %v424_v4 = vsel %vm420_vm0, %v414_v63, 0.0  ;;  %v628_v5 = vadd.f32 %v627_v2, %v626_v61 }
  0xf4   :  { %v425_v8 = vadd.f32 %v424_v4, %v423_v6 }
  0xf5   :  { %v417_v7 = vadd.f32 %v628_v5, %v600_v1 }
  0xf7   :  { %v426_v9 = vsel %vm420_vm0, %v417_v7, 0.0 }
  0xf8   :  { %v427_v10 = vadd.f32 %v426_v9, %v425_v8 }
  0xfa   :  { %v428_v11 = vrot.slane %v427_v10, 4 }
  0xfc   :  { %v429_v12 = vadd.f32 %v428_v11, %v427_v10 }
  0xfe   :  { %v430_v13 = vrot.slane %v429_v12, 2 }
 0x100   :  { %v431_v14 = vadd.f32 %v430_v13, %v429_v12 }
 0x102   :  { %v432_v15 = vrot.slane %v431_v14, 1 }
 0x104   :  { %v433_v16 = vadd.f32 %v432_v15, %v431_v14 }
 0x106   :  { %v435_v17 = vmul.f32 0.03125, %v433_v16 }
 0x108   :  { %v436_v18 = vsub.f32 %v406_v58, %v435_v17  ;;  %v437_v19 = vsub.f32 %v409_v54, %v435_v17  ;;  %v438_v20 = vsub.f32 %v414_v63, %v435_v17  ;;  %v439_v21 = vsub.f32 %v417_v7, %v435_v17 }
 0x10a   :  { %v440_v22 = vmul.f32 %v436_v18, %v436_v18  ;;  %v441_v23 = vmul.f32 %v437_v19, %v437_v19  ;;  %v442_v24 = vmul.f32 %v438_v20, %v438_v20  ;;  %v443_v25 = vmul.f32 %v439_v21, %v439_v21 }
 0x10c   :  { %v444_v26 = vsel %vm420_vm0, %v440_v22, 0.0  ;;  %v445_v27 = vsel %vm420_vm0, %v441_v23, 0.0  ;;  %v447_v29 = vsel %vm420_vm0, %v442_v24, 0.0  ;;  %v449_v31 = vsel %vm420_vm0, %v443_v25, 0.0 }
 0x10d   :  { %v446_v28 = vadd.f32 %v445_v27, %v444_v26 }
 0x10f   :  { %v448_v30 = vadd.f32 %v447_v29, %v446_v28 }
 0x111   :  { %v450_v32 = vadd.f32 %v449_v31, %v448_v30 }
 0x113   :  { %v451_v33 = vrot.slane %v450_v32, 4 }
 0x115   :  { %v452_v34 = vadd.f32 %v451_v33, %v450_v32 }
 0x117   :  { %v453_v35 = vrot.slane %v452_v34, 2 }
 0x119   :  { %v454_v36 = vadd.f32 %v453_v35, %v452_v34 }
 0x11b   :  { %v455_v37 = vrot.slane %v454_v36, 1 }
 0x11d   :  { %v456_v38 = vadd.f32 %v455_v37, %v454_v36 }
 0x11f   :  { %v457_v39 = vmul.f32 0.03125, %v456_v38 }
 0x121   :  { %v458_v40 = vadd.f32 1e-05, %v457_v39 }
 0x123   :  { %673 = vrsqrt.f32 %v458_v40 }
 0x130   :  { %v674_v41 = vpop.eup %673 }
 0x131   :  { %v460_v43 = vmul.f32 %v674_v41, %v436_v18  ;;  %v461_v44 = vmul.f32 %v674_v41, %v437_v19  ;;  %v462_v45 = vmul.f32 %v674_v41, %v438_v20  ;;  %v463_v46 = vmul.f32 %v674_v41, %v439_v21 }
 0x133   :  { %v471_v48 = vmul.f32 %v563_v42, %v460_v43  ;;  %v472_v49 = vmul.f32 %v563_v42, %v461_v44  ;;  %v473_v50 = vmul.f32 %v563_v42, %v462_v45  ;;  %v474_v51 = vmul.f32 %v563_v42, %v463_v46 }
 0x135   :  { %v482_v52 = vadd.f32 %v564_v47, %v471_v48  ;;  %v483_v53 = vadd.f32 %v564_v47, %v472_v49  ;;  %v484_v54 = vadd.f32 %v564_v47, %v473_v50  ;;  %v485_v55 = vadd.f32 %v564_v47, %v474_v51 }
 0x137   :  { %vm486_vm1 = vcmp.gt.f32.partialorder %v482_v52, 0.0  ;;  %vm487_vm2 = vcmp.gt.f32.partialorder %v483_v53, 0.0  ;;  %vm488_vm3 = vcmp.gt.f32.partialorder %v484_v54, 0.0  ;;  %vm489_vm4 = vcmp.gt.f32.partialorder %v485_v55, 0.0 }
 0x138   :  { %v490_v56 = vmul.f32 0.2, %v482_v52  ;;  %v491_v57 = vmul.f32 0.2, %v483_v53  ;;  %v492_v58 = vmul.f32 0.2, %v484_v54 }
 0x139   :  { %v493_v59 = vmul.f32 0.2, %v485_v55 }
 0x13a   :  { %v494_v60 = vsel %vm486_vm1, %v482_v52, %v490_v56  ;;  %v495_v61 = vsel %vm487_vm2, %v483_v53, %v491_v57  ;;  %v496_v62 = vsel %vm488_vm3, %v484_v54, %v492_v58 }
 0x13b   :  { %v497_v63 = vsel %vm489_vm4, %v485_v55, %v493_v59  ;;  %v569_v0 = vpack.c.bf16 %v494_v60, %v494_v60  ;;  %v570_v1 = vpack.c.bf16 %v495_v61, %v495_v61  ;;  %v571_v2 = vpack.c.bf16 %v496_v62, %v496_v62 }
 0x13c   :  { %v572_v3 = vpack.c.bf16 %v497_v63, %v497_v63 }
 0x13d   :  { %515 = vst.msk [vmem:[%s850_s4] sm:$0xf] %vm514_vm5, %v569_v0  ;;  %516 = vst.msk [vmem:[%s850_s4 + $0x4] sm:$0xf] %vm514_vm5, %v570_v1 }
 0x13e   :  { %517 = vst.msk [vmem:[%s850_s4 + $0x8] sm:$0xf] %vm514_vm5, %v571_v2  ;;  %518 = vst.msk [vmem:[%s850_s4 + $0xc] sm:$0xf] %vm514_vm5, %v572_v3 }

// kernel: discriminator_forward.9
= control target key start
LH: loop header
LB: loop body
LE: loop exit
PB: predicated region body
PF: predicated region fallthrough
CT: control target
= control target key end

     0   :  { %s11264_s0 = inlined_call_operand.vmem [shape: bf16[2,1024], index: 0, kind: input, shape index: {}]   ;;  %s11265_s1 = inlined_call_operand.vmem [shape: bf16[1024,1], index: 1, kind: input, shape index: {}]   ;;  %s11266_s2 = inlined_call_operand.<no memory space> [shape: f32[1,1], index: 2, kind: input, shape index: {}]   ;;  %s11267_s3 = inlined_call_operand.vmem [shape: bf16[1024,1024], index: 3, kind: input, shape index: {}]   ;;  %s11268_s4 = inlined_call_operand.vmem [shape: f32[1,1024], index: 4, kind: input, shape index: {}]   ;;  %s11269_s5 = inlined_call_operand.vmem [shape: bf16[1024,512], index: 5, kind: input, shape index: {}]   ;;  %s11270_s6 = inlined_call_operand.vmem [shape: f32[1,512], index: 6, kind: input, shape index: {}]   ;;  %s11271_s7 = inlined_call_operand.vmem [shape: bf16[512,5], index: 7, kind: input, shape index: {}]   ;;  %s11272_s8 = inlined_call_operand.vmem [shape: f32[1,5], index: 8, kind: input, shape index: {}]   ;;  %s11273_s9 = inlined_call_operand.vmem [shape: f32[2,1], index: 9, kind: output, shape index: {0}]   ;;  %s11274_s10 = inlined_call_operand.hbm [shape: f32[2,5], index: 10, kind: output, shape index: {1}]  }
   0x1   :  { %v16_v0 = vstv %s11266_s2 }
   0x2   :  { %17 = vst [vmem:[#allocation2] sm:$0x1] %v16_v0 }
   0x3   :  { %v7851_v1 = vld [vmem:[%s11265_s1 + $0x78] sm:$0xff]   ;;  %v7855_v5 = vld [vmem:[%s11265_s1 + $0x70] sm:$0xff]   ;;  %v7859_v9 = vld [vmem:[%s11265_s1 + $0x68] sm:$0xff]   ;;  %v179_v29 = vlaneseq  ;;  %v8359_v37 = vmov 1966171168  }
   0x4   :  { %v7852_v2 = vld [vmem:[%s11265_s1 + $0xf8] sm:$0xff]   ;;  %7717 = vmatprep.subr.bf16.mxu0 %v7851_v1  ;;  %v7856_v6 = vld [vmem:[%s11265_s1 + $0xf0] sm:$0xff]   ;;  %v7860_v10 = vld [vmem:[%s11265_s1 + $0xe8] sm:$0xff]   ;;  %v177_v38 = vunpack.c.l.s4 %v8359_v37 }
   0x5   :  { %v7853_v3 = vld [vmem:[%s11265_s1 + $0x38] sm:$0xff]   ;;  %7739 = vmatprep.subr.bf16.mxu1 %v7852_v2  ;;  %v7857_v7 = vld [vmem:[%s11265_s1 + $0x30] sm:$0xff]   ;;  %v7861_v11 = vld [vmem:[%s11265_s1 + $0x28] sm:$0xff]   ;;  %v8515_v34 = vshrl.u32 %v179_v29, 7 }
   0x6   :  { %v7854_v4 = vld [vmem:[%s11265_s1 + $0xb8] sm:$0xff]   ;;  %7718 = vmatpush3.bf16.msra.mxu0 %v7853_v3  ;;  %v7858_v8 = vld [vmem:[%s11265_s1 + $0xb0] sm:$0xff]   ;;  %v7862_v12 = vld [vmem:[%s11265_s1 + $0xa8] sm:$0xff]   ;;  %v178_v40 = vunpack.c.0.s8 %v177_v38 }
   0x7   :  { %7740 = vmatpush3.bf16.msra.mxu1 %v7854_v4  ;;  %7719 = vmatprep.subr.bf16.mxu0 %v7855_v5  ;;  %v7863_v13 = vld [vmem:[%s11265_s1 + $0x60] sm:$0xff]   ;;  %v7867_v17 = vld [vmem:[%s11265_s1 + $0x58] sm:$0xff]   ;;  %v7871_v21 = vld [vmem:[%s11265_s1 + $0x50] sm:$0xff]  }
   0x8   :  { %7741 = vmatprep.subr.bf16.mxu1 %v7856_v6  ;;  %v7864_v14 = vld [vmem:[%s11265_s1 + $0xe0] sm:$0xff]   ;;  %v7868_v18 = vld [vmem:[%s11265_s1 + $0xd8] sm:$0xff]   ;;  %v7872_v22 = vld [vmem:[%s11265_s1 + $0xd0] sm:$0xff]   ;;  %v8527_v42 = vsub.s32 %v178_v40, %v8515_v34 }
   0x9   :  { %v7865_v15 = vld [vmem:[%s11265_s1 + $0x20] sm:$0xff]   ;;  %v7869_v19 = vld [vmem:[%s11265_s1 + $0x18] sm:$0xff]   ;;  %v7873_v23 = vld [vmem:[%s11265_s1 + $0x10] sm:$0xff]  }
   0xa   :  { %7720 = vmatpush3.bf16.msra.mxu0 %v7857_v7  ;;  %v7866_v16 = vld [vmem:[%s11265_s1 + $0xa0] sm:$0xff]   ;;  %v7870_v20 = vld [vmem:[%s11265_s1 + $0x98] sm:$0xff]   ;;  %v7874_v24 = vld [vmem:[%s11265_s1 + $0x90] sm:$0xff]  }
   0xb   :  { %7742 = vmatpush3.bf16.msra.mxu1 %v7858_v8  ;;  %7721 = vmatprep.subr.bf16.mxu0 %v7859_v9  ;;  %v7875_v25 = vld [vmem:[%s11265_s1 + $0x48] sm:$0xff]   ;;  %v7879_v30 = vld [vmem:[%s11265_s1 + $0x40] sm:$0xff]   ;;  %v7883_v36 = vld [vmem:[%s11265_s1 + $0x178] sm:$0xff]  }
   0xc   :  { %7743 = vmatprep.subr.bf16.mxu1 %v7860_v10  ;;  %v7876_v26 = vld [vmem:[%s11265_s1 + $0xc8] sm:$0xff]   ;;  %v7880_v31 = vld [vmem:[%s11265_s1 + $0xc0] sm:$0xff]   ;;  %v7884_v39 = vld [vmem:[%s11265_s1 + $0x1f8] sm:$0xff]  }
   0xd   :  { %v7877_v27 = vld [vmem:[%s11265_s1 + $0x8] sm:$0xff]   ;;  %v7881_v32 = vld [vmem:[%s11265_s1] sm:$0xff]   ;;  %v7885_v49 = vld [vmem:[%s11265_s1 + $0x138] sm:$0xff]  }
   0xe   :  { %7722 = vmatpush3.bf16.msra.mxu0 %v7861_v11  ;;  %v7878_v28 = vld [vmem:[%s11265_s1 + $0x88] sm:$0xff]   ;;  %v7882_v33 = vld [vmem:[%s11265_s1 + $0x80] sm:$0xff]   ;;  %v7887_v52 = vld [vmem:[%s11265_s1 + $0x170] sm:$0xff]  }
   0xf   :  { %7744 = vmatpush3.bf16.msra.mxu1 %v7862_v12  ;;  %7723 = vmatprep.subr.bf16.mxu0 %v7863_v13  ;;  %v38_v35 = vld [vmem:[%s11264_s0] sm:$0xff]  ;;  %v7886_v54 = vld [vmem:[%s11265_s1 + $0x1b8] sm:$0xff]   ;;  %v7888_v55 = vld [vmem:[%s11265_s1 + $0x1f0] sm:$0xff]  }
  0x10   :  { %7745 = vmatprep.subr.bf16.mxu1 %v7864_v14  ;;  %v175_v41 = vcombine.high %v38_v35, %v38_v35  ;;  %v182_v43 = vrot.slane %v38_v35, %v8527_v42  ;;  %v7889_v57 = vld [vmem:[%s11265_s1 + $0x130] sm:$0xff]   ;;  %v7891_v58 = vld [vmem:[%s11265_s1 + $0x168] sm:$0xff]   ;;  %v7895_v62 = vld [vmem:[%s11265_s1 + $0x160] sm:$0xff]  }
  0x11   :  { %v7890_v59 = vld [vmem:[%s11265_s1 + $0x1b0] sm:$0xff]   ;;  %v7892_v60 = vld [vmem:[%s11265_s1 + $0x1e8] sm:$0xff]   ;;  %v7896_v0 = vld [vmem:[%s11265_s1 + $0x1e0] sm:$0xff]  }
  0x12   :  { %7724 = vmatpush3.bf16.msra.mxu0 %v7865_v15  ;;  %v8531_v44 = vrot.slane %v175_v41, %v8527_v42  ;;  %v190_v45 = vcombine.high %v182_v43, %v182_v43  ;;  %v8534_v46 = vrot.slane %v182_v43, %v8527_v42  ;;  %v7893_v61 = vld [vmem:[%s11265_s1 + $0x128] sm:$0xff]   ;;  %v7897_v1 = vld [vmem:[%s11265_s1 + $0x120] sm:$0xff]   ;;  %v7899_v2 = vld [vmem:[%s11265_s1 + $0x158] sm:$0xff]  }
  0x13   :  { %7746 = vmatpush3.bf16.msra.mxu1 %v7866_v16  ;;  %7725 = vmatprep.subr.bf16.mxu0 %v7867_v17  ;;  %v7894_v63 = vld [vmem:[%s11265_s1 + $0x1a8] sm:$0xff]   ;;  %v7898_v3 = vld [vmem:[%s11265_s1 + $0x1a0] sm:$0xff]   ;;  %v7900_v4 = vld [vmem:[%s11265_s1 + $0x1d8] sm:$0xff]  }
  0x14   :  { %7747 = vmatprep.subr.bf16.mxu1 %v7868_v18  ;;  %v191_v47 = vcombine.high %v8531_v44, %v8531_v44  ;;  %v8539_v48 = vrot.slane %v190_v45, %v8527_v42  ;;  %v8549_v51 = vcombine.high %v8534_v46, %v8534_v46  ;;  %v7901_v5 = vld [vmem:[%s11265_s1 + $0x118] sm:$0xff]   ;;  %v7903_v6 = vld [vmem:[%s11265_s1 + $0x150] sm:$0xff]   ;;  %v7907_v10 = vld [vmem:[%s11265_s1 + $0x148] sm:$0xff]  }
  0x15   :  { %v7902_v7 = vld [vmem:[%s11265_s1 + $0x198] sm:$0xff]   ;;  %v7904_v8 = vld [vmem:[%s11265_s1 + $0x1d0] sm:$0xff]   ;;  %v7908_v12 = vld [vmem:[%s11265_s1 + $0x1c8] sm:$0xff]  }
  0x16   :  { %7726 = vmatpush3.bf16.msra.mxu0 %v7869_v19  ;;  %v8545_v50 = vrot.slane %v191_v47, %v8527_v42  ;;  %648 = vmatprep.mubr.bf16.mxu0 %v8539_v48  ;;  %v8557_v53 = vcombine.high %v8539_v48, %v8539_v48  ;;  %v7905_v9 = vld [vmem:[%s11265_s1 + $0x110] sm:$0xff]   ;;  %v7909_v13 = vld [vmem:[%s11265_s1 + $0x108] sm:$0xff]   ;;  %v7911_v14 = vld [vmem:[%s11265_s1 + $0x140] sm:$0xff]  }
  0x17   :  { %7748 = vmatpush3.bf16.msra.mxu1 %v7870_v20  ;;  %7727 = vmatprep.subr.bf16.mxu0 %v7871_v21  ;;  %v7906_v11 = vld [vmem:[%s11265_s1 + $0x190] sm:$0xff]   ;;  %v7910_v15 = vld [vmem:[%s11265_s1 + $0x188] sm:$0xff]   ;;  %v840_v16 = vld [vmem:[%s11267_s3 + $0x1c0] sm:$0xff] }
  0x18   :  { %7749 = vmatprep.subr.bf16.mxu1 %v7872_v22  ;;  %v8568_v56 = vcombine.high %v8545_v50, %v8545_v50  ;;  %688 = vmatprep.mubr.bf16.mxu1 %v8557_v53  ;;  %v844_v17 = vld [vmem:[%s11267_s3 + $0x1e0] sm:$0xff]  ;;  %v8663_v22 = vrot.slane %v8531_v44, %v8527_v42 }
  0x19   :  { %v7912_v18 = vld [vmem:[%s11265_s1 + $0x1c0] sm:$0xff]  }
  0x1a   :  { %7728 = vmatpush3.bf16.msra.mxu0 %v7873_v23  ;;  %v7913_v19 = vld [vmem:[%s11265_s1 + $0x100] sm:$0xff]   ;;  %v6973_v23 = vcombine.high %v840_v16, %v844_v17 }
  0x1b   :  { %7750 = vmatpush3.bf16.msra.mxu1 %v7874_v24  ;;  %7729 = vmatprep.subr.bf16.mxu0 %v7875_v25  ;;  %v968_v20 = vld [vmem:[%s11267_s3 + $0x5c0] sm:$0xff] }
  0x1c   :  { %7751 = vmatprep.subr.bf16.mxu1 %v7876_v26  ;;  %v972_v21 = vld [vmem:[%s11267_s3 + $0x5e0] sm:$0xff] }
  0x1d   :  { %v7914_v24 = vld [vmem:[%s11265_s1 + $0x180] sm:$0xff]  }
  0x1e   :  { %7730 = vmatpush3.bf16.msra.mxu0 %v7877_v27  ;;  %v832_v25 = vld [vmem:[%s11267_s3 + $0x180] sm:$0xff]  ;;  %v7101_v27 = vcombine.high %v968_v20, %v972_v21 }
  0x1f   :  { %7752 = vmatpush3.bf16.msra.mxu1 %v7878_v28  ;;  %7731 = vmatprep.subr.bf16.mxu0 %v7879_v30  ;;  %v836_v26 = vld [vmem:[%s11267_s3 + $0x1a0] sm:$0xff]  ;;  %v6972_v28 = vcombine.low %v840_v16, %v844_v17 }
  0x20   :  { %7753 = vmatprep.subr.bf16.mxu1 %v7880_v31  ;;  %v960_v29 = vld [vmem:[%s11267_s3 + $0x580] sm:$0xff]  ;;  %v8682_v31 = vcombine.high %v8663_v22, %v8663_v22  ;;  %v6964_v38 = vcombine.low %v832_v25, %v836_v26 }
  0x21   :  { %v964_v30 = vld [vmem:[%s11267_s3 + $0x5a0] sm:$0xff] }
  0x22   :  { %7732 = vmatpush3.bf16.msra.mxu0 %v7881_v32  ;;  %v6965_v32 = vcombine.high %v832_v25, %v836_v26  ;;  %v824_v35 = vld [vmem:[%s11267_s3 + $0x140] sm:$0xff]  ;;  %v7093_v37 = vcombine.high %v960_v29, %v964_v30  ;;  %v7092_v42 = vcombine.low %v960_v29, %v964_v30 }
  0x23   :  { %7754 = vmatpush3.bf16.msra.mxu1 %v7882_v33  ;;  %7761 = vmatprep.subr.bf16.mxu0 %v7883_v36  ;;  %v7100_v33 = vcombine.low %v968_v20, %v972_v21  ;;  %v828_v36 = vld [vmem:[%s11267_s3 + $0x160] sm:$0xff] }
  0x24   :  { %7783 = vmatprep.subr.bf16.mxu1 %v7884_v39  ;;  %v952_v39 = vld [vmem:[%s11267_s3 + $0x540] sm:$0xff]  ;;  %v6957_v41 = vcombine.high %v824_v35, %v828_v36  ;;  %v6956_v47 = vcombine.low %v824_v35, %v828_v36 }
  0x25   :  { %649 = vmatmul.mubr.bf16.vlgmr.msra.gmra.mxu0 %v8534_v46  ;;  %v956_v40 = vld [vmem:[%s11267_s3 + $0x560] sm:$0xff] }
  0x26   :  { %7762 = vmatpush3.bf16.msra.mxu0 %v7885_v49  ;;  %689 = vmatmul.mubr.bf16.vlgmr.msra.gmra.mxu1 %v8549_v51  ;;  %v816_v43 = vld [vmem:[%s11267_s3 + $0x100] sm:$0xff]  ;;  %v7085_v45 = vcombine.high %v952_v39, %v956_v40 }
  0x27   :  { %7763 = vmatprep.subr.bf16.mxu0 %v7887_v52  ;;  %7784 = vmatpush3.bf16.msra.mxu1 %v7886_v54  ;;  %v820_v44 = vld [vmem:[%s11267_s3 + $0x120] sm:$0xff] }
  0x28   :  { %728 = vmatprep.mubr.bf16.mxu0 %v8545_v50  ;;  %7785 = vmatprep.subr.bf16.mxu1 %v7888_v55  ;;  %v944_v49 = vld [vmem:[%s11267_s3 + $0x500] sm:$0xff]  ;;  %v6949_v54 = vcombine.high %v816_v43, %v820_v44  ;;  %v7084_v55 = vcombine.low %v952_v39, %v956_v40 }
  0x29   :  { %768 = vmatprep.mubr.bf16.mxu1 %v8568_v56  ;;  %v948_v52 = vld [vmem:[%s11267_s3 + $0x520] sm:$0xff] }
  0x2a   :  { %7764 = vmatpush3.bf16.msra.mxu0 %v7889_v57  ;;  %v808_v57 = vld [vmem:[%s11267_s3 + $0xc0] sm:$0xff] }
  0x2b   :  { %7765 = vmatprep.subr.bf16.mxu0 %v7891_v58  ;;  %7786 = vmatpush3.bf16.msra.mxu1 %v7890_v59  ;;  %v812_v58 = vld [vmem:[%s11267_s3 + $0xe0] sm:$0xff]  ;;  %v7077_v59 = vcombine.high %v944_v49, %v948_v52 }
  0x2c   :  { %7787 = vmatprep.subr.bf16.mxu1 %v7892_v60  ;;  %v6948_v60 = vcombine.low %v816_v43, %v820_v44  ;;  %v784_v17 = vld [vmem:[%s11267_s3] sm:$0xff] }
  0x2d   :  { %v912_v21 = vld [vmem:[%s11267_s3 + $0x400] sm:$0xff] }
  0x2e   :  { %7766 = vmatpush3.bf16.msra.mxu0 %v7893_v61  ;;  %v936_v61 = vld [vmem:[%s11267_s3 + $0x4c0] sm:$0xff] }
  0x2f   :  { %7767 = vmatprep.subr.bf16.mxu0 %v7895_v62  ;;  %7788 = vmatpush3.bf16.msra.mxu1 %v7894_v63  ;;  %v940_v62 = vld [vmem:[%s11267_s3 + $0x4e0] sm:$0xff]  ;;  %v6941_v63 = vcombine.high %v808_v57, %v812_v58 }
  0x30   :  { %7789 = vmatprep.subr.bf16.mxu1 %v7896_v0  ;;  %v7076_v0 = vcombine.low %v944_v49, %v948_v52  ;;  %v904_v26 = vld [vmem:[%s11267_s3 + $0x3c0] sm:$0xff] }
  0x31   :  { %v1032_v30 = vld [vmem:[%s11267_s3 + $0x7c0] sm:$0xff] }
  0x32   :  { %7768 = vmatpush3.bf16.msra.mxu0 %v7897_v1  ;;  %v800_v1 = vld [vmem:[%s11267_s3 + $0x80] sm:$0xff] }
  0x33   :  { %7769 = vmatprep.subr.bf16.mxu0 %v7899_v2  ;;  %7790 = vmatpush3.bf16.msra.mxu1 %v7898_v3  ;;  %v804_v2 = vld [vmem:[%s11267_s3 + $0xa0] sm:$0xff]  ;;  %v7069_v3 = vcombine.high %v936_v61, %v940_v62 }
  0x34   :  { %7791 = vmatprep.subr.bf16.mxu1 %v7900_v4  ;;  %v6940_v4 = vcombine.low %v808_v57, %v812_v58  ;;  %v896_v36 = vld [vmem:[%s11267_s3 + $0x380] sm:$0xff] }
  0x35   :  { %v1024_v40 = vld [vmem:[%s11267_s3 + $0x780] sm:$0xff] }
  0x36   :  { %7770 = vmatpush3.bf16.msra.mxu0 %v7901_v5  ;;  %v928_v5 = vld [vmem:[%s11267_s3 + $0x480] sm:$0xff] }
  0x37   :  { %7771 = vmatprep.subr.bf16.mxu0 %v7903_v6  ;;  %7792 = vmatpush3.bf16.msra.mxu1 %v7902_v7  ;;  %v932_v6 = vld [vmem:[%s11267_s3 + $0x4a0] sm:$0xff]  ;;  %v6933_v7 = vcombine.high %v800_v1, %v804_v2 }
  0x38   :  { %7793 = vmatprep.subr.bf16.mxu1 %v7904_v8  ;;  %v7068_v8 = vcombine.low %v936_v61, %v940_v62  ;;  %v7060_v16 = vcombine.low %v928_v5, %v932_v6  ;;  %v888_v44 = vld [vmem:[%s11267_s3 + $0x340] sm:$0xff] }
  0x39   :  { %v1016_v52 = vld [vmem:[%s11267_s3 + $0x740] sm:$0xff] }
  0x3a   :  { %7772 = vmatpush3.bf16.msra.mxu0 %v7905_v9  ;;  %v792_v9 = vld [vmem:[%s11267_s3 + $0x40] sm:$0xff] }
  0x3b   :  { %7773 = vmatprep.subr.bf16.mxu0 %v7907_v10  ;;  %7794 = vmatpush3.bf16.msra.mxu1 %v7906_v11  ;;  %v796_v10 = vld [vmem:[%s11267_s3 + $0x60] sm:$0xff]  ;;  %v7061_v11 = vcombine.high %v928_v5, %v932_v6 }
  0x3c   :  { %7795 = vmatprep.subr.bf16.mxu1 %v7908_v12  ;;  %v6932_v12 = vcombine.low %v800_v1, %v804_v2  ;;  %v6924_v20 = vcombine.low %v792_v9, %v796_v10  ;;  %v880_v58 = vld [vmem:[%s11267_s3 + $0x300] sm:$0xff] }
  0x3d   :  { %v1008_v62 = vld [vmem:[%s11267_s3 + $0x700] sm:$0xff] }
  0x3e   :  { %7774 = vmatpush3.bf16.msra.mxu0 %v7909_v13  ;;  %v920_v13 = vld [vmem:[%s11267_s3 + $0x440] sm:$0xff] }
  0x3f   :  { %7775 = vmatprep.subr.bf16.mxu0 %v7911_v14  ;;  %7796 = vmatpush3.bf16.msra.mxu1 %v7910_v15  ;;  %v924_v14 = vld [vmem:[%s11267_s3 + $0x460] sm:$0xff]  ;;  %v6925_v15 = vcombine.high %v792_v9, %v796_v10 }
  0x40   :  { %7797 = vmatprep.subr.bf16.mxu1 %v7912_v18  ;;  %v788_v18 = vld [vmem:[%s11267_s3 + $0x20] sm:$0xff]  ;;  %v7052_v25 = vcombine.low %v920_v13, %v924_v14 }
  0x41   :  { %v6916_v29 = vcombine.low %v784_v17, %v788_v18  ;;  %v872_v2 = vld [vmem:[%s11267_s3 + $0x2c0] sm:$0xff] }
  0x42   :  { %7776 = vmatpush3.bf16.msra.mxu0 %v7913_v19  ;;  %v7053_v19 = vcombine.high %v920_v13, %v924_v14  ;;  %v1000_v6 = vld [vmem:[%s11267_s3 + $0x6c0] sm:$0xff] }
  0x43   :  { %3898 = vmatprep.subr.bf16.mxu0 %v6973_v23  ;;  %7798 = vmatpush3.bf16.msra.mxu1 %v7914_v24  ;;  %v916_v23 = vld [vmem:[%s11267_s3 + $0x420] sm:$0xff]  ;;  %v6917_v24 = vcombine.high %v784_v17, %v788_v18 }
  0x44   :  { %3939 = vmatprep.subr.bf16.mxu1 %v7101_v27  ;;  %v908_v27 = vld [vmem:[%s11267_s3 + $0x3e0] sm:$0xff]  ;;  %v7044_v35 = vcombine.low %v912_v21, %v916_v23 }
  0x45   :  { %729 = vmatmul.mubr.bf16.vlgmr.msra.gmra.mxu0 %v8663_v22  ;;  %v7036_v39 = vcombine.low %v904_v26, %v908_v27  ;;  %v864_v10 = vld [vmem:[%s11267_s3 + $0x280] sm:$0xff] }
  0x46   :  { %3899 = vmatpush1.bf16.msra.mxu0 %v6972_v28  ;;  %769 = vmatmul.mubr.bf16.vlgmr.msra.gmra.mxu1 %v8682_v31  ;;  %v7045_v28 = vcombine.high %v912_v21, %v916_v23  ;;  %v992_v13 = vld [vmem:[%s11267_s3 + $0x680] sm:$0xff] }
  0x47   :  { %3900 = vmatprep.subr.bf16.mxu0 %v6965_v32  ;;  %3940 = vmatpush1.bf16.msra.mxu1 %v7100_v33  ;;  %v1036_v32 = vld [vmem:[%s11267_s3 + $0x7e0] sm:$0xff]  ;;  %v7037_v33 = vcombine.high %v904_v26, %v908_v27 }
  0x48   :  { %3941 = vmatprep.subr.bf16.mxu1 %v7093_v37  ;;  %3930 = vmatprep.mubr.bf16.mxu0 %v8539_v48  ;;  %v900_v37 = vld [vmem:[%s11267_s3 + $0x3a0] sm:$0xff]  ;;  %v7164_v43 = vcombine.low %v1032_v30, %v1036_v32 }
  0x49   :  { %3971 = vmatprep.mubr.bf16.mxu1 %v8557_v53  ;;  %v7028_v49 = vcombine.low %v896_v36, %v900_v37  ;;  %v856_v18 = vld [vmem:[%s11267_s3 + $0x240] sm:$0xff] }
  0x4a   :  { %3901 = vmatpush1.bf16.msra.mxu0 %v6964_v38  ;;  %v7165_v38 = vcombine.high %v1032_v30, %v1036_v32  ;;  %v988_v23 = vld [vmem:[%s11267_s3 + $0x660] sm:$0xff] }
  0x4b   :  { %3902 = vmatprep.subr.bf16.mxu0 %v6957_v41  ;;  %3942 = vmatpush1.bf16.msra.mxu1 %v7092_v42  ;;  %v1028_v41 = vld [vmem:[%s11267_s3 + $0x7a0] sm:$0xff]  ;;  %v7029_v42 = vcombine.high %v896_v36, %v900_v37 }
  0x4c   :  { %3943 = vmatprep.subr.bf16.mxu1 %v7085_v45  ;;  %v892_v45 = vld [vmem:[%s11267_s3 + $0x360] sm:$0xff]  ;;  %v7156_v57 = vcombine.low %v1024_v40, %v1028_v41 }
  0x4d   :  { %v7020_v61 = vcombine.low %v888_v44, %v892_v45  ;;  %v848_v27 = vld [vmem:[%s11267_s3 + $0x200] sm:$0xff] }
  0x4e   :  { %3903 = vmatpush1.bf16.msra.mxu0 %v6956_v47  ;;  %v7157_v47 = vcombine.high %v1024_v40, %v1028_v41  ;;  %v980_v32 = vld [vmem:[%s11267_s3 + $0x620] sm:$0xff] }
  0x4f   :  { %3904 = vmatprep.subr.bf16.mxu0 %v6949_v54  ;;  %3944 = vmatpush1.bf16.msra.mxu1 %v7084_v55  ;;  %v1020_v54 = vld [vmem:[%s11267_s3 + $0x760] sm:$0xff]  ;;  %v7021_v55 = vcombine.high %v888_v44, %v892_v45 }
  0x50   :  { %3945 = vmatprep.subr.bf16.mxu1 %v7077_v59  ;;  %v884_v59 = vld [vmem:[%s11267_s3 + $0x320] sm:$0xff]  ;;  %v7148_v1 = vcombine.low %v1016_v52, %v1020_v54 }
  0x51   :  { %v7012_v5 = vcombine.low %v880_v58, %v884_v59  ;;  %v1096_v37 = vld [vmem:[%s11267_s3 + $0x9c0] sm:$0xff] }
  0x52   :  { %3905 = vmatpush1.bf16.msra.mxu0 %v6948_v60  ;;  %v7149_v60 = vcombine.high %v1016_v52, %v1020_v54  ;;  %v1228_v41 = vld [vmem:[%s11267_s3 + $0xde0] sm:$0xff] }
  0x53   :  { %3906 = vmatprep.subr.bf16.mxu0 %v6941_v63  ;;  %3946 = vmatpush1.bf16.msra.mxu1 %v7076_v0  ;;  %v1012_v63 = vld [vmem:[%s11267_s3 + $0x720] sm:$0xff]  ;;  %v7013_v0 = vcombine.high %v880_v58, %v884_v59 }
  0x54   :  { %3947 = vmatprep.subr.bf16.mxu1 %v7069_v3  ;;  %v876_v3 = vld [vmem:[%s11267_s3 + $0x2e0] sm:$0xff]  ;;  %v7140_v9 = vcombine.low %v1008_v62, %v1012_v63 }
  0x55   :  { %v7004_v14 = vcombine.low %v872_v2, %v876_v3  ;;  %v1088_v45 = vld [vmem:[%s11267_s3 + $0x980] sm:$0xff] }
  0x56   :  { %3907 = vmatpush1.bf16.msra.mxu0 %v6940_v4  ;;  %v7141_v4 = vcombine.high %v1008_v62, %v1012_v63  ;;  %v1220_v54 = vld [vmem:[%s11267_s3 + $0xda0] sm:$0xff] }
  0x57   :  { %3908 = vmatprep.subr.bf16.mxu0 %v6933_v7  ;;  %3948 = vmatpush1.bf16.msra.mxu1 %v7068_v8  ;;  %v1004_v7 = vld [vmem:[%s11267_s3 + $0x6e0] sm:$0xff]  ;;  %v7005_v8 = vcombine.high %v872_v2, %v876_v3 }
  0x58   :  { %3949 = vmatprep.subr.bf16.mxu1 %v7061_v11  ;;  %v868_v11 = vld [vmem:[%s11267_s3 + $0x2a0] sm:$0xff]  ;;  %v7132_v17 = vcombine.low %v1000_v6, %v1004_v7 }
  0x59   :  { %v1080_v59 = vld [vmem:[%s11267_s3 + $0x940] sm:$0xff] }
  0x5a   :  { %3909 = vmatpush1.bf16.msra.mxu0 %v6932_v12  ;;  %v7133_v12 = vcombine.high %v1000_v6, %v1004_v7  ;;  %v1212_v63 = vld [vmem:[%s11267_s3 + $0xd60] sm:$0xff] }
  0x5b   :  { %3910 = vmatprep.subr.bf16.mxu0 %v6925_v15  ;;  %3950 = vmatpush1.bf16.msra.mxu1 %v7060_v16  ;;  %v996_v15 = vld [vmem:[%s11267_s3 + $0x6a0] sm:$0xff]  ;;  %v6997_v16 = vcombine.high %v864_v10, %v868_v11 }
  0x5c   :  { %3951 = vmatprep.subr.bf16.mxu1 %v7053_v19  ;;  %v860_v19 = vld [vmem:[%s11267_s3 + $0x260] sm:$0xff]  ;;  %v7125_v21 = vcombine.high %v992_v13, %v996_v15  ;;  %v7124_v26 = vcombine.low %v992_v13, %v996_v15 }
  0x5d   :  { %v1072_v3 = vld [vmem:[%s11267_s3 + $0x900] sm:$0xff] }
  0x5e   :  { %3911 = vmatpush1.bf16.msra.mxu0 %v6924_v20  ;;  %v984_v20 = vld [vmem:[%s11267_s3 + $0x640] sm:$0xff] }
  0x5f   :  { %3912 = vmatprep.subr.bf16.mxu0 %v6917_v24  ;;  %3952 = vmatpush1.bf16.msra.mxu1 %v7052_v25  ;;  %v6996_v24 = vcombine.low %v864_v10, %v868_v11  ;;  %v6989_v25 = vcombine.high %v856_v18, %v860_v19  ;;  %v7117_v30 = vcombine.high %v984_v20, %v988_v23  ;;  %v1204_v7 = vld [vmem:[%s11267_s3 + $0xd20] sm:$0xff] }
  0x60   :  { %3953 = vmatprep.subr.bf16.mxu1 %v7045_v28  ;;  %v852_v28 = vld [vmem:[%s11267_s3 + $0x220] sm:$0xff]  ;;  %v7116_v36 = vcombine.low %v984_v20, %v988_v23 }
  0x61   :  { %v1064_v11 = vld [vmem:[%s11267_s3 + $0x8c0] sm:$0xff] }
  0x62   :  { %3913 = vmatpush1.bf16.msra.mxu0 %v6916_v29  ;;  %v976_v29 = vld [vmem:[%s11267_s3 + $0x600] sm:$0xff] }
  0x63   :  { %3914 = vmatprep.subr.bf16.mxu0 %v7037_v33  ;;  %3954 = vmatpush1.bf16.msra.mxu1 %v7044_v35  ;;  %v6988_v33 = vcombine.low %v856_v18, %v860_v19  ;;  %v6981_v35 = vcombine.high %v848_v27, %v852_v28  ;;  %v7109_v40 = vcombine.high %v976_v29, %v980_v32  ;;  %v1192_v13 = vld [vmem:[%s11267_s3 + $0xcc0] sm:$0xff] }
  0x64   :  { %3955 = vmatprep.subr.bf16.mxu1 %v7165_v38  ;;  %v1100_v38 = vld [vmem:[%s11267_s3 + $0x9e0] sm:$0xff]  ;;  %v7108_v44 = vcombine.low %v976_v29, %v980_v32 }
  0x65   :  { %v1196_v15 = vld [vmem:[%s11267_s3 + $0xce0] sm:$0xff] }
  0x66   :  { %3915 = vmatpush2.bf16.msra.mxu0 %v7036_v39  ;;  %v1224_v39 = vld [vmem:[%s11267_s3 + $0xdc0] sm:$0xff]  ;;  %v7325_v23 = vcombine.high %v1192_v13, %v1196_v15 }
  0x67   :  { %3916 = vmatprep.subr.bf16.mxu0 %v7029_v42  ;;  %3956 = vmatpush2.bf16.msra.mxu1 %v7164_v43  ;;  %v6980_v42 = vcombine.low %v848_v27, %v852_v28  ;;  %v7229_v43 = vcombine.high %v1096_v37, %v1100_v38  ;;  %v7357_v52 = vcombine.high %v1224_v39, %v1228_v41  ;;  %v1056_v19 = vld [vmem:[%s11267_s3 + $0x880] sm:$0xff] }
  0x68   :  { %3957 = vmatprep.subr.bf16.mxu1 %v7157_v47  ;;  %v1092_v47 = vld [vmem:[%s11267_s3 + $0x9a0] sm:$0xff]  ;;  %v7356_v58 = vcombine.low %v1224_v39, %v1228_v41  ;;  %v7324_v27 = vcombine.low %v1192_v13, %v1196_v15 }
  0x69   :  { %v1060_v20 = vld [vmem:[%s11267_s3 + $0x8a0] sm:$0xff] }
  0x6a   :  { %3917 = vmatpush2.bf16.msra.mxu0 %v7028_v49  ;;  %v1216_v49 = vld [vmem:[%s11267_s3 + $0xd80] sm:$0xff] }
  0x6b   :  { %3918 = vmatprep.subr.bf16.mxu0 %v7021_v55  ;;  %3958 = vmatpush2.bf16.msra.mxu1 %v7156_v57  ;;  %v7228_v55 = vcombine.low %v1096_v37, %v1100_v38  ;;  %v7221_v57 = vcombine.high %v1088_v45, %v1092_v47  ;;  %v7349_v62 = vcombine.high %v1216_v49, %v1220_v54  ;;  %v1048_v28 = vld [vmem:[%s11267_s3 + $0x840] sm:$0xff] }
  0x6c   :  { %3959 = vmatprep.subr.bf16.mxu1 %v7149_v60  ;;  %v1084_v60 = vld [vmem:[%s11267_s3 + $0x960] sm:$0xff]  ;;  %v7348_v2 = vcombine.low %v1216_v49, %v1220_v54 }
  0x6d   :  { %v1052_v29 = vld [vmem:[%s11267_s3 + $0x860] sm:$0xff] }
  0x6e   :  { %3919 = vmatpush2.bf16.msra.mxu0 %v7020_v61  ;;  %v1208_v61 = vld [vmem:[%s11267_s3 + $0xd40] sm:$0xff] }
  0x6f   :  { %3920 = vmatprep.subr.bf16.mxu0 %v7013_v0  ;;  %3960 = vmatpush2.bf16.msra.mxu1 %v7148_v1  ;;  %v7220_v0 = vcombine.low %v1088_v45, %v1092_v47  ;;  %v7213_v1 = vcombine.high %v1080_v59, %v1084_v60  ;;  %v7341_v6 = vcombine.high %v1208_v61, %v1212_v63  ;;  %v1040_v38 = vld [vmem:[%s11267_s3 + $0x800] sm:$0xff] }
  0x70   :  { %3961 = vmatprep.subr.bf16.mxu1 %v7141_v4  ;;  %v1076_v4 = vld [vmem:[%s11267_s3 + $0x920] sm:$0xff]  ;;  %v7340_v10 = vcombine.low %v1208_v61, %v1212_v63 }
  0x71   :  { %v1044_v39 = vld [vmem:[%s11267_s3 + $0x820] sm:$0xff] }
  0x72   :  { %3921 = vmatpush2.bf16.msra.mxu0 %v7012_v5  ;;  %v1200_v5 = vld [vmem:[%s11267_s3 + $0xd00] sm:$0xff] }
  0x73   :  { %3922 = vmatprep.subr.bf16.mxu0 %v7005_v8  ;;  %3962 = vmatpush2.bf16.msra.mxu1 %v7140_v9  ;;  %v7212_v8 = vcombine.low %v1080_v59, %v1084_v60  ;;  %v7205_v9 = vcombine.high %v1072_v3, %v1076_v4  ;;  %v7332_v18 = vcombine.low %v1200_v5, %v1204_v7  ;;  %v1160_v47 = vld [vmem:[%s11267_s3 + $0xbc0] sm:$0xff] }
  0x74   :  { %3963 = vmatprep.subr.bf16.mxu1 %v7133_v12  ;;  %v1068_v12 = vld [vmem:[%s11267_s3 + $0x8e0] sm:$0xff] }
  0x75   :  { %v1164_v49 = vld [vmem:[%s11267_s3 + $0xbe0] sm:$0xff] }
  0x76   :  { %3923 = vmatpush2.bf16.msra.mxu0 %v7004_v14  ;;  %v7333_v14 = vcombine.high %v1200_v5, %v1204_v7  ;;  %v1152_v60 = vld [vmem:[%s11267_s3 + $0xb80] sm:$0xff] }
  0x77   :  { %3924 = vmatprep.subr.bf16.mxu0 %v6997_v16  ;;  %3964 = vmatpush2.bf16.msra.mxu1 %v7132_v17  ;;  %v7204_v16 = vcombine.low %v1072_v3, %v1076_v4  ;;  %v7197_v17 = vcombine.high %v1064_v11, %v1068_v12  ;;  %v1156_v61 = vld [vmem:[%s11267_s3 + $0xba0] sm:$0xff] }
  0x78   :  { %3965 = vmatprep.subr.bf16.mxu1 %v7125_v21  ;;  %v1184_v21 = vld [vmem:[%s11267_s3 + $0xc80] sm:$0xff] }
  0x79   :  { %v1144_v4 = vld [vmem:[%s11267_s3 + $0xb40] sm:$0xff] }
  0x7a   :  { %3925 = vmatpush2.bf16.msra.mxu0 %v6996_v24  ;;  %v1188_v24 = vld [vmem:[%s11267_s3 + $0xca0] sm:$0xff] }
  0x7b   :  { %3926 = vmatprep.subr.bf16.mxu0 %v6989_v25  ;;  %3966 = vmatpush2.bf16.msra.mxu1 %v7124_v26  ;;  %v7196_v25 = vcombine.low %v1064_v11, %v1068_v12  ;;  %v7189_v26 = vcombine.high %v1056_v19, %v1060_v20  ;;  %v7317_v32 = vcombine.high %v1184_v21, %v1188_v24  ;;  %v1148_v5 = vld [vmem:[%s11267_s3 + $0xb60] sm:$0xff] }
  0x7c   :  { %3967 = vmatprep.subr.bf16.mxu1 %v7117_v30  ;;  %v1176_v30 = vld [vmem:[%s11267_s3 + $0xc40] sm:$0xff]  ;;  %v7316_v37 = vcombine.low %v1184_v21, %v1188_v24 }
  0x7d   :  { %v1136_v12 = vld [vmem:[%s11267_s3 + $0xb00] sm:$0xff] }
  0x7e   :  { %3927 = vmatpush2.bf16.msra.mxu0 %v6988_v33  ;;  %v1180_v33 = vld [vmem:[%s11267_s3 + $0xc60] sm:$0xff] }
  0x7f   :  { %3928 = vmatprep.subr.bf16.mxu0 %v6981_v35  ;;  %3968 = vmatpush2.bf16.msra.mxu1 %v7116_v36  ;;  %v7188_v35 = vcombine.low %v1056_v19, %v1060_v20  ;;  %v7181_v36 = vcombine.high %v1048_v28, %v1052_v29  ;;  %v7309_v41 = vcombine.high %v1176_v30, %v1180_v33  ;;  %v1140_v13 = vld [vmem:[%s11267_s3 + $0xb20] sm:$0xff] }
  0x80   :  { %3969 = vmatprep.subr.bf16.mxu1 %v7109_v40  ;;  %v1168_v40 = vld [vmem:[%s11267_s3 + $0xc00] sm:$0xff]  ;;  %v7308_v45 = vcombine.low %v1176_v30, %v1180_v33 }
  0x81   :  { %v1128_v20 = vld [vmem:[%s11267_s3 + $0xac0] sm:$0xff] }
  0x82   :  { %3929 = vmatpush2.bf16.msra.mxu0 %v6980_v42  ;;  %v1172_v42 = vld [vmem:[%s11267_s3 + $0xc20] sm:$0xff] }
  0x83   :  { %3980 = vmatprep.subr.bf16.mxu0 %v7229_v43  ;;  %3970 = vmatpush2.bf16.msra.mxu1 %v7108_v44  ;;  %v7180_v43 = vcombine.low %v1048_v28, %v1052_v29  ;;  %v7173_v44 = vcombine.high %v1040_v38, %v1044_v39  ;;  %v7301_v54 = vcombine.high %v1168_v40, %v1172_v42  ;;  %v1132_v21 = vld [vmem:[%s11267_s3 + $0xae0] sm:$0xff] }
  0x84   :  { %4021 = vmatprep.subr.bf16.mxu1 %v7357_v52  ;;  %v1288_v52 = vld [vmem:[%s11267_s3 + $0xfc0] sm:$0xff]  ;;  %v7300_v59 = vcombine.low %v1168_v40, %v1172_v42 }
  0x85   :  { %3931 = vmatmul.mubr.bf16.vlgmr.msra.gmra.mxu0 %v8534_v46  ;;  %v1120_v29 = vld [vmem:[%s11267_s3 + $0xa80] sm:$0xff] }
  0x86   :  { %3981 = vmatpush1.bf16.msra.mxu0 %v7228_v55  ;;  %4012 = vmatprep.mubr.bf16.mxu0 %v8545_v50  ;;  %v1292_v55 = vld [vmem:[%s11267_s3 + $0xfe0] sm:$0xff] }
  0x87   :  { %3972 = vmatmul.mubr.bf16.vlgmr.msra.gmra.mxu1 %v8549_v51  ;;  %3982 = vmatprep.subr.bf16.mxu0 %v7221_v57  ;;  %v7172_v57 = vcombine.low %v1040_v38, %v1044_v39  ;;  %v7421_v63 = vcombine.high %v1288_v52, %v1292_v55  ;;  %v7420_v3 = vcombine.low %v1288_v52, %v1292_v55  ;;  %v1124_v30 = vld [vmem:[%s11267_s3 + $0xaa0] sm:$0xff] }
  0x88   :  { %4022 = vmatpush1.bf16.msra.mxu1 %v7356_v58  ;;  %4053 = vmatprep.mubr.bf16.mxu1 %v8568_v56  ;;  %v7293_v58 = vcombine.high %v1160_v47, %v1164_v49  ;;  %v1112_v39 = vld [vmem:[%s11267_s3 + $0xa40] sm:$0xff] }
  0x89   :  { %4023 = vmatprep.subr.bf16.mxu1 %v7349_v62  ;;  %v1280_v62 = vld [vmem:[%s11267_s3 + $0xf80] sm:$0xff] }
  0x8a   :  { %3983 = vmatpush1.bf16.msra.mxu0 %v7220_v0  ;;  %v1284_v0 = vld [vmem:[%s11267_s3 + $0xfa0] sm:$0xff] }
  0x8b   :  { %3984 = vmatprep.subr.bf16.mxu0 %v7213_v1  ;;  %v7292_v1 = vcombine.low %v1160_v47, %v1164_v49  ;;  %v7413_v7 = vcombine.high %v1280_v62, %v1284_v0  ;;  %v7412_v11 = vcombine.low %v1280_v62, %v1284_v0  ;;  %v1116_v40 = vld [vmem:[%s11267_s3 + $0xa60] sm:$0xff]  ;;  %v845_v62 = vld [vmem:[%s11267_s3 + $0x1e8] sm:$0xff] }
  0x8c   :  { %4024 = vmatpush1.bf16.msra.mxu1 %v7348_v2  ;;  %v7285_v2 = vcombine.high %v1152_v60, %v1156_v61  ;;  %v1104_v49 = vld [vmem:[%s11267_s3 + $0xa00] sm:$0xff] }
  0x8d   :  { %4025 = vmatprep.subr.bf16.mxu1 %v7341_v6  ;;  %v1272_v6 = vld [vmem:[%s11267_s3 + $0xf40] sm:$0xff] }
  0x8e   :  { %3985 = vmatpush1.bf16.msra.mxu0 %v7212_v8  ;;  %v1276_v8 = vld [vmem:[%s11267_s3 + $0xf60] sm:$0xff] }
  0x8f   :  { %3986 = vmatprep.subr.bf16.mxu0 %v7205_v9  ;;  %v7284_v9 = vcombine.low %v1152_v60, %v1156_v61  ;;  %v7405_v15 = vcombine.high %v1272_v6, %v1276_v8  ;;  %v7404_v19 = vcombine.low %v1272_v6, %v1276_v8  ;;  %v1108_v52 = vld [vmem:[%s11267_s3 + $0xa20] sm:$0xff]  ;;  %v841_v61 = vld [vmem:[%s11267_s3 + $0x1c8] sm:$0xff] }
  0x90   :  { %4026 = vmatpush1.bf16.msra.mxu1 %v7340_v10  ;;  %v7277_v10 = vcombine.high %v1144_v4, %v1148_v5  ;;  %v837_v6 = vld [vmem:[%s11267_s3 + $0x1a8] sm:$0xff] }
  0x91   :  { %4027 = vmatprep.subr.bf16.mxu1 %v7333_v14  ;;  %v1264_v14 = vld [vmem:[%s11267_s3 + $0xf00] sm:$0xff] }
  0x92   :  { %3987 = vmatpush1.bf16.msra.mxu0 %v7204_v16  ;;  %v1268_v16 = vld [vmem:[%s11267_s3 + $0xf20] sm:$0xff] }
  0x93   :  { %3988 = vmatprep.subr.bf16.mxu0 %v7197_v17  ;;  %v7276_v17 = vcombine.low %v1144_v4, %v1148_v5  ;;  %v7397_v24 = vcombine.high %v1264_v14, %v1268_v16  ;;  %v7396_v28 = vcombine.low %v1264_v14, %v1268_v16  ;;  %v833_v5 = vld [vmem:[%s11267_s3 + $0x188] sm:$0xff] }
  0x94   :  { %4028 = vmatpush1.bf16.msra.mxu1 %v7332_v18  ;;  %v7269_v18 = vcombine.high %v1136_v12, %v1140_v13  ;;  %v829_v14 = vld [vmem:[%s11267_s3 + $0x168] sm:$0xff] }
  0x95   :  { %4029 = vmatprep.subr.bf16.mxu1 %v7325_v23  ;;  %v1256_v23 = vld [vmem:[%s11267_s3 + $0xec0] sm:$0xff]  ;;  %v953_v16 = vld [vmem:[%s11267_s3 + $0x548] sm:$0xff] }
  0x96   :  { %3989 = vmatpush1.bf16.msra.mxu0 %v7196_v25  ;;  %v1260_v25 = vld [vmem:[%s11267_s3 + $0xee0] sm:$0xff] }
  0x97   :  { %3990 = vmatprep.subr.bf16.mxu0 %v7189_v26  ;;  %v7268_v26 = vcombine.low %v1136_v12, %v1140_v13  ;;  %v7389_v33 = vcombine.high %v1256_v23, %v1260_v25  ;;  %v7388_v38 = vcombine.low %v1256_v23, %v1260_v25  ;;  %v825_v13 = vld [vmem:[%s11267_s3 + $0x148] sm:$0xff] }
  0x98   :  { %4030 = vmatpush1.bf16.msra.mxu1 %v7324_v27  ;;  %v7261_v27 = vcombine.high %v1128_v20, %v1132_v21  ;;  %v821_v23 = vld [vmem:[%s11267_s3 + $0x128] sm:$0xff] }
  0x99   :  { %4031 = vmatprep.subr.bf16.mxu1 %v7317_v32  ;;  %v1248_v32 = vld [vmem:[%s11267_s3 + $0xe80] sm:$0xff] }
  0x9a   :  { %3991 = vmatpush1.bf16.msra.mxu0 %v7188_v35  ;;  %v1252_v35 = vld [vmem:[%s11267_s3 + $0xea0] sm:$0xff] }
  0x9b   :  { %3992 = vmatprep.subr.bf16.mxu0 %v7181_v36  ;;  %v7260_v36 = vcombine.low %v1128_v20, %v1132_v21  ;;  %v7381_v42 = vcombine.high %v1248_v32, %v1252_v35  ;;  %v7380_v47 = vcombine.low %v1248_v32, %v1252_v35  ;;  %v817_v21 = vld [vmem:[%s11267_s3 + $0x108] sm:$0xff] }
  0x9c   :  { %4032 = vmatpush1.bf16.msra.mxu1 %v7316_v37  ;;  %v7253_v37 = vcombine.high %v1120_v29, %v1124_v30  ;;  %v813_v32 = vld [vmem:[%s11267_s3 + $0xe8] sm:$0xff] }
  0x9d   :  { %4033 = vmatprep.subr.bf16.mxu1 %v7309_v41  ;;  %v1240_v41 = vld [vmem:[%s11267_s3 + $0xe40] sm:$0xff] }
  0x9e   :  { %3993 = vmatpush1.bf16.msra.mxu0 %v7180_v43  ;;  %v1244_v43 = vld [vmem:[%s11267_s3 + $0xe60] sm:$0xff] }
  0x9f   :  { %3994 = vmatprep.subr.bf16.mxu0 %v7173_v44  ;;  %v7252_v44 = vcombine.low %v1120_v29, %v1124_v30  ;;  %v7373_v55 = vcombine.high %v1240_v41, %v1244_v43  ;;  %v7372_v60 = vcombine.low %v1240_v41, %v1244_v43  ;;  %v809_v30 = vld [vmem:[%s11267_s3 + $0xc8] sm:$0xff] }
  0xa0   :  { %4034 = vmatpush1.bf16.msra.mxu1 %v7308_v45  ;;  %v7245_v45 = vcombine.high %v1112_v39, %v1116_v40  ;;  %v805_v41 = vld [vmem:[%s11267_s3 + $0xa8] sm:$0xff] }
  0xa1   :  { %4035 = vmatprep.subr.bf16.mxu1 %v7301_v54  ;;  %v1232_v54 = vld [vmem:[%s11267_s3 + $0xe00] sm:$0xff] }
  0xa2   :  { %3995 = vmatpush1.bf16.msra.mxu0 %v7172_v57  ;;  %v1236_v57 = vld [vmem:[%s11267_s3 + $0xe20] sm:$0xff] }
  0xa3   :  { %3996 = vmatprep.subr.bf16.mxu0 %v7293_v58  ;;  %v7244_v58 = vcombine.low %v1112_v39, %v1116_v40  ;;  %v7365_v0 = vcombine.high %v1232_v54, %v1236_v57  ;;  %v7364_v4 = vcombine.low %v1232_v54, %v1236_v57  ;;  %v801_v40 = vld [vmem:[%s11267_s3 + $0x88] sm:$0xff] }
  0xa4   :  { %4036 = vmatpush1.bf16.msra.mxu1 %v7300_v59  ;;  %v7237_v59 = vcombine.high %v1104_v49, %v1108_v52  ;;  %v797_v54 = vld [vmem:[%s11267_s3 + $0x68] sm:$0xff] }
  0xa5   :  { %4037 = vmatprep.subr.bf16.mxu1 %v7421_v63  ;;  %v969_v63 = vld [vmem:[%s11267_s3 + $0x5c8] sm:$0xff] }
  0xa6   :  { %3997 = vmatpush2.bf16.msra.mxu0 %v7292_v1  ;;  %v973_v1 = vld [vmem:[%s11267_s3 + $0x5e8] sm:$0xff] }
  0xa7   :  { %3998 = vmatprep.subr.bf16.mxu0 %v7285_v2  ;;  %v7236_v2 = vcombine.low %v1104_v49, %v1108_v52  ;;  %v7103_v8 = vcombine.high %v969_v63, %v973_v1  ;;  %v7102_v12 = vcombine.low %v969_v63, %v973_v1  ;;  %v793_v52 = vld [vmem:[%s11267_s3 + $0x48] sm:$0xff] }
  0xa8   :  { %4038 = vmatpush2.bf16.msra.mxu1 %v7420_v3  ;;  %v6975_v3 = vcombine.high %v841_v61, %v845_v62  ;;  %v789_v63 = vld [vmem:[%s11267_s3 + $0x28] sm:$0xff] }
  0xa9   :  { %4039 = vmatprep.subr.bf16.mxu1 %v7413_v7  ;;  %v961_v7 = vld [vmem:[%s11267_s3 + $0x588] sm:$0xff] }
  0xaa   :  { %3999 = vmatpush2.bf16.msra.mxu0 %v7284_v9  ;;  %v965_v9 = vld [vmem:[%s11267_s3 + $0x5a8] sm:$0xff] }
  0xab   :  { %4000 = vmatprep.subr.bf16.mxu0 %v7277_v10  ;;  %v6974_v10 = vcombine.low %v841_v61, %v845_v62  ;;  %v7094_v20 = vcombine.low %v961_v7, %v965_v9  ;;  %v785_v62 = vld [vmem:[%s11267_s3 + $0x8] sm:$0xff] }
  0xac   :  { %4040 = vmatpush2.bf16.msra.mxu1 %v7412_v11  ;;  %v6967_v11 = vcombine.high %v833_v5, %v837_v6 }
  0xad   :  { %4041 = vmatprep.subr.bf16.mxu1 %v7405_v15  ;;  %v7095_v15 = vcombine.high %v961_v7, %v965_v9  ;;  %v909_v7 = vld [vmem:[%s11267_s3 + $0x3e8] sm:$0xff] }
  0xae   :  { %4001 = vmatpush2.bf16.msra.mxu0 %v7276_v17  ;;  %v957_v17 = vld [vmem:[%s11267_s3 + $0x568] sm:$0xff] }
  0xaf   :  { %4002 = vmatprep.subr.bf16.mxu0 %v7269_v18  ;;  %v6966_v18 = vcombine.low %v833_v5, %v837_v6  ;;  %v7087_v25 = vcombine.high %v953_v16, %v957_v17  ;;  %v7086_v29 = vcombine.low %v953_v16, %v957_v17  ;;  %v905_v6 = vld [vmem:[%s11267_s3 + $0x3c8] sm:$0xff] }
  0xb0   :  { %4042 = vmatpush2.bf16.msra.mxu1 %v7404_v19  ;;  %v6959_v19 = vcombine.high %v825_v13, %v829_v14  ;;  %v1025_v16 = vld [vmem:[%s11267_s3 + $0x788] sm:$0xff] }
  0xb1   :  { %4043 = vmatprep.subr.bf16.mxu1 %v7397_v24  ;;  %v945_v24 = vld [vmem:[%s11267_s3 + $0x508] sm:$0xff] }
  0xb2   :  { %4003 = vmatpush2.bf16.msra.mxu0 %v7268_v26  ;;  %v949_v26 = vld [vmem:[%s11267_s3 + $0x528] sm:$0xff] }
  0xb3   :  { %4004 = vmatprep.subr.bf16.mxu0 %v7261_v27  ;;  %v6958_v27 = vcombine.low %v825_v13, %v829_v14  ;;  %v7079_v35 = vcombine.high %v945_v24, %v949_v26  ;;  %v7078_v39 = vcombine.low %v945_v24, %v949_v26  ;;  %v897_v14 = vld [vmem:[%s11267_s3 + $0x388] sm:$0xff] }
  0xb4   :  { %4044 = vmatpush2.bf16.msra.mxu1 %v7396_v28  ;;  %v6951_v28 = vcombine.high %v817_v21, %v821_v23  ;;  %v893_v24 = vld [vmem:[%s11267_s3 + $0x368] sm:$0xff] }
  0xb5   :  { %4045 = vmatprep.subr.bf16.mxu1 %v7389_v33  ;;  %v937_v33 = vld [vmem:[%s11267_s3 + $0x4c8] sm:$0xff] }
  0xb6   :  { %4005 = vmatpush2.bf16.msra.mxu0 %v7260_v36  ;;  %v941_v36 = vld [vmem:[%s11267_s3 + $0x4e8] sm:$0xff] }
  0xb7   :  { %4006 = vmatprep.subr.bf16.mxu0 %v7253_v37  ;;  %v6950_v37 = vcombine.low %v817_v21, %v821_v23  ;;  %v7071_v43 = vcombine.high %v937_v33, %v941_v36  ;;  %v7070_v49 = vcombine.low %v937_v33, %v941_v36  ;;  %v889_v23 = vld [vmem:[%s11267_s3 + $0x348] sm:$0xff] }
  0xb8   :  { %4046 = vmatpush2.bf16.msra.mxu1 %v7388_v38  ;;  %v6943_v38 = vcombine.high %v809_v30, %v813_v32  ;;  %v7023_v33 = vcombine.high %v889_v23, %v893_v24  ;;  %v881_v36 = vld [vmem:[%s11267_s3 + $0x308] sm:$0xff] }
  0xb9   :  { %4047 = vmatprep.subr.bf16.mxu1 %v7381_v42  ;;  %v929_v42 = vld [vmem:[%s11267_s3 + $0x488] sm:$0xff] }
  0xba   :  { %4007 = vmatpush2.bf16.msra.mxu0 %v7252_v44  ;;  %v933_v44 = vld [vmem:[%s11267_s3 + $0x4a8] sm:$0xff] }
  0xbb   :  { %4008 = vmatprep.subr.bf16.mxu0 %v7245_v45  ;;  %v6942_v45 = vcombine.low %v809_v30, %v813_v32  ;;  %v7063_v57 = vcombine.high %v929_v42, %v933_v44  ;;  %v7062_v61 = vcombine.low %v929_v42, %v933_v44  ;;  %v1013_v42 = vld [vmem:[%s11267_s3 + $0x728] sm:$0xff] }
  0xbc   :  { %4048 = vmatpush2.bf16.msra.mxu1 %v7380_v47  ;;  %v6935_v47 = vcombine.high %v801_v40, %v805_v41 }
  0xbd   :  { %4049 = vmatprep.subr.bf16.mxu1 %v7373_v55  ;;  %v921_v55 = vld [vmem:[%s11267_s3 + $0x448] sm:$0xff] }
  0xbe   :  { %4009 = vmatpush2.bf16.msra.mxu0 %v7244_v58  ;;  %v925_v58 = vld [vmem:[%s11267_s3 + $0x468] sm:$0xff] }
  0xbf   :  { %4010 = vmatprep.subr.bf16.mxu0 %v7237_v59  ;;  %v6934_v59 = vcombine.low %v801_v40, %v805_v41  ;;  %v7055_v1 = vcombine.high %v921_v55, %v925_v58  ;;  %v7054_v5 = vcombine.low %v921_v55, %v925_v58  ;;  %v1001_v55 = vld [vmem:[%s11267_s3 + $0x6c8] sm:$0xff] }
  0xc0   :  { %4050 = vmatpush2.bf16.msra.mxu1 %v7372_v60  ;;  %v6927_v60 = vcombine.high %v793_v52, %v797_v54 }
  0xc1   :  { %4051 = vmatprep.subr.bf16.mxu1 %v7365_v0  ;;  %v913_v0 = vld [vmem:[%s11267_s3 + $0x408] sm:$0xff] }
  0xc2   :  { %4011 = vmatpush2.bf16.msra.mxu0 %v7236_v2  ;;  %v917_v2 = vld [vmem:[%s11267_s3 + $0x428] sm:$0xff] }
  0xc3   :  { %4062 = vmatprep.subr.bf16.mxu0 %v6975_v3  ;;  %v6926_v3 = vcombine.low %v793_v52, %v797_v54  ;;  %v7047_v9 = vcombine.high %v913_v0, %v917_v2  ;;  %v7046_v13 = vcombine.low %v913_v0, %v917_v2  ;;  %v873_v52 = vld [vmem:[%s11267_s3 + $0x2c8] sm:$0xff] }
  0xc4   :  { %4052 = vmatpush2.bf16.msra.mxu1 %v7364_v4  ;;  %v6919_v4 = vcombine.high %v785_v62, %v789_v63  ;;  %v877_v54 = vld [vmem:[%s11267_s3 + $0x2e8] sm:$0xff] }
  0xc5   :  { %4013 = vmatmul.mubr.bf16.vlgmr.msra.gmra.mxu0 %v8663_v22  ;;  %4103 = vmatprep.subr.bf16.mxu1 %v7103_v8  ;;  %v1033_v8 = vld [vmem:[%s11267_s3 + $0x7c8] sm:$0xff] }
  0xc6   :  { %4063 = vmatpush1.bf16.msra.mxu0 %v6974_v10  ;;  %4094 = vmatprep.mubr.bf16.mxu0 %v8539_v48  ;;  %v1037_v10 = vld [vmem:[%s11267_s3 + $0x7e8] sm:$0xff] }
  0xc7   :  { %4054 = vmatmul.mubr.bf16.vlgmr.msra.gmra.mxu1 %v8682_v31  ;;  %4064 = vmatprep.subr.bf16.mxu0 %v6967_v11  ;;  %v6918_v11 = vcombine.low %v785_v62, %v789_v63  ;;  %v7167_v17 = vcombine.high %v1033_v8, %v1037_v10  ;;  %v7166_v21 = vcombine.low %v1033_v8, %v1037_v10  ;;  %v865_v63 = vld [vmem:[%s11267_s3 + $0x288] sm:$0xff] }
  0xc8   :  { %4104 = vmatpush1.bf16.msra.mxu1 %v7102_v12  ;;  %4135 = vmatprep.mubr.bf16.mxu1 %v8557_v53  ;;  %v7039_v12 = vcombine.high %v905_v6, %v909_v7  ;;  %v869_v0 = vld [vmem:[%s11267_s3 + $0x2a8] sm:$0xff] }
  0xc9   :  { %4105 = vmatprep.subr.bf16.mxu1 %v7095_v15  ;;  %v901_v15 = vld [vmem:[%s11267_s3 + $0x3a8] sm:$0xff] }
  0xca   :  { %4065 = vmatpush1.bf16.msra.mxu0 %v6966_v18  ;;  %v1029_v18 = vld [vmem:[%s11267_s3 + $0x7a8] sm:$0xff] }
  0xcb   :  { %4066 = vmatprep.subr.bf16.mxu0 %v6959_v19  ;;  %v7038_v19 = vcombine.low %v905_v6, %v909_v7  ;;  %v857_v7 = vld [vmem:[%s11267_s3 + $0x248] sm:$0xff] }
  0xcc   :  { %4106 = vmatpush1.bf16.msra.mxu1 %v7094_v20  ;;  %v7031_v20 = vcombine.high %v897_v14, %v901_v15  ;;  %v861_v8 = vld [vmem:[%s11267_s3 + $0x268] sm:$0xff] }
  0xcd   :  { %4107 = vmatprep.subr.bf16.mxu1 %v7087_v25  ;;  %v1017_v25 = vld [vmem:[%s11267_s3 + $0x748] sm:$0xff] }
  0xce   :  { %4067 = vmatpush1.bf16.msra.mxu0 %v6958_v27  ;;  %v7159_v27 = vcombine.high %v1025_v16, %v1029_v18 }
  0xcf   :  { %4068 = vmatprep.subr.bf16.mxu0 %v6951_v28  ;;  %v1021_v28 = vld [vmem:[%s11267_s3 + $0x768] sm:$0xff] }
  0xd0   :  { %4108 = vmatpush1.bf16.msra.mxu1 %v7086_v29  ;;  %v7030_v29 = vcombine.low %v897_v14, %v901_v15  ;;  %v7151_v41 = vcombine.high %v1017_v25, %v1021_v28  ;;  %v849_v15 = vld [vmem:[%s11267_s3 + $0x208] sm:$0xff] }
  0xd1   :  { %4109 = vmatprep.subr.bf16.mxu1 %v7079_v35  ;;  %v7158_v35 = vcombine.low %v1025_v16, %v1029_v18  ;;  %v853_v16 = vld [vmem:[%s11267_s3 + $0x228] sm:$0xff] }
  0xd2   :  { %4069 = vmatpush1.bf16.msra.mxu0 %v6950_v37  ;;  %v885_v37 = vld [vmem:[%s11267_s3 + $0x328] sm:$0xff] }
  0xd3   :  { %4070 = vmatprep.subr.bf16.mxu0 %v6943_v38  ;;  %v1009_v38 = vld [vmem:[%s11267_s3 + $0x708] sm:$0xff] }
  0xd4   :  { %4110 = vmatpush1.bf16.msra.mxu1 %v7078_v39  ;;  %v7143_v58 = vcombine.high %v1009_v38, %v1013_v42  ;;  %v7142_v62 = vcombine.low %v1009_v38, %v1013_v42  ;;  %v1217_v42 = vld [vmem:[%s11267_s3 + $0xd88] sm:$0xff] }
  0xd5   :  { %4111 = vmatprep.subr.bf16.mxu1 %v7071_v43  ;;  %v7022_v43 = vcombine.low %v889_v23, %v893_v24  ;;  %v1097_v24 = vld [vmem:[%s11267_s3 + $0x9c8] sm:$0xff] }
  0xd6   :  { %4071 = vmatpush1.bf16.msra.mxu0 %v6942_v45 }
  0xd7   :  { %4072 = vmatprep.subr.bf16.mxu0 %v6935_v47  ;;  %v7015_v47 = vcombine.high %v881_v36, %v885_v37 }
  0xd8   :  { %4112 = vmatpush1.bf16.msra.mxu1 %v7070_v49  ;;  %v7150_v49 = vcombine.low %v1017_v25, %v1021_v28  ;;  %v1101_v25 = vld [vmem:[%s11267_s3 + $0x9e8] sm:$0xff] }
  0xd9   :  { %4113 = vmatprep.subr.bf16.mxu1 %v7063_v57 }
  0xda   :  { %4073 = vmatpush1.bf16.msra.mxu0 %v6934_v59  ;;  %v1005_v59 = vld [vmem:[%s11267_s3 + $0x6e8] sm:$0xff] }
  0xdb   :  { %4074 = vmatprep.subr.bf16.mxu0 %v6927_v60  ;;  %v7014_v60 = vcombine.low %v881_v36, %v885_v37  ;;  %v7135_v2 = vcombine.high %v1001_v55, %v1005_v59  ;;  %v7134_v6 = vcombine.low %v1001_v55, %v1005_v59  ;;  %v7231_v36 = vcombine.high %v1097_v24, %v1101_v25  ;;  %v1209_v55 = vld [vmem:[%s11267_s3 + $0xd48] sm:$0xff] }
  0xdc   :  { %4114 = vmatpush1.bf16.msra.mxu1 %v7062_v61  ;;  %v7007_v61 = vcombine.high %v873_v52, %v877_v54 }
  0xdd   :  { %4115 = vmatprep.subr.bf16.mxu1 %v7055_v1  ;;  %v993_v1 = vld [vmem:[%s11267_s3 + $0x688] sm:$0xff] }
  0xde   :  { %4075 = vmatpush1.bf16.msra.mxu0 %v6926_v3  ;;  %v997_v3 = vld [vmem:[%s11267_s3 + $0x6a8] sm:$0xff] }
  0xdf   :  { %4076 = vmatprep.subr.bf16.mxu0 %v6919_v4  ;;  %v7006_v4 = vcombine.low %v873_v52, %v877_v54  ;;  %v7127_v10 = vcombine.high %v993_v1, %v997_v3  ;;  %v7126_v14 = vcombine.low %v993_v1, %v997_v3  ;;  %v1081_v52 = vld [vmem:[%s11267_s3 + $0x948] sm:$0xff] }
  0xe0   :  { %4116 = vmatpush1.bf16.msra.mxu1 %v7054_v5  ;;  %v6999_v5 = vcombine.high %v865_v63, %v869_v0  ;;  %v1085_v54 = vld [vmem:[%s11267_s3 + $0x968] sm:$0xff] }
  0xe1   :  { %4117 = vmatprep.subr.bf16.mxu1 %v7047_v9  ;;  %v985_v9 = vld [vmem:[%s11267_s3 + $0x648] sm:$0xff] }
  0xe2   :  { %4077 = vmatpush1.bf16.msra.mxu0 %v6918_v11  ;;  %v989_v11 = vld [vmem:[%s11267_s3 + $0x668] sm:$0xff] }
  0xe3   :  { %4078 = vmatprep.subr.bf16.mxu0 %v7039_v12  ;;  %v6998_v12 = vcombine.low %v865_v63, %v869_v0  ;;  %v7119_v18 = vcombine.high %v985_v9, %v989_v11  ;;  %v7118_v23 = vcombine.low %v985_v9, %v989_v11  ;;  %v1073_v1 = vld [vmem:[%s11267_s3 + $0x908] sm:$0xff] }
  0xe4   :  { %4118 = vmatpush1.bf16.msra.mxu1 %v7046_v13  ;;  %v6991_v13 = vcombine.high %v857_v7, %v861_v8  ;;  %v1201_v3 = vld [vmem:[%s11267_s3 + $0xd08] sm:$0xff] }
  0xe5   :  { %v9185_v26 = vpop.f32.mrf.mxu0  ;;  %4119 = vmatprep.subr.bf16.mxu1 %v7167_v17  ;;  %v977_v17 = vld [vmem:[%s11267_s3 + $0x608] sm:$0xff] }
  0xe6   :  { %4079 = vmatpush2.bf16.msra.mxu0 %v7038_v19  ;;  %v9190_v30 = vpop.f32.mrf.mxu1  ;;  %v981_v19 = vld [vmem:[%s11267_s3 + $0x628] sm:$0xff] }
  0xe7   :  { %v9192_v32 = vpop.f32.mrf.mxu0  ;;  %4080 = vmatprep.subr.bf16.mxu0 %v7031_v20  ;;  %v6990_v20 = vcombine.low %v857_v7, %v861_v8  ;;  %v7111_v28 = vcombine.high %v977_v17, %v981_v19  ;;  %v7110_v38 = vcombine.low %v977_v17, %v981_v19  ;;  %v1205_v7 = vld [vmem:[%s11267_s3 + $0xd28] sm:$0xff] }
  0xe8   :  { %4120 = vmatpush2.bf16.msra.mxu1 %v7166_v21  ;;  %v9203_v39 = vpop.f32.mrf.mxu1  ;;  %v6983_v21 = vcombine.high %v849_v15, %v853_v16  ;;  %v7735_v37 = vadd.f32 %v9192_v32, %v9185_v26  ;;  %v1221_v26 = vld [vmem:[%s11267_s3 + $0xda8] sm:$0xff]  ;;  %v7230_v32 = vcombine.low %v1097_v24, %v1101_v25  ;;  %v7335_v19 = vcombine.high %v1201_v3, %v1205_v7 }
  0xe9   :  { %v7736_v40 = vpop.f32.mrf.mxu0  ;;  %4121 = vmatprep.subr.bf16.mxu1 %v7159_v27  ;;  %v1225_v27 = vld [vmem:[%s11267_s3 + $0xdc8] sm:$0xff]  ;;  %v7350_v0 = vcombine.low %v1217_v42, %v1221_v26 }
  0xea   :  { %4081 = vmatpush2.bf16.msra.mxu0 %v7030_v29  ;;  %v7758_v44 = vpop.f32.mrf.mxu1  ;;  %v1229_v29 = vld [vmem:[%s11267_s3 + $0xde8] sm:$0xff] }
  0xeb   :  { %v7737_v45 = vpop.f32.mrf.mxu0  ;;  %4082 = vmatprep.subr.bf16.mxu0 %v7023_v33  ;;  %v6982_v33 = vcombine.low %v849_v15, %v853_v16  ;;  %v1089_v40 = vld [vmem:[%s11267_s3 + $0x988] sm:$0xff] }
  0xec   :  { %4122 = vmatpush2.bf16.msra.mxu1 %v7158_v35  ;;  %v7759_v57 = vpop.f32.mrf.mxu1  ;;  %v6851_v35 = vld [vmem:[#allocation2] ss:$0 sm:$0xff]  ;;  %v1065_v16 = vld [vmem:[%s11267_s3 + $0x8c8] sm:$0xff] }
  0xed   :  { %4123 = vmatprep.subr.bf16.mxu1 %v7151_v41  ;;  %v1093_v41 = vld [vmem:[%s11267_s3 + $0x9a8] sm:$0xff]  ;;  %v651_v45 = vadd.f32 %v7735_v37, %v6851_v35 }
  0xee   :  { %4083 = vmatpush2.bf16.msra.mxu0 %v7022_v43  ;;  %v7359_v43 = vcombine.high %v1225_v27, %v1229_v29  ;;  %v7223_v44 = vcombine.high %v1089_v40, %v1093_v41  ;;  %v1069_v17 = vld [vmem:[%s11267_s3 + $0x8e8] sm:$0xff] }
  0xef   :  { %4084 = vmatprep.subr.bf16.mxu0 %v7015_v47  ;;  %v7757_v47 = vadd.f32 %v9203_v39, %v9190_v30  ;;  %v1213_v30 = vld [vmem:[%s11267_s3 + $0xd68] sm:$0xff]  ;;  %v7222_v39 = vcombine.low %v1089_v40, %v1093_v41  ;;  %v7199_v25 = vcombine.high %v1065_v16, %v1069_v17 }
  0xf0   :  { %4124 = vmatpush2.bf16.msra.mxu1 %v7150_v49  ;;  %v7358_v49 = vcombine.low %v1225_v27, %v1229_v29  ;;  %v7342_v15 = vcombine.low %v1209_v55, %v1213_v30  ;;  %v1197_v24 = vld [vmem:[%s11267_s3 + $0xce8] sm:$0xff] }
  0xf1   :  { %4125 = vmatprep.subr.bf16.mxu1 %v7143_v58  ;;  %v7351_v58 = vcombine.high %v1217_v42, %v1221_v26  ;;  %v1057_v29 = vld [vmem:[%s11267_s3 + $0x888] sm:$0xff] }
  0xf2   :  { %4085 = vmatpush2.bf16.msra.mxu0 %v7014_v60  ;;  %v1185_v35 = vld [vmem:[%s11267_s3 + $0xc88] sm:$0xff] }
  0xf3   :  { %4086 = vmatprep.subr.bf16.mxu0 %v7007_v61  ;;  %v7215_v61 = vcombine.high %v1081_v52, %v1085_v54  ;;  %v1189_v37 = vld [vmem:[%s11267_s3 + $0xca8] sm:$0xff] }
  0xf4   :  { %4126 = vmatpush2.bf16.msra.mxu1 %v7142_v62  ;;  %v691_v62 = vadd.f32 %v7757_v47, %v651_v45 }
  0xf5   :  { %4127 = vmatprep.subr.bf16.mxu1 %v7135_v2  ;;  %v1077_v2 = vld [vmem:[%s11267_s3 + $0x928] sm:$0xff] }
  0xf6   :  { %4087 = vmatpush2.bf16.msra.mxu0 %v7006_v4 }
  0xf7   :  { %4088 = vmatprep.subr.bf16.mxu0 %v6999_v5 }
  0xf8   :  { %4128 = vmatpush2.bf16.msra.mxu1 %v7134_v6  ;;  %v7343_v6 = vcombine.high %v1209_v55, %v1213_v30 }
  0xf9   :  { %4129 = vmatprep.subr.bf16.mxu1 %v7127_v10  ;;  %v7214_v10 = vcombine.low %v1081_v52, %v1085_v54 }
  0xfa   :  { %4089 = vmatpush2.bf16.msra.mxu0 %v6998_v12 }
  0xfb   :  { %4090 = vmatprep.subr.bf16.mxu0 %v6991_v13  ;;  %v7207_v13 = vcombine.high %v1073_v1, %v1077_v2 }
  0xfc   :  { %4130 = vmatpush2.bf16.msra.mxu1 %v7126_v14 }
  0xfd   :  { %4131 = vmatprep.subr.bf16.mxu1 %v7119_v18 }
  0xfe   :  { %4091 = vmatpush2.bf16.msra.mxu0 %v6990_v20  ;;  %v1193_v20 = vld [vmem:[%s11267_s3 + $0xcc8] sm:$0xff] }
  0xff   :  { %4092 = vmatprep.subr.bf16.mxu0 %v6983_v21 }
 0x100   :  { %4132 = vmatpush2.bf16.msra.mxu1 %v7118_v23  ;;  %v7206_v23 = vcombine.low %v1073_v1, %v1077_v2 }
 0x101   :  { %4133 = vmatprep.subr.bf16.mxu1 %v7111_v28  ;;  %v7334_v28 = vcombine.low %v1201_v3, %v1205_v7 }
 0x102   :  { %4093 = vmatpush2.bf16.msra.mxu0 %v6982_v33  ;;  %v1061_v33 = vld [vmem:[%s11267_s3 + $0x8a8] sm:$0xff] }
 0x103   :  { %4144 = vmatprep.subr.bf16.mxu0 %v7231_v36  ;;  %v7327_v36 = vcombine.high %v1193_v20, %v1197_v24  ;;  %v7191_v40 = vcombine.high %v1057_v29, %v1061_v33 }
 0x104   :  { %4134 = vmatpush2.bf16.msra.mxu1 %v7110_v38  ;;  %v7198_v38 = vcombine.low %v1065_v16, %v1069_v17 }
 0x105   :  { %v7777_v57 = vpop.f32.mrf.mxu0  ;;  %4095 = vmatmul.mubr.bf16.vlgmr.msra.gmra.mxu0 %v8534_v46  ;;  %4185 = vmatprep.subr.bf16.mxu1 %v7359_v43 }
 0x106   :  { %4145 = vmatpush1.bf16.msra.mxu0 %v7230_v32  ;;  %4176 = vmatprep.mubr.bf16.mxu0 %v8545_v50  ;;  %v7799_v59 = vpop.f32.mrf.mxu1 }
 0x107   :  { %4136 = vmatmul.mubr.bf16.vlgmr.msra.gmra.mxu1 %v8549_v51  ;;  %v7778_v60 = vpop.f32.mrf.mxu0  ;;  %4146 = vmatprep.subr.bf16.mxu0 %v7223_v44 }
 0x108   :  { %4186 = vmatpush1.bf16.msra.mxu1 %v7358_v49  ;;  %v7779_v63 = vadd.f32 %v7778_v60, %v7777_v57  ;;  %4217 = vmatprep.mubr.bf16.mxu1 %v8568_v56  ;;  %v7800_v4 = vpop.f32.mrf.mxu1 }
 0x109   :  { %v7780_v5 = vpop.f32.mrf.mxu0  ;;  %4187 = vmatprep.subr.bf16.mxu1 %v7351_v58  ;;  %v7801_v9 = vadd.f32 %v7800_v4, %v7799_v59 }
 0x10a   :  { %v731_v8 = vadd.f32 %v7779_v63, %v691_v62  ;;  %4147 = vmatpush1.bf16.msra.mxu0 %v7222_v39  ;;  %v7802_v11 = vpop.f32.mrf.mxu1 }
 0x10b   :  { %v7781_v12 = vpop.f32.mrf.mxu0  ;;  %4148 = vmatprep.subr.bf16.mxu0 %v7215_v61 }
 0x10c   :  { %v771_v14 = vadd.f32 %v7801_v9, %v731_v8  ;;  %4188 = vmatpush1.bf16.msra.mxu1 %v7350_v0  ;;  %v7803_v18 = vpop.f32.mrf.mxu1 }
 0x10d   :  { %4189 = vmatprep.subr.bf16.mxu1 %v7343_v6 }
 0x10e   :  { %v776_v21 = vsub.f32 0.0, %v771_v14  ;;  %4149 = vmatpush1.bf16.msra.mxu0 %v7214_v10 }
 0x10f   :  { %4150 = vmatprep.subr.bf16.mxu0 %v7207_v13 }
 0x110   :  { %v777_v27 = vmul.f32 1.442695, %v776_v21  ;;  %4190 = vmatpush1.bf16.msra.mxu1 %v7342_v15 }
 0x111   :  { %4191 = vmatprep.subr.bf16.mxu1 %v7335_v19 }
 0x112   :  { %8332 = vpow2.f32 %v777_v27  ;;  %4151 = vmatpush1.bf16.msra.mxu0 %v7206_v23 }
 0x113   :  { %4152 = vmatprep.subr.bf16.mxu0 %v7199_v25 }
 0x114   :  { %18 = vsyncpa [#allocation4], 0  ;;  %4192 = vmatpush1.bf16.msra.mxu1 %v7334_v28  ;;  %v7326_v41 = vcombine.low %v1193_v20, %v1197_v24  ;;  %v1049_v42 = vld [vmem:[%s11267_s3 + $0x848] sm:$0xff]  ;;  %v7319_v26 = vcombine.high %v1185_v35, %v1189_v37  ;;  %v7190_v32 = vcombine.low %v1057_v29, %v1061_v33  ;;  %v7318_v49 = vcombine.low %v1185_v35, %v1189_v37  ;;  %s8360_s11 = smov [#allocation3]  }
 0x115   :  { %v1053_v43 = vld [vmem:[%s11267_s3 + $0x868] sm:$0xff]  ;;  %4193 = vmatprep.subr.bf16.mxu1 %v7327_v36  ;;  %vm782_vm0 = vcmask 1024   ;;  %vm6831_vm13 = vcmask 33792  }
 0x116   :  { %4153 = vmatpush1.bf16.msra.mxu0 %v7198_v38  ;;  %v1177_v44 = vld [vmem:[%s11267_s3 + $0xc48] sm:$0xff]  ;;  %v7183_v47 = vcombine.high %v1049_v42, %v1053_v43  ;;  %v7182_v57 = vcombine.low %v1049_v42, %v1053_v43 }
 0x117   :  { %v1181_v45 = vld [vmem:[%s11267_s3 + $0xc68] sm:$0xff]  ;;  %4154 = vmatprep.subr.bf16.mxu0 %v7191_v40 }
 0x118   :  { %4194 = vmatpush1.bf16.msra.mxu1 %v7326_v41  ;;  %v1041_v52 = vld [vmem:[%s11267_s3 + $0x808] sm:$0xff]  ;;  %v7311_v55 = vcombine.high %v1177_v44, %v1181_v45  ;;  %v7310_v59 = vcombine.low %v1177_v44, %v1181_v45 }
 0x119   :  { %v1045_v54 = vld [vmem:[%s11267_s3 + $0x828] sm:$0xff]  ;;  %4195 = vmatprep.subr.bf16.mxu1 %v7319_v26 }
 0x11a   :  { %4155 = vmatpush1.bf16.msra.mxu0 %v7190_v32  ;;  %v1169_v58 = vld [vmem:[%s11267_s3 + $0xc08] sm:$0xff]  ;;  %v7175_v39 = vcombine.high %v1041_v52, %v1045_v54  ;;  %v7174_v63 = vcombine.low %v1041_v52, %v1045_v54 }
 0x11b   :  { %v1173_v30 = vld [vmem:[%s11267_s3 + $0xc28] sm:$0xff]  ;;  %4156 = vmatprep.subr.bf16.mxu0 %v7183_v47 }
 0x11c   :  { %4196 = vmatpush1.bf16.msra.mxu1 %v7318_v49  ;;  %v1161_v60 = vld [vmem:[%s11267_s3 + $0xbc8] sm:$0xff]  ;;  %v7303_v62 = vcombine.high %v1169_v58, %v1173_v30  ;;  %v7302_v5 = vcombine.low %v1169_v58, %v1173_v30 }
 0x11d   :  { %v1165_v61 = vld [vmem:[%s11267_s3 + $0xbe8] sm:$0xff]  ;;  %4197 = vmatprep.subr.bf16.mxu1 %v7311_v55 }
 0x11e   :  { %4157 = vmatpush1.bf16.msra.mxu0 %v7182_v57  ;;  %v1289_v0 = vld [vmem:[%s11267_s3 + $0xfc8] sm:$0xff]  ;;  %v7295_v3 = vcombine.high %v1161_v60, %v1165_v61  ;;  %v7294_v9 = vcombine.low %v1161_v60, %v1165_v61 }
 0x11f   :  { %v1293_v1 = vld [vmem:[%s11267_s3 + $0xfe8] sm:$0xff]  ;;  %v8333_v2 = vpop.eup %8332  ;;  %4158 = vmatprep.subr.bf16.mxu0 %v7175_v39 }
 0x120   :  { %v779_v4 = vadd.f32 1.0, %v8333_v2  ;;  %4198 = vmatpush1.bf16.msra.mxu1 %v7310_v59  ;;  %v1153_v6 = vld [vmem:[%s11267_s3 + $0xb88] sm:$0xff]  ;;  %v7423_v8 = vcombine.high %v1289_v0, %v1293_v1  ;;  %v7422_v13 = vcombine.low %v1289_v0, %v1293_v1 }
 0x121   :  { %v1157_v7 = vld [vmem:[%s11267_s3 + $0xba8] sm:$0xff]  ;;  %4199 = vmatprep.subr.bf16.mxu1 %v7303_v62 }
 0x122   :  { %8334 = vrcp.f32 %v779_v4  ;;  %4159 = vmatpush1.bf16.msra.mxu0 %v7174_v63  ;;  %v1281_v10 = vld [vmem:[%s11267_s3 + $0xf88] sm:$0xff]  ;;  %v7287_v12 = vcombine.high %v1153_v6, %v1157_v7  ;;  %v7286_v17 = vcombine.low %v1153_v6, %v1157_v7 }
 0x123   :  { %v1285_v11 = vld [vmem:[%s11267_s3 + $0xfa8] sm:$0xff]  ;;  %4160 = vmatprep.subr.bf16.mxu0 %v7295_v3 }
 0x124   :  { %4200 = vmatpush1.bf16.msra.mxu1 %v7302_v5  ;;  %v1145_v14 = vld [vmem:[%s11267_s3 + $0xb48] sm:$0xff]  ;;  %v7415_v16 = vcombine.high %v1281_v10, %v1285_v11  ;;  %v7414_v21 = vcombine.low %v1281_v10, %v1285_v11 }
 0x125   :  { %v1149_v15 = vld [vmem:[%s11267_s3 + $0xb68] sm:$0xff]  ;;  %4201 = vmatprep.subr.bf16.mxu1 %v7423_v8  ;;  %v842_v8 = vld [vmem:[%s11267_s3 + $0x1d0] sm:$0xff] }
 0x126   :  { %4161 = vmatpush2.bf16.msra.mxu0 %v7294_v9  ;;  %v1273_v18 = vld [vmem:[%s11267_s3 + $0xf48] sm:$0xff]  ;;  %v7279_v20 = vcombine.high %v1145_v14, %v1149_v15  ;;  %v7278_v27 = vcombine.low %v1145_v14, %v1149_v15  ;;  %v846_v9 = vld [vmem:[%s11267_s3 + $0x1f0] sm:$0xff]  ;;  %v9475_v15 = vld [vmem:[%s11268_s4] sm:$0xff] }
 0x127   :  { %v1277_v19 = vld [vmem:[%s11267_s3 + $0xf68] sm:$0xff]  ;;  %4162 = vmatprep.subr.bf16.mxu0 %v7287_v12  ;;  %v1300_v12 = vsub.s32 0, %v8515_v34  ;;  %v974_v14 = vld [vmem:[%s11267_s3 + $0x5f0] sm:$0xff] }
 0x128   :  { %4202 = vmatpush2.bf16.msra.mxu1 %v7422_v13  ;;  %v1137_v23 = vld [vmem:[%s11267_s3 + $0xb08] sm:$0xff]  ;;  %v7407_v25 = vcombine.high %v1273_v18, %v1277_v19  ;;  %v7406_v35 = vcombine.low %v1273_v18, %v1277_v19  ;;  %v970_v13 = vld [vmem:[%s11267_s3 + $0x5d0] sm:$0xff]  ;;  %v1304_v18 = vsub.s32 1, %v8515_v34 }
 0x129   :  { %v1141_v24 = vld [vmem:[%s11267_s3 + $0xb28] sm:$0xff]  ;;  %4203 = vmatprep.subr.bf16.mxu1 %v7415_v16  ;;  %v6977_v16 = vcombine.high %v842_v8, %v846_v9  ;;  %v834_v19 = vld [vmem:[%s11267_s3 + $0x190] sm:$0xff] }
 0x12a   :  { %4163 = vmatpush2.bf16.msra.mxu0 %v7286_v17  ;;  %v1265_v28 = vld [vmem:[%s11267_s3 + $0xf08] sm:$0xff]  ;;  %v7271_v33 = vcombine.high %v1137_v23, %v1141_v24  ;;  %v7270_v40 = vcombine.low %v1137_v23, %v1141_v24  ;;  %v1301_v23 = vrot.slane %v9475_v15, %v1300_v12  ;;  %v6976_v24 = vcombine.low %v842_v8, %v846_v9 }
 0x12b   :  { %v1269_v29 = vld [vmem:[%s11267_s3 + $0xf28] sm:$0xff]  ;;  %4164 = vmatprep.subr.bf16.mxu0 %v7279_v20  ;;  %v838_v20 = vld [vmem:[%s11267_s3 + $0x1b0] sm:$0xff] }
 0x12c   :  { %4204 = vmatpush2.bf16.msra.mxu1 %v7414_v21  ;;  %v1129_v36 = vld [vmem:[%s11267_s3 + $0xac8] sm:$0xff]  ;;  %v7399_v38 = vcombine.high %v1265_v28, %v1269_v29  ;;  %v7398_v32 = vcombine.low %v1265_v28, %v1269_v29  ;;  %v7105_v21 = vcombine.high %v970_v13, %v974_v14  ;;  %v6969_v28 = vcombine.high %v834_v19, %v838_v20 }
 0x12d   :  { %v1133_v37 = vld [vmem:[%s11267_s3 + $0xae8] sm:$0xff]  ;;  %4205 = vmatprep.subr.bf16.mxu1 %v7407_v25  ;;  %v962_v25 = vld [vmem:[%s11267_s3 + $0x590] sm:$0xff]  ;;  %v7104_v29 = vcombine.low %v970_v13, %v974_v14 }
 0x12e   :  { %4165 = vmatpush2.bf16.msra.mxu0 %v7278_v27  ;;  %v1257_v41 = vld [vmem:[%s11267_s3 + $0xec8] sm:$0xff]  ;;  %v7263_v26 = vcombine.high %v1129_v36, %v1133_v37  ;;  %v7262_v49 = vcombine.low %v1129_v36, %v1133_v37  ;;  %v966_v27 = vld [vmem:[%s11267_s3 + $0x5b0] sm:$0xff] }
 0x12f   :  { %v1261_v42 = vld [vmem:[%s11267_s3 + $0xee8] sm:$0xff]  ;;  %v8335_v43 = vpop.eup %8334  ;;  %4166 = vmatprep.subr.bf16.mxu0 %v7271_v33  ;;  %v1305_v33 = vrot.slane %v9475_v15, %v1304_v18  ;;  %v830_v36 = vld [vmem:[%s11267_s3 + $0x170] sm:$0xff] }
 0x130   :  { %783 = vst.msk [vmem:[%s11273_s9] sm:$0x3] %vm782_vm0, %v8335_v43  ;;  %4206 = vmatpush2.bf16.msra.mxu1 %v7406_v35  ;;  %v1121_v44 = vld [vmem:[%s11267_s3 + $0xa88] sm:$0xff]  ;;  %v7391_v47 = vcombine.high %v1257_v41, %v1261_v42  ;;  %v7390_v57 = vcombine.low %v1257_v41, %v1261_v42  ;;  %v826_v35 = vld [vmem:[%s11267_s3 + $0x150] sm:$0xff]  ;;  %v6968_v41 = vcombine.low %v834_v19, %v838_v20 }
 0x131   :  { %v1125_v45 = vld [vmem:[%s11267_s3 + $0xaa8] sm:$0xff]  ;;  %4207 = vmatprep.subr.bf16.mxu1 %v7399_v38  ;;  %v7097_v38 = vcombine.high %v962_v25, %v966_v27  ;;  %v954_v42 = vld [vmem:[%s11267_s3 + $0x550] sm:$0xff] }
 0x132   :  { %4167 = vmatpush2.bf16.msra.mxu0 %v7270_v40  ;;  %v1249_v52 = vld [vmem:[%s11267_s3 + $0xe88] sm:$0xff]  ;;  %v7255_v55 = vcombine.high %v1121_v44, %v1125_v45  ;;  %v7254_v59 = vcombine.low %v1121_v44, %v1125_v45  ;;  %v958_v43 = vld [vmem:[%s11267_s3 + $0x570] sm:$0xff]  ;;  %v6961_v44 = vcombine.high %v826_v35, %v830_v36 }
 0x133   :  { %v1253_v54 = vld [vmem:[%s11267_s3 + $0xea8] sm:$0xff]  ;;  %4168 = vmatprep.subr.bf16.mxu0 %v7263_v26 }
 0x134   :  { %4208 = vmatpush2.bf16.msra.mxu1 %v7398_v32  ;;  %v1113_v58 = vld [vmem:[%s11267_s3 + $0xa48] sm:$0xff]  ;;  %v7383_v39 = vcombine.high %v1249_v52, %v1253_v54  ;;  %v7382_v63 = vcombine.low %v1249_v52, %v1253_v54  ;;  %v818_v52 = vld [vmem:[%s11267_s3 + $0x110] sm:$0xff] }
 0x135   :  { %v1117_v30 = vld [vmem:[%s11267_s3 + $0xa68] sm:$0xff]  ;;  %4209 = vmatprep.subr.bf16.mxu1 %v7391_v47  ;;  %v822_v54 = vld [vmem:[%s11267_s3 + $0x130] sm:$0xff] }
 0x136   :  { %4169 = vmatpush2.bf16.msra.mxu0 %v7262_v49  ;;  %v1241_v60 = vld [vmem:[%s11267_s3 + $0xe48] sm:$0xff]  ;;  %v7247_v62 = vcombine.high %v1113_v58, %v1117_v30  ;;  %v7246_v3 = vcombine.low %v1113_v58, %v1117_v30  ;;  %v7096_v49 = vcombine.low %v962_v25, %v966_v27  ;;  %v7089_v58 = vcombine.high %v954_v42, %v958_v43  ;;  %v922_v27 = vld [vmem:[%s11267_s3 + $0x450] sm:$0xff] }
 0x137   :  { %v1245_v61 = vld [vmem:[%s11267_s3 + $0xe68] sm:$0xff]  ;;  %4170 = vmatprep.subr.bf16.mxu0 %v7255_v55 }
 0x138   :  { %4210 = vmatpush2.bf16.msra.mxu1 %v7390_v57  ;;  %v1105_v0 = vld [vmem:[%s11267_s3 + $0xa08] sm:$0xff]  ;;  %v7375_v2 = vcombine.high %v1241_v60, %v1245_v61  ;;  %v7374_v7 = vcombine.low %v1241_v60, %v1245_v61  ;;  %v950_v60 = vld [vmem:[%s11267_s3 + $0x530] sm:$0xff] }
 0x139   :  { %v1109_v1 = vld [vmem:[%s11267_s3 + $0xa28] sm:$0xff]  ;;  %4211 = vmatprep.subr.bf16.mxu1 %v7383_v39  ;;  %v6960_v39 = vcombine.low %v826_v35, %v830_v36  ;;  %v786_v35 = vld [vmem:[%s11267_s3 + $0x10] sm:$0xff] }
 0x13a   :  { %4171 = vmatpush2.bf16.msra.mxu0 %v7254_v59  ;;  %v1233_v4 = vld [vmem:[%s11267_s3 + $0xe08] sm:$0xff]  ;;  %v7239_v6 = vcombine.high %v1105_v0, %v1109_v1  ;;  %v7238_v11 = vcombine.low %v1105_v0, %v1109_v1  ;;  %v946_v59 = vld [vmem:[%s11267_s3 + $0x510] sm:$0xff]  ;;  %v7088_v0 = vcombine.low %v954_v42, %v958_v43 }
 0x13b   :  { %v1237_v5 = vld [vmem:[%s11267_s3 + $0xe28] sm:$0xff]  ;;  %4172 = vmatprep.subr.bf16.mxu0 %v7247_v62  ;;  %v810_v1 = vld [vmem:[%s11267_s3 + $0xd0] sm:$0xff]  ;;  %v7080_v9 = vcombine.low %v946_v59, %v950_v60 }
 0x13c   :  { %4212 = vmatpush2.bf16.msra.mxu1 %v7382_v63  ;;  %v7367_v10 = vcombine.high %v1233_v4, %v1237_v5  ;;  %v7366_v17 = vcombine.low %v1233_v4, %v1237_v5  ;;  %v6953_v63 = vcombine.high %v818_v52, %v822_v54  ;;  %v7081_v4 = vcombine.high %v946_v59, %v950_v60  ;;  %v790_v36 = vld [vmem:[%s11267_s3 + $0x30] sm:$0xff] }
 0x13d   :  { %4213 = vmatprep.subr.bf16.mxu1 %v7375_v2  ;;  %v814_v2 = vld [vmem:[%s11267_s3 + $0xf0] sm:$0xff]  ;;  %v6952_v5 = vcombine.low %v818_v52, %v822_v54  ;;  %v6921_v42 = vcombine.high %v786_v35, %v790_v36 }
 0x13e   :  { %4173 = vmatpush2.bf16.msra.mxu0 %v7246_v3  ;;  %v6945_v8 = vcombine.high %v810_v1, %v814_v2  ;;  %v6944_v14 = vcombine.low %v810_v1, %v814_v2  ;;  %v1038_v52 = vld [vmem:[%s11267_s3 + $0x7f0] sm:$0xff] }
 0x13f   :  { %4174 = vmatprep.subr.bf16.mxu0 %v7239_v6  ;;  %v938_v6 = vld [vmem:[%s11267_s3 + $0x4d0] sm:$0xff] }
 0x140   :  { %4214 = vmatpush2.bf16.msra.mxu1 %v7374_v7  ;;  %v942_v7 = vld [vmem:[%s11267_s3 + $0x4f0] sm:$0xff] }
 0x141   :  { %4215 = vmatprep.subr.bf16.mxu1 %v7367_v10  ;;  %v802_v10 = vld [vmem:[%s11267_s3 + $0x90] sm:$0xff]  ;;  %v7073_v13 = vcombine.high %v938_v6, %v942_v7  ;;  %v7072_v20 = vcombine.low %v938_v6, %v942_v7 }
 0x142   :  { %4175 = vmatpush2.bf16.msra.mxu0 %v7238_v11  ;;  %v806_v11 = vld [vmem:[%s11267_s3 + $0xb0] sm:$0xff] }
 0x143   :  { %4226 = vmatprep.subr.bf16.mxu0 %v6977_v16  ;;  %v930_v16 = vld [vmem:[%s11267_s3 + $0x490] sm:$0xff]  ;;  %v6937_v19 = vcombine.high %v802_v10, %v806_v11  ;;  %v6936_v25 = vcombine.low %v802_v10, %v806_v11 }
 0x144   :  { %4216 = vmatpush2.bf16.msra.mxu1 %v7366_v17  ;;  %v934_v17 = vld [vmem:[%s11267_s3 + $0x4b0] sm:$0xff] }
 0x145   :  { %v3932_v37 = vpop.f32.mrf.mxu0  ;;  %4177 = vmatmul.mubr.bf16.vlgmr.msra.gmra.mxu0 %v8663_v22  ;;  %4267 = vmatprep.subr.bf16.mxu1 %v7105_v21  ;;  %v794_v21 = vld [vmem:[%s11267_s3 + $0x50] sm:$0xff] }
 0x146   :  { %v3933_v40 = vadd.f32 %v3932_v37, %v1301_v23  ;;  %4227 = vmatpush1.bf16.msra.mxu0 %v6976_v24  ;;  %4258 = vmatprep.mubr.bf16.mxu0 %v8539_v48  ;;  %v798_v23 = vld [vmem:[%s11267_s3 + $0x70] sm:$0xff]  ;;  %v7065_v24 = vcombine.high %v930_v16, %v934_v17 }
 0x147   :  { %v3973_v26 = vpop.f32.mrf.mxu1  ;;  %4218 = vmatmul.mubr.bf16.vlgmr.msra.gmra.mxu1 %v8682_v31  ;;  %v3934_v32 = vpop.f32.mrf.mxu0  ;;  %4228 = vmatprep.subr.bf16.mxu0 %v6969_v28  ;;  %v926_v28 = vld [vmem:[%s11267_s3 + $0x470] sm:$0xff] }
 0x148   :  { %v9511_v45 = vadd.f32 %v3973_v26, %v3933_v40  ;;  %4268 = vmatpush1.bf16.msra.mxu1 %v7104_v29  ;;  %v3935_v47 = vadd.f32 %v3934_v32, %v1305_v33  ;;  %4299 = vmatprep.mubr.bf16.mxu1 %v8557_v53  ;;  %v6929_v29 = vcombine.high %v794_v21, %v798_v23  ;;  %v914_v40 = vld [vmem:[%s11267_s3 + $0x410] sm:$0xff] }
 0x149   :  { %v3975_v55 = vpop.f32.mrf.mxu1  ;;  %v3936_v57 = vpop.f32.mrf.mxu0  ;;  %4269 = vmatprep.subr.bf16.mxu1 %v7097_v38  ;;  %v7064_v33 = vcombine.low %v930_v16, %v934_v17  ;;  %v7057_v37 = vcombine.high %v922_v27, %v926_v28  ;;  %v6928_v38 = vcombine.low %v794_v21, %v798_v23  ;;  %v7056_v43 = vcombine.low %v922_v27, %v926_v28  ;;  %v906_v26 = vld [vmem:[%s11267_s3 + $0x3d0] sm:$0xff] }
 0x14a   :  { %v9520_v30 = vadd.f32 %v3975_v55, %v3935_v47  ;;  %4229 = vmatpush1.bf16.msra.mxu0 %v6968_v41  ;;  %v918_v41 = vld [vmem:[%s11267_s3 + $0x430] sm:$0xff]  ;;  %v6920_v47 = vcombine.low %v786_v35, %v790_v36 }
 0x14b   :  { %v3977_v61 = vpop.f32.mrf.mxu1  ;;  %v3937_v62 = vpop.f32.mrf.mxu0  ;;  %4230 = vmatprep.subr.bf16.mxu0 %v6961_v44  ;;  %v910_v32 = vld [vmem:[%s11267_s3 + $0x3f0] sm:$0xff]  ;;  %v7049_v44 = vcombine.high %v914_v40, %v918_v41  ;;  %v7048_v55 = vcombine.low %v914_v40, %v918_v41 }
 0x14c   :  { %4270 = vmatpush1.bf16.msra.mxu1 %v7096_v49  ;;  %v1034_v49 = vld [vmem:[%s11267_s3 + $0x7d0] sm:$0xff]  ;;  %v7041_v54 = vcombine.high %v906_v26, %v910_v32  ;;  %v7040_v59 = vcombine.low %v906_v26, %v910_v32 }
 0x14d   :  { %v3978_v3 = vpop.f32.mrf.mxu1  ;;  %4271 = vmatprep.subr.bf16.mxu1 %v7089_v58  ;;  %v898_v57 = vld [vmem:[%s11267_s3 + $0x390] sm:$0xff] }
 0x14e   :  { %4231 = vmatpush1.bf16.msra.mxu0 %v6960_v39  ;;  %v902_v58 = vld [vmem:[%s11267_s3 + $0x3b0] sm:$0xff]  ;;  %v7169_v39 = vcombine.high %v1034_v49, %v1038_v52 }
 0x14f   :  { %4232 = vmatprep.subr.bf16.mxu0 %v6953_v63  ;;  %v1026_v60 = vld [vmem:[%s11267_s3 + $0x790] sm:$0xff]  ;;  %v7033_v62 = vcombine.high %v898_v57, %v902_v58  ;;  %v7168_v63 = vcombine.low %v1034_v49, %v1038_v52  ;;  %v7032_v3 = vcombine.low %v898_v57, %v902_v58 }
 0x150   :  { %4272 = vmatpush1.bf16.msra.mxu1 %v7088_v0  ;;  %v1030_v61 = vld [vmem:[%s11267_s3 + $0x7b0] sm:$0xff] }
 0x151   :  { %4273 = vmatprep.subr.bf16.mxu1 %v7081_v4  ;;  %v890_v0 = vld [vmem:[%s11267_s3 + $0x350] sm:$0xff]  ;;  %v7161_v2 = vcombine.high %v1026_v60, %v1030_v61  ;;  %v7160_v7 = vcombine.low %v1026_v60, %v1030_v61 }
 0x152   :  { %4233 = vmatpush1.bf16.msra.mxu0 %v6952_v5  ;;  %v894_v1 = vld [vmem:[%s11267_s3 + $0x370] sm:$0xff] }
 0x153   :  { %4234 = vmatprep.subr.bf16.mxu0 %v6945_v8  ;;  %v1018_v4 = vld [vmem:[%s11267_s3 + $0x750] sm:$0xff]  ;;  %v7025_v6 = vcombine.high %v890_v0, %v894_v1  ;;  %v7024_v11 = vcombine.low %v890_v0, %v894_v1 }
 0x154   :  { %4274 = vmatpush1.bf16.msra.mxu1 %v7080_v9  ;;  %v1022_v5 = vld [vmem:[%s11267_s3 + $0x770] sm:$0xff] }
 0x155   :  { %4275 = vmatprep.subr.bf16.mxu1 %v7073_v13  ;;  %v882_v8 = vld [vmem:[%s11267_s3 + $0x310] sm:$0xff]  ;;  %v7153_v10 = vcombine.high %v1018_v4, %v1022_v5  ;;  %v7152_v17 = vcombine.low %v1018_v4, %v1022_v5 }
 0x156   :  { %4235 = vmatpush1.bf16.msra.mxu0 %v6944_v14  ;;  %v886_v9 = vld [vmem:[%s11267_s3 + $0x330] sm:$0xff] }
 0x157   :  { %4236 = vmatprep.subr.bf16.mxu0 %v6937_v19  ;;  %v1010_v13 = vld [vmem:[%s11267_s3 + $0x710] sm:$0xff]  ;;  %v7017_v16 = vcombine.high %v882_v8, %v886_v9  ;;  %v7016_v23 = vcombine.low %v882_v8, %v886_v9 }
 0x158   :  { %4276 = vmatpush1.bf16.msra.mxu1 %v7072_v20  ;;  %v1014_v14 = vld [vmem:[%s11267_s3 + $0x730] sm:$0xff] }
 0x159   :  { %4277 = vmatprep.subr.bf16.mxu1 %v7065_v24  ;;  %v874_v19 = vld [vmem:[%s11267_s3 + $0x2d0] sm:$0xff]  ;;  %v7145_v21 = vcombine.high %v1010_v13, %v1014_v14  ;;  %v7144_v28 = vcombine.low %v1010_v13, %v1014_v14 }
 0x15a   :  { %4237 = vmatpush1.bf16.msra.mxu0 %v6936_v25  ;;  %v878_v20 = vld [vmem:[%s11267_s3 + $0x2f0] sm:$0xff] }
 0x15b   :  { %4238 = vmatprep.subr.bf16.mxu0 %v6929_v29  ;;  %v1002_v24 = vld [vmem:[%s11267_s3 + $0x6d0] sm:$0xff]  ;;  %v7009_v27 = vcombine.high %v874_v19, %v878_v20  ;;  %v7008_v36 = vcombine.low %v874_v19, %v878_v20 }
 0x15c   :  { %4278 = vmatpush1.bf16.msra.mxu1 %v7064_v33  ;;  %v1006_v25 = vld [vmem:[%s11267_s3 + $0x6f0] sm:$0xff] }
 0x15d   :  { %4279 = vmatprep.subr.bf16.mxu1 %v7057_v37  ;;  %v866_v29 = vld [vmem:[%s11267_s3 + $0x290] sm:$0xff]  ;;  %v7137_v35 = vcombine.high %v1002_v24, %v1006_v25  ;;  %v7136_v41 = vcombine.low %v1002_v24, %v1006_v25 }
 0x15e   :  { %4239 = vmatpush1.bf16.msra.mxu0 %v6928_v38  ;;  %v870_v33 = vld [vmem:[%s11267_s3 + $0x2b0] sm:$0xff] }
 0x15f   :  { %4240 = vmatprep.subr.bf16.mxu0 %v6921_v42  ;;  %v994_v37 = vld [vmem:[%s11267_s3 + $0x690] sm:$0xff]  ;;  %v7001_v40 = vcombine.high %v866_v29, %v870_v33  ;;  %v7000_v32 = vcombine.low %v866_v29, %v870_v33 }
 0x160   :  { %4280 = vmatpush1.bf16.msra.mxu1 %v7056_v43  ;;  %v998_v38 = vld [vmem:[%s11267_s3 + $0x6b0] sm:$0xff] }
 0x161   :  { %4281 = vmatprep.subr.bf16.mxu1 %v7049_v44  ;;  %v858_v42 = vld [vmem:[%s11267_s3 + $0x250] sm:$0xff]  ;;  %v7129_v26 = vcombine.high %v994_v37, %v998_v38  ;;  %v7128_v52 = vcombine.low %v994_v37, %v998_v38 }
 0x162   :  { %4241 = vmatpush1.bf16.msra.mxu0 %v6920_v47  ;;  %v862_v43 = vld [vmem:[%s11267_s3 + $0x270] sm:$0xff] }
 0x163   :  { %4242 = vmatprep.subr.bf16.mxu0 %v7041_v54  ;;  %v986_v44 = vld [vmem:[%s11267_s3 + $0x650] sm:$0xff]  ;;  %v6993_v49 = vcombine.high %v858_v42, %v862_v43  ;;  %v6992_v58 = vcombine.low %v858_v42, %v862_v43 }
 0x164   :  { %4282 = vmatpush1.bf16.msra.mxu1 %v7048_v55  ;;  %v990_v47 = vld [vmem:[%s11267_s3 + $0x670] sm:$0xff] }
 0x165   :  { %4283 = vmatprep.subr.bf16.mxu1 %v7169_v39  ;;  %v850_v54 = vld [vmem:[%s11267_s3 + $0x210] sm:$0xff]  ;;  %v7121_v57 = vcombine.high %v986_v44, %v990_v47  ;;  %v7120_v61 = vcombine.low %v986_v44, %v990_v47 }
 0x166   :  { %4243 = vmatpush2.bf16.msra.mxu0 %v7040_v59  ;;  %v854_v55 = vld [vmem:[%s11267_s3 + $0x230] sm:$0xff] }
 0x167   :  { %4244 = vmatprep.subr.bf16.mxu0 %v7033_v62  ;;  %v978_v39 = vld [vmem:[%s11267_s3 + $0x610] sm:$0xff]  ;;  %v6985_v60 = vcombine.high %v850_v54, %v854_v55  ;;  %v6984_v1 = vcombine.low %v850_v54, %v854_v55 }
 0x168   :  { %4284 = vmatpush2.bf16.msra.mxu1 %v7168_v63  ;;  %v982_v59 = vld [vmem:[%s11267_s3 + $0x630] sm:$0xff] }
 0x169   :  { %4285 = vmatprep.subr.bf16.mxu1 %v7161_v2  ;;  %v1098_v62 = vld [vmem:[%s11267_s3 + $0x9d0] sm:$0xff]  ;;  %v7113_v0 = vcombine.high %v978_v39, %v982_v59  ;;  %v7112_v5 = vcombine.low %v978_v39, %v982_v59 }
 0x16a   :  { %4245 = vmatpush2.bf16.msra.mxu0 %v7032_v3  ;;  %v1102_v63 = vld [vmem:[%s11267_s3 + $0x9f0] sm:$0xff] }
 0x16b   :  { %4246 = vmatprep.subr.bf16.mxu0 %v7025_v6  ;;  %v1226_v2 = vld [vmem:[%s11267_s3 + $0xdd0] sm:$0xff]  ;;  %v7233_v4 = vcombine.high %v1098_v62, %v1102_v63  ;;  %v7232_v9 = vcombine.low %v1098_v62, %v1102_v63 }
 0x16c   :  { %4286 = vmatpush2.bf16.msra.mxu1 %v7160_v7  ;;  %v1230_v3 = vld [vmem:[%s11267_s3 + $0xdf0] sm:$0xff] }
 0x16d   :  { %4287 = vmatprep.subr.bf16.mxu1 %v7153_v10  ;;  %v1090_v6 = vld [vmem:[%s11267_s3 + $0x990] sm:$0xff]  ;;  %v7361_v8 = vcombine.high %v1226_v2, %v1230_v3  ;;  %v7360_v14 = vcombine.low %v1226_v2, %v1230_v3 }
 0x16e   :  { %4247 = vmatpush2.bf16.msra.mxu0 %v7024_v11  ;;  %v1094_v7 = vld [vmem:[%s11267_s3 + $0x9b0] sm:$0xff] }
 0x16f   :  { %4248 = vmatprep.subr.bf16.mxu0 %v7017_v16  ;;  %v1218_v10 = vld [vmem:[%s11267_s3 + $0xd90] sm:$0xff]  ;;  %v7225_v13 = vcombine.high %v1090_v6, %v1094_v7 }
 0x170   :  { %4288 = vmatpush2.bf16.msra.mxu1 %v7152_v17  ;;  %v1222_v11 = vld [vmem:[%s11267_s3 + $0xdb0] sm:$0xff] }
 0x171   :  { %4289 = vmatprep.subr.bf16.mxu1 %v7145_v21  ;;  %v1082_v16 = vld [vmem:[%s11267_s3 + $0x950] sm:$0xff]  ;;  %v7353_v20 = vcombine.high %v1218_v10, %v1222_v11 }
 0x172   :  { %4249 = vmatpush2.bf16.msra.mxu0 %v7016_v23  ;;  %v1086_v17 = vld [vmem:[%s11267_s3 + $0x970] sm:$0xff]  ;;  %v7224_v23 = vcombine.low %v1090_v6, %v1094_v7 }
 0x173   :  { %4250 = vmatprep.subr.bf16.mxu0 %v7009_v27  ;;  %v1210_v24 = vld [vmem:[%s11267_s3 + $0xd50] sm:$0xff]  ;;  %v7217_v29 = vcombine.high %v1082_v16, %v1086_v17  ;;  %v7216_v43 = vcombine.low %v1082_v16, %v1086_v17 }
 0x174   :  { %4290 = vmatpush2.bf16.msra.mxu1 %v7144_v28  ;;  %v1214_v25 = vld [vmem:[%s11267_s3 + $0xd70] sm:$0xff] }
 0x175   :  { %4291 = vmatprep.subr.bf16.mxu1 %v7137_v35  ;;  %v7352_v35 = vcombine.low %v1218_v10, %v1222_v11  ;;  %v1078_v37 = vld [vmem:[%s11267_s3 + $0x930] sm:$0xff] }
 0x176   :  { %4251 = vmatpush2.bf16.msra.mxu0 %v7008_v36  ;;  %v1074_v36 = vld [vmem:[%s11267_s3 + $0x910] sm:$0xff] }
 0x177   :  { %4252 = vmatprep.subr.bf16.mxu0 %v7001_v40  ;;  %v7209_v47 = vcombine.high %v1074_v36, %v1078_v37  ;;  %v1070_v54 = vld [vmem:[%s11267_s3 + $0x8f0] sm:$0xff] }
 0x178   :  { %4292 = vmatpush2.bf16.msra.mxu1 %v7136_v41  ;;  %v7345_v41 = vcombine.high %v1210_v24, %v1214_v25  ;;  %v1194_v39 = vld [vmem:[%s11267_s3 + $0xcd0] sm:$0xff] }
 0x179   :  { %4293 = vmatprep.subr.bf16.mxu1 %v7129_v26  ;;  %v1206_v26 = vld [vmem:[%s11267_s3 + $0xd30] sm:$0xff] }
 0x17a   :  { %4253 = vmatpush2.bf16.msra.mxu0 %v7000_v32  ;;  %v1198_v59 = vld [vmem:[%s11267_s3 + $0xcf0] sm:$0xff] }
 0x17b   :  { %4254 = vmatprep.subr.bf16.mxu0 %v6993_v49  ;;  %v7344_v49 = vcombine.low %v1210_v24, %v1214_v25  ;;  %v1058_v62 = vld [vmem:[%s11267_s3 + $0x890] sm:$0xff] }
 0x17c   :  { %4294 = vmatpush2.bf16.msra.mxu1 %v7128_v52  ;;  %v1066_v52 = vld [vmem:[%s11267_s3 + $0x8d0] sm:$0xff] }
 0x17d   :  { %4295 = vmatprep.subr.bf16.mxu1 %v7121_v57  ;;  %v1062_v63 = vld [vmem:[%s11267_s3 + $0x8b0] sm:$0xff] }
 0x17e   :  { %4255 = vmatpush2.bf16.msra.mxu0 %v6992_v58  ;;  %v7208_v58 = vcombine.low %v1074_v36, %v1078_v37  ;;  %v1186_v2 = vld [vmem:[%s11267_s3 + $0xc90] sm:$0xff] }
 0x17f   :  { %4256 = vmatprep.subr.bf16.mxu0 %v6985_v60  ;;  %v7201_v60 = vcombine.high %v1066_v52, %v1070_v54  ;;  %v1190_v3 = vld [vmem:[%s11267_s3 + $0xcb0] sm:$0xff] }
 0x180   :  { %4296 = vmatpush2.bf16.msra.mxu1 %v7120_v61  ;;  %v1050_v6 = vld [vmem:[%s11267_s3 + $0x850] sm:$0xff] }
 0x181   :  { %4297 = vmatprep.subr.bf16.mxu1 %v7113_v0  ;;  %v7329_v0 = vcombine.high %v1194_v39, %v1198_v59  ;;  %v1054_v7 = vld [vmem:[%s11267_s3 + $0x870] sm:$0xff] }
 0x182   :  { %4257 = vmatpush2.bf16.msra.mxu0 %v6984_v1  ;;  %v7200_v1 = vcombine.low %v1066_v52, %v1070_v54  ;;  %v1178_v10 = vld [vmem:[%s11267_s3 + $0xc50] sm:$0xff] }
 0x183   :  { %4308 = vmatprep.subr.bf16.mxu0 %v7233_v4  ;;  %v7193_v4 = vcombine.high %v1058_v62, %v1062_v63  ;;  %v1182_v11 = vld [vmem:[%s11267_s3 + $0xc70] sm:$0xff] }
 0x184   :  { %4298 = vmatpush2.bf16.msra.mxu1 %v7112_v5  ;;  %v7328_v5 = vcombine.low %v1194_v39, %v1198_v59  ;;  %v1042_v16 = vld [vmem:[%s11267_s3 + $0x810] sm:$0xff]  ;;  %v7312_v25 = vcombine.low %v1178_v10, %v1182_v11 }
 0x185   :  { %v4014_v19 = vpop.f32.mrf.mxu0  ;;  %4259 = vmatmul.mubr.bf16.vlgmr.msra.gmra.mxu0 %v8534_v46  ;;  %4349 = vmatprep.subr.bf16.mxu1 %v7361_v8  ;;  %v7321_v8 = vcombine.high %v1186_v2, %v1190_v3  ;;  %v1046_v17 = vld [vmem:[%s11267_s3 + $0x830] sm:$0xff] }
 0x186   :  { %v4015_v21 = vadd.f32 %v4014_v19, %v9511_v45  ;;  %4309 = vmatpush1.bf16.msra.mxu0 %v7232_v9  ;;  %4340 = vmatprep.mubr.bf16.mxu0 %v8545_v50  ;;  %v7192_v9 = vcombine.low %v1058_v62, %v1062_v63  ;;  %v7313_v19 = vcombine.high %v1178_v10, %v1182_v11  ;;  %v1294_v36 = vld [vmem:[%s11267_s3 + $0xff0] sm:$0xff] }
 0x187   :  { %v4055_v27 = vpop.f32.mrf.mxu1  ;;  %4300 = vmatmul.mubr.bf16.vlgmr.msra.gmra.mxu1 %v8549_v51  ;;  %v4016_v28 = vpop.f32.mrf.mxu0  ;;  %4310 = vmatprep.subr.bf16.mxu0 %v7225_v13  ;;  %v7185_v13 = vcombine.high %v1050_v6, %v1054_v7  ;;  %v7177_v24 = vcombine.high %v1042_v16, %v1046_v17  ;;  %v1150_v52 = vld [vmem:[%s11267_s3 + $0xb70] sm:$0xff] }
 0x188   :  { %v9712_v33 = vadd.f32 %v4055_v27, %v4015_v21  ;;  %4350 = vmatpush1.bf16.msra.mxu1 %v7360_v14  ;;  %v4017_v45 = vadd.f32 %v4016_v28, %v9520_v30  ;;  %4381 = vmatprep.mubr.bf16.mxu1 %v8568_v56  ;;  %v1202_v30 = vld [vmem:[%s11267_s3 + $0xd10] sm:$0xff]  ;;  %v7320_v14 = vcombine.low %v1186_v2, %v1190_v3 }
 0x189   :  { %v4057_v38 = vpop.f32.mrf.mxu1  ;;  %v4018_v40 = vpop.f32.mrf.mxu0  ;;  %4351 = vmatprep.subr.bf16.mxu1 %v7353_v20  ;;  %v7337_v57 = vcombine.high %v1202_v30, %v1206_v26  ;;  %v7336_v61 = vcombine.low %v1202_v30, %v1206_v26  ;;  %v7184_v20 = vcombine.low %v1050_v6, %v1054_v7  ;;  %v1170_v21 = vld [vmem:[%s11267_s3 + $0xc10] sm:$0xff] }
 0x18a   :  { %v9722_v42 = vadd.f32 %v4057_v38, %v4017_v45  ;;  %4311 = vmatpush1.bf16.msra.mxu0 %v7224_v23  ;;  %v1174_v23 = vld [vmem:[%s11267_s3 + $0xc30] sm:$0xff]  ;;  %v7176_v45 = vcombine.low %v1042_v16, %v1046_v17  ;;  %vm4554_vm3 = vcmp.gt.f32.partialorder %v9712_v33, 0.0 }
 0x18b   :  { %v4059_v32 = vpop.f32.mrf.mxu1  ;;  %v4019_v44 = vpop.f32.mrf.mxu0  ;;  %4312 = vmatprep.subr.bf16.mxu0 %v7217_v29  ;;  %v1162_v27 = vld [vmem:[%s11267_s3 + $0xbd0] sm:$0xff]  ;;  %v7305_v29 = vcombine.high %v1170_v21, %v1174_v23  ;;  %v7304_v38 = vcombine.low %v1170_v21, %v1174_v23 }
 0x18c   :  { %4352 = vmatpush1.bf16.msra.mxu1 %v7352_v35  ;;  %v1166_v28 = vld [vmem:[%s11267_s3 + $0xbf0] sm:$0xff]  ;;  %vm4555_vm1 = vcmp.gt.f32.partialorder %v9722_v42, 0.0 }
 0x18d   :  { %v4060_v55 = vpop.f32.mrf.mxu1  ;;  %4353 = vmatprep.subr.bf16.mxu1 %v7345_v41  ;;  %v1290_v35 = vld [vmem:[%s11267_s3 + $0xfd0] sm:$0xff]  ;;  %v7297_v37 = vcombine.high %v1162_v27, %v1166_v28  ;;  %v7296_v30 = vcombine.low %v1162_v27, %v1166_v28 }
 0x18e   :  { %4313 = vmatpush1.bf16.msra.mxu0 %v7216_v43  ;;  %v1154_v40 = vld [vmem:[%s11267_s3 + $0xb90] sm:$0xff]  ;;  %v7425_v43 = vcombine.high %v1290_v35, %v1294_v36 }
 0x18f   :  { %4314 = vmatprep.subr.bf16.mxu0 %v7209_v47  ;;  %v1158_v41 = vld [vmem:[%s11267_s3 + $0xbb0] sm:$0xff]  ;;  %v7424_v47 = vcombine.low %v1290_v35, %v1294_v36 }
 0x190   :  { %4354 = vmatpush1.bf16.msra.mxu1 %v7344_v49  ;;  %v1282_v26 = vld [vmem:[%s11267_s3 + $0xf90] sm:$0xff]  ;;  %v7289_v44 = vcombine.high %v1154_v40, %v1158_v41  ;;  %v7288_v55 = vcombine.low %v1154_v40, %v1158_v41 }
 0x191   :  { %4355 = vmatprep.subr.bf16.mxu1 %v7337_v57  ;;  %v1286_v32 = vld [vmem:[%s11267_s3 + $0xfb0] sm:$0xff] }
 0x192   :  { %4315 = vmatpush1.bf16.msra.mxu0 %v7208_v58  ;;  %v1146_v49 = vld [vmem:[%s11267_s3 + $0xb50] sm:$0xff]  ;;  %v7417_v54 = vcombine.high %v1282_v26, %v1286_v32  ;;  %v7416_v59 = vcombine.low %v1282_v26, %v1286_v32 }
 0x193   :  { %4316 = vmatprep.subr.bf16.mxu0 %v7201_v60  ;;  %v1274_v57 = vld [vmem:[%s11267_s3 + $0xf50] sm:$0xff]  ;;  %v7281_v39 = vcombine.high %v1146_v49, %v1150_v52  ;;  %v7280_v63 = vcombine.low %v1146_v49, %v1150_v52 }
 0x194   :  { %4356 = vmatpush1.bf16.msra.mxu1 %v7336_v61  ;;  %v1278_v58 = vld [vmem:[%s11267_s3 + $0xf70] sm:$0xff] }
 0x195   :  { %4357 = vmatprep.subr.bf16.mxu1 %v7329_v0  ;;  %v1138_v60 = vld [vmem:[%s11267_s3 + $0xb10] sm:$0xff]  ;;  %v7409_v62 = vcombine.high %v1274_v57, %v1278_v58  ;;  %v7408_v3 = vcombine.low %v1274_v57, %v1278_v58  ;;  %v975_v57 = vld [vmem:[%s11267_s3 + $0x5f8] sm:$0xff] }
 0x196   :  { %4317 = vmatpush1.bf16.msra.mxu0 %v7200_v1  ;;  %v1142_v61 = vld [vmem:[%s11267_s3 + $0xb30] sm:$0xff] }
 0x197   :  { %4318 = vmatprep.subr.bf16.mxu0 %v7193_v4  ;;  %v1266_v0 = vld [vmem:[%s11267_s3 + $0xf10] sm:$0xff]  ;;  %v7273_v2 = vcombine.high %v1138_v60, %v1142_v61  ;;  %v7272_v7 = vcombine.low %v1138_v60, %v1142_v61  ;;  %v835_v60 = vld [vmem:[%s11267_s3 + $0x198] sm:$0xff] }
 0x198   :  { %4358 = vmatpush1.bf16.msra.mxu1 %v7328_v5  ;;  %v1270_v1 = vld [vmem:[%s11267_s3 + $0xf30] sm:$0xff]  ;;  %v839_v61 = vld [vmem:[%s11267_s3 + $0x1b8] sm:$0xff] }
 0x199   :  { %4359 = vmatprep.subr.bf16.mxu1 %v7321_v8  ;;  %v1130_v4 = vld [vmem:[%s11267_s3 + $0xad0] sm:$0xff]  ;;  %v7401_v6 = vcombine.high %v1266_v0, %v1270_v1  ;;  %v7400_v11 = vcombine.low %v1266_v0, %v1270_v1  ;;  %v963_v1 = vld [vmem:[%s11267_s3 + $0x598] sm:$0xff] }
 0x19a   :  { %4319 = vmatpush1.bf16.msra.mxu0 %v7192_v9  ;;  %v1134_v5 = vld [vmem:[%s11267_s3 + $0xaf0] sm:$0xff] }
 0x19b   :  { %4320 = vmatprep.subr.bf16.mxu0 %v7185_v13  ;;  %v1258_v8 = vld [vmem:[%s11267_s3 + $0xed0] sm:$0xff]  ;;  %v7265_v10 = vcombine.high %v1130_v4, %v1134_v5  ;;  %v7264_v17 = vcombine.low %v1130_v4, %v1134_v5 }
 0x19c   :  { %4360 = vmatpush1.bf16.msra.mxu1 %v7320_v14  ;;  %v1262_v9 = vld [vmem:[%s11267_s3 + $0xef0] sm:$0xff] }
 0x19d   :  { %4361 = vmatprep.subr.bf16.mxu1 %v7313_v19  ;;  %v1122_v13 = vld [vmem:[%s11267_s3 + $0xa90] sm:$0xff]  ;;  %v7393_v16 = vcombine.high %v1258_v8, %v1262_v9  ;;  %v7392_v23 = vcombine.low %v1258_v8, %v1262_v9 }
 0x19e   :  { %4321 = vmatpush1.bf16.msra.mxu0 %v7184_v20  ;;  %v1126_v14 = vld [vmem:[%s11267_s3 + $0xab0] sm:$0xff] }
 0x19f   :  { %4322 = vmatprep.subr.bf16.mxu0 %v7177_v24  ;;  %v1250_v19 = vld [vmem:[%s11267_s3 + $0xe90] sm:$0xff]  ;;  %v7257_v21 = vcombine.high %v1122_v13, %v1126_v14  ;;  %v7256_v28 = vcombine.low %v1122_v13, %v1126_v14  ;;  %v959_v13 = vld [vmem:[%s11267_s3 + $0x578] sm:$0xff] }
 0x1a0   :  { %4362 = vmatpush1.bf16.msra.mxu1 %v7312_v25  ;;  %v1254_v20 = vld [vmem:[%s11267_s3 + $0xeb0] sm:$0xff] }
 0x1a1   :  { %4363 = vmatprep.subr.bf16.mxu1 %v7305_v29  ;;  %v1114_v24 = vld [vmem:[%s11267_s3 + $0xa50] sm:$0xff]  ;;  %v7385_v27 = vcombine.high %v1250_v19, %v1254_v20  ;;  %v7384_v36 = vcombine.low %v1250_v19, %v1254_v20 }
 0x1a2   :  { %4323 = vmatpush1.bf16.msra.mxu0 %v7176_v45  ;;  %v1118_v25 = vld [vmem:[%s11267_s3 + $0xa70] sm:$0xff] }
 0x1a3   :  { %4324 = vmatprep.subr.bf16.mxu0 %v7297_v37  ;;  %v1242_v29 = vld [vmem:[%s11267_s3 + $0xe50] sm:$0xff]  ;;  %v7249_v35 = vcombine.high %v1114_v24, %v1118_v25  ;;  %v7248_v41 = vcombine.low %v1114_v24, %v1118_v25  ;;  %v823_v24 = vld [vmem:[%s11267_s3 + $0x138] sm:$0xff] }
 0x1a4   :  { %4364 = vmatpush1.bf16.msra.mxu1 %v7304_v38  ;;  %v1246_v45 = vld [vmem:[%s11267_s3 + $0xe70] sm:$0xff] }
 0x1a5   :  { %4365 = vmatprep.subr.bf16.mxu1 %v7425_v43  ;;  %v1106_v37 = vld [vmem:[%s11267_s3 + $0xa10] sm:$0xff]  ;;  %v7377_v40 = vcombine.high %v1242_v29, %v1246_v45  ;;  %v7376_v32 = vcombine.low %v1242_v29, %v1246_v45  ;;  %v947_v45 = vld [vmem:[%s11267_s3 + $0x518] sm:$0xff] }
 0x1a6   :  { %4325 = vmatpush2.bf16.msra.mxu0 %v7296_v30  ;;  %v1110_v38 = vld [vmem:[%s11267_s3 + $0xa30] sm:$0xff] }
 0x1a7   :  { %4326 = vmatprep.subr.bf16.mxu0 %v7289_v44  ;;  %v1234_v43 = vld [vmem:[%s11267_s3 + $0xe10] sm:$0xff]  ;;  %v7241_v26 = vcombine.high %v1106_v37, %v1110_v38  ;;  %v843_v44 = vld [vmem:[%s11267_s3 + $0x1d8] sm:$0xff]  ;;  %v7240_v52 = vcombine.low %v1106_v37, %v1110_v38 }
 0x1a8   :  { %4366 = vmatpush2.bf16.msra.mxu1 %v7424_v47  ;;  %v1238_v30 = vld [vmem:[%s11267_s3 + $0xe30] sm:$0xff]  ;;  %v847_v47 = vld [vmem:[%s11267_s3 + $0x1f8] sm:$0xff] }
 0x1a9   :  { %4367 = vmatprep.subr.bf16.mxu1 %v7417_v54  ;;  %v7369_v49 = vcombine.high %v1234_v43, %v1238_v30  ;;  %v1308_v54 = vsub.s32 2, %v8515_v34  ;;  %v6979_v58 = vcombine.high %v843_v44, %v847_v47  ;;  %v6978_v0 = vcombine.low %v843_v44, %v847_v47  ;;  %v943_v44 = vld [vmem:[%s11267_s3 + $0x4f8] sm:$0xff] }
 0x1aa   :  { %4327 = vmatpush2.bf16.msra.mxu0 %v7288_v55  ;;  %v971_v55 = vld [vmem:[%s11267_s3 + $0x5d8] sm:$0xff] }
 0x1ab   :  { %4328 = vmatprep.subr.bf16.mxu0 %v7281_v39  ;;  %v7368_v39 = vcombine.low %v1234_v43, %v1238_v30  ;;  %v7106_v4 = vcombine.low %v971_v55, %v975_v57 }
 0x1ac   :  { %4368 = vmatpush2.bf16.msra.mxu1 %v7416_v59  ;;  %v1312_v59 = vsub.s32 3, %v8515_v34 }
 0x1ad   :  { %4369 = vmatprep.subr.bf16.mxu1 %v7409_v62  ;;  %v7107_v62 = vcombine.high %v971_v55, %v975_v57  ;;  %v807_v55 = vld [vmem:[%s11267_s3 + $0xb8] sm:$0xff] }
 0x1ae   :  { %4329 = vmatpush2.bf16.msra.mxu0 %v7280_v63  ;;  %v1309_v63 = vrot.slane %v9475_v15, %v1308_v54  ;;  %v1313_v5 = vrot.slane %v9475_v15, %v1312_v59  ;;  %v955_v15 = vld [vmem:[%s11267_s3 + $0x558] sm:$0xff] }
 0x1af   :  { %4330 = vmatprep.subr.bf16.mxu0 %v7273_v2  ;;  %v967_v2 = vld [vmem:[%s11267_s3 + $0x5b8] sm:$0xff]  ;;  %v7090_v38 = vcombine.low %v955_v15, %v959_v13 }
 0x1b0   :  { %4370 = vmatpush2.bf16.msra.mxu1 %v7408_v3  ;;  %v6971_v3 = vcombine.high %v835_v60, %v839_v61  ;;  %v7099_v9 = vcombine.high %v963_v1, %v967_v2 }
 0x1b1   :  { %4371 = vmatprep.subr.bf16.mxu1 %v7401_v6  ;;  %v827_v6 = vld [vmem:[%s11267_s3 + $0x158] sm:$0xff] }
 0x1b2   :  { %4331 = vmatpush2.bf16.msra.mxu0 %v7272_v7  ;;  %v831_v7 = vld [vmem:[%s11267_s3 + $0x178] sm:$0xff] }
 0x1b3   :  { %4332 = vmatprep.subr.bf16.mxu0 %v7265_v10  ;;  %v6962_v29 = vcombine.low %v827_v6, %v831_v7 }
 0x1b4   :  { %4372 = vmatpush2.bf16.msra.mxu1 %v7400_v11  ;;  %v6970_v11 = vcombine.low %v835_v60, %v839_v61  ;;  %v935_v60 = vld [vmem:[%s11267_s3 + $0x4b8] sm:$0xff] }
 0x1b5   :  { %4373 = vmatprep.subr.bf16.mxu1 %v7393_v16 }
 0x1b6   :  { %4333 = vmatpush2.bf16.msra.mxu0 %v7264_v17  ;;  %v6963_v17 = vcombine.high %v827_v6, %v831_v7  ;;  %v787_v7 = vld [vmem:[%s11267_s3 + $0x18] sm:$0xff] }
 0x1b7   :  { %4334 = vmatprep.subr.bf16.mxu0 %v7257_v21  ;;  %v7098_v21 = vcombine.low %v963_v1, %v967_v2 }
 0x1b8   :  { %4374 = vmatpush2.bf16.msra.mxu1 %v7392_v23  ;;  %v819_v23 = vld [vmem:[%s11267_s3 + $0x118] sm:$0xff] }
 0x1b9   :  { %4375 = vmatprep.subr.bf16.mxu1 %v7385_v27  ;;  %v7091_v27 = vcombine.high %v955_v15, %v959_v13  ;;  %v919_v15 = vld [vmem:[%s11267_s3 + $0x438] sm:$0xff] }
 0x1ba   :  { %4335 = vmatpush2.bf16.msra.mxu0 %v7256_v28 }
 0x1bb   :  { %4336 = vmatprep.subr.bf16.mxu0 %v7249_v35  ;;  %v951_v35 = vld [vmem:[%s11267_s3 + $0x538] sm:$0xff] }
 0x1bc   :  { %4376 = vmatpush2.bf16.msra.mxu1 %v7384_v36  ;;  %v7083_v30 = vcombine.high %v947_v45, %v951_v35 }
 0x1bd   :  { %4377 = vmatprep.subr.bf16.mxu1 %v7377_v40  ;;  %v811_v40 = vld [vmem:[%s11267_s3 + $0xd8] sm:$0xff] }
 0x1be   :  { %4337 = vmatpush2.bf16.msra.mxu0 %v7248_v41  ;;  %v815_v41 = vld [vmem:[%s11267_s3 + $0xf8] sm:$0xff] }
 0x1bf   :  { %4338 = vmatprep.subr.bf16.mxu0 %v7241_v26  ;;  %v6954_v26 = vcombine.low %v819_v23, %v823_v24  ;;  %v6947_v47 = vcombine.high %v811_v40, %v815_v41 }
 0x1c0   :  { %4378 = vmatpush2.bf16.msra.mxu1 %v7376_v32  ;;  %v939_v32 = vld [vmem:[%s11267_s3 + $0x4d8] sm:$0xff] }
 0x1c1   :  { %4379 = vmatprep.subr.bf16.mxu1 %v7369_v49  ;;  %v7082_v49 = vcombine.low %v947_v45, %v951_v35  ;;  %v7075_v57 = vcombine.high %v939_v32, %v943_v44 }
 0x1c2   :  { %4339 = vmatpush2.bf16.msra.mxu0 %v7240_v52  ;;  %v803_v52 = vld [vmem:[%s11267_s3 + $0x98] sm:$0xff] }
 0x1c3   :  { %4390 = vmatprep.subr.bf16.mxu0 %v6979_v58  ;;  %v6946_v58 = vcombine.low %v811_v40, %v815_v41  ;;  %v6939_v61 = vcombine.high %v803_v52, %v807_v55  ;;  %v6938_v2 = vcombine.low %v803_v52, %v807_v55  ;;  %v891_v40 = vld [vmem:[%s11267_s3 + $0x358] sm:$0xff] }
 0x1c4   :  { %4380 = vmatpush2.bf16.msra.mxu1 %v7368_v39  ;;  %v931_v39 = vld [vmem:[%s11267_s3 + $0x498] sm:$0xff] }
 0x1c5   :  { %v4096_v8 = vpop.f32.mrf.mxu0  ;;  %4341 = vmatmul.mubr.bf16.vlgmr.msra.gmra.mxu0 %v8663_v22  ;;  %4431 = vmatprep.subr.bf16.mxu1 %v7107_v62  ;;  %v7074_v62 = vcombine.low %v939_v32, %v943_v44  ;;  %v7067_v1 = vcombine.high %v931_v39, %v935_v60  ;;  %v7066_v6 = vcombine.low %v931_v39, %v935_v60  ;;  %v895_v41 = vld [vmem:[%s11267_s3 + $0x378] sm:$0xff] }
 0x1c6   :  { %v4097_v10 = vadd.f32 %v4096_v8, %v1309_v63  ;;  %4391 = vmatpush1.bf16.msra.mxu0 %v6978_v0  ;;  %4422 = vmatprep.mubr.bf16.mxu0 %v8539_v48  ;;  %v795_v63 = vld [vmem:[%s11267_s3 + $0x58] sm:$0xff]  ;;  %v7027_v44 = vcombine.high %v891_v40, %v895_v41 }
 0x1c7   :  { %v4137_v14 = vpop.f32.mrf.mxu1  ;;  %4382 = vmatmul.mubr.bf16.vlgmr.msra.gmra.mxu1 %v8682_v31  ;;  %v4098_v16 = vpop.f32.mrf.mxu0  ;;  %4392 = vmatprep.subr.bf16.mxu0 %v6971_v3  ;;  %v799_v0 = vld [vmem:[%s11267_s3 + $0x78] sm:$0xff] }
 0x1c8   :  { %v9921_v19 = vadd.f32 %v4137_v14, %v4097_v10  ;;  %4432 = vmatpush1.bf16.msra.mxu1 %v7106_v4  ;;  %v4099_v20 = vadd.f32 %v4098_v16, %v1313_v5  ;;  %4463 = vmatprep.mubr.bf16.mxu1 %v8557_v53  ;;  %v6955_v53 = vcombine.high %v819_v23, %v823_v24  ;;  %v923_v3 = vld [vmem:[%s11267_s3 + $0x458] sm:$0xff] }
 0x1c9   :  { %v4139_v48 = vpop.f32.mrf.mxu1  ;;  %v4100_v25 = vpop.f32.mrf.mxu0  ;;  %4433 = vmatprep.subr.bf16.mxu1 %v7099_v9  ;;  %v927_v4 = vld [vmem:[%s11267_s3 + $0x478] sm:$0xff]  ;;  %v6931_v5 = vcombine.high %v795_v63, %v799_v0  ;;  %v6930_v10 = vcombine.low %v795_v63, %v799_v0 }
 0x1ca   :  { %v9930_v28 = vadd.f32 %v4139_v48, %v4099_v20  ;;  %4393 = vmatpush1.bf16.msra.mxu0 %v6970_v11  ;;  %v791_v8 = vld [vmem:[%s11267_s3 + $0x38] sm:$0xff]  ;;  %v7059_v9 = vcombine.high %v923_v3, %v927_v4  ;;  %v7058_v14 = vcombine.low %v923_v3, %v927_v4 }
 0x1cb   :  { %v4141_v36 = vpop.f32.mrf.mxu1  ;;  %v4101_v37 = vpop.f32.mrf.mxu0  ;;  %4394 = vmatprep.subr.bf16.mxu0 %v6963_v17  ;;  %v915_v11 = vld [vmem:[%s11267_s3 + $0x418] sm:$0xff]  ;;  %v6923_v13 = vcombine.high %v787_v7, %v791_v8 }
 0x1cc   :  { %4434 = vmatpush1.bf16.msra.mxu1 %v7098_v21  ;;  %v907_v16 = vld [vmem:[%s11267_s3 + $0x3d8] sm:$0xff]  ;;  %v7051_v20 = vcombine.high %v915_v11, %v919_v15  ;;  %v6922_v21 = vcombine.low %v787_v7, %v791_v8  ;;  %v7050_v25 = vcombine.low %v915_v11, %v919_v15 }
 0x1cd   :  { %v4142_v43 = vpop.f32.mrf.mxu1  ;;  %4435 = vmatprep.subr.bf16.mxu1 %v7091_v27  ;;  %v911_v17 = vld [vmem:[%s11267_s3 + $0x3f8] sm:$0xff] }
 0x1ce   :  { %4395 = vmatpush1.bf16.msra.mxu0 %v6962_v29  ;;  %v1035_v23 = vld [vmem:[%s11267_s3 + $0x7d8] sm:$0xff]  ;;  %v7043_v48 = vcombine.high %v907_v16, %v911_v17  ;;  %v7042_v35 = vcombine.low %v907_v16, %v911_v17 }
 0x1cf   :  { %4396 = vmatprep.subr.bf16.mxu0 %v6955_v53  ;;  %v1039_v24 = vld [vmem:[%s11267_s3 + $0x7f8] sm:$0xff] }
 0x1d0   :  { %4436 = vmatpush1.bf16.msra.mxu1 %v7090_v38  ;;  %v899_v27 = vld [vmem:[%s11267_s3 + $0x398] sm:$0xff]  ;;  %v7171_v45 = vcombine.high %v1035_v23, %v1039_v24  ;;  %v7170_v38 = vcombine.low %v1035_v23, %v1039_v24 }
 0x1d1   :  { %4437 = vmatprep.subr.bf16.mxu1 %v7083_v30  ;;  %v903_v29 = vld [vmem:[%s11267_s3 + $0x3b8] sm:$0xff] }
 0x1d2   :  { %4397 = vmatpush1.bf16.msra.mxu0 %v6954_v26  ;;  %v1027_v36 = vld [vmem:[%s11267_s3 + $0x798] sm:$0xff]  ;;  %v7035_v53 = vcombine.high %v899_v27, %v903_v29  ;;  %v7034_v30 = vcombine.low %v899_v27, %v903_v29 }
 0x1d3   :  { %4398 = vmatprep.subr.bf16.mxu0 %v6947_v47  ;;  %v1031_v37 = vld [vmem:[%s11267_s3 + $0x7b8] sm:$0xff] }
 0x1d4   :  { %4438 = vmatpush1.bf16.msra.mxu1 %v7082_v49  ;;  %v7163_v43 = vcombine.high %v1027_v36, %v1031_v37  ;;  %v1019_v26 = vld [vmem:[%s11267_s3 + $0x758] sm:$0xff]  ;;  %v7162_v47 = vcombine.low %v1027_v36, %v1031_v37 }
 0x1d5   :  { %4439 = vmatprep.subr.bf16.mxu1 %v7075_v57  ;;  %v1023_v32 = vld [vmem:[%s11267_s3 + $0x778] sm:$0xff]  ;;  %v7026_v57 = vcombine.low %v891_v40, %v895_v41 }
 0x1d6   :  { %4399 = vmatpush1.bf16.msra.mxu0 %v6946_v58  ;;  %v883_v49 = vld [vmem:[%s11267_s3 + $0x318] sm:$0xff]  ;;  %v7155_v55 = vcombine.high %v1019_v26, %v1023_v32 }
 0x1d7   :  { %4400 = vmatprep.subr.bf16.mxu0 %v6939_v61  ;;  %v887_v52 = vld [vmem:[%s11267_s3 + $0x338] sm:$0xff]  ;;  %v7154_v61 = vcombine.low %v1019_v26, %v1023_v32 }
 0x1d8   :  { %4440 = vmatpush1.bf16.msra.mxu1 %v7074_v62  ;;  %v1011_v58 = vld [vmem:[%s11267_s3 + $0x718] sm:$0xff]  ;;  %v7019_v60 = vcombine.high %v883_v49, %v887_v52 }
 0x1d9   :  { %4441 = vmatprep.subr.bf16.mxu1 %v7067_v1  ;;  %v1015_v39 = vld [vmem:[%s11267_s3 + $0x738] sm:$0xff]  ;;  %v7018_v1 = vcombine.low %v883_v49, %v887_v52 }
 0x1da   :  { %4401 = vmatpush1.bf16.msra.mxu0 %v6938_v2  ;;  %v875_v62 = vld [vmem:[%s11267_s3 + $0x2d8] sm:$0xff]  ;;  %v7147_v0 = vcombine.high %v1011_v58, %v1015_v39 }
 0x1db   :  { %4402 = vmatprep.subr.bf16.mxu0 %v6931_v5  ;;  %v879_v63 = vld [vmem:[%s11267_s3 + $0x2f8] sm:$0xff]  ;;  %v7146_v5 = vcombine.low %v1011_v58, %v1015_v39 }
 0x1dc   :  { %4442 = vmatpush1.bf16.msra.mxu1 %v7066_v6  ;;  %v1003_v2 = vld [vmem:[%s11267_s3 + $0x6d8] sm:$0xff]  ;;  %v7011_v4 = vcombine.high %v875_v62, %v879_v63 }
 0x1dd   :  { %4443 = vmatprep.subr.bf16.mxu1 %v7059_v9  ;;  %v1007_v3 = vld [vmem:[%s11267_s3 + $0x6f8] sm:$0xff]  ;;  %v7010_v9 = vcombine.low %v875_v62, %v879_v63 }
 0x1de   :  { %4403 = vmatpush1.bf16.msra.mxu0 %v6930_v10  ;;  %v867_v6 = vld [vmem:[%s11267_s3 + $0x298] sm:$0xff]  ;;  %v7139_v8 = vcombine.high %v1003_v2, %v1007_v3 }
 0x1df   :  { %4404 = vmatprep.subr.bf16.mxu0 %v6923_v13  ;;  %v871_v7 = vld [vmem:[%s11267_s3 + $0x2b8] sm:$0xff]  ;;  %v7138_v13 = vcombine.low %v1003_v2, %v1007_v3 }
 0x1e0   :  { %4444 = vmatpush1.bf16.msra.mxu1 %v7058_v14  ;;  %v995_v10 = vld [vmem:[%s11267_s3 + $0x698] sm:$0xff]  ;;  %v7003_v15 = vcombine.high %v867_v6, %v871_v7 }
 0x1e1   :  { %4445 = vmatprep.subr.bf16.mxu1 %v7051_v20  ;;  %v999_v11 = vld [vmem:[%s11267_s3 + $0x6b8] sm:$0xff]  ;;  %v7002_v20 = vcombine.low %v867_v6, %v871_v7 }
 0x1e2   :  { %4405 = vmatpush1.bf16.msra.mxu0 %v6922_v21  ;;  %v859_v14 = vld [vmem:[%s11267_s3 + $0x258] sm:$0xff]  ;;  %v7131_v17 = vcombine.high %v995_v10, %v999_v11 }
 0x1e3   :  { %4406 = vmatprep.subr.bf16.mxu0 %v7043_v48  ;;  %v863_v16 = vld [vmem:[%s11267_s3 + $0x278] sm:$0xff]  ;;  %v7130_v48 = vcombine.low %v995_v10, %v999_v11 }
 0x1e4   :  { %4446 = vmatpush1.bf16.msra.mxu1 %v7050_v25  ;;  %v987_v21 = vld [vmem:[%s11267_s3 + $0x658] sm:$0xff]  ;;  %v6995_v24 = vcombine.high %v859_v14, %v863_v16 }
 0x1e5   :  { %4447 = vmatprep.subr.bf16.mxu1 %v7171_v45  ;;  %v991_v23 = vld [vmem:[%s11267_s3 + $0x678] sm:$0xff]  ;;  %v6994_v45 = vcombine.low %v859_v14, %v863_v16 }
 0x1e6   :  { %4407 = vmatpush2.bf16.msra.mxu0 %v7042_v35  ;;  %v851_v25 = vld [vmem:[%s11267_s3 + $0x218] sm:$0xff]  ;;  %v7123_v29 = vcombine.high %v987_v21, %v991_v23 }
 0x1e7   :  { %4408 = vmatprep.subr.bf16.mxu0 %v7035_v53  ;;  %v855_v27 = vld [vmem:[%s11267_s3 + $0x238] sm:$0xff]  ;;  %v7122_v53 = vcombine.low %v987_v21, %v991_v23 }
 0x1e8   :  { %4448 = vmatpush2.bf16.msra.mxu1 %v7170_v38  ;;  %v979_v35 = vld [vmem:[%s11267_s3 + $0x618] sm:$0xff]  ;;  %v6987_v37 = vcombine.high %v851_v25, %v855_v27 }
 0x1e9   :  { %4449 = vmatprep.subr.bf16.mxu1 %v7163_v43  ;;  %v983_v36 = vld [vmem:[%s11267_s3 + $0x638] sm:$0xff]  ;;  %v6986_v43 = vcombine.low %v851_v25, %v855_v27 }
 0x1ea   :  { %4409 = vmatpush2.bf16.msra.mxu0 %v7034_v30  ;;  %v1099_v38 = vld [vmem:[%s11267_s3 + $0x9d8] sm:$0xff]  ;;  %v7115_v41 = vcombine.high %v979_v35, %v983_v36 }
 0x1eb   :  { %4410 = vmatprep.subr.bf16.mxu0 %v7027_v44  ;;  %v1103_v40 = vld [vmem:[%s11267_s3 + $0x9f8] sm:$0xff]  ;;  %v7114_v44 = vcombine.low %v979_v35, %v983_v36 }
 0x1ec   :  { %4450 = vmatpush2.bf16.msra.mxu1 %v7162_v47  ;;  %v1227_v30 = vld [vmem:[%s11267_s3 + $0xdd8] sm:$0xff]  ;;  %v7235_v32 = vcombine.high %v1099_v38, %v1103_v40 }
 0x1ed   :  { %4451 = vmatprep.subr.bf16.mxu1 %v7155_v55  ;;  %v1231_v26 = vld [vmem:[%s11267_s3 + $0xdf8] sm:$0xff]  ;;  %v7234_v55 = vcombine.low %v1099_v38, %v1103_v40 }
 0x1ee   :  { %4411 = vmatpush2.bf16.msra.mxu0 %v7026_v57  ;;  %v1091_v47 = vld [vmem:[%s11267_s3 + $0x998] sm:$0xff]  ;;  %v7363_v52 = vcombine.high %v1227_v30, %v1231_v26 }
 0x1ef   :  { %4412 = vmatprep.subr.bf16.mxu0 %v7019_v60  ;;  %v1095_v49 = vld [vmem:[%s11267_s3 + $0x9b8] sm:$0xff]  ;;  %v7362_v60 = vcombine.low %v1227_v30, %v1231_v26 }
 0x1f0   :  { %4452 = vmatpush2.bf16.msra.mxu1 %v7154_v61  ;;  %v1219_v57 = vld [vmem:[%s11267_s3 + $0xd98] sm:$0xff]  ;;  %v7227_v39 = vcombine.high %v1091_v47, %v1095_v49  ;;  %v7226_v2 = vcombine.low %v1091_v47, %v1095_v49 }
 0x1f1   :  { %4453 = vmatprep.subr.bf16.mxu1 %v7147_v0  ;;  %v1223_v58 = vld [vmem:[%s11267_s3 + $0xdb8] sm:$0xff] }
 0x1f2   :  { %4413 = vmatpush2.bf16.msra.mxu0 %v7018_v1  ;;  %v1083_v61 = vld [vmem:[%s11267_s3 + $0x958] sm:$0xff]  ;;  %v7355_v0 = vcombine.high %v1219_v57, %v1223_v58  ;;  %v7354_v7 = vcombine.low %v1219_v57, %v1223_v58 }
 0x1f3   :  { %4414 = vmatprep.subr.bf16.mxu0 %v7011_v4  ;;  %v1087_v62 = vld [vmem:[%s11267_s3 + $0x978] sm:$0xff] }
 0x1f4   :  { %4454 = vmatpush2.bf16.msra.mxu1 %v7146_v5  ;;  %v1211_v3 = vld [vmem:[%s11267_s3 + $0xd58] sm:$0xff]  ;;  %v7219_v6 = vcombine.high %v1083_v61, %v1087_v62  ;;  %v7218_v11 = vcombine.low %v1083_v61, %v1087_v62 }
 0x1f5   :  { %4455 = vmatprep.subr.bf16.mxu1 %v7139_v8  ;;  %v1215_v4 = vld [vmem:[%s11267_s3 + $0xd78] sm:$0xff] }
 0x1f6   :  { %4415 = vmatpush2.bf16.msra.mxu0 %v7010_v9  ;;  %v1075_v8 = vld [vmem:[%s11267_s3 + $0x918] sm:$0xff]  ;;  %v7347_v10 = vcombine.high %v1211_v3, %v1215_v4 }
 0x1f7   :  { %4416 = vmatprep.subr.bf16.mxu0 %v7003_v15  ;;  %v1079_v9 = vld [vmem:[%s11267_s3 + $0x938] sm:$0xff] }
 0x1f8   :  { %4456 = vmatpush2.bf16.msra.mxu1 %v7138_v13  ;;  %v1203_v15 = vld [vmem:[%s11267_s3 + $0xd18] sm:$0xff] }
 0x1f9   :  { %4457 = vmatprep.subr.bf16.mxu1 %v7131_v17  ;;  %v1207_v13 = vld [vmem:[%s11267_s3 + $0xd38] sm:$0xff]  ;;  %v7211_v17 = vcombine.high %v1075_v8, %v1079_v9 }
 0x1fa   :  { %4417 = vmatpush2.bf16.msra.mxu0 %v7002_v20  ;;  %v1067_v20 = vld [vmem:[%s11267_s3 + $0x8d8] sm:$0xff] }
 0x1fb   :  { %4418 = vmatprep.subr.bf16.mxu0 %v6995_v24  ;;  %v1071_v21 = vld [vmem:[%s11267_s3 + $0x8f8] sm:$0xff]  ;;  %v7339_v24 = vcombine.high %v1203_v15, %v1207_v13 }
 0x1fc   :  { %4458 = vmatpush2.bf16.msra.mxu1 %v7130_v48  ;;  %v7210_v48 = vcombine.low %v1075_v8, %v1079_v9  ;;  %v1195_v25 = vld [vmem:[%s11267_s3 + $0xcd8] sm:$0xff] }
 0x1fd   :  { %4459 = vmatprep.subr.bf16.mxu1 %v7123_v29  ;;  %v1199_v27 = vld [vmem:[%s11267_s3 + $0xcf8] sm:$0xff]  ;;  %v7203_v29 = vcombine.high %v1067_v20, %v1071_v21 }
 0x1fe   :  { %4419 = vmatpush2.bf16.msra.mxu0 %v6994_v45  ;;  %v7338_v45 = vcombine.low %v1203_v15, %v1207_v13  ;;  %v1059_v35 = vld [vmem:[%s11267_s3 + $0x898] sm:$0xff] }
 0x1ff   :  { %4420 = vmatprep.subr.bf16.mxu0 %v6987_v37  ;;  %v1063_v36 = vld [vmem:[%s11267_s3 + $0x8b8] sm:$0xff]  ;;  %v7331_v37 = vcombine.high %v1195_v25, %v1199_v27 }
 0x200   :  { %4460 = vmatpush2.bf16.msra.mxu1 %v7122_v53  ;;  %v7202_v53 = vcombine.low %v1067_v20, %v1071_v21  ;;  %v1187_v38 = vld [vmem:[%s11267_s3 + $0xc98] sm:$0xff] }
 0x201   :  { %4461 = vmatprep.subr.bf16.mxu1 %v7115_v41  ;;  %v1191_v40 = vld [vmem:[%s11267_s3 + $0xcb8] sm:$0xff]  ;;  %v7195_v41 = vcombine.high %v1059_v35, %v1063_v36 }
 0x202   :  { %4421 = vmatpush2.bf16.msra.mxu0 %v6986_v43  ;;  %v7330_v43 = vcombine.low %v1195_v25, %v1199_v27  ;;  %v1051_v30 = vld [vmem:[%s11267_s3 + $0x858] sm:$0xff] }
 0x203   :  { %4472 = vmatprep.subr.bf16.mxu0 %v7235_v32  ;;  %v1055_v26 = vld [vmem:[%s11267_s3 + $0x878] sm:$0xff]  ;;  %v7323_v32 = vcombine.high %v1187_v38, %v1191_v40 }
 0x204   :  { %4462 = vmatpush2.bf16.msra.mxu1 %v7114_v44  ;;  %v7194_v44 = vcombine.low %v1059_v35, %v1063_v36  ;;  %v1179_v47 = vld [vmem:[%s11267_s3 + $0xc58] sm:$0xff] }
 0x205   :  { %v4178_v63 = vpop.f32.mrf.mxu0  ;;  %4423 = vmatmul.mubr.bf16.vlgmr.msra.gmra.mxu0 %v8534_v46  ;;  %4513 = vmatprep.subr.bf16.mxu1 %v7363_v52  ;;  %v1183_v49 = vld [vmem:[%s11267_s3 + $0xc78] sm:$0xff]  ;;  %v7187_v52 = vcombine.high %v1051_v30, %v1055_v26 }
 0x206   :  { %v4179_v1 = vadd.f32 %v4178_v63, %v9921_v19  ;;  %4473 = vmatpush1.bf16.msra.mxu0 %v7234_v55  ;;  %4504 = vmatprep.mubr.bf16.mxu0 %v8545_v50  ;;  %v7322_v55 = vcombine.low %v1187_v38, %v1191_v40  ;;  %v1043_v57 = vld [vmem:[%s11267_s3 + $0x818] sm:$0xff] }
 0x207   :  { %v4219_v5 = vpop.f32.mrf.mxu1  ;;  %4464 = vmatmul.mubr.bf16.vlgmr.msra.gmra.mxu1 %v8549_v51  ;;  %v10122_v46 = vpop.f32.mrf.mxu0  ;;  %4474 = vmatprep.subr.bf16.mxu0 %v7227_v39  ;;  %v1047_v58 = vld [vmem:[%s11267_s3 + $0x838] sm:$0xff]  ;;  %v7315_v39 = vcombine.high %v1179_v47, %v1183_v49 }
 0x208   :  { %v10124_v19 = vadd.f32 %v4219_v5, %v4179_v1  ;;  %4514 = vmatpush1.bf16.msra.mxu1 %v7362_v60  ;;  %4545 = vmatprep.mubr.bf16.mxu1 %v8568_v56  ;;  %v7346_v56 = vcombine.low %v1211_v3, %v1215_v4  ;;  %v7186_v60 = vcombine.low %v1051_v30, %v1055_v26  ;;  %v1171_v61 = vld [vmem:[%s11267_s3 + $0xc18] sm:$0xff] }
 0x209   :  { %v10133_v50 = vpop.f32.mrf.mxu1  ;;  %v4182_v51 = vpop.f32.mrf.mxu0  ;;  %4515 = vmatprep.subr.bf16.mxu1 %v7355_v0  ;;  %v1175_v62 = vld [vmem:[%s11267_s3 + $0xc38] sm:$0xff]  ;;  %v7179_v63 = vcombine.high %v1043_v57, %v1047_v58  ;;  %v7314_v0 = vcombine.low %v1179_v47, %v1183_v49  ;;  %v7178_v4 = vcombine.low %v1043_v57, %v1047_v58 }
 0x20a   :  { %4475 = vmatpush1.bf16.msra.mxu0 %v7226_v2  ;;  %v1163_v1 = vld [vmem:[%s11267_s3 + $0xbd8] sm:$0xff]  ;;  %v7307_v3 = vcombine.high %v1171_v61, %v1175_v62  ;;  %v7306_v8 = vcombine.low %v1171_v61, %v1175_v62  ;;  %vm4556_vm4 = vcmp.gt.f32.partialorder %v10124_v19, 0.0 }
 0x20b   :  { %v4223_v14 = vpop.f32.mrf.mxu1  ;;  %v4183_v16 = vpop.f32.mrf.mxu0  ;;  %4476 = vmatprep.subr.bf16.mxu0 %v7219_v6  ;;  %v1167_v2 = vld [vmem:[%s11267_s3 + $0xbf8] sm:$0xff] }
 0x20c   :  { %4516 = vmatpush1.bf16.msra.mxu1 %v7354_v7  ;;  %v1291_v5 = vld [vmem:[%s11267_s3 + $0xfd8] sm:$0xff]  ;;  %v7299_v7 = vcombine.high %v1163_v1, %v1167_v2 }
 0x20d   :  { %v4224_v23 = vpop.f32.mrf.mxu1  ;;  %4517 = vmatprep.subr.bf16.mxu1 %v7347_v10  ;;  %v1295_v6 = vld [vmem:[%s11267_s3 + $0xff8] sm:$0xff] }
 0x20e   :  { %4477 = vmatpush1.bf16.msra.mxu0 %v7218_v11  ;;  %v1155_v9 = vld [vmem:[%s11267_s3 + $0xb98] sm:$0xff]  ;;  %v7427_v10 = vcombine.high %v1291_v5, %v1295_v6  ;;  %v7298_v11 = vcombine.low %v1163_v1, %v1167_v2  ;;  %v7426_v16 = vcombine.low %v1291_v5, %v1295_v6 }
 0x20f   :  { %4478 = vmatprep.subr.bf16.mxu0 %v7211_v17  ;;  %v1159_v51 = vld [vmem:[%s11267_s3 + $0xbb8] sm:$0xff] }
 0x210   :  { %4518 = vmatpush1.bf16.msra.mxu1 %v7346_v56  ;;  %v1283_v15 = vld [vmem:[%s11267_s3 + $0xf98] sm:$0xff]  ;;  %v7291_v14 = vcombine.high %v1155_v9, %v1159_v51  ;;  %v7290_v21 = vcombine.low %v1155_v9, %v1159_v51 }
 0x211   :  { %4519 = vmatprep.subr.bf16.mxu1 %v7339_v24  ;;  %v1287_v13 = vld [vmem:[%s11267_s3 + $0xfb8] sm:$0xff] }
 0x212   :  { %4479 = vmatpush1.bf16.msra.mxu0 %v7210_v48  ;;  %v1147_v17 = vld [vmem:[%s11267_s3 + $0xb58] sm:$0xff]  ;;  %v7419_v20 = vcombine.high %v1283_v15, %v1287_v13  ;;  %v7418_v25 = vcombine.low %v1283_v15, %v1287_v13  ;;  %v4563_v13 = vmul.f32 0.2, %v9722_v42 }
 0x213   :  { %4480 = vmatprep.subr.bf16.mxu0 %v7203_v29  ;;  %v1151_v56 = vld [vmem:[%s11267_s3 + $0xb78] sm:$0xff] }
 0x214   :  { %4520 = vmatpush1.bf16.msra.mxu1 %v7338_v45  ;;  %v1275_v23 = vld [vmem:[%s11267_s3 + $0xf58] sm:$0xff]  ;;  %v7283_v48 = vcombine.high %v1147_v17, %v1151_v56  ;;  %v7282_v35 = vcombine.low %v1147_v17, %v1151_v56  ;;  %v1316_v17 = vsub.s32 4, %v8515_v34 }
 0x215   :  { %4521 = vmatprep.subr.bf16.mxu1 %v7331_v37  ;;  %v1279_v24 = vld [vmem:[%s11267_s3 + $0xf78] sm:$0xff] }
 0x216   :  { %4481 = vmatpush1.bf16.msra.mxu0 %v7202_v53  ;;  %v1139_v27 = vld [vmem:[%s11267_s3 + $0xb18] sm:$0xff]  ;;  %v7411_v45 = vcombine.high %v1275_v23, %v1279_v24  ;;  %v7410_v38 = vcombine.low %v1275_v23, %v1279_v24  ;;  %v4571_v23 = vsel %vm4555_vm1, %v9722_v42, %v4563_v13  ;;  %v10301_v24 = vld [vmem:[%s11268_s4] sm:$0xff] }
 0x217   :  { %4482 = vmatprep.subr.bf16.mxu0 %v7195_v41  ;;  %v1143_v29 = vld [vmem:[%s11267_s3 + $0xb38] sm:$0xff]  ;;  %v7919_v42 = vld [vmem:[%s11269_s5 + $0x2e0] ss:$16 sps:$4 sm:$0xff]   ;;  %v7972_v13 = vld [vmem:[%s11269_s5 + $0x1c4] ss:$16 sps:$4 sm:$0xff]  }
 0x218   :  { %4522 = vmatpush1.bf16.msra.mxu1 %v7330_v43  ;;  %v1267_v36 = vld [vmem:[%s11267_s3 + $0xf18] sm:$0xff]  ;;  %v7275_v53 = vcombine.high %v1139_v27, %v1143_v29  ;;  %v7274_v30 = vcombine.low %v1139_v27, %v1143_v29  ;;  %v7924_v29 = vld [vmem:[%s11269_s5 + $0xc4] ss:$16 sps:$4 sm:$0xff]  }
 0x219   :  { %4523 = vmatprep.subr.bf16.mxu1 %v7323_v32  ;;  %v1271_v37 = vld [vmem:[%s11267_s3 + $0xf38] sm:$0xff] }
 0x21a   :  { %4483 = vmatpush1.bf16.msra.mxu0 %v7194_v44  ;;  %v1131_v40 = vld [vmem:[%s11267_s3 + $0xad8] sm:$0xff]  ;;  %v7403_v43 = vcombine.high %v1267_v36, %v1271_v37  ;;  %v7402_v47 = vcombine.low %v1267_v36, %v1271_v37  ;;  %v7927_v36 = vld [vmem:[%s11269_s5 + $0x2c4] ss:$16 sps:$4 sm:$0xff]  }
 0x21b   :  { %4484 = vmatprep.subr.bf16.mxu0 %v7187_v52  ;;  %v1135_v41 = vld [vmem:[%s11267_s3 + $0xaf8] sm:$0xff] }
 0x21c   :  { %4524 = vmatpush1.bf16.msra.mxu1 %v7322_v55  ;;  %v1259_v26 = vld [vmem:[%s11267_s3 + $0xed8] sm:$0xff]  ;;  %v7267_v44 = vcombine.high %v1131_v40, %v1135_v41  ;;  %v7266_v57 = vcombine.low %v1131_v40, %v1135_v41 }
 0x21d   :  { %4525 = vmatprep.subr.bf16.mxu1 %v7315_v39  ;;  %v1263_v32 = vld [vmem:[%s11267_s3 + $0xef8] sm:$0xff] }
 0x21e   :  { %4485 = vmatpush1.bf16.msra.mxu0 %v7186_v60  ;;  %v1123_v49 = vld [vmem:[%s11267_s3 + $0xa98] sm:$0xff]  ;;  %v7395_v55 = vcombine.high %v1259_v26, %v1263_v32  ;;  %v7394_v61 = vcombine.low %v1259_v26, %v1263_v32 }
 0x21f   :  { %4486 = vmatprep.subr.bf16.mxu0 %v7179_v63  ;;  %v1127_v52 = vld [vmem:[%s11267_s3 + $0xab8] sm:$0xff] }
 0x220   :  { %4526 = vmatpush1.bf16.msra.mxu1 %v7314_v0  ;;  %v1251_v58 = vld [vmem:[%s11267_s3 + $0xe98] sm:$0xff]  ;;  %v7259_v60 = vcombine.high %v1123_v49, %v1127_v52  ;;  %v7258_v1 = vcombine.low %v1123_v49, %v1127_v52  ;;  %v7936_v52 = vld [vmem:[%s11269_s5 + $0x84] ss:$16 sps:$4 sm:$0xff]  }
 0x221   :  { %4527 = vmatprep.subr.bf16.mxu1 %v7307_v3  ;;  %v1255_v39 = vld [vmem:[%s11267_s3 + $0xeb8] sm:$0xff] }
 0x222   :  { %4487 = vmatpush1.bf16.msra.mxu0 %v7178_v4  ;;  %v1115_v62 = vld [vmem:[%s11267_s3 + $0xa58] sm:$0xff]  ;;  %v7387_v0 = vcombine.high %v1251_v58, %v1255_v39  ;;  %v4181_v4 = vadd.f32 %v10122_v46, %v9930_v28  ;;  %v7386_v6 = vcombine.low %v1251_v58, %v1255_v39  ;;  %v7939_v58 = vld [vmem:[%s11269_s5 + $0x284] ss:$16 sps:$4 sm:$0xff]   ;;  %v7934_v39 = vld [vmem:[%s11269_s5 + $0x80] ss:$16 sps:$4 sm:$0xff]  }
 0x223   :  { %4488 = vmatprep.subr.bf16.mxu0 %v7299_v7  ;;  %v1119_v63 = vld [vmem:[%s11267_s3 + $0xa78] sm:$0xff] }
 0x224   :  { %4528 = vmatpush1.bf16.msra.mxu1 %v7306_v8  ;;  %v1243_v2 = vld [vmem:[%s11267_s3 + $0xe58] sm:$0xff]  ;;  %v7251_v5 = vcombine.high %v1115_v62, %v1119_v63  ;;  %v7250_v51 = vcombine.low %v1115_v62, %v1119_v63  ;;  %v7945_v62 = vld [vmem:[%s11269_s5 + $0x264] ss:$16 sps:$4 sm:$0xff]   ;;  %v7940_v63 = vld [vmem:[%s11269_s5 + $0x60] ss:$16 sps:$4 sm:$0xff]  }
 0x225   :  { %4529 = vmatprep.subr.bf16.mxu1 %v7427_v10  ;;  %v1247_v3 = vld [vmem:[%s11267_s3 + $0xe78] sm:$0xff]  ;;  %v4222_v10 = vadd.f32 %v10133_v50, %v4181_v4  ;;  %v7918_v50 = vld [vmem:[%s11269_s5 + $0xe4] ss:$16 sps:$4 sm:$0xff]  }
 0x226   :  { %4489 = vmatpush2.bf16.msra.mxu0 %v7298_v11  ;;  %v1107_v7 = vld [vmem:[%s11267_s3 + $0xa18] sm:$0xff]  ;;  %v7379_v9 = vcombine.high %v1243_v2, %v1247_v3  ;;  %v7378_v15 = vcombine.low %v1243_v2, %v1247_v3  ;;  %v7951_v2 = vld [vmem:[%s11269_s5 + $0x244] ss:$16 sps:$4 sm:$0xff]   ;;  %v7946_v3 = vld [vmem:[%s11269_s5 + $0x40] ss:$16 sps:$4 sm:$0xff]  }
 0x227   :  { %4490 = vmatprep.subr.bf16.mxu0 %v7291_v14  ;;  %v1111_v8 = vld [vmem:[%s11267_s3 + $0xa38] sm:$0xff]  ;;  %v4565_v56 = vmul.f32 0.2, %v4222_v10  ;;  %vm4557_vm2 = vcmp.gt.f32.partialorder %v4222_v10, 0.0  ;;  %v7954_v4 = vld [vmem:[%s11269_s5 + $0x24] ss:$16 sps:$4 sm:$0xff]  }
 0x228   :  { %4530 = vmatpush2.bf16.msra.mxu1 %v7426_v16  ;;  %v1235_v28 = vld [vmem:[%s11267_s3 + $0xe18] sm:$0xff]  ;;  %v7243_v11 = vcombine.high %v1107_v7, %v1111_v8  ;;  %v7242_v16 = vcombine.low %v1107_v7, %v1111_v8  ;;  %v7952_v7 = vld [vmem:[%s11269_s5 + $0x20] ss:$16 sps:$4 sm:$0xff]   ;;  %v7960_v8 = vld [vmem:[%s11269_s5 + $0x4] ss:$16 sps:$4 sm:$0xff]  }
 0x229   :  { %4531 = vmatprep.subr.bf16.mxu1 %v7419_v20  ;;  %v1239_v46 = vld [vmem:[%s11267_s3 + $0xe38] sm:$0xff]  ;;  %v4573_v27 = vsel %vm4557_vm2, %v4222_v10, %v4565_v56  ;;  %v7961_v10 = vld [vmem:[%s11269_s5 + $0x200] ss:$16 sps:$4 sm:$0xff]   ;;  %v7978_v56 = vld [vmem:[%s11269_s5 + $0x1a4] ss:$16 sps:$4 sm:$0xff]  }
 0x22a   :  { %4491 = vmatpush2.bf16.msra.mxu0 %v7290_v21  ;;  %v7371_v14 = vcombine.high %v1235_v28, %v1239_v46  ;;  %v7370_v20 = vcombine.low %v1235_v28, %v1239_v46  ;;  %v7921_v21 = vld [vmem:[%s11269_s5 + $0x2e4] ss:$16 sps:$4 sm:$0xff]   ;;  %v7958_v28 = vld [vmem:[%s11269_s5] ss:$16 sps:$4 sm:$0xff]  }
 0x22b   :  { %4492 = vmatprep.subr.bf16.mxu0 %v7283_v48  ;;  %v1317_v48 = vrot.slane %v10301_v24, %v1316_v17  ;;  %v7966_v46 = vld [vmem:[%s11269_s5 + $0x1e4] ss:$16 sps:$4 sm:$0xff]   ;;  %v7970_v17 = vld [vmem:[%s11269_s5 + $0x1c0] ss:$16 sps:$4 sm:$0xff]  }
 0x22c   :  { %4532 = vmatpush2.bf16.msra.mxu1 %v7418_v25  ;;  %v7916_v25 = vld [vmem:[%s11269_s5 + $0xe0] ss:$16 sps:$4 sm:$0xff]  }
 0x22d   :  { %4533 = vmatprep.subr.bf16.mxu1 %v7411_v45  ;;  %v10313_v45 = vpack.c.bf16 %v4571_v23, %v4571_v23  ;;  %v7984_v23 = vld [vmem:[%s11269_s5 + $0x184] ss:$16 sps:$4 sm:$0xff]  }
 0x22e   :  { %4493 = vmatpush2.bf16.msra.mxu0 %v7282_v35 }
 0x22f   :  { %4494 = vmatprep.subr.bf16.mxu0 %v7275_v53  ;;  %v10320_v53 = vpack.c.bf16 %v4573_v27, %v4573_v27  ;;  %v7982_v27 = vld [vmem:[%s11269_s5 + $0x180] ss:$16 sps:$4 sm:$0xff]  }
 0x230   :  { %4534 = vmatpush2.bf16.msra.mxu1 %v7410_v38  ;;  %v7922_v38 = vld [vmem:[%s11269_s5 + $0xc0] ss:$16 sps:$4 sm:$0xff]  }
 0x231   :  { %4535 = vmatprep.subr.bf16.mxu1 %v7403_v43 }
 0x232   :  { %4495 = vmatpush2.bf16.msra.mxu0 %v7274_v30  ;;  %v7925_v30 = vld [vmem:[%s11269_s5 + $0x2c0] ss:$16 sps:$4 sm:$0xff]  }
 0x233   :  { %4496 = vmatprep.subr.bf16.mxu0 %v7267_v44  ;;  %v7928_v44 = vld [vmem:[%s11269_s5 + $0xa0] ss:$16 sps:$4 sm:$0xff]  }
 0x234   :  { %4536 = vmatpush2.bf16.msra.mxu1 %v7402_v47 }
 0x235   :  { %4537 = vmatprep.subr.bf16.mxu1 %v7395_v55  ;;  %v7931_v55 = vld [vmem:[%s11269_s5 + $0x2a0] ss:$16 sps:$4 sm:$0xff]  }
 0x236   :  { %4497 = vmatpush2.bf16.msra.mxu0 %v7266_v57 }
 0x237   :  { %4498 = vmatprep.subr.bf16.mxu0 %v7259_v60  ;;  %v7942_v60 = vld [vmem:[%s11269_s5 + $0x64] ss:$16 sps:$4 sm:$0xff]  }
 0x238   :  { %4538 = vmatpush2.bf16.msra.mxu1 %v7394_v61  ;;  %v7937_v61 = vld [vmem:[%s11269_s5 + $0x280] ss:$16 sps:$4 sm:$0xff]  }
 0x239   :  { %4539 = vmatprep.subr.bf16.mxu1 %v7387_v0  ;;  %v7948_v0 = vld [vmem:[%s11269_s5 + $0x44] ss:$16 sps:$4 sm:$0xff]  }
 0x23a   :  { %4499 = vmatpush2.bf16.msra.mxu0 %v7258_v1  ;;  %v7943_v1 = vld [vmem:[%s11269_s5 + $0x260] ss:$16 sps:$4 sm:$0xff]  }
 0x23b   :  { %4500 = vmatprep.subr.bf16.mxu0 %v7251_v5  ;;  %v7949_v5 = vld [vmem:[%s11269_s5 + $0x240] ss:$16 sps:$4 sm:$0xff]  }
 0x23c   :  { %4540 = vmatpush2.bf16.msra.mxu1 %v7386_v6  ;;  %v7957_v6 = vld [vmem:[%s11269_s5 + $0x224] ss:$16 sps:$4 sm:$0xff]  }
 0x23d   :  { %4541 = vmatprep.subr.bf16.mxu1 %v7379_v9  ;;  %v7955_v9 = vld [vmem:[%s11269_s5 + $0x220] ss:$16 sps:$4 sm:$0xff]  }
 0x23e   :  { %4501 = vmatpush2.bf16.msra.mxu0 %v7250_v51  ;;  %v7963_v51 = vld [vmem:[%s11269_s5 + $0x204] ss:$16 sps:$4 sm:$0xff]  }
 0x23f   :  { %4502 = vmatprep.subr.bf16.mxu0 %v7243_v11  ;;  %v7969_v11 = vld [vmem:[%s11269_s5 + $0x3e4] ss:$16 sps:$4 sm:$0xff]  }
 0x240   :  { %4542 = vmatpush2.bf16.msra.mxu1 %v7378_v15  ;;  %v7964_v15 = vld [vmem:[%s11269_s5 + $0x1e0] ss:$16 sps:$4 sm:$0xff]  }
 0x241   :  { %4543 = vmatprep.subr.bf16.mxu1 %v7371_v14  ;;  %v7967_v14 = vld [vmem:[%s11269_s5 + $0x3e0] ss:$16 sps:$4 sm:$0xff]  }
 0x242   :  { %4503 = vmatpush2.bf16.msra.mxu0 %v7242_v16  ;;  %v7975_v16 = vld [vmem:[%s11269_s5 + $0x3c4] ss:$16 sps:$4 sm:$0xff]  }
 0x243   :  { %6144 = vmatprep.subr.bf16.mxu0 %v7918_v50  ;;  %v7973_v50 = vld [vmem:[%s11269_s5 + $0x3c0] ss:$16 sps:$4 sm:$0xff]  }
 0x244   :  { %4544 = vmatpush2.bf16.msra.mxu1 %v7370_v20  ;;  %v7981_v20 = vld [vmem:[%s11269_s5 + $0x3a4] ss:$16 sps:$4 sm:$0xff]  }
 0x245   :  { %v4260_v35 = vpop.f32.mrf.mxu0  ;;  %4505 = vmatmul.mubr.bf16.vlgmr.msra.gmra.mxu0 %v8663_v22  ;;  %6185 = vmatprep.subr.bf16.mxu1 %v7921_v21  ;;  %v7930_v22 = vld [vmem:[%s11269_s5 + $0xa4] ss:$16 sps:$4 sm:$0xff]   ;;  %v7976_v21 = vld [vmem:[%s11269_s5 + $0x1a0] ss:$16 sps:$4 sm:$0xff]  }
 0x246   :  { %v4261_v37 = vadd.f32 %v4260_v35, %v1317_v48  ;;  %6145 = vmatpush1.bf16.msra.mxu0 %v7916_v25  ;;  %6176 = vmatprep.mubr.bf16.mxu0 %v10313_v45  ;;  %v7979_v48 = vld [vmem:[%s11269_s5 + $0x3a0] ss:$16 sps:$4 sm:$0xff]   ;;  %v7987_v25 = vld [vmem:[%s11269_s5 + $0x384] ss:$16 sps:$4 sm:$0xff]  }
 0x247   :  { %v4301_v40 = vpop.f32.mrf.mxu1  ;;  %4546 = vmatmul.mubr.bf16.vlgmr.msra.gmra.mxu1 %v8682_v31  ;;  %v10326_v41 = vpop.f32.mrf.mxu0  ;;  %6146 = vmatprep.subr.bf16.mxu0 %v7924_v29  ;;  %v7933_v31 = vld [vmem:[%s11269_s5 + $0x2a4] ss:$16 sps:$4 sm:$0xff]  }
 0x248   :  { %v10331_v43 = vadd.f32 %v4301_v40, %v4261_v37  ;;  %6186 = vmatpush1.bf16.msra.mxu1 %v7919_v42  ;;  %6217 = vmatprep.mubr.bf16.mxu1 %v10320_v53  ;;  %v7990_v29 = vld [vmem:[%s11269_s5 + $0x164] ss:$16 sps:$4 sm:$0xff]   ;;  %v7985_v42 = vld [vmem:[%s11269_s5 + $0x380] ss:$16 sps:$4 sm:$0xff]  }
 0x249   :  { %v10337_v26 = vpop.f32.mrf.mxu1  ;;  %v4264_v32 = vpop.f32.mrf.mxu0  ;;  %6187 = vmatprep.subr.bf16.mxu1 %v7927_v36  ;;  %v7993_v35 = vld [vmem:[%s11269_s5 + $0x364] ss:$16 sps:$4 sm:$0xff]   ;;  %v7988_v36 = vld [vmem:[%s11269_s5 + $0x160] ss:$16 sps:$4 sm:$0xff]  }
 0x24a   :  { %6147 = vmatpush1.bf16.msra.mxu0 %v7922_v38  ;;  %v7996_v37 = vld [vmem:[%s11269_s5 + $0x144] ss:$16 sps:$4 sm:$0xff]   ;;  %v7991_v38 = vld [vmem:[%s11269_s5 + $0x360] ss:$16 sps:$4 sm:$0xff]  }
 0x24b   :  { %v4305_v47 = vpop.f32.mrf.mxu1  ;;  %v4265_v49 = vpop.f32.mrf.mxu0  ;;  %6148 = vmatprep.subr.bf16.mxu0 %v7930_v22  ;;  %v7999_v40 = vld [vmem:[%s11269_s5 + $0x344] ss:$16 sps:$4 sm:$0xff]   ;;  %v7994_v22 = vld [vmem:[%s11269_s5 + $0x140] ss:$16 sps:$4 sm:$0xff]  }
 0x24c   :  { %6188 = vmatpush1.bf16.msra.mxu1 %v7925_v30  ;;  %v8002_v30 = vld [vmem:[%s11269_s5 + $0x124] ss:$16 sps:$4 sm:$0xff]   ;;  %v7997_v32 = vld [vmem:[%s11269_s5 + $0x340] ss:$16 sps:$4 sm:$0xff]  }
 0x24d   :  { %v4306_v57 = vpop.f32.mrf.mxu1  ;;  %6189 = vmatprep.subr.bf16.mxu1 %v7933_v31  ;;  %v8005_v31 = vld [vmem:[%s11269_s5 + $0x324] ss:$16 sps:$4 sm:$0xff]   ;;  %v8000_v47 = vld [vmem:[%s11269_s5 + $0x120] ss:$16 sps:$4 sm:$0xff]  }
 0x24e   :  { %6149 = vmatpush1.bf16.msra.mxu0 %v7928_v44  ;;  %v1320_v44 = vsub.s32 5, %v8515_v34  ;;  %v8008_v49 = vld [vmem:[%s11269_s5 + $0x104] ss:$16 sps:$4 sm:$0xff]  }
 0x24f   :  { %6150 = vmatprep.subr.bf16.mxu0 %v7936_v52  ;;  %v4562_v52 = vmul.f32 0.2, %v9712_v33  ;;  %v8011_v57 = vld [vmem:[%s11269_s5 + $0x304] ss:$16 sps:$4 sm:$0xff]  }
 0x250   :  { %6190 = vmatpush1.bf16.msra.mxu1 %v7931_v55  ;;  %v8003_v55 = vld [vmem:[%s11269_s5 + $0x320] ss:$16 sps:$4 sm:$0xff]  }
 0x251   :  { %6191 = vmatprep.subr.bf16.mxu1 %v7939_v58  ;;  %v4564_v58 = vmul.f32 0.2, %v10124_v19 }
 0x252   :  { %6151 = vmatpush1.bf16.msra.mxu0 %v7934_v39  ;;  %v1321_v39 = vrot.slane %v10301_v24, %v1320_v44  ;;  %v8030_v44 = vld [vmem:[%s11269_s5 + $0x420] ss:$16 sps:$4 sm:$0xff]  }
 0x253   :  { %6152 = vmatprep.subr.bf16.mxu0 %v7942_v60  ;;  %v8006_v60 = vld [vmem:[%s11269_s5 + $0x100] ss:$16 sps:$4 sm:$0xff]  }
 0x254   :  { %6192 = vmatpush1.bf16.msra.mxu1 %v7937_v61  ;;  %v8014_v61 = vld [vmem:[%s11269_s5 + $0x4e4] ss:$16 sps:$4 sm:$0xff]  }
 0x255   :  { %6193 = vmatprep.subr.bf16.mxu1 %v7945_v62  ;;  %v4570_v62 = vsel %vm4554_vm3, %v9712_v33, %v4562_v52  ;;  %v8113_v52 = vld [vmem:[%s11269_s5 + $0x604] ss:$16 sps:$4 sm:$0xff]  }
 0x256   :  { %6153 = vmatpush1.bf16.msra.mxu0 %v7940_v63  ;;  %v8009_v63 = vld [vmem:[%s11269_s5 + $0x300] ss:$16 sps:$4 sm:$0xff]   ;;  %v10522_v33 = vpack.c.bf16 %v4570_v62, %v4570_v62 }
 0x257   :  { %6154 = vmatprep.subr.bf16.mxu0 %v7948_v0  ;;  %v8071_v0 = vld [vmem:[%s11269_s5 + $0x6e4] ss:$16 sps:$4 sm:$0xff]   ;;  %v8117_v62 = vld [vmem:[%s11269_s5 + $0x7e0] ss:$16 sps:$4 sm:$0xff]  }
 0x258   :  { %6194 = vmatpush1.bf16.msra.mxu1 %v7943_v1  ;;  %v4572_v1 = vsel %vm4556_vm4, %v10124_v19, %v4564_v58  ;;  %v8111_v58 = vld [vmem:[%s11269_s5 + $0x600] ss:$16 sps:$4 sm:$0xff]  }
 0x259   :  { %6195 = vmatprep.subr.bf16.mxu1 %v7951_v2  ;;  %v4263_v2 = vadd.f32 %v10326_v41, %v1321_v39  ;;  %v10530_v19 = vpack.c.bf16 %v4572_v1, %v4572_v1  ;;  %v8119_v39 = vld [vmem:[%s11269_s5 + $0x7e4] ss:$16 sps:$4 sm:$0xff]  }
 0x25a   :  { %6155 = vmatpush1.bf16.msra.mxu0 %v7946_v3  ;;  %v8012_v3 = vld [vmem:[%s11269_s5 + $0x4e0] ss:$16 sps:$4 sm:$0xff]   ;;  %v8044_v1 = vld [vmem:[%s11269_s5 + $0x5a4] ss:$16 sps:$4 sm:$0xff]  }
 0x25b   :  { %6156 = vmatprep.subr.bf16.mxu0 %v7954_v4  ;;  %v8017_v4 = vld [vmem:[%s11269_s5 + $0x4c4] ss:$16 sps:$4 sm:$0xff]  }
 0x25c   :  { %6196 = vmatpush1.bf16.msra.mxu1 %v7949_v5  ;;  %v8069_v5 = vld [vmem:[%s11269_s5 + $0x6e0] ss:$16 sps:$4 sm:$0xff]  }
 0x25d   :  { %6197 = vmatprep.subr.bf16.mxu1 %v7957_v6  ;;  %v8077_v6 = vld [vmem:[%s11269_s5 + $0x6c4] ss:$16 sps:$4 sm:$0xff]  }
 0x25e   :  { %6157 = vmatpush1.bf16.msra.mxu0 %v7952_v7  ;;  %v4304_v7 = vadd.f32 %v10337_v26, %v4263_v2  ;;  %v8075_v26 = vld [vmem:[%s11269_s5 + $0x6c0] ss:$16 sps:$4 sm:$0xff]  }
 0x25f   :  { %6158 = vmatprep.subr.bf16.mxu0 %v7960_v8  ;;  %v8015_v8 = vld [vmem:[%s11269_s5 + $0x4c0] ss:$16 sps:$4 sm:$0xff]  }
 0x260   :  { %6198 = vmatpush1.bf16.msra.mxu1 %v7955_v9  ;;  %v8123_v2 = vld [vmem:[%s11269_s5 + $0x7c0] ss:$16 sps:$4 sm:$0xff]  }
 0x261   :  { %6199 = vmatprep.subr.bf16.mxu1 %v7963_v51 }
 0x262   :  { %6159 = vmatpush1.bf16.msra.mxu0 %v7958_v28  ;;  %v8020_v28 = vld [vmem:[%s11269_s5 + $0x4a4] ss:$16 sps:$4 sm:$0xff]  }
 0x263   :  { %6160 = vmatprep.subr.bf16.mxu0 %v7966_v46 }
 0x264   :  { %6200 = vmatpush1.bf16.msra.mxu1 %v7961_v10 }
 0x265   :  { %6201 = vmatprep.subr.bf16.mxu1 %v7969_v11 }
 0x266   :  { %6161 = vmatpush2.bf16.msra.mxu0 %v7964_v15  ;;  %v8083_v15 = vld [vmem:[%s11269_s5 + $0x6a4] ss:$16 sps:$4 sm:$0xff]  }
 0x267   :  { %6162 = vmatprep.subr.bf16.mxu0 %v7972_v13 }
 0x268   :  { %6202 = vmatpush2.bf16.msra.mxu1 %v7967_v14  ;;  %v8018_v14 = vld [vmem:[%s11269_s5 + $0x4a0] ss:$16 sps:$4 sm:$0xff]  }
 0x269   :  { %6203 = vmatprep.subr.bf16.mxu1 %v7975_v16 }
 0x26a   :  { %6163 = vmatpush2.bf16.msra.mxu0 %v7970_v17 }
 0x26b   :  { %6164 = vmatprep.subr.bf16.mxu0 %v7978_v56  ;;  %v8023_v56 = vld [vmem:[%s11269_s5 + $0x484] ss:$16 sps:$4 sm:$0xff]  }
 0x26c   :  { %6204 = vmatpush2.bf16.msra.mxu1 %v7973_v50 }
 0x26d   :  { %6205 = vmatprep.subr.bf16.mxu1 %v7981_v20  ;;  %v8081_v20 = vld [vmem:[%s11269_s5 + $0x6a0] ss:$16 sps:$4 sm:$0xff]  }
 0x26e   :  { %6165 = vmatpush2.bf16.msra.mxu0 %v7976_v21 }
 0x26f   :  { %6166 = vmatprep.subr.bf16.mxu0 %v7984_v23  ;;  %v8089_v23 = vld [vmem:[%s11269_s5 + $0x684] ss:$16 sps:$4 sm:$0xff]  }
 0x270   :  { %6206 = vmatpush2.bf16.msra.mxu1 %v7979_v48  ;;  %v8021_v48 = vld [vmem:[%s11269_s5 + $0x480] ss:$16 sps:$4 sm:$0xff]  }
 0x271   :  { %6207 = vmatprep.subr.bf16.mxu1 %v7987_v25 }
 0x272   :  { %6167 = vmatpush2.bf16.msra.mxu0 %v7982_v27 }
 0x273   :  { %6168 = vmatprep.subr.bf16.mxu0 %v7990_v29  ;;  %v8026_v29 = vld [vmem:[%s11269_s5 + $0x464] ss:$16 sps:$4 sm:$0xff]  }
 0x274   :  { %6208 = vmatpush2.bf16.msra.mxu1 %v7985_v42  ;;  %v8087_v42 = vld [vmem:[%s11269_s5 + $0x680] ss:$16 sps:$4 sm:$0xff]  }
 0x275   :  { %6209 = vmatprep.subr.bf16.mxu1 %v7993_v35  ;;  %v8095_v35 = vld [vmem:[%s11269_s5 + $0x664] ss:$16 sps:$4 sm:$0xff]  }
 0x276   :  { %6169 = vmatpush2.bf16.msra.mxu0 %v7988_v36  ;;  %v8024_v36 = vld [vmem:[%s11269_s5 + $0x460] ss:$16 sps:$4 sm:$0xff]  }
 0x277   :  { %6170 = vmatprep.subr.bf16.mxu0 %v7996_v37  ;;  %v8029_v37 = vld [vmem:[%s11269_s5 + $0x444] ss:$16 sps:$4 sm:$0xff]  }
 0x278   :  { %6210 = vmatpush2.bf16.msra.mxu1 %v7991_v38  ;;  %v8093_v38 = vld [vmem:[%s11269_s5 + $0x660] ss:$16 sps:$4 sm:$0xff]  }
 0x279   :  { %6211 = vmatprep.subr.bf16.mxu1 %v7999_v40  ;;  %v8101_v40 = vld [vmem:[%s11269_s5 + $0x644] ss:$16 sps:$4 sm:$0xff]  }
 0x27a   :  { %6171 = vmatpush2.bf16.msra.mxu0 %v7994_v22  ;;  %v8027_v22 = vld [vmem:[%s11269_s5 + $0x440] ss:$16 sps:$4 sm:$0xff]  }
 0x27b   :  { %6172 = vmatprep.subr.bf16.mxu0 %v8002_v30  ;;  %v8032_v30 = vld [vmem:[%s11269_s5 + $0x424] ss:$16 sps:$4 sm:$0xff]  }
 0x27c   :  { %6212 = vmatpush2.bf16.msra.mxu1 %v7997_v32  ;;  %v8099_v32 = vld [vmem:[%s11269_s5 + $0x640] ss:$16 sps:$4 sm:$0xff]  }
 0x27d   :  { %6213 = vmatprep.subr.bf16.mxu1 %v8005_v31  ;;  %v8107_v31 = vld [vmem:[%s11269_s5 + $0x624] ss:$16 sps:$4 sm:$0xff]  }
 0x27e   :  { %6173 = vmatpush2.bf16.msra.mxu0 %v8000_v47  ;;  %v8035_v47 = vld [vmem:[%s11269_s5 + $0x404] ss:$16 sps:$4 sm:$0xff]  }
 0x27f   :  { %6174 = vmatprep.subr.bf16.mxu0 %v8008_v49  ;;  %v8105_v49 = vld [vmem:[%s11269_s5 + $0x620] ss:$16 sps:$4 sm:$0xff]  }
 0x280   :  { %6214 = vmatpush2.bf16.msra.mxu1 %v8003_v55  ;;  %v8033_v55 = vld [vmem:[%s11269_s5 + $0x400] ss:$16 sps:$4 sm:$0xff]  }
 0x281   :  { %6215 = vmatprep.subr.bf16.mxu1 %v8011_v57  ;;  %v8038_v57 = vld [vmem:[%s11269_s5 + $0x5e4] ss:$16 sps:$4 sm:$0xff]  }
 0x282   :  { %6175 = vmatpush2.bf16.msra.mxu0 %v8006_v60  ;;  %v8036_v60 = vld [vmem:[%s11269_s5 + $0x5e0] ss:$16 sps:$4 sm:$0xff]  }
 0x283   :  { %6226 = vmatprep.subr.bf16.mxu0 %v8014_v61  ;;  %v8041_v61 = vld [vmem:[%s11269_s5 + $0x5c4] ss:$16 sps:$4 sm:$0xff]  }
 0x284   :  { %6216 = vmatpush2.bf16.msra.mxu1 %v8009_v63  ;;  %v8125_v63 = vld [vmem:[%s11269_s5 + $0x7c4] ss:$16 sps:$4 sm:$0xff]  }
 0x285   :  { %v10532_v41 = vpop.f32.mrf.mxu0  ;;  %6177 = vmatmul.mubr.bf16.vlgmr.msra.gmra.mxu0 %v10522_v33  ;;  %6267 = vmatprep.subr.bf16.mxu1 %v8071_v0  ;;  %v8039_v0 = vld [vmem:[%s11269_s5 + $0x5c0] ss:$16 sps:$4 sm:$0xff]  }
 0x286   :  { %6227 = vmatpush1.bf16.msra.mxu0 %v8012_v3  ;;  %v8131_v3 = vld [vmem:[%s11269_s5 + $0x7a4] ss:$16 sps:$4 sm:$0xff]  }
 0x287   :  { %v10542_v9 = vpop.f32.mrf.mxu1  ;;  %6218 = vmatmul.mubr.bf16.vlgmr.msra.gmra.mxu1 %v10530_v19  ;;  %v4344_v51 = vpop.f32.mrf.mxu0  ;;  %6228 = vmatprep.subr.bf16.mxu0 %v8017_v4  ;;  %v8042_v4 = vld [vmem:[%s11269_s5 + $0x5a0] ss:$16 sps:$4 sm:$0xff]  }
 0x288   :  { %v4345_v46 = vadd.f32 %v4344_v51, %v4304_v7  ;;  %6268 = vmatpush1.bf16.msra.mxu1 %v8069_v5  ;;  %v8047_v5 = vld [vmem:[%s11269_s5 + $0x584] ss:$16 sps:$4 sm:$0xff]  }
 0x289   :  { %v4385_v10 = vpop.f32.mrf.mxu1  ;;  %v4346_v11 = vpop.f32.mrf.mxu0  ;;  %6269 = vmatprep.subr.bf16.mxu1 %v8077_v6  ;;  %v8129_v6 = vld [vmem:[%s11269_s5 + $0x7a0] ss:$16 sps:$4 sm:$0xff]   ;;  %v8137_v7 = vld [vmem:[%s11269_s5 + $0x784] ss:$16 sps:$4 sm:$0xff]  }
 0x28a   :  { %v4386_v13 = vadd.f32 %v4385_v10, %v4345_v46  ;;  %6229 = vmatpush1.bf16.msra.mxu0 %v8015_v8  ;;  %v8045_v8 = vld [vmem:[%s11269_s5 + $0x580] ss:$16 sps:$4 sm:$0xff]   ;;  %v8050_v51 = vld [vmem:[%s11269_s5 + $0x564] ss:$16 sps:$4 sm:$0xff]   ;;  %v4343_v11 = vadd.f32 %v10532_v41, %v10331_v43 }
 0x28b   :  { %v4387_v16 = vpop.f32.mrf.mxu1  ;;  %v4347_v17 = vpop.f32.mrf.mxu0  ;;  %6230 = vmatprep.subr.bf16.mxu0 %v8020_v28  ;;  %v8135_v28 = vld [vmem:[%s11269_s5 + $0x780] ss:$16 sps:$4 sm:$0xff]   ;;  %v8143_v46 = vld [vmem:[%s11269_s5 + $0x764] ss:$16 sps:$4 sm:$0xff]  }
 0x28c   :  { %vm4559_vm5 = vcmp.gt.f32.partialorder %v4386_v13, 0.0  ;;  %v4567_v50 = vmul.f32 0.2, %v4386_v13  ;;  %6270 = vmatpush1.bf16.msra.mxu1 %v8075_v26  ;;  %v8048_v26 = vld [vmem:[%s11269_s5 + $0x560] ss:$16 sps:$4 sm:$0xff]   ;;  %v4384_v41 = vadd.f32 %v10542_v9, %v4343_v11 }
 0x28d   :  { %v4388_v21 = vpop.f32.mrf.mxu1  ;;  %6271 = vmatprep.subr.bf16.mxu1 %v8083_v15  ;;  %v8053_v10 = vld [vmem:[%s11269_s5 + $0x544] ss:$16 sps:$4 sm:$0xff]   ;;  %v8141_v15 = vld [vmem:[%s11269_s5 + $0x760] ss:$16 sps:$4 sm:$0xff]   ;;  %v8140_v11 = vld [vmem:[%s11269_s5 + $0x12c] ss:$16 sps:$4 sm:$0xff]  }
 0x28e   :  { %6231 = vmatpush1.bf16.msra.mxu0 %v8018_v14  ;;  %v4575_v25 = vsel %vm4559_vm5, %v4386_v13, %v4567_v50  ;;  %v8149_v13 = vld [vmem:[%s11269_s5 + $0x744] ss:$16 sps:$4 sm:$0xff]   ;;  %v8051_v14 = vld [vmem:[%s11269_s5 + $0x540] ss:$16 sps:$4 sm:$0xff]   ;;  %v4566_v50 = vmul.f32 0.2, %v4384_v41 }
 0x28f   :  { %6232 = vmatprep.subr.bf16.mxu0 %v8023_v56  ;;  %v10569_v27 = vpack.c.bf16 %v4575_v25, %v4575_v25  ;;  %v8056_v43 = vld [vmem:[%s11269_s5 + $0x524] ss:$16 sps:$4 sm:$0xff]   ;;  %v8147_v16 = vld [vmem:[%s11269_s5 + $0x740] ss:$16 sps:$4 sm:$0xff]   ;;  %vm4558_vm6 = vcmp.gt.f32.partialorder %v4384_v41, 0.0 }
 0x290   :  { %6272 = vmatpush1.bf16.msra.mxu1 %v8081_v20  ;;  %v8155_v17 = vld [vmem:[%s11269_s5 + $0x724] ss:$16 sps:$4 sm:$0xff]   ;;  %v8054_v56 = vld [vmem:[%s11269_s5 + $0x520] ss:$16 sps:$4 sm:$0xff]   ;;  %v4574_v25 = vsel %vm4558_vm6, %v4384_v41, %v4566_v50 }
 0x291   :  { %6258 = vmatprep.mubr.bf16.mxu0 %v10569_v27  ;;  %6273 = vmatprep.subr.bf16.mxu1 %v8089_v23  ;;  %v8059_v9 = vld [vmem:[%s11269_s5 + $0x504] ss:$16 sps:$4 sm:$0xff]   ;;  %v8153_v20 = vld [vmem:[%s11269_s5 + $0x720] ss:$16 sps:$4 sm:$0xff]  }
 0x292   :  { %6233 = vmatpush1.bf16.msra.mxu0 %v8021_v48  ;;  %v8161_v21 = vld [vmem:[%s11269_s5 + $0x704] ss:$16 sps:$4 sm:$0xff]   ;;  %v8057_v23 = vld [vmem:[%s11269_s5 + $0x500] ss:$16 sps:$4 sm:$0xff]   ;;  %v8062_v48 = vld [vmem:[%s11269_s5 + $0xec] ss:$16 sps:$4 sm:$0xff]  }
 0x293   :  { %6234 = vmatprep.subr.bf16.mxu0 %v8026_v29  ;;  %v8159_v29 = vld [vmem:[%s11269_s5 + $0x700] ss:$16 sps:$4 sm:$0xff]  }
 0x294   :  { %6274 = vmatpush1.bf16.msra.mxu1 %v8087_v42  ;;  %v8167_v42 = vld [vmem:[%s11269_s5 + $0x2ec] ss:$16 sps:$4 sm:$0xff]  }
 0x295   :  { %6275 = vmatprep.subr.bf16.mxu1 %v8095_v35  ;;  %v8060_v35 = vld [vmem:[%s11269_s5 + $0xe8] ss:$16 sps:$4 sm:$0xff]  }
 0x296   :  { %6235 = vmatpush1.bf16.msra.mxu0 %v8024_v36  ;;  %v10731_v36 = vpack.c.bf16 %v4574_v25, %v4574_v25 }
 0x297   :  { %6236 = vmatprep.subr.bf16.mxu0 %v8029_v37  ;;  %v8065_v37 = vld [vmem:[%s11269_s5 + $0xcc] ss:$16 sps:$4 sm:$0xff]  }
 0x298   :  { %6276 = vmatpush1.bf16.msra.mxu1 %v8093_v38 }
 0x299   :  { %6277 = vmatprep.subr.bf16.mxu1 %v8101_v40  ;;  %v8063_v40 = vld [vmem:[%s11269_s5 + $0xc8] ss:$16 sps:$4 sm:$0xff]  }
 0x29a   :  { %6237 = vmatpush1.bf16.msra.mxu0 %v8027_v22 }
 0x29b   :  { %6238 = vmatprep.subr.bf16.mxu0 %v8032_v30 }
 0x29c   :  { %6278 = vmatpush1.bf16.msra.mxu1 %v8099_v32  ;;  %v8068_v32 = vld [vmem:[%s11269_s5 + $0xac] ss:$16 sps:$4 sm:$0xff]  }
 0x29d   :  { %6279 = vmatprep.subr.bf16.mxu1 %v8107_v31 }
 0x29e   :  { %6239 = vmatpush1.bf16.msra.mxu0 %v8030_v44 }
 0x29f   :  { %6240 = vmatprep.subr.bf16.mxu0 %v8035_v47 }
 0x2a0   :  { %6280 = vmatpush1.bf16.msra.mxu1 %v8105_v49 }
 0x2a1   :  { %6281 = vmatprep.subr.bf16.mxu1 %v8113_v52  ;;  %v8074_v52 = vld [vmem:[%s11269_s5 + $0x8c] ss:$16 sps:$4 sm:$0xff]  }
 0x2a2   :  { %6241 = vmatpush1.bf16.msra.mxu0 %v8033_v55 }
 0x2a3   :  { %6242 = vmatprep.subr.bf16.mxu0 %v8038_v57  ;;  %v8072_v57 = vld [vmem:[%s11269_s5 + $0x88] ss:$16 sps:$4 sm:$0xff]  }
 0x2a4   :  { %6282 = vmatpush1.bf16.msra.mxu1 %v8111_v58  ;;  %v8080_v58 = vld [vmem:[%s11269_s5 + $0x6c] ss:$16 sps:$4 sm:$0xff]  }
 0x2a5   :  { %6283 = vmatprep.subr.bf16.mxu1 %v8119_v39  ;;  %v8078_v39 = vld [vmem:[%s11269_s5 + $0x68] ss:$16 sps:$4 sm:$0xff]  }
 0x2a6   :  { %6243 = vmatpush2.bf16.msra.mxu0 %v8036_v60  ;;  %v8086_v60 = vld [vmem:[%s11269_s5 + $0x4c] ss:$16 sps:$4 sm:$0xff]  }
 0x2a7   :  { %6244 = vmatprep.subr.bf16.mxu0 %v8041_v61  ;;  %v8084_v61 = vld [vmem:[%s11269_s5 + $0x48] ss:$16 sps:$4 sm:$0xff]  }
 0x2a8   :  { %6284 = vmatpush2.bf16.msra.mxu1 %v8117_v62  ;;  %v8092_v62 = vld [vmem:[%s11269_s5 + $0x2c] ss:$16 sps:$4 sm:$0xff]  }
 0x2a9   :  { %6285 = vmatprep.subr.bf16.mxu1 %v8125_v63  ;;  %v8090_v63 = vld [vmem:[%s11269_s5 + $0x28] ss:$16 sps:$4 sm:$0xff]  }
 0x2aa   :  { %6245 = vmatpush2.bf16.msra.mxu0 %v8039_v0  ;;  %v8098_v0 = vld [vmem:[%s11269_s5 + $0xc] ss:$16 sps:$4 sm:$0xff]  }
 0x2ab   :  { %6246 = vmatprep.subr.bf16.mxu0 %v8044_v1  ;;  %v8096_v1 = vld [vmem:[%s11269_s5 + $0x8] ss:$16 sps:$4 sm:$0xff]  }
 0x2ac   :  { %6286 = vmatpush2.bf16.msra.mxu1 %v8123_v2  ;;  %v8104_v2 = vld [vmem:[%s11269_s5 + $0x1ec] ss:$16 sps:$4 sm:$0xff]  }
 0x2ad   :  { %6287 = vmatprep.subr.bf16.mxu1 %v8131_v3  ;;  %v8102_v3 = vld [vmem:[%s11269_s5 + $0x1e8] ss:$16 sps:$4 sm:$0xff]  }
 0x2ae   :  { %6247 = vmatpush2.bf16.msra.mxu0 %v8042_v4  ;;  %v8110_v4 = vld [vmem:[%s11269_s5 + $0x1cc] ss:$16 sps:$4 sm:$0xff]  }
 0x2af   :  { %6248 = vmatprep.subr.bf16.mxu0 %v8047_v5  ;;  %v8108_v5 = vld [vmem:[%s11269_s5 + $0x1c8] ss:$16 sps:$4 sm:$0xff]  }
 0x2b0   :  { %6288 = vmatpush2.bf16.msra.mxu1 %v8129_v6  ;;  %v8116_v6 = vld [vmem:[%s11269_s5 + $0x1ac] ss:$16 sps:$4 sm:$0xff]  }
 0x2b1   :  { %6289 = vmatprep.subr.bf16.mxu1 %v8137_v7  ;;  %v8114_v7 = vld [vmem:[%s11269_s5 + $0x1a8] ss:$16 sps:$4 sm:$0xff]  }
 0x2b2   :  { %6249 = vmatpush2.bf16.msra.mxu0 %v8045_v8  ;;  %v8122_v8 = vld [vmem:[%s11269_s5 + $0x18c] ss:$16 sps:$4 sm:$0xff]  }
 0x2b3   :  { %6250 = vmatprep.subr.bf16.mxu0 %v8050_v51  ;;  %v8120_v51 = vld [vmem:[%s11269_s5 + $0x188] ss:$16 sps:$4 sm:$0xff]  }
 0x2b4   :  { %6290 = vmatpush2.bf16.msra.mxu1 %v8135_v28  ;;  %v8128_v28 = vld [vmem:[%s11269_s5 + $0x16c] ss:$16 sps:$4 sm:$0xff]  }
 0x2b5   :  { %6291 = vmatprep.subr.bf16.mxu1 %v8143_v46  ;;  %v8126_v46 = vld [vmem:[%s11269_s5 + $0x168] ss:$16 sps:$4 sm:$0xff]  }
 0x2b6   :  { %6251 = vmatpush2.bf16.msra.mxu0 %v8048_v26  ;;  %v8134_v26 = vld [vmem:[%s11269_s5 + $0x14c] ss:$16 sps:$4 sm:$0xff]  }
 0x2b7   :  { %6252 = vmatprep.subr.bf16.mxu0 %v8053_v10  ;;  %v8132_v10 = vld [vmem:[%s11269_s5 + $0x148] ss:$16 sps:$4 sm:$0xff]  }
 0x2b8   :  { %6292 = vmatpush2.bf16.msra.mxu1 %v8141_v15  ;;  %v1324_v15 = vsub.s32 6, %v8515_v34 }
 0x2b9   :  { %6293 = vmatprep.subr.bf16.mxu1 %v8149_v13  ;;  %v1328_v13 = vsub.s32 7, %v8515_v34 }
 0x2ba   :  { %6253 = vmatpush2.bf16.msra.mxu0 %v8051_v14  ;;  %v8138_v14 = vld [vmem:[%s11269_s5 + $0x128] ss:$16 sps:$4 sm:$0xff]   ;;  %v1325_v41 = vrot.slane %v10301_v24, %v1324_v15 }
 0x2bb   :  { %6254 = vmatprep.subr.bf16.mxu0 %v8056_v43  ;;  %v8146_v43 = vld [vmem:[%s11269_s5 + $0x10c] ss:$16 sps:$4 sm:$0xff]   ;;  %v8195_v15 = vld [vmem:[%s11269_s5 + $0x248] ss:$16 sps:$4 sm:$0xff]  }
 0x2bc   :  { %6294 = vmatpush2.bf16.msra.mxu1 %v8147_v16  ;;  %v1329_v16 = vrot.slane %v10301_v24, %v1328_v13  ;;  %v8158_v24 = vld [vmem:[%s11269_s5 + $0x4cc] ss:$16 sps:$4 sm:$0xff]  }
 0x2bd   :  { %6295 = vmatprep.subr.bf16.mxu1 %v8155_v17  ;;  %v8144_v17 = vld [vmem:[%s11269_s5 + $0x108] ss:$16 sps:$4 sm:$0xff]   ;;  %v8206_v13 = vld [vmem:[%s11269_s5 + $0x5cc] ss:$16 sps:$4 sm:$0xff]  }
 0x2be   :  { %6255 = vmatpush2.bf16.msra.mxu0 %v8054_v56  ;;  %v8152_v56 = vld [vmem:[%s11269_s5 + $0x4ec] ss:$16 sps:$4 sm:$0xff]  }
 0x2bf   :  { %6256 = vmatprep.subr.bf16.mxu0 %v8059_v9 }
 0x2c0   :  { %6296 = vmatpush2.bf16.msra.mxu1 %v8153_v20  ;;  %v8150_v20 = vld [vmem:[%s11269_s5 + $0x4e8] ss:$16 sps:$4 sm:$0xff]  }
 0x2c1   :  { %6297 = vmatprep.subr.bf16.mxu1 %v8161_v21 }
 0x2c2   :  { %6257 = vmatpush2.bf16.msra.mxu0 %v8057_v23 }
 0x2c3   :  { %6308 = vmatprep.subr.bf16.mxu0 %v8062_v48 }
 0x2c4   :  { %6298 = vmatpush2.bf16.msra.mxu1 %v8159_v29  ;;  %v8156_v29 = vld [vmem:[%s11269_s5 + $0x4c8] ss:$16 sps:$4 sm:$0xff]  }
 0x2c5   :  { %v10736_v38 = vpop.f32.mrf.mxu0  ;;  %6259 = vmatmul.mubr.bf16.vlgmr.msra.gmra.mxu0 %v10731_v36  ;;  %6349 = vmatprep.subr.bf16.mxu1 %v8167_v42 }
 0x2c6   :  { %6309 = vmatpush1.bf16.msra.mxu0 %v8060_v35  ;;  %6340 = vmatprep.mubr.bf16.mxu0 %v10313_v45  ;;  %v8066_v45 = vld [vmem:[%s11269_s5 + $0xa8] ss:$16 sps:$4 sm:$0xff]   ;;  %v4425_v9 = vadd.f32 %v10736_v38, %v1325_v41 }
 0x2c7   :  { %v10743_v22 = vpop.f32.mrf.mxu1  ;;  %v10745_v30 = vpop.f32.mrf.mxu0  ;;  %6310 = vmatprep.subr.bf16.mxu0 %v8065_v37  ;;  %v8164_v37 = vld [vmem:[%s11269_s5 + $0x4ac] ss:$16 sps:$4 sm:$0xff]   ;;  %v8201_v41 = vld [vmem:[%s11269_s5 + $0x228] ss:$16 sps:$4 sm:$0xff]  }
 0x2c8   :  { %v4427_v50 = vadd.f32 %v10745_v30, %v1329_v16  ;;  %v4466_v21 = vadd.f32 %v10743_v22, %v4425_v9  ;;  %v8212_v16 = vld [vmem:[%s11269_s5 + $0x5ac] ss:$16 sps:$4 sm:$0xff]   ;;  %v8207_v9 = vld [vmem:[%s11269_s5 + $0x208] ss:$16 sps:$4 sm:$0xff]  }
 0x2c9   :  { %v10750_v31 = vpop.f32.mrf.mxu1  ;;  %v4428_v44 = vpop.f32.mrf.mxu0 }
 0x2ca   :  { %6311 = vmatpush1.bf16.msra.mxu0 %v8063_v40  ;;  %v4468_v48 = vadd.f32 %v10750_v31, %v4427_v50  ;;  %v8218_v50 = vld [vmem:[%s11269_s5 + $0x58c] ss:$16 sps:$4 sm:$0xff]  }
 0x2cb   :  { %v4469_v47 = vpop.f32.mrf.mxu1  ;;  %v4429_v49 = vpop.f32.mrf.mxu0  ;;  %6312 = vmatprep.subr.bf16.mxu0 %v8068_v32 }
 0x2cd   :  { %v4470_v55 = vpop.f32.mrf.mxu1 }
 0x2ce   :  { %6313 = vmatpush1.bf16.msra.mxu0 %v8066_v45  ;;  %v8170_v45 = vld [vmem:[%s11269_s5 + $0x48c] ss:$16 sps:$4 sm:$0xff]  }
 0x2cf   :  { %6314 = vmatprep.subr.bf16.mxu0 %v8074_v52 }
 0x2d2   :  { %6315 = vmatpush1.bf16.msra.mxu0 %v8072_v57  ;;  %v8168_v57 = vld [vmem:[%s11269_s5 + $0x488] ss:$16 sps:$4 sm:$0xff]  }
 0x2d3   :  { %6316 = vmatprep.subr.bf16.mxu0 %v8080_v58 }
 0x2d6   :  { %6317 = vmatpush1.bf16.msra.mxu0 %v8078_v39  ;;  %v8165_v39 = vld [vmem:[%s11269_s5 + $0x2e8] ss:$16 sps:$4 sm:$0xff]  }
 0x2d7   :  { %6318 = vmatprep.subr.bf16.mxu0 %v8086_v60 }
 0x2da   :  { %6319 = vmatpush1.bf16.msra.mxu0 %v8084_v61  ;;  %v8173_v61 = vld [vmem:[%s11269_s5 + $0x2cc] ss:$16 sps:$4 sm:$0xff]  }
 0x2db   :  { %6320 = vmatprep.subr.bf16.mxu0 %v8092_v62  ;;  %v8176_v62 = vld [vmem:[%s11269_s5 + $0x46c] ss:$16 sps:$4 sm:$0xff]  }
 0x2de   :  { %6321 = vmatpush1.bf16.msra.mxu0 %v8090_v63  ;;  %v8174_v63 = vld [vmem:[%s11269_s5 + $0x468] ss:$16 sps:$4 sm:$0xff]  }
 0x2df   :  { %6322 = vmatprep.subr.bf16.mxu0 %v8098_v0  ;;  %v8171_v0 = vld [vmem:[%s11269_s5 + $0x2c8] ss:$16 sps:$4 sm:$0xff]  }
 0x2e2   :  { %6323 = vmatpush1.bf16.msra.mxu0 %v8096_v1  ;;  %v8182_v1 = vld [vmem:[%s11269_s5 + $0x44c] ss:$16 sps:$4 sm:$0xff]  }
 0x2e3   :  { %6324 = vmatprep.subr.bf16.mxu0 %v8104_v2  ;;  %v8179_v2 = vld [vmem:[%s11269_s5 + $0x2ac] ss:$16 sps:$4 sm:$0xff]  }
 0x2e6   :  { %6325 = vmatpush2.bf16.msra.mxu0 %v8102_v3  ;;  %v8180_v3 = vld [vmem:[%s11269_s5 + $0x448] ss:$16 sps:$4 sm:$0xff]  }
 0x2e7   :  { %6326 = vmatprep.subr.bf16.mxu0 %v8110_v4  ;;  %v8188_v4 = vld [vmem:[%s11269_s5 + $0x42c] ss:$16 sps:$4 sm:$0xff]  }
 0x2ea   :  { %6327 = vmatpush2.bf16.msra.mxu0 %v8108_v5  ;;  %v8185_v5 = vld [vmem:[%s11269_s5 + $0x28c] ss:$16 sps:$4 sm:$0xff]  }
 0x2eb   :  { %6328 = vmatprep.subr.bf16.mxu0 %v8116_v6  ;;  %v8186_v6 = vld [vmem:[%s11269_s5 + $0x428] ss:$16 sps:$4 sm:$0xff]  }
 0x2ee   :  { %6329 = vmatpush2.bf16.msra.mxu0 %v8114_v7  ;;  %v8183_v7 = vld [vmem:[%s11269_s5 + $0x288] ss:$16 sps:$4 sm:$0xff]  }
 0x2ef   :  { %6330 = vmatprep.subr.bf16.mxu0 %v8122_v8  ;;  %v8194_v8 = vld [vmem:[%s11269_s5 + $0x40c] ss:$16 sps:$4 sm:$0xff]  }
 0x2f2   :  { %6331 = vmatpush2.bf16.msra.mxu0 %v8120_v51  ;;  %v8191_v51 = vld [vmem:[%s11269_s5 + $0x26c] ss:$16 sps:$4 sm:$0xff]  }
 0x2f3   :  { %6332 = vmatprep.subr.bf16.mxu0 %v8128_v28  ;;  %v8192_v28 = vld [vmem:[%s11269_s5 + $0x408] ss:$16 sps:$4 sm:$0xff]  }
 0x2f6   :  { %6333 = vmatpush2.bf16.msra.mxu0 %v8126_v46  ;;  %v8189_v46 = vld [vmem:[%s11269_s5 + $0x268] ss:$16 sps:$4 sm:$0xff]  }
 0x2f7   :  { %6334 = vmatprep.subr.bf16.mxu0 %v8134_v26  ;;  %v8200_v26 = vld [vmem:[%s11269_s5 + $0x5ec] ss:$16 sps:$4 sm:$0xff]  }
 0x2fa   :  { %6335 = vmatpush2.bf16.msra.mxu0 %v8132_v10  ;;  %v8197_v10 = vld [vmem:[%s11269_s5 + $0x24c] ss:$16 sps:$4 sm:$0xff]  }
 0x2fb   :  { %6336 = vmatprep.subr.bf16.mxu0 %v8140_v11  ;;  %v8198_v11 = vld [vmem:[%s11269_s5 + $0x5e8] ss:$16 sps:$4 sm:$0xff]  }
 0x2fe   :  { %6337 = vmatpush2.bf16.msra.mxu0 %v8138_v14  ;;  %v8203_v14 = vld [vmem:[%s11269_s5 + $0x22c] ss:$16 sps:$4 sm:$0xff]  }
 0x2ff   :  { %6338 = vmatprep.subr.bf16.mxu0 %v8146_v43  ;;  %v8204_v43 = vld [vmem:[%s11269_s5 + $0x5c8] ss:$16 sps:$4 sm:$0xff]  }
 0x302   :  { %6339 = vmatpush2.bf16.msra.mxu0 %v8144_v17  ;;  %v8209_v17 = vld [vmem:[%s11269_s5 + $0x20c] ss:$16 sps:$4 sm:$0xff]  }
 0x303   :  { %6390 = vmatprep.subr.bf16.mxu0 %v8152_v56  ;;  %v8210_v56 = vld [vmem:[%s11269_s5 + $0x5a8] ss:$16 sps:$4 sm:$0xff]  }
 0x305   :  { %v4506_v23 = vpop.f32.mrf.mxu0  ;;  %6341 = vmatmul.mubr.bf16.vlgmr.msra.gmra.mxu0 %v10522_v33 }
 0x306   :  { %v4507_v25 = vadd.f32 %v4506_v23, %v4466_v21  ;;  %6391 = vmatpush1.bf16.msra.mxu0 %v8150_v20  ;;  %6422 = vmatprep.mubr.bf16.mxu0 %v10569_v27  ;;  %v8162_v27 = vld [vmem:[%s11269_s5 + $0x4a8] ss:$16 sps:$4 sm:$0xff]   ;;  %v8215_v20 = vld [vmem:[%s11269_s5 + $0x3ec] ss:$16 sps:$4 sm:$0xff]  }
 0x307   :  { %v4547_v42 = vpop.f32.mrf.mxu1  ;;  %v4508_v35 = vpop.f32.mrf.mxu0  ;;  %6392 = vmatprep.subr.bf16.mxu0 %v8158_v24  ;;  %v8216_v24 = vld [vmem:[%s11269_s5 + $0x588] ss:$16 sps:$4 sm:$0xff]   ;;  %v8224_v23 = vld [vmem:[%s11269_s5 + $0x56c] ss:$16 sps:$4 sm:$0xff]  }
 0x308   :  { %v4548_v38 = vadd.f32 %v4547_v42, %v4507_v25  ;;  %v4509_v40 = vadd.f32 %v4508_v35, %v4468_v48  ;;  %v8213_v21 = vld [vmem:[%s11269_s5 + $0x3e8] ss:$16 sps:$4 sm:$0xff]   ;;  %v8221_v48 = vld [vmem:[%s11269_s5 + $0x3cc] ss:$16 sps:$4 sm:$0xff]  }
 0x309   :  { %v4549_v33 = vpop.f32.mrf.mxu1  ;;  %v4510_v22 = vpop.f32.mrf.mxu0  ;;  %v8222_v25 = vld [vmem:[%s11269_s5 + $0x568] ss:$16 sps:$4 sm:$0xff]   ;;  %v8230_v42 = vld [vmem:[%s11269_s5 + $0x54c] ss:$16 sps:$4 sm:$0xff]  }
 0x30a   :  { %vm4560_vm7 = vcmp.gt.f32.partialorder %v4548_v38, 0.0  ;;  %v4568_v30 = vmul.f32 0.2, %v4548_v38  ;;  %v4550_v32 = vadd.f32 %v4549_v33, %v4509_v40  ;;  %6393 = vmatpush1.bf16.msra.mxu0 %v8156_v29  ;;  %v8219_v29 = vld [vmem:[%s11269_s5 + $0x3c8] ss:$16 sps:$4 sm:$0xff]  }
 0x30b   :  { %v4551_v31 = vpop.f32.mrf.mxu1  ;;  %v4511_v44 = vpop.f32.mrf.mxu0  ;;  %6394 = vmatprep.subr.bf16.mxu0 %v8164_v37  ;;  %v8227_v35 = vld [vmem:[%s11269_s5 + $0x3ac] ss:$16 sps:$4 sm:$0xff]   ;;  %v8228_v37 = vld [vmem:[%s11269_s5 + $0x548] ss:$16 sps:$4 sm:$0xff]  }
 0x30c   :  { %vm4561_vm8 = vcmp.gt.f32.partialorder %v4550_v32, 0.0  ;;  %v4569_v47 = vmul.f32 0.2, %v4550_v32  ;;  %v4576_v49 = vsel %vm4560_vm7, %v4548_v38, %v4568_v30  ;;  %v8225_v38 = vld [vmem:[%s11269_s5 + $0x3a8] ss:$16 sps:$4 sm:$0xff]  }
 0x30d   :  { %v4552_v52 = vpop.f32.mrf.mxu1  ;;  %v10872_v60 = vpack.c.bf16 %v4576_v49, %v4576_v49  ;;  %v8236_v40 = vld [vmem:[%s11269_s5 + $0x52c] ss:$16 sps:$4 sm:$0xff]   ;;  %v8234_v22 = vld [vmem:[%s11269_s5 + $0x528] ss:$16 sps:$4 sm:$0xff]  }
 0x30e   :  { %6395 = vmatpush1.bf16.msra.mxu0 %v8162_v27  ;;  %v4577_v55 = vsel %vm4561_vm8, %v4550_v32, %v4569_v47  ;;  %v8233_v33 = vld [vmem:[%s11269_s5 + $0x38c] ss:$16 sps:$4 sm:$0xff]   ;;  %v8231_v30 = vld [vmem:[%s11269_s5 + $0x388] ss:$16 sps:$4 sm:$0xff]  }
 0x30f   :  { %v10867_v58 = vpack.c.bf16 %v4577_v55, %v4577_v55  ;;  %6396 = vmatprep.subr.bf16.mxu0 %v8170_v45  ;;  %v8242_v32 = vld [vmem:[%s11269_s5 + $0x50c] ss:$16 sps:$4 sm:$0xff]   ;;  %v8240_v31 = vld [vmem:[%s11269_s5 + $0x508] ss:$16 sps:$4 sm:$0xff]   ;;  %v11024_v45 = vld [vmem:[%s11270_s6] sm:$0xf] }
 0x310   :  { %v8239_v27 = vld [vmem:[%s11269_s5 + $0x36c] ss:$16 sps:$4 sm:$0xff]   ;;  %v8237_v44 = vld [vmem:[%s11269_s5 + $0x368] ss:$16 sps:$4 sm:$0xff]   ;;  %v4847_v52 = vrot.slane %v11024_v45, %v1300_v12  ;;  %s6841_s6 = sshll.u32 %s8360_s11, 4  ;;  %s6842_s6 = int_to_ptr.vmem [resolvable:$true] %s6841_s6 }
 0x311   :  { %6299 = vmatprep.mubr.bf16.mxu1 %v10867_v58  ;;  %v8300_v47 = vld [vmem:[%s11271_s7 + $0x78] sm:$0xff]   ;;  %p8342_p1 = scmp.lt.s32.totalorder %s6842_s6, %s6842_s6 }
 0x312   :  { %6300 = vmatmul.mubr.bf16.vlgmr.msra.gmra.mxu1 %v10872_v60  ;;  %6397 = vmatpush1.bf16.msra.mxu0 %v8168_v57  ;;  %v8245_v49 = vld [vmem:[%s11269_s5 + $0x34c] ss:$16 sps:$4 sm:$0xff]   ;;  %v8243_v57 = vld [vmem:[%s11269_s5 + $0x348] ss:$16 sps:$4 sm:$0xff]  }
 0x313   :  { %6350 = vmatpush1.bf16.msra.mxu1 %v8165_v39  ;;  %6381 = vmatprep.mubr.bf16.mxu1 %v10320_v53  ;;  %v8177_v53 = vld [vmem:[%s11269_s5 + $0x2a8] ss:$16 sps:$4 sm:$0xff]   ;;  %v8302_v39 = vld [vmem:[%s11271_s7 + $0x70] sm:$0xff]   ;;  %v8248_v12 = vld [vmem:[%s11269_s5 + $0x32c] ss:$16 sps:$4 sm:$0xff]  }
 0x314   :  { %6351 = vmatprep.subr.bf16.mxu1 %v8173_v61  ;;  %6398 = vmatprep.subr.bf16.mxu0 %v8176_v62  ;;  %v8301_v55 = vld [vmem:[%s11271_s7 + $0x38] sm:$0xff]   ;;  %v4851_v61 = vrot.slane %v11024_v45, %v1304_v18 }
 0x315   :  { %v8246_v18 = vld [vmem:[%s11269_s5 + $0x328] ss:$16 sps:$4 sm:$0xff]  }
 0x316   :  { %6399 = vmatpush1.bf16.msra.mxu0 %v8174_v63 }
 0x317   :  { %6352 = vmatpush1.bf16.msra.mxu1 %v8171_v0  ;;  %6400 = vmatprep.subr.bf16.mxu0 %v8182_v1  ;;  %v8303_v0 = vld [vmem:[%s11271_s7 + $0x30] sm:$0xff]  }
 0x318   :  { %6353 = vmatprep.subr.bf16.mxu1 %v8179_v2 }
 0x31a   :  { %6401 = vmatpush1.bf16.msra.mxu0 %v8180_v3  ;;  %v8304_v3 = vld [vmem:[%s11271_s7 + $0x68] sm:$0xff]  }
 0x31b   :  { %6354 = vmatpush1.bf16.msra.mxu1 %v8177_v53  ;;  %6402 = vmatprep.subr.bf16.mxu0 %v8188_v4  ;;  %v8251_v4 = vld [vmem:[%s11269_s5 + $0x30c] ss:$16 sps:$4 sm:$0xff]  }
 0x31c   :  { %6355 = vmatprep.subr.bf16.mxu1 %v8185_v5 }
 0x31e   :  { %6403 = vmatpush1.bf16.msra.mxu0 %v8186_v6 }
 0x31f   :  { %6356 = vmatpush1.bf16.msra.mxu1 %v8183_v7  ;;  %6404 = vmatprep.subr.bf16.mxu0 %v8194_v8  ;;  %v8305_v8 = vld [vmem:[%s11271_s7 + $0x28] sm:$0xff]  }
 0x320   :  { %6357 = vmatprep.subr.bf16.mxu1 %v8191_v51 }
 0x322   :  { %6405 = vmatpush1.bf16.msra.mxu0 %v8192_v28 }
 0x323   :  { %6358 = vmatpush1.bf16.msra.mxu1 %v8189_v46  ;;  %6406 = vmatprep.subr.bf16.mxu0 %v8200_v26  ;;  %v8249_v46 = vld [vmem:[%s11269_s5 + $0x308] ss:$16 sps:$4 sm:$0xff]   ;;  %v8306_v26 = vld [vmem:[%s11271_s7 + $0x60] sm:$0xff]  }
 0x324   :  { %6359 = vmatprep.subr.bf16.mxu1 %v8197_v10  ;;  %v8254_v10 = vld [vmem:[%s11269_s5 + $0x6ec] ss:$16 sps:$4 sm:$0xff]  }
 0x326   :  { %6407 = vmatpush2.bf16.msra.mxu0 %v8198_v11 }
 0x327   :  { %6360 = vmatpush1.bf16.msra.mxu1 %v8195_v15  ;;  %6408 = vmatprep.subr.bf16.mxu0 %v8206_v13  ;;  %v8307_v15 = vld [vmem:[%s11271_s7 + $0x20] sm:$0xff]   ;;  %v8252_v13 = vld [vmem:[%s11269_s5 + $0x6e8] ss:$16 sps:$4 sm:$0xff]  }
 0x328   :  { %6361 = vmatprep.subr.bf16.mxu1 %v8203_v14  ;;  %v8257_v14 = vld [vmem:[%s11269_s5 + $0x6cc] ss:$16 sps:$4 sm:$0xff]  }
 0x32a   :  { %6409 = vmatpush2.bf16.msra.mxu0 %v8204_v43  ;;  %v8308_v43 = vld [vmem:[%s11271_s7 + $0x58] sm:$0xff]  }
 0x32b   :  { %6362 = vmatpush1.bf16.msra.mxu1 %v8201_v41  ;;  %6410 = vmatprep.subr.bf16.mxu0 %v8212_v16  ;;  %v8309_v41 = vld [vmem:[%s11271_s7 + $0x18] sm:$0xff]  }
 0x32c   :  { %6363 = vmatprep.subr.bf16.mxu1 %v8209_v17  ;;  %v8255_v16 = vld [vmem:[%s11269_s5 + $0x6c8] ss:$16 sps:$4 sm:$0xff]   ;;  %v8310_v17 = vld [vmem:[%s11271_s7 + $0x50] sm:$0xff]  }
 0x32e   :  { %6411 = vmatpush2.bf16.msra.mxu0 %v8210_v56  ;;  %v8311_v56 = vld [vmem:[%s11271_s7 + $0x10] sm:$0xff]  }
 0x32f   :  { %6364 = vmatpush1.bf16.msra.mxu1 %v8207_v9  ;;  %6412 = vmatprep.subr.bf16.mxu0 %v8218_v50  ;;  %v8312_v9 = vld [vmem:[%s11271_s7 + $0x48] sm:$0xff]  }
 0x330   :  { %6365 = vmatprep.subr.bf16.mxu1 %v8215_v20  ;;  %v8263_v50 = vld [vmem:[%s11269_s5 + $0x68c] ss:$16 sps:$4 sm:$0xff]  }
 0x331   :  { %v8313_v20 = vld [vmem:[%s11271_s7 + $0x8] sm:$0xff]  }
 0x332   :  { %6413 = vmatpush2.bf16.msra.mxu0 %v8216_v24  ;;  %v8261_v24 = vld [vmem:[%s11269_s5 + $0x688] ss:$16 sps:$4 sm:$0xff]  }
 0x333   :  { %6366 = vmatpush2.bf16.msra.mxu1 %v8213_v21  ;;  %6414 = vmatprep.subr.bf16.mxu0 %v8224_v23  ;;  %v8314_v21 = vld [vmem:[%s11271_s7 + $0x40] sm:$0xff]   ;;  %v8266_v23 = vld [vmem:[%s11269_s5 + $0x66c] ss:$16 sps:$4 sm:$0xff]  }
 0x334   :  { %6367 = vmatprep.subr.bf16.mxu1 %v8221_v48  ;;  %v8315_v48 = vld [vmem:[%s11271_s7] sm:$0xff]  }
 0x336   :  { %6415 = vmatpush2.bf16.msra.mxu0 %v8222_v25  ;;  %v8264_v25 = vld [vmem:[%s11269_s5 + $0x668] ss:$16 sps:$4 sm:$0xff]  }
 0x337   :  { %6368 = vmatpush2.bf16.msra.mxu1 %v8219_v29  ;;  %6416 = vmatprep.subr.bf16.mxu0 %v8230_v42  ;;  %v8269_v29 = vld [vmem:[%s11269_s5 + $0x64c] ss:$16 sps:$4 sm:$0xff]   ;;  %v8267_v42 = vld [vmem:[%s11269_s5 + $0x648] ss:$16 sps:$4 sm:$0xff]  }
 0x338   :  { %6369 = vmatprep.subr.bf16.mxu1 %v8227_v35  ;;  %v8272_v35 = vld [vmem:[%s11269_s5 + $0x62c] ss:$16 sps:$4 sm:$0xff]  }
 0x33a   :  { %6417 = vmatpush2.bf16.msra.mxu0 %v8228_v37  ;;  %v8270_v37 = vld [vmem:[%s11269_s5 + $0x628] ss:$16 sps:$4 sm:$0xff]  }
 0x33b   :  { %6370 = vmatpush2.bf16.msra.mxu1 %v8225_v38  ;;  %6418 = vmatprep.subr.bf16.mxu0 %v8236_v40  ;;  %v8275_v38 = vld [vmem:[%s11269_s5 + $0x60c] ss:$16 sps:$4 sm:$0xff]   ;;  %v8273_v40 = vld [vmem:[%s11269_s5 + $0x608] ss:$16 sps:$4 sm:$0xff]  }
 0x33c   :  { %6371 = vmatprep.subr.bf16.mxu1 %v8233_v33  ;;  %v8278_v33 = vld [vmem:[%s11269_s5 + $0x7ec] ss:$16 sps:$4 sm:$0xff]  }
 0x33e   :  { %6419 = vmatpush2.bf16.msra.mxu0 %v8234_v22  ;;  %v8276_v22 = vld [vmem:[%s11269_s5 + $0x7e8] ss:$16 sps:$4 sm:$0xff]  }
 0x33f   :  { %6372 = vmatpush2.bf16.msra.mxu1 %v8231_v30  ;;  %6420 = vmatprep.subr.bf16.mxu0 %v8242_v32  ;;  %v8281_v30 = vld [vmem:[%s11269_s5 + $0x7cc] ss:$16 sps:$4 sm:$0xff]   ;;  %v8279_v32 = vld [vmem:[%s11269_s5 + $0x7c8] ss:$16 sps:$4 sm:$0xff]  }
 0x340   :  { %6373 = vmatprep.subr.bf16.mxu1 %v8239_v27  ;;  %v8284_v27 = vld [vmem:[%s11269_s5 + $0x7ac] ss:$16 sps:$4 sm:$0xff]  }
 0x342   :  { %6421 = vmatpush2.bf16.msra.mxu0 %v8240_v31  ;;  %v8282_v31 = vld [vmem:[%s11269_s5 + $0x7a8] ss:$16 sps:$4 sm:$0xff]  }
 0x343   :  { %6374 = vmatpush2.bf16.msra.mxu1 %v8237_v44  ;;  %7805 = vmatprep.subr.bf16.mxu0 %v8300_v47  ;;  %v8287_v44 = vld [vmem:[%s11269_s5 + $0x78c] ss:$16 sps:$4 sm:$0xff]   ;;  %v8285_v47 = vld [vmem:[%s11269_s5 + $0x788] ss:$16 sps:$4 sm:$0xff]  }
 0x344   :  { %6375 = vmatprep.subr.bf16.mxu1 %v8245_v49  ;;  %v8290_v49 = vld [vmem:[%s11269_s5 + $0x76c] ss:$16 sps:$4 sm:$0xff]  }
 0x345   :  { %v6178_v62 = vpop.f32.mrf.mxu0  ;;  %6423 = vmatmul.mubr.bf16.vlgmr.msra.gmra.mxu0 %v10731_v36 }
 0x346   :  { %v6179_v63 = vadd.f32 %v6178_v62, %v4847_v52  ;;  %7806 = vmatpush3.bf16.msra.mxu0 %v8301_v55  ;;  %v8288_v52 = vld [vmem:[%s11269_s5 + $0x768] ss:$16 sps:$4 sm:$0xff]   ;;  %v8293_v55 = vld [vmem:[%s11269_s5 + $0x74c] ss:$16 sps:$4 sm:$0xff]  }
 0x347   :  { %v6219_v1 = vpop.f32.mrf.mxu1  ;;  %6376 = vmatpush2.bf16.msra.mxu1 %v8243_v57  ;;  %v6180_v2 = vpop.f32.mrf.mxu0  ;;  %7807 = vmatprep.subr.bf16.mxu0 %v8302_v39  ;;  %v8291_v57 = vld [vmem:[%s11269_s5 + $0x748] ss:$16 sps:$4 sm:$0xff]   ;;  %v8296_v39 = vld [vmem:[%s11269_s5 + $0x72c] ss:$16 sps:$4 sm:$0xff]  }
 0x348   :  { %v11060_v53 = vadd.f32 %v6219_v1, %v6179_v63  ;;  %v6181_v36 = vadd.f32 %v6180_v2, %v4851_v61  ;;  %6377 = vmatprep.subr.bf16.mxu1 %v8248_v12  ;;  %v8294_v63 = vld [vmem:[%s11269_s5 + $0x728] ss:$16 sps:$4 sm:$0xff]   ;;  %v8299_v1 = vld [vmem:[%s11269_s5 + $0x70c] ss:$16 sps:$4 sm:$0xff]  }
 0x349   :  { %v6221_v5 = vpop.f32.mrf.mxu1  ;;  %v6182_v6 = vpop.f32.mrf.mxu0 }
 0x34a   :  { %v11065_v7 = vadd.f32 %v6221_v5, %v6181_v36  ;;  %7808 = vmatpush3.bf16.msra.mxu0 %v8303_v0  ;;  %v8317_v36 = vld [vmem:[%s11271_s7 + $0xb8] sm:$0xff]   ;;  %v8319_v5 = vld [vmem:[%s11271_s7 + $0xb0] sm:$0xff]   ;;  %v8321_v6 = vld [vmem:[%s11271_s7 + $0xa8] sm:$0xff]  }
 0x34b   :  { %v6223_v51 = vpop.f32.mrf.mxu1  ;;  %6378 = vmatpush2.bf16.msra.mxu1 %v8246_v18  ;;  %v6183_v28 = vpop.f32.mrf.mxu0  ;;  %7809 = vmatprep.subr.bf16.mxu0 %v8304_v3  ;;  %v8297_v3 = vld [vmem:[%s11269_s5 + $0x708] ss:$16 sps:$4 sm:$0xff]  }
 0x34c   :  { %6379 = vmatprep.subr.bf16.mxu1 %v8251_v4  ;;  %v8318_v4 = vld [vmem:[%s11271_s7 + $0xf0] sm:$0xff]   ;;  %v8324_v51 = vld [vmem:[%s11271_s7 + $0xd8] sm:$0xff]  }
 0x34d   :  { %v6224_v11 = vpop.f32.mrf.mxu1  ;;  %v8325_v28 = vld [vmem:[%s11271_s7 + $0x98] sm:$0xff]  }
 0x34e   :  { %7810 = vmatpush3.bf16.msra.mxu0 %v8305_v8  ;;  %v8323_v8 = vld [vmem:[%s11271_s7 + $0xa0] sm:$0xff]  }
 0x34f   :  { %6380 = vmatpush2.bf16.msra.mxu1 %v8249_v46  ;;  %7811 = vmatprep.subr.bf16.mxu0 %v8306_v26  ;;  %v8326_v46 = vld [vmem:[%s11271_s7 + $0xd0] sm:$0xff]  }
 0x350   :  { %6431 = vmatprep.subr.bf16.mxu1 %v8254_v10 }
 0x352   :  { %6382 = vmatmul.mubr.bf16.vlgmr.msra.gmra.mxu1 %v10530_v19  ;;  %7812 = vmatpush3.bf16.msra.mxu0 %v8307_v15  ;;  %v8260_v19 = vld [vmem:[%s11269_s5 + $0x6ac] ss:$16 sps:$4 sm:$0xff]  }
 0x353   :  { %6432 = vmatpush1.bf16.msra.mxu1 %v8252_v13  ;;  %6463 = vmatprep.mubr.bf16.mxu1 %v10867_v58  ;;  %v8258_v58 = vld [vmem:[%s11269_s5 + $0x6a8] ss:$16 sps:$4 sm:$0xff]   ;;  %v8327_v13 = vld [vmem:[%s11271_s7 + $0x90] sm:$0xff]   ;;  %s8337_s5 = scalar_lea.vmem %s6842_s6, 32 }
 0x354   :  { %6433 = vmatprep.subr.bf16.mxu1 %v8257_v14  ;;  %7813 = vmatprep.subr.bf16.mxu0 %v8308_v43  ;;  %p8338_p0 = scmp.ne.s32.totalorder %s6842_s6, %s8337_s5  ;;  %p8343_p2 = scmp.lt.s32.totalorder %s8337_s5, %s8337_s5 }
 0x356   :  { %7814 = vmatpush3.bf16.msra.mxu0 %v8309_v41  ;;  %p8344_p3 = por %p8343_p2, %p8342_p1 }
 0x357   :  { %6434 = vmatpush1.bf16.msra.mxu1 %v8255_v16  ;;  %7815 = vmatprep.subr.bf16.mxu0 %v8310_v17  ;;  %v8328_v16 = vld [vmem:[%s11271_s7 + $0xc8] sm:$0xff]  }
 0x358   :  { %6435 = vmatprep.subr.bf16.mxu1 %v8260_v19  ;;  %p8345_p4 = pnand %p8344_p3, %p8338_p0 }
 0x35a   :  { %7816 = vmatpush3.bf16.msra.mxu0 %v8311_v56  ;;  %v8329_v56 = vld [vmem:[%s11271_s7 + $0x88] sm:$0xff]  }
 0x35b   :  { %6436 = vmatpush1.bf16.msra.mxu1 %v8258_v58  ;;  %7817 = vmatprep.subr.bf16.mxu0 %v8312_v9 }
 0x35c   :  { %6437 = vmatprep.subr.bf16.mxu1 %v8263_v50 }
 0x35e   :  { %7818 = vmatpush3.bf16.msra.mxu0 %v8313_v20 }
 0x35f   :  { %6438 = vmatpush1.bf16.msra.mxu1 %v8261_v24  ;;  %7819 = vmatprep.subr.bf16.mxu0 %v8314_v21  ;;  %v8330_v24 = vld [vmem:[%s11271_s7 + $0xc0] sm:$0xff]  }
 0x360   :  { %6439 = vmatprep.subr.bf16.mxu1 %v8266_v23  ;;  %v8331_v21 = vld [vmem:[%s11271_s7 + $0x80] sm:$0xff]  }
 0x362   :  { %7820 = vmatpush3.bf16.msra.mxu0 %v8315_v48 }
 0x363   :  { %6440 = vmatpush1.bf16.msra.mxu1 %v8264_v25 }
 0x364   :  { %6441 = vmatprep.subr.bf16.mxu1 %v8269_v29 }
 0x367   :  { %6442 = vmatpush1.bf16.msra.mxu1 %v8267_v42 }
 0x368   :  { %6443 = vmatprep.subr.bf16.mxu1 %v8272_v35 }
 0x36b   :  { %6444 = vmatpush1.bf16.msra.mxu1 %v8270_v37 }
 0x36c   :  { %6445 = vmatprep.subr.bf16.mxu1 %v8275_v38  ;;  %v4855_v38 = vrot.slane %v11024_v45, %v1308_v54 }
 0x36f   :  { %6446 = vmatpush1.bf16.msra.mxu1 %v8273_v40  ;;  %v4859_v40 = vrot.slane %v11024_v45, %v1312_v59 }
 0x370   :  { %6447 = vmatprep.subr.bf16.mxu1 %v8278_v33 }
 0x373   :  { %6448 = vmatpush2.bf16.msra.mxu1 %v8276_v22 }
 0x374   :  { %6449 = vmatprep.subr.bf16.mxu1 %v8281_v30 }
 0x377   :  { %6450 = vmatpush2.bf16.msra.mxu1 %v8279_v32 }
 0x378   :  { %6451 = vmatprep.subr.bf16.mxu1 %v8284_v27 }
 0x37b   :  { %6452 = vmatpush2.bf16.msra.mxu1 %v8282_v31 }
 0x37c   :  { %6453 = vmatprep.subr.bf16.mxu1 %v8287_v44 }
 0x37f   :  { %6454 = vmatpush2.bf16.msra.mxu1 %v8285_v47 }
 0x380   :  { %6455 = vmatprep.subr.bf16.mxu1 %v8290_v49 }
 0x383   :  { %6456 = vmatpush2.bf16.msra.mxu1 %v8288_v52 }
 0x384   :  { %6457 = vmatprep.subr.bf16.mxu1 %v8293_v55 }
 0x385   :  { %v6260_v61 = vpop.f32.mrf.mxu0 }
 0x386   :  { %v6261_v12 = vadd.f32 %v6260_v61, %v11060_v53  ;;  %v8316_v53 = vld [vmem:[%s11271_s7 + $0xf8] sm:$0xff]  }
 0x387   :  { %6458 = vmatpush2.bf16.msra.mxu1 %v8291_v57  ;;  %v6262_v62 = vpop.f32.mrf.mxu0 }
 0x388   :  { %v6263_v0 = vadd.f32 %v6262_v62, %v11065_v7  ;;  %6459 = vmatprep.subr.bf16.mxu1 %v8296_v39  ;;  %v8322_v7 = vld [vmem:[%s11271_s7 + $0xe0] sm:$0xff]  }
 0x389   :  { %v6264_v2 = vpop.f32.mrf.mxu0 }
 0x38b   :  { %6460 = vmatpush2.bf16.msra.mxu1 %v8294_v63  ;;  %v6265_v18 = vpop.f32.mrf.mxu0 }
 0x38c   :  { %6461 = vmatprep.subr.bf16.mxu1 %v8299_v1 }
 0x38f   :  { %6462 = vmatpush2.bf16.msra.mxu1 %v8297_v3 }
 0x390   :  { %7827 = vmatprep.subr.bf16.mxu1 %v8316_v53 }
 0x392   :  { %6464 = vmatmul.mubr.bf16.vlgmr.msra.gmra.mxu1 %v10872_v60  ;;  %v8320_v60 = vld [vmem:[%s11271_s7 + $0xe8] sm:$0xff]  }
 0x393   :  { %7828 = vmatpush3.bf16.msra.mxu1 %v8317_v36  ;;  %v7684_v36 = vld [vmem:[%s11272_s8] ss:$0 sm:$0xff] }
 0x394   :  { %7829 = vmatprep.subr.bf16.mxu1 %v8318_v4 }
 0x397   :  { %7830 = vmatpush3.bf16.msra.mxu1 %v8319_v5 }
 0x398   :  { %7831 = vmatprep.subr.bf16.mxu1 %v8320_v60 }
 0x39b   :  { %7832 = vmatpush3.bf16.msra.mxu1 %v8321_v6 }
 0x39c   :  { %7833 = vmatprep.subr.bf16.mxu1 %v8322_v7 }
 0x39f   :  { %7834 = vmatpush3.bf16.msra.mxu1 %v8323_v8 }
 0x3a0   :  { %7835 = vmatprep.subr.bf16.mxu1 %v8324_v51 }
 0x3a3   :  { %7836 = vmatpush3.bf16.msra.mxu1 %v8325_v28 }
 0x3a4   :  { %7837 = vmatprep.subr.bf16.mxu1 %v8326_v46 }
 0x3a7   :  { %7838 = vmatpush3.bf16.msra.mxu1 %v8327_v13 }
 0x3a8   :  { %7839 = vmatprep.subr.bf16.mxu1 %v8328_v16 }
 0x3ab   :  { %7840 = vmatpush3.bf16.msra.mxu1 %v8329_v56 }
 0x3ac   :  { %7841 = vmatprep.subr.bf16.mxu1 %v8330_v24 }
 0x3af   :  { %7842 = vmatpush3.bf16.msra.mxu1 %v8331_v21 }
 0x3c5   :  { %v6342_v26 = vpop.f32.mrf.mxu0 }
 0x3c6   :  { %v6343_v33 = vadd.f32 %v6342_v26, %v4855_v38 }
 0x3c7   :  { %v6344_v10 = vpop.f32.mrf.mxu0 }
 0x3c8   :  { %v6345_v30 = vadd.f32 %v6344_v10, %v4859_v40 }
 0x3c9   :  { %v6346_v11 = vpop.f32.mrf.mxu0 }
 0x3cb   :  { %v6347_v15 = vpop.f32.mrf.mxu0 }
 0x3d2   :  { %v6301_v14 = vpop.f32.mrf.mxu1 }
 0x3d3   :  { %v6302_v43 = vadd.f32 %v6301_v14, %v6261_v12 }
 0x3d4   :  { %v6303_v41 = vpop.f32.mrf.mxu1 }
 0x3d5   :  { %vm6472_vm9 = vcmp.gt.f32.partialorder %v6302_v43, 0.0  ;;  %v6476_v17 = vmul.f32 0.2, %v6302_v43  ;;  %v6304_v19 = vadd.f32 %v6303_v41, %v6263_v0 }
 0x3d6   :  { %v6305_v58 = vpop.f32.mrf.mxu1 }
 0x3d7   :  { %vm6473_vm10 = vcmp.gt.f32.partialorder %v6304_v19, 0.0  ;;  %v6477_v9 = vmul.f32 0.2, %v6304_v19  ;;  %v6480_v50 = vsel %vm6472_vm9, %v6302_v43, %v6476_v17 }
 0x3d8   :  { %v6306_v20 = vpop.f32.mrf.mxu1  ;;  %v6484_v25 = vpack.c.bf16 %v6480_v50, %v6480_v50 }
 0x3d9   :  { %v6481_v23 = vsel %vm6473_vm10, %v6304_v19, %v6477_v9 }
 0x3da   :  { %v6485_v48 = vpack.c.bf16 %v6481_v23, %v6481_v23 }
 0x3dc   :  { %6783 = vmatprep.mubr.bf16.mxu0 %v6485_v48 }
 0x3dd   :  { %6784 = vmatmul.mubr.bf16.vlgmr.msra.gmra.mxu0 %v6484_v25 }
 0x405   :  { %v6424_v29 = vpop.f32.mrf.mxu0 }
 0x407   :  { %v6426_v42 = vpop.f32.mrf.mxu0 }
 0x409   :  { %v6428_v35 = vpop.f32.mrf.mxu0 }
 0x40b   :  { %v6429_v37 = vpop.f32.mrf.mxu0 }
 0x412   :  { %v6383_v22 = vpop.f32.mrf.mxu1 }
 0x413   :  { %v6384_v32 = vadd.f32 %v6383_v22, %v6343_v33 }
 0x414   :  { %v6385_v27 = vpop.f32.mrf.mxu1 }
 0x415   :  { %v6386_v31 = vadd.f32 %v6385_v27, %v6345_v30  ;;  %v6425_v44 = vadd.f32 %v6424_v29, %v6384_v32 }
 0x416   :  { %v6387_v47 = vpop.f32.mrf.mxu1 }
 0x417   :  { %v6427_v49 = vadd.f32 %v6426_v42, %v6386_v31 }
 0x418   :  { %v6388_v52 = vpop.f32.mrf.mxu1 }
 0x452   :  { %v6465_v55 = vpop.f32.mrf.mxu1 }
 0x453   :  { %v6466_v57 = vadd.f32 %v6465_v55, %v6425_v44 }
 0x454   :  { %v6467_v39 = vpop.f32.mrf.mxu1 }
 0x455   :  { %vm6474_vm11 = vcmp.gt.f32.partialorder %v6466_v57, 0.0  ;;  %v6478_v61 = vmul.f32 0.2, %v6466_v57  ;;  %v6468_v54 = vadd.f32 %v6467_v39, %v6427_v49 }
 0x456   :  { %v6469_v12 = vpop.f32.mrf.mxu1 }
 0x457   :  { %vm6475_vm12 = vcmp.gt.f32.partialorder %v6468_v54, 0.0  ;;  %v6479_v34 = vmul.f32 0.2, %v6468_v54  ;;  %v6482_v59 = vsel %vm6474_vm11, %v6466_v57, %v6478_v61 }
 0x458   :  { %v6470_v45 = vpop.f32.mrf.mxu1  ;;  %v6486_v0 = vpack.c.bf16 %v6482_v59, %v6482_v59 }
 0x459   :  { %v6483_v62 = vsel %vm6475_vm12, %v6468_v54, %v6479_v34 }
 0x45a   :  { %v6487_v63 = vpack.c.bf16 %v6483_v62, %v6483_v62 }
 0x45c   :  { %6823 = vmatprep.mubr.bf16.mxu1 %v6487_v63 }
 0x45d   :  { %6824 = vmatmul.mubr.bf16.vlgmr.msra.gmra.mxu1 %v6486_v0 }
 0x49d   :  { %v7821_v1 = vpop.f32.mrf.mxu0 }
 0x49f   :  { %v7822_v2 = vpop.f32.mrf.mxu0 }
 0x4a0   :  { %v7823_v18 = vadd.f32 %v7822_v2, %v7821_v1 }
 0x4a1   :  { %v7824_v3 = vpop.f32.mrf.mxu0 }
 0x4a2   :  { %v6786_v60 = vadd.f32 %v7823_v18, %v7684_v36 }
 0x4a3   :  { %v7825_v53 = vpop.f32.mrf.mxu0 }
 0x51d   :  { %v7843_v4 = vpop.f32.mrf.mxu1 }
 0x51f   :  { %v7844_v5 = vpop.f32.mrf.mxu1 }
 0x520   :  { %v7845_v6 = vadd.f32 %v7844_v5, %v7843_v4 }
 0x521   :  { %v7846_v7 = vpop.f32.mrf.mxu1 }
 0x522   :  { %v6826_v8 = vadd.f32 %v7845_v6, %v6786_v60 }
 0x523   :  { %v7847_v51 = vpop.f32.mrf.mxu1 }
 0x524   :  { %6832 = vst.msk [vmem:[#allocation3] sm:$0x3] %vm6831_vm13, %v6826_v8 }
 0x525   :  { %8348 = shalt.err (!%p8345_p4)
}
 0x526   :  { %6844 = dma.vmem_to_hbm [thread:$0]  %s6842_s6, 32, %s11274_s10, [#allocation4]  }
 0x527   :  { %8357 = dma.done.wait [#allocation4], 32  }
 0x528   :  { %8358 = vsyncadd [#allocation4], 4294967264 }
 0x529   :  { %6850 = vsyncpa [#allocation4], 1 }

</bundles_post_ra>
